<compile_context>
chip_gen: v6e
topology: v6e:2x2x1
jax: 0.10.0
libtpu: 0.0.40
codegen_flags: <defaults>
</compile_context>

<pallas_src>
import functools

import jax
import jax.numpy as jnp
from jax import lax
from jax.experimental import pallas as pl
from jax.experimental.pallas import tpu as pltpu

BN_EPS = 1e-5


def _full_spec(shape):
    nd = len(shape)
    return pl.BlockSpec(shape, lambda i, nd=nd: (0,) * nd)


def _block_kernel(x_ref, idx1_ref, idx2_ref, idx3_ref,
                  w1_ref, g1_ref, b1_ref,
                  w2_ref, g2_ref, b2_ref,
                  w3_ref, g3_ref, b3_ref,
                  wr_ref, rb_ref, rg_ref, rbeta_ref,
                  out_ref,
                  xpad_ref, xcol_ref, res_ref, z_ref,
                  *, N, L, Cin, pmax, TPAD, use_residual):
    """Fused InceptionBlockTranspose: 3 inception modules + residual, one launch."""
    W = 2 * pmax + 1
    K = W * Cin
    KC = 128                                    # lane-aligned K-chunk for the matmul

    # Zero once; only lanes [0, L) are ever rewritten, so the zero tail
    # [L, TPAD) stays valid for every module (it implements the conv zero
    # padding through the circular rolls below).
    xpad_ref[...] = jnp.zeros_like(xpad_ref)

    def load_padded(src_ref):
        # module input -> lanes [0, L) of the padded scratch
        for n in range(N):
            xpad_ref[n, :, pl.ds(0, L)] = src_ref[n]

    def run_module(weffT_ref, idx_ref, gamma_ref, beta_ref, dst_ref):
        O = dst_ref.shape[1]

        # --- fused (3x ConvTranspose1d -> bottleneck 1x1) + conv_to_maxpool as
        # ONE matmul per sample: (2*O, K) @ (K, L).  Tap m of the im2col needs
        # xpad[c, t + m - pmax]; with data at lane 0 and a zero tail of width
        # >= pmax, a circular lane roll by (pmax - m) produces exactly that
        # window (wrap-around reads zeros).  Each tap is written to the
        # sublane-aligned row block [m*Cin, (m+1)*Cin) of the xcol scratch.
        for n in range(N):
            xp = xpad_ref[n]                               # (Cin, TPAD)
            for m in range(W):
                xcol_ref[pl.ds(m * Cin, Cin), :] = pltpu.roll(
                    xp, (pmax - m) % TPAD, 1)
            acc = None
            for k0 in range(0, K, KC):                     # K chunked: caps vregs
                kw = min(KC, K - k0)
                part = jnp.dot(weffT_ref[:, pl.ds(k0, kw)],
                               xcol_ref[pl.ds(k0, kw), pl.ds(0, L)],
                               preferred_element_type=jnp.float32)
                acc = part if acc is None else acc + part
            res_ref[n, pl.ds(0, 2 * O), :] = acc           # rows [0,O)=bneck, [O,2O)=z4

        bneck = res_ref[:, pl.ds(0, O), :]                 # (N, O, L)
        z4 = res_ref[:, pl.ds(O, O), :]                    # (N, O, L) conv_to_maxpool

        # --- MaxUnpool1d(kernel=3, stride=1, padding=1), batched over N.
        # Output position t can only receive from pooled positions {t-1,t,t+1};
        # duplicate hits resolve last-write-wins (t+1 > t > t-1), matching the
        # PyTorch CPU scatter order.
        # TODO(synk): assumes |idx[l] - l| <= 1, which holds for indices
        # produced by MaxPool1d(3, stride=1, padding=1).
        idx = idx_ref[...]                                 # (N, O, L) int32
        t_iota = lax.broadcasted_iota(jnp.int32, (N, O, L), 2)
        idx_p1 = pltpu.roll(idx, L - 1, 2)                 # [.., t] -> idx[.., t+1]
        z4_p1 = pltpu.roll(z4, L - 1, 2)
        idx_m1 = pltpu.roll(idx, 1, 2)                     # [.., t] -> idx[.., t-1]
        z4_m1 = pltpu.roll(z4, 1, 2)
        hit_p1 = jnp.logical_and(idx_p1 == t_iota, t_iota < L - 1)
        hit_0 = idx == t_iota
        hit_m1 = jnp.logical_and(idx_m1 == t_iota, t_iota > 0)
        mup = jnp.where(hit_p1, z4_p1,
                        jnp.where(hit_0, z4,
                                  jnp.where(hit_m1, z4_m1, 0.0)))

        # --- BatchNorm1d (training mode: biased stats over (N, L)) + ReLU
        pre = bneck + mup
        mean = jnp.mean(pre, axis=(0, 2), keepdims=True)
        var = jnp.mean(jnp.square(pre - mean), axis=(0, 2), keepdims=True)
        y = (pre - mean) * lax.rsqrt(var + BN_EPS) * gamma_ref[...] + beta_ref[...]
        dst_ref[...] = jnp.maximum(y, 0.0)

    load_padded(x_ref)
    run_module(w1_ref, idx1_ref, g1_ref, b1_ref, z_ref)      # inception_1
    load_padded(z_ref)
    run_module(w2_ref, idx2_ref, g2_ref, b2_ref, z_ref)      # inception_2
    load_padded(z_ref)
    run_module(w3_ref, idx3_ref, g3_ref, b3_ref, out_ref)    # inception_3

    if use_residual:
        # ConvTranspose1d(k=1, bias) -> BatchNorm1d (batch stats) -> add -> ReLU
        O = out_ref.shape[1]
        for n in range(N):
            res_ref[n, pl.ds(0, O), :] = (
                jnp.dot(wr_ref[...], x_ref[n], preferred_element_type=jnp.float32)
                + rb_ref[...])
        r = res_ref[:, pl.ds(0, O), :]
        mean = jnp.mean(r, axis=(0, 2), keepdims=True)
        var = jnp.mean(jnp.square(r - mean), axis=(0, 2), keepdims=True)
        rn = (r - mean) * lax.rsqrt(var + BN_EPS) * rg_ref[...] + rbeta_ref[...]
        out_ref[...] = jnp.maximum(out_ref[...] + rn, 0.0)


def inception_block_transpose(x_ncl, indices_ncl, params, *,
                              kernel_sizes=(9, 19, 39), bottleneck=32,
                              use_residual=True):
    """x_ncl: (N, Cin, L) float32 (PyTorch layout).
    indices_ncl: list of 3 int32 arrays [(N, Cout, L), (N, Cin, L), (N, Cin, L)]
    (indices[2] feeds inception_1, ..., indices[0] feeds inception_3)."""
    assert len(indices_ncl) == 3
    x = x_ncl.astype(jnp.float32)
    N, Cin, L = x.shape
    pmax = max(kernel_sizes) // 2
    W = 2 * pmax + 1
    TPAD = ((L + 2 * pmax + 127) // 128) * 128   # roll width; zero tail >= pmax

    p1, p2, p3, pr = params['inc1'], params['inc2'], params['inc3'], params['res']
    assert p1['w4'].shape[1] == Cin and p2['w4'].shape[1] == Cin
    Cout = p3['w4'].shape[1]
    Omax = max(Cin, Cout)

    # Glue: pre-compose (3x ConvTranspose1d -> bottleneck 1x1) AND the 1x1
    # conv_to_maxpool into ONE effective matmul weight, stored transposed for
    # the channel-on-sublane layout: (2*O, W*Cin).  Rows [0, O) produce the
    # bottleneck output; rows [O, 2O) produce the conv_to_maxpool output.
    def compose(p):
        O = p['w4'].shape[1]
        weff = jnp.zeros((W, Cin, 2 * O), jnp.float32)
        for i, (wk, k) in enumerate(zip(('w1', 'w2', 'w3'), kernel_sizes)):
            pk = k // 2
            wb_i = p['wb'][i * bottleneck:(i + 1) * bottleneck]      # (B, O)
            contrib = jnp.einsum('jcb,bo->jco', p[wk], wb_i)         # (k, Cin, O)
            # tap j contributes at shift m = pmax + pk - j
            weff = weff.at[pmax - pk:pmax + pk + 1, :, :O].add(contrib[::-1])
        weff = weff.at[pmax, :, O:].add(p['w4'])                     # fold the 1x1
        return jnp.transpose(weff.reshape(W * Cin, 2 * O))           # (2O, W*Cin)

    # Indices stay in PyTorch (N, C, L) layout -- no transposes needed.
    idx1 = indices_ncl[2].astype(jnp.int32)      # (N, Cin, L)  -> inception_1
    idx2 = indices_ncl[1].astype(jnp.int32)      # (N, Cin, L)  -> inception_2
    idx3 = indices_ncl[0].astype(jnp.int32)      # (N, Cout, L) -> inception_3

    def col(v):
        return v.reshape(-1, 1).astype(jnp.float32)

    args = (x, idx1, idx2, idx3,
            compose(p1), col(p1['gamma']), col(p1['beta']),
            compose(p2), col(p2['gamma']), col(p2['beta']),
            compose(p3), col(p3['gamma']), col(p3['beta']),
            jnp.transpose(pr['w']).astype(jnp.float32), col(pr['b']),
            col(pr['gamma']), col(pr['beta']))

    kern = functools.partial(_block_kernel, N=N, L=L, Cin=Cin, pmax=pmax,
                             TPAD=TPAD, use_residual=use_residual)
    out = pl.pallas_call(
        kern,
        grid=(1,),
        in_specs=[_full_spec(a.shape) for a in args],
        out_specs=_full_spec((N, Cout, L)),
        out_shape=jax.ShapeDtypeStruct((N, Cout, L), jnp.float32),
        scratch_shapes=[
            pltpu.VMEM((N, Cin, TPAD), jnp.float32),     # padded module input
            pltpu.VMEM((W * Cin, TPAD), jnp.float32),    # per-sample im2col (rhs)
            pltpu.VMEM((N, 2 * Omax, L), jnp.float32),   # matmul results / residual
            pltpu.VMEM((N, Cin, L), jnp.float32),        # inter-module activations
        ],
        compiler_params=pltpu.CompilerParams(
            dimension_semantics=("arbitrary",)),
    )(*args)
    return out                                           # (N, Cout, L)


# ------------------------- pure-JAX reference (for the self-check) ----------
def _ref_module(x_nlc, idx_nlo, p, kernel_sizes, bottleneck):
    N, L, Cin = x_nlc.shape
    B = bottleneck
    pmax = max(kernel_sizes) // 2
    xp = jnp.pad(x_nlc, ((0, 0), (pmax, pmax), (0, 0)))

    def tconv(w, k):
        pk = k // 2
        acc = jnp.zeros((N, L, B), jnp.float32)
        for j in range(k):
            off = pmax + pk - j
            acc = acc + jnp.einsum('nlc,cb->nlb', xp[:, off:off + L, :], w[j])
        return acc

    z1 = tconv(p['w1'], kernel_sizes[0])
    z2 = tconv(p['w2'], kernel_sizes[1])
    z3 = tconv(p['w3'], kernel_sizes[2])
    wb = p['wb']
    bneck = (jnp.einsum('nlb,bo->nlo', z1, wb[0:B])
             + jnp.einsum('nlb,bo->nlo', z2, wb[B:2 * B])
             + jnp.einsum('nlb,bo->nlo', z3, wb[2 * B:3 * B]))
    z4 = jnp.einsum('nlc,co->nlo', x_nlc, p['w4'])
    O = z4.shape[-1]

    t_iota = jnp.arange(L)[None, :, None, None]
    l_iota = jnp.arange(L)[None, None, :, None]
    hit = idx_nlo[:, None, :, :] == t_iota                       # (N, T, L, O)
    l_star = jnp.max(jnp.where(hit, l_iota, -1), axis=2)         # (N, T, O)
    sel = jnp.logical_and(hit, l_iota == l_star[:, :, None, :])
    mup = jnp.sum(jnp.where(sel, z4[:, None, :, :], 0.0), axis=2)

    pre = bneck + mup
    mean = jnp.mean(pre, axis=(0, 1), keepdims=True)
    var = jnp.mean((pre - mean) ** 2, axis=(0, 1), keepdims=True)
    y = (pre - mean) / jnp.sqrt(var + BN_EPS) * p['gamma'].reshape(1, 1, O) \
        + p['beta'].reshape(1, 1, O)
    return jnp.maximum(y, 0.0)


def _ref_block(x_ncl, indices_ncl, params, kernel_sizes, bottleneck, use_residual):
    x = jnp.transpose(x_ncl, (0, 2, 1)).astype(jnp.float32)
    z = _ref_module(x, jnp.transpose(indices_ncl[2], (0, 2, 1)), params['inc1'],
                    kernel_sizes, bottleneck)
    z = _ref_module(z, jnp.transpose(indices_ncl[1], (0, 2, 1)), params['inc2'],
                    kernel_sizes, bottleneck)
    z = _ref_module(z, jnp.transpose(indices_ncl[0], (0, 2, 1)), params['inc3'],
                    kernel_sizes, bottleneck)
    if use_residual:
        pr = params['res']
        O = pr['w'].shape[1]
        r = jnp.einsum('nlc,co->nlo', x, pr['w']) + pr['b'].reshape(1, 1, O)
        mean = jnp.mean(r, axis=(0, 1), keepdims=True)
        var = jnp.mean((r - mean) ** 2, axis=(0, 1), keepdims=True)
        rn = (r - mean) / jnp.sqrt(var + BN_EPS) * pr['gamma'].reshape(1, 1, O) \
            + pr['beta'].reshape(1, 1, O)
        z = jnp.maximum(z + rn, 0.0)
    return jnp.transpose(z, (0, 2, 1))


# ------------------------------ parameter init ------------------------------
def _init_module_params(key, cin, cout, bottleneck, kernel_sizes):
    k1, k2, k3, k4, k5 = jax.random.split(key, 5)

    def w(k, shape):
        return 0.1 * jax.random.normal(k, shape, jnp.float32)

    ks = kernel_sizes
    return dict(
        # w{1,2,3}[j, c, b] == torch ConvTranspose1d.weight[c, b, j]
        w1=w(k1, (ks[0], cin, bottleneck)),
        w2=w(k2, (ks[1], cin, bottleneck)),
        w3=w(k3, (ks[2], cin, bottleneck)),
        # w4[c, o] == torch Conv1d.weight[o, c, 0]   (conv_to_maxpool)
        w4=w(k4, (cin, cout)),
        # wb[b, o] == torch bottleneck Conv1d.weight[o, b, 0]
        wb=w(k5, (3 * bottleneck, cout)),
        gamma=jnp.ones((1, cout), jnp.float32),
        beta=jnp.zeros((1, cout), jnp.float32),
    )


def init_block_params(key, cin, cout, bottleneck, kernel_sizes):
    ka, kb, kc, kd, ke = jax.random.split(key, 5)
    return dict(
        inc1=_init_module_params(ka, cin, cin, bottleneck, kernel_sizes),
        inc2=_init_module_params(kb, cin, cin, bottleneck, kernel_sizes),
        inc3=_init_module_params(kc, cin, cout, bottleneck, kernel_sizes),
        res=dict(
            w=0.1 * jax.random.normal(kd, (cin, cout), jnp.float32),
            b=0.1 * jax.random.normal(ke, (1, cout), jnp.float32),
            gamma=jnp.ones((1, cout), jnp.float32),
            beta=jnp.zeros((1, cout), jnp.float32),
        ),
    )


if __name__ == "__main__":
    key = jax.random.PRNGKey(0)
    N, Cin, L = 2, 8, 64
    Cout, B = 32, 32
    ks = (9, 19, 39)

    kx, kd0, kd1, kd2, kp = jax.random.split(key, 5)
    x = jax.random.normal(kx, (N, Cin, L), jnp.float32)

    def make_indices(k, channels):
        # indices consistent with MaxPool1d(3, stride=1, padding=1): idx[l] in
        # {l-1, l, l+1} clipped to [0, L).
        d = jax.random.randint(k, (N, channels, L), -1, 2, dtype=jnp.int32)
        pos = jnp.arange(L, dtype=jnp.int32)[None, None, :]
        return jnp.clip(pos + d, 0, L - 1)

    indices = [
        make_indices(kd0, Cout),   # feeds inception_3
        make_indices(kd1, Cin),    # feeds inception_2
        make_indices(kd2, Cin),    # feeds inception_1
    ]
    params = init_block_params(kp, Cin, Cout, B, ks)

    out = inception_block_transpose(x, indices, params,
                                    kernel_sizes=ks, bottleneck=B,
                                    use_residual=True)
    out = jax.block_until_ready(out)
    assert out.shape == (N, Cout, L), out.shape
    assert bool(jnp.all(jnp.isfinite(out)))

    ref = _ref_block(x, indices, params, ks, B, True)
    err = float(jnp.max(jnp.abs(out - ref)))
    assert err < 1e-2, f"mismatch vs reference: {err}"
    print("KERNEL_OK")
</pallas_src>

<mosaic_0001>
module attributes {stable_mosaic.version = 11 : i64} {
  func.func @_block_kernel(%arg0: i32, %arg1: memref<2x8x64xf32, #tpu.memory_space<vmem>>, %arg2: memref<2x8x64xi32, #tpu.memory_space<vmem>>, %arg3: memref<2x8x64xi32, #tpu.memory_space<vmem>>, %arg4: memref<2x32x64xi32, #tpu.memory_space<vmem>>, %arg5: memref<16x312xf32, #tpu.memory_space<vmem>>, %arg6: memref<8x1xf32, #tpu.memory_space<vmem>>, %arg7: memref<8x1xf32, #tpu.memory_space<vmem>>, %arg8: memref<16x312xf32, #tpu.memory_space<vmem>>, %arg9: memref<8x1xf32, #tpu.memory_space<vmem>>, %arg10: memref<8x1xf32, #tpu.memory_space<vmem>>, %arg11: memref<64x312xf32, #tpu.memory_space<vmem>>, %arg12: memref<32x1xf32, #tpu.memory_space<vmem>>, %arg13: memref<32x1xf32, #tpu.memory_space<vmem>>, %arg14: memref<32x8xf32, #tpu.memory_space<vmem>>, %arg15: memref<32x1xf32, #tpu.memory_space<vmem>>, %arg16: memref<32x1xf32, #tpu.memory_space<vmem>>, %arg17: memref<32x1xf32, #tpu.memory_space<vmem>>, %arg18: memref<2x32x64xf32, #tpu.memory_space<vmem>>, %arg19: memref<2x8x128xf32, #tpu.memory_space<vmem>>, %arg20: memref<312x128xf32, #tpu.memory_space<vmem>>, %arg21: memref<2x64x64xf32, #tpu.memory_space<vmem>>, %arg22: memref<2x8x64xf32, #tpu.memory_space<vmem>>) attributes {dimension_semantics = [#tpu.dimension_semantics<arbitrary>], iteration_bounds = array<i64: 1>, scalar_prefetch = 0 : i64, scratch_operands = 4 : i64, tpu.core_type = #tpu.core_type<tc>, window_params = [{pipeline_mode = #tpu.pipeline_mode<synchronous>, transform_indices = @transform_0, window_bounds = array<i64: 2, 8, 64>}, {pipeline_mode = #tpu.pipeline_mode<synchronous>, transform_indices = @transform_1, window_bounds = array<i64: 2, 8, 64>}, {pipeline_mode = #tpu.pipeline_mode<synchronous>, transform_indices = @transform_2, window_bounds = array<i64: 2, 8, 64>}, {pipeline_mode = #tpu.pipeline_mode<synchronous>, transform_indices = @transform_3, window_bounds = array<i64: 2, 32, 64>}, {pipeline_mode = #tpu.pipeline_mode<synchronous>, transform_indices = @transform_4, window_bounds = array<i64: 16, 312>}, {pipeline_mode = #tpu.pipeline_mode<synchronous>, transform_indices = @transform_5, window_bounds = array<i64: 8, 1>}, {pipeline_mode = #tpu.pipeline_mode<synchronous>, transform_indices = @transform_6, window_bounds = array<i64: 8, 1>}, {pipeline_mode = #tpu.pipeline_mode<synchronous>, transform_indices = @transform_7, window_bounds = array<i64: 16, 312>}, {pipeline_mode = #tpu.pipeline_mode<synchronous>, transform_indices = @transform_8, window_bounds = array<i64: 8, 1>}, {pipeline_mode = #tpu.pipeline_mode<synchronous>, transform_indices = @transform_9, window_bounds = array<i64: 8, 1>}, {pipeline_mode = #tpu.pipeline_mode<synchronous>, transform_indices = @transform_10, window_bounds = array<i64: 64, 312>}, {pipeline_mode = #tpu.pipeline_mode<synchronous>, transform_indices = @transform_11, window_bounds = array<i64: 32, 1>}, {pipeline_mode = #tpu.pipeline_mode<synchronous>, transform_indices = @transform_12, window_bounds = array<i64: 32, 1>}, {pipeline_mode = #tpu.pipeline_mode<synchronous>, transform_indices = @transform_13, window_bounds = array<i64: 32, 8>}, {pipeline_mode = #tpu.pipeline_mode<synchronous>, transform_indices = @transform_14, window_bounds = array<i64: 32, 1>}, {pipeline_mode = #tpu.pipeline_mode<synchronous>, transform_indices = @transform_15, window_bounds = array<i64: 32, 1>}, {pipeline_mode = #tpu.pipeline_mode<synchronous>, transform_indices = @transform_16, window_bounds = array<i64: 32, 1>}, {pipeline_mode = #tpu.pipeline_mode<synchronous>, transform_indices = @transform_17, window_bounds = array<i64: 2, 32, 64>}]} {
    %cst = arith.constant 0.000000e+00 : f32
    %0 = vector.broadcast %cst : f32 to vector<2x8x128xf32>
    %c0 = arith.constant 0 : index
    %c0_0 = arith.constant 0 : index
    %c0_1 = arith.constant 0 : index
    %1 = vector.load %arg19[%c0, %c0_0, %c0_1] : memref<2x8x128xf32, #tpu.memory_space<vmem>>, vector<2x8x128xf32>
    tpu.vector_store %arg19[%c0, %c0_0, %c0_1], %0 {strides = array<i32>} : memref<2x8x128xf32, #tpu.memory_space<vmem>>, vector<2x8x128xf32>,
    %c0_2 = arith.constant 0 : index
    %c0_3 = arith.constant 0 : index
    %c0_4 = arith.constant 0 : index
    %2 = vector.load %arg1[%c0_2, %c0_3, %c0_4] : memref<2x8x64xf32, #tpu.memory_space<vmem>>, vector<1x8x64xf32>
    %3 = vector.shape_cast %2 : vector<1x8x64xf32> to vector<8x64xf32>
    %c0_5 = arith.constant 0 : index
    %c0_6 = arith.constant 0 : index
    %c0_7 = arith.constant 0 : index
    %4 = vector.load %arg19[%c0_5, %c0_6, %c0_7] : memref<2x8x128xf32, #tpu.memory_space<vmem>>, vector<1x8x64xf32>
    %5 = vector.shape_cast %4 : vector<1x8x64xf32> to vector<8x64xf32>
    %6 = vector.shape_cast %3 : vector<8x64xf32> to vector<1x8x64xf32>
    tpu.vector_store %arg19[%c0_5, %c0_6, %c0_7], %6 {strides = array<i32>} : memref<2x8x128xf32, #tpu.memory_space<vmem>>, vector<1x8x64xf32>,
    %c1 = arith.constant 1 : index
    %c0_8 = arith.constant 0 : index
    %c0_9 = arith.constant 0 : index
    %7 = vector.load %arg1[%c1, %c0_8, %c0_9] : memref<2x8x64xf32, #tpu.memory_space<vmem>>, vector<1x8x64xf32>
    %8 = vector.shape_cast %7 : vector<1x8x64xf32> to vector<8x64xf32>
    %c1_10 = arith.constant 1 : index
    %c0_11 = arith.constant 0 : index
    %c0_12 = arith.constant 0 : index
    %9 = vector.load %arg19[%c1_10, %c0_11, %c0_12] : memref<2x8x128xf32, #tpu.memory_space<vmem>>, vector<1x8x64xf32>
    %10 = vector.shape_cast %9 : vector<1x8x64xf32> to vector<8x64xf32>
    %11 = vector.shape_cast %8 : vector<8x64xf32> to vector<1x8x64xf32>
    tpu.vector_store %arg19[%c1_10, %c0_11, %c0_12], %11 {strides = array<i32>} : memref<2x8x128xf32, #tpu.memory_space<vmem>>, vector<1x8x64xf32>,
    %c0_13 = arith.constant 0 : index
    %c0_14 = arith.constant 0 : index
    %c0_15 = arith.constant 0 : index
    %12 = vector.load %arg19[%c0_13, %c0_14, %c0_15] : memref<2x8x128xf32, #tpu.memory_space<vmem>>, vector<1x8x128xf32>
    %13 = vector.shape_cast %12 : vector<1x8x128xf32> to vector<8x128xf32>
    %c19_i32 = arith.constant 19 : i32
    %14 = tpu.dynamic_rotate %13 by %c19_i32 dim 1 : vector<8x128xf32>, i32 -> vector<8x128xf32>
    %c0_16 = arith.constant 0 : index
    %c0_17 = arith.constant 0 : index
    %15 = vector.load %arg20[%c0_16, %c0_17] : memref<312x128xf32, #tpu.memory_space<vmem>>, vector<8x128xf32>
    tpu.vector_store %arg20[%c0_16, %c0_17], %14 {strides = array<i32>} : memref<312x128xf32, #tpu.memory_space<vmem>>, vector<8x128xf32>,
    %c18_i32 = arith.constant 18 : i32
    %16 = tpu.dynamic_rotate %13 by %c18_i32 dim 1 : vector<8x128xf32>, i32 -> vector<8x128xf32>
    %c8 = arith.constant 8 : index
    %c0_18 = arith.constant 0 : index
    %17 = vector.load %arg20[%c8, %c0_18] : memref<312x128xf32, #tpu.memory_space<vmem>>, vector<8x128xf32>
    tpu.vector_store %arg20[%c8, %c0_18], %16 {strides = array<i32>} : memref<312x128xf32, #tpu.memory_space<vmem>>, vector<8x128xf32>,
    %c17_i32 = arith.constant 17 : i32
    %18 = tpu.dynamic_rotate %13 by %c17_i32 dim 1 : vector<8x128xf32>, i32 -> vector<8x128xf32>
    %c16 = arith.constant 16 : index
    %c0_19 = arith.constant 0 : index
    %19 = vector.load %arg20[%c16, %c0_19] : memref<312x128xf32, #tpu.memory_space<vmem>>, vector<8x128xf32>
    tpu.vector_store %arg20[%c16, %c0_19], %18 {strides = array<i32>} : memref<312x128xf32, #tpu.memory_space<vmem>>, vector<8x128xf32>,
    %c16_i32 = arith.constant 16 : i32
    %20 = tpu.dynamic_rotate %13 by %c16_i32 dim 1 : vector<8x128xf32>, i32 -> vector<8x128xf32>
    %c24 = arith.constant 24 : index
    %c0_20 = arith.constant 0 : index
    %21 = vector.load %arg20[%c24, %c0_20] : memref<312x128xf32, #tpu.memory_space<vmem>>, vector<8x128xf32>
    tpu.vector_store %arg20[%c24, %c0_20], %20 {strides = array<i32>} : memref<312x128xf32, #tpu.memory_space<vmem>>, vector<8x128xf32>,
    %c15_i32 = arith.constant 15 : i32
    %22 = tpu.dynamic_rotate %13 by %c15_i32 dim 1 : vector<8x128xf32>, i32 -> vector<8x128xf32>
    %c32 = arith.constant 32 : index
    %c0_21 = arith.constant 0 : index
    %23 = vector.load %arg20[%c32, %c0_21] : memref<312x128xf32, #tpu.memory_space<vmem>>, vector<8x128xf32>
    tpu.vector_store %arg20[%c32, %c0_21], %22 {strides = array<i32>} : memref<312x128xf32, #tpu.memory_space<vmem>>, vector<8x128xf32>,
    %c14_i32 = arith.constant 14 : i32
    %24 = tpu.dynamic_rotate %13 by %c14_i32 dim 1 : vector<8x128xf32>, i32 -> vector<8x128xf32>
    %c40 = arith.constant 40 : index
    %c0_22 = arith.constant 0 : index
    %25 = vector.load %arg20[%c40, %c0_22] : memref<312x128xf32, #tpu.memory_space<vmem>>, vector<8x128xf32>
    tpu.vector_store %arg20[%c40, %c0_22], %24 {strides = array<i32>} : memref<312x128xf32, #tpu.memory_space<vmem>>, vector<8x128xf32>,
    %c13_i32 = arith.constant 13 : i32
    %26 = tpu.dynamic_rotate %13 by %c13_i32 dim 1 : vector<8x128xf32>, i32 -> vector<8x128xf32>
    %c48 = arith.constant 48 : index
    %c0_23 = arith.constant 0 : index
    %27 = vector.load %arg20[%c48, %c0_23] : memref<312x128xf32, #tpu.memory_space<vmem>>, vector<8x128xf32>
    tpu.vector_store %arg20[%c48, %c0_23], %26 {strides = array<i32>} : memref<312x128xf32, #tpu.memory_space<vmem>>, vector<8x128xf32>,
    %c12_i32 = arith.constant 12 : i32
    %28 = tpu.dynamic_rotate %13 by %c12_i32 dim 1 : vector<8x128xf32>, i32 -> vector<8x128xf32>
    %c56 = arith.constant 56 : index
    %c0_24 = arith.constant 0 : index
    %29 = vector.load %arg20[%c56, %c0_24] : memref<312x128xf32, #tpu.memory_space<vmem>>, vector<8x128xf32>
    tpu.vector_store %arg20[%c56, %c0_24], %28 {strides = array<i32>} : memref<312x128xf32, #tpu.memory_space<vmem>>, vector<8x128xf32>,
    %c11_i32 = arith.constant 11 : i32
    %30 = tpu.dynamic_rotate %13 by %c11_i32 dim 1 : vector<8x128xf32>, i32 -> vector<8x128xf32>
    %c64 = arith.constant 64 : index
    %c0_25 = arith.constant 0 : index
    %31 = vector.load %arg20[%c64, %c0_25] : memref<312x128xf32, #tpu.memory_space<vmem>>, vector<8x128xf32>
    tpu.vector_store %arg20[%c64, %c0_25], %30 {strides = array<i32>} : memref<312x128xf32, #tpu.memory_space<vmem>>, vector<8x128xf32>,
    %c10_i32 = arith.constant 10 : i32
    %32 = tpu.dynamic_rotate %13 by %c10_i32 dim 1 : vector<8x128xf32>, i32 -> vector<8x128xf32>
    %c72 = arith.constant 72 : index
    %c0_26 = arith.constant 0 : index
    %33 = vector.load %arg20[%c72, %c0_26] : memref<312x128xf32, #tpu.memory_space<vmem>>, vector<8x128xf32>
    tpu.vector_store %arg20[%c72, %c0_26], %32 {strides = array<i32>} : memref<312x128xf32, #tpu.memory_space<vmem>>, vector<8x128xf32>,
    %c9_i32 = arith.constant 9 : i32
    %34 = tpu.dynamic_rotate %13 by %c9_i32 dim 1 : vector<8x128xf32>, i32 -> vector<8x128xf32>
    %c80 = arith.constant 80 : index
    %c0_27 = arith.constant 0 : index
    %35 = vector.load %arg20[%c80, %c0_27] : memref<312x128xf32, #tpu.memory_space<vmem>>, vector<8x128xf32>
    tpu.vector_store %arg20[%c80, %c0_27], %34 {strides = array<i32>} : memref<312x128xf32, #tpu.memory_space<vmem>>, vector<8x128xf32>,
    %c8_i32 = arith.constant 8 : i32
    %36 = tpu.dynamic_rotate %13 by %c8_i32 dim 1 : vector<8x128xf32>, i32 -> vector<8x128xf32>
    %c88 = arith.constant 88 : index
    %c0_28 = arith.constant 0 : index
    %37 = vector.load %arg20[%c88, %c0_28] : memref<312x128xf32, #tpu.memory_space<vmem>>, vector<8x128xf32>
    tpu.vector_store %arg20[%c88, %c0_28], %36 {strides = array<i32>} : memref<312x128xf32, #tpu.memory_space<vmem>>, vector<8x128xf32>,
    %c7_i32 = arith.constant 7 : i32
    %38 = tpu.dynamic_rotate %13 by %c7_i32 dim 1 : vector<8x128xf32>, i32 -> vector<8x128xf32>
    %c96 = arith.constant 96 : index
    %c0_29 = arith.constant 0 : index
    %39 = vector.load %arg20[%c96, %c0_29] : memref<312x128xf32, #tpu.memory_space<vmem>>, vector<8x128xf32>
    tpu.vector_store %arg20[%c96, %c0_29], %38 {strides = array<i32>} : memref<312x128xf32, #tpu.memory_space<vmem>>, vector<8x128xf32>,
    %c6_i32 = arith.constant 6 : i32
    %40 = tpu.dynamic_rotate %13 by %c6_i32 dim 1 : vector<8x128xf32>, i32 -> vector<8x128xf32>
    %c104 = arith.constant 104 : index
    %c0_30 = arith.constant 0 : index
    %41 = vector.load %arg20[%c104, %c0_30] : memref<312x128xf32, #tpu.memory_space<vmem>>, vector<8x128xf32>
    tpu.vector_store %arg20[%c104, %c0_30], %40 {strides = array<i32>} : memref<312x128xf32, #tpu.memory_space<vmem>>, vector<8x128xf32>,
    %c5_i32 = arith.constant 5 : i32
    %42 = tpu.dynamic_rotate %13 by %c5_i32 dim 1 : vector<8x128xf32>, i32 -> vector<8x128xf32>
    %c112 = arith.constant 112 : index
    %c0_31 = arith.constant 0 : index
    %43 = vector.load %arg20[%c112, %c0_31] : memref<312x128xf32, #tpu.memory_space<vmem>>, vector<8x128xf32>
    tpu.vector_store %arg20[%c112, %c0_31], %42 {strides = array<i32>} : memref<312x128xf32, #tpu.memory_space<vmem>>, vector<8x128xf32>,
    %c4_i32 = arith.constant 4 : i32
    %44 = tpu.dynamic_rotate %13 by %c4_i32 dim 1 : vector<8x128xf32>, i32 -> vector<8x128xf32>
    %c120 = arith.constant 120 : index
    %c0_32 = arith.constant 0 : index
    %45 = vector.load %arg20[%c120, %c0_32] : memref<312x128xf32, #tpu.memory_space<vmem>>, vector<8x128xf32>
    tpu.vector_store %arg20[%c120, %c0_32], %44 {strides = array<i32>} : memref<312x128xf32, #tpu.memory_space<vmem>>, vector<8x128xf32>,
    %c3_i32 = arith.constant 3 : i32
    %46 = tpu.dynamic_rotate %13 by %c3_i32 dim 1 : vector<8x128xf32>, i32 -> vector<8x128xf32>
    %c128 = arith.constant 128 : index
    %c0_33 = arith.constant 0 : index
    %47 = vector.load %arg20[%c128, %c0_33] : memref<312x128xf32, #tpu.memory_space<vmem>>, vector<8x128xf32>
    tpu.vector_store %arg20[%c128, %c0_33], %46 {strides = array<i32>} : memref<312x128xf32, #tpu.memory_space<vmem>>, vector<8x128xf32>,
    %c2_i32 = arith.constant 2 : i32
    %48 = tpu.dynamic_rotate %13 by %c2_i32 dim 1 : vector<8x128xf32>, i32 -> vector<8x128xf32>
    %c136 = arith.constant 136 : index
    %c0_34 = arith.constant 0 : index
    %49 = vector.load %arg20[%c136, %c0_34] : memref<312x128xf32, #tpu.memory_space<vmem>>, vector<8x128xf32>
    tpu.vector_store %arg20[%c136, %c0_34], %48 {strides = array<i32>} : memref<312x128xf32, #tpu.memory_space<vmem>>, vector<8x128xf32>,
    %c1_i32 = arith.constant 1 : i32
    %50 = tpu.dynamic_rotate %13 by %c1_i32 dim 1 : vector<8x128xf32>, i32 -> vector<8x128xf32>
    %c144 = arith.constant 144 : index
    %c0_35 = arith.constant 0 : index
    %51 = vector.load %arg20[%c144, %c0_35] : memref<312x128xf32, #tpu.memory_space<vmem>>, vector<8x128xf32>
    tpu.vector_store %arg20[%c144, %c0_35], %50 {strides = array<i32>} : memref<312x128xf32, #tpu.memory_space<vmem>>, vector<8x128xf32>,
    %c0_i32 = arith.constant 0 : i32
    %52 = tpu.dynamic_rotate %13 by %c0_i32 dim 1 : vector<8x128xf32>, i32 -> vector<8x128xf32>
    %c152 = arith.constant 152 : index
    %c0_36 = arith.constant 0 : index
    %53 = vector.load %arg20[%c152, %c0_36] : memref<312x128xf32, #tpu.memory_space<vmem>>, vector<8x128xf32>
    tpu.vector_store %arg20[%c152, %c0_36], %52 {strides = array<i32>} : memref<312x128xf32, #tpu.memory_space<vmem>>, vector<8x128xf32>,
    %c127_i32 = arith.constant 127 : i32
    %54 = tpu.dynamic_rotate %13 by %c127_i32 dim 1 : vector<8x128xf32>, i32 -> vector<8x128xf32>
    %c160 = arith.constant 160 : index
    %c0_37 = arith.constant 0 : index
    %55 = vector.load %arg20[%c160, %c0_37] : memref<312x128xf32, #tpu.memory_space<vmem>>, vector<8x128xf32>
    tpu.vector_store %arg20[%c160, %c0_37], %54 {strides = array<i32>} : memref<312x128xf32, #tpu.memory_space<vmem>>, vector<8x128xf32>,
    %c126_i32 = arith.constant 126 : i32
    %56 = tpu.dynamic_rotate %13 by %c126_i32 dim 1 : vector<8x128xf32>, i32 -> vector<8x128xf32>
    %c168 = arith.constant 168 : index
    %c0_38 = arith.constant 0 : index
    %57 = vector.load %arg20[%c168, %c0_38] : memref<312x128xf32, #tpu.memory_space<vmem>>, vector<8x128xf32>
    tpu.vector_store %arg20[%c168, %c0_38], %56 {strides = array<i32>} : memref<312x128xf32, #tpu.memory_space<vmem>>, vector<8x128xf32>,
    %c125_i32 = arith.constant 125 : i32
    %58 = tpu.dynamic_rotate %13 by %c125_i32 dim 1 : vector<8x128xf32>, i32 -> vector<8x128xf32>
    %c176 = arith.constant 176 : index
    %c0_39 = arith.constant 0 : index
    %59 = vector.load %arg20[%c176, %c0_39] : memref<312x128xf32, #tpu.memory_space<vmem>>, vector<8x128xf32>
    tpu.vector_store %arg20[%c176, %c0_39], %58 {strides = array<i32>} : memref<312x128xf32, #tpu.memory_space<vmem>>, vector<8x128xf32>,
    %c124_i32 = arith.constant 124 : i32
    %60 = tpu.dynamic_rotate %13 by %c124_i32 dim 1 : vector<8x128xf32>, i32 -> vector<8x128xf32>
    %c184 = arith.constant 184 : index
    %c0_40 = arith.constant 0 : index
    %61 = vector.load %arg20[%c184, %c0_40] : memref<312x128xf32, #tpu.memory_space<vmem>>, vector<8x128xf32>
    tpu.vector_store %arg20[%c184, %c0_40], %60 {strides = array<i32>} : memref<312x128xf32, #tpu.memory_space<vmem>>, vector<8x128xf32>,
    %c123_i32 = arith.constant 123 : i32
    %62 = tpu.dynamic_rotate %13 by %c123_i32 dim 1 : vector<8x128xf32>, i32 -> vector<8x128xf32>
    %c192 = arith.constant 192 : index
    %c0_41 = arith.constant 0 : index
    %63 = vector.load %arg20[%c192, %c0_41] : memref<312x128xf32, #tpu.memory_space<vmem>>, vector<8x128xf32>
    tpu.vector_store %arg20[%c192, %c0_41], %62 {strides = array<i32>} : memref<312x128xf32, #tpu.memory_space<vmem>>, vector<8x128xf32>,
    %c122_i32 = arith.constant 122 : i32
    %64 = tpu.dynamic_rotate %13 by %c122_i32 dim 1 : vector<8x128xf32>, i32 -> vector<8x128xf32>
    %c200 = arith.constant 200 : index
    %c0_42 = arith.constant 0 : index
    %65 = vector.load %arg20[%c200, %c0_42] : memref<312x128xf32, #tpu.memory_space<vmem>>, vector<8x128xf32>
    tpu.vector_store %arg20[%c200, %c0_42], %64 {strides = array<i32>} : memref<312x128xf32, #tpu.memory_space<vmem>>, vector<8x128xf32>,
    %c121_i32 = arith.constant 121 : i32
    %66 = tpu.dynamic_rotate %13 by %c121_i32 dim 1 : vector<8x128xf32>, i32 -> vector<8x128xf32>
    %c208 = arith.constant 208 : index
    %c0_43 = arith.constant 0 : index
    %67 = vector.load %arg20[%c208, %c0_43] : memref<312x128xf32, #tpu.memory_space<vmem>>, vector<8x128xf32>
    tpu.vector_store %arg20[%c208, %c0_43], %66 {strides = array<i32>} : memref<312x128xf32, #tpu.memory_space<vmem>>, vector<8x128xf32>,
    %c120_i32 = arith.constant 120 : i32
    %68 = tpu.dynamic_rotate %13 by %c120_i32 dim 1 : vector<8x128xf32>, i32 -> vector<8x128xf32>
    %c216 = arith.constant 216 : index
    %c0_44 = arith.constant 0 : index
    %69 = vector.load %arg20[%c216, %c0_44] : memref<312x128xf32, #tpu.memory_space<vmem>>, vector<8x128xf32>
    tpu.vector_store %arg20[%c216, %c0_44], %68 {strides = array<i32>} : memref<312x128xf32, #tpu.memory_space<vmem>>, vector<8x128xf32>,
    %c119_i32 = arith.constant 119 : i32
    %70 = tpu.dynamic_rotate %13 by %c119_i32 dim 1 : vector<8x128xf32>, i32 -> vector<8x128xf32>
    %c224 = arith.constant 224 : index
    %c0_45 = arith.constant 0 : index
    %71 = vector.load %arg20[%c224, %c0_45] : memref<312x128xf32, #tpu.memory_space<vmem>>, vector<8x128xf32>
    tpu.vector_store %arg20[%c224, %c0_45], %70 {strides = array<i32>} : memref<312x128xf32, #tpu.memory_space<vmem>>, vector<8x128xf32>,
    %c118_i32 = arith.constant 118 : i32
    %72 = tpu.dynamic_rotate %13 by %c118_i32 dim 1 : vector<8x128xf32>, i32 -> vector<8x128xf32>
    %c232 = arith.constant 232 : index
    %c0_46 = arith.constant 0 : index
    %73 = vector.load %arg20[%c232, %c0_46] : memref<312x128xf32, #tpu.memory_space<vmem>>, vector<8x128xf32>
    tpu.vector_store %arg20[%c232, %c0_46], %72 {strides = array<i32>} : memref<312x128xf32, #tpu.memory_space<vmem>>, vector<8x128xf32>,
    %c117_i32 = arith.constant 117 : i32
    %74 = tpu.dynamic_rotate %13 by %c117_i32 dim 1 : vector<8x128xf32>, i32 -> vector<8x128xf32>
    %c240 = arith.constant 240 : index
    %c0_47 = arith.constant 0 : index
    %75 = vector.load %arg20[%c240, %c0_47] : memref<312x128xf32, #tpu.memory_space<vmem>>, vector<8x128xf32>
    tpu.vector_store %arg20[%c240, %c0_47], %74 {strides = array<i32>} : memref<312x128xf32, #tpu.memory_space<vmem>>, vector<8x128xf32>,
    %c116_i32 = arith.constant 116 : i32
    %76 = tpu.dynamic_rotate %13 by %c116_i32 dim 1 : vector<8x128xf32>, i32 -> vector<8x128xf32>
    %c248 = arith.constant 248 : index
    %c0_48 = arith.constant 0 : index
    %77 = vector.load %arg20[%c248, %c0_48] : memref<312x128xf32, #tpu.memory_space<vmem>>, vector<8x128xf32>
    tpu.vector_store %arg20[%c248, %c0_48], %76 {strides = array<i32>} : memref<312x128xf32, #tpu.memory_space<vmem>>, vector<8x128xf32>,
    %c115_i32 = arith.constant 115 : i32
    %78 = tpu.dynamic_rotate %13 by %c115_i32 dim 1 : vector<8x128xf32>, i32 -> vector<8x128xf32>
    %c256 = arith.constant 256 : index
    %c0_49 = arith.constant 0 : index
    %79 = vector.load %arg20[%c256, %c0_49] : memref<312x128xf32, #tpu.memory_space<vmem>>, vector<8x128xf32>
    tpu.vector_store %arg20[%c256, %c0_49], %78 {strides = array<i32>} : memref<312x128xf32, #tpu.memory_space<vmem>>, vector<8x128xf32>,
    %c114_i32 = arith.constant 114 : i32
    %80 = tpu.dynamic_rotate %13 by %c114_i32 dim 1 : vector<8x128xf32>, i32 -> vector<8x128xf32>
    %c264 = arith.constant 264 : index
    %c0_50 = arith.constant 0 : index
    %81 = vector.load %arg20[%c264, %c0_50] : memref<312x128xf32, #tpu.memory_space<vmem>>, vector<8x128xf32>
    tpu.vector_store %arg20[%c264, %c0_50], %80 {strides = array<i32>} : memref<312x128xf32, #tpu.memory_space<vmem>>, vector<8x128xf32>,
    %c113_i32 = arith.constant 113 : i32
    %82 = tpu.dynamic_rotate %13 by %c113_i32 dim 1 : vector<8x128xf32>, i32 -> vector<8x128xf32>
    %c272 = arith.constant 272 : index
    %c0_51 = arith.constant 0 : index
    %83 = vector.load %arg20[%c272, %c0_51] : memref<312x128xf32, #tpu.memory_space<vmem>>, vector<8x128xf32>
    tpu.vector_store %arg20[%c272, %c0_51], %82 {strides = array<i32>} : memref<312x128xf32, #tpu.memory_space<vmem>>, vector<8x128xf32>,
    %c112_i32 = arith.constant 112 : i32
    %84 = tpu.dynamic_rotate %13 by %c112_i32 dim 1 : vector<8x128xf32>, i32 -> vector<8x128xf32>
    %c280 = arith.constant 280 : index
    %c0_52 = arith.constant 0 : index
    %85 = vector.load %arg20[%c280, %c0_52] : memref<312x128xf32, #tpu.memory_space<vmem>>, vector<8x128xf32>
    tpu.vector_store %arg20[%c280, %c0_52], %84 {strides = array<i32>} : memref<312x128xf32, #tpu.memory_space<vmem>>, vector<8x128xf32>,
    %c111_i32 = arith.constant 111 : i32
    %86 = tpu.dynamic_rotate %13 by %c111_i32 dim 1 : vector<8x128xf32>, i32 -> vector<8x128xf32>
    %c288 = arith.constant 288 : index
    %c0_53 = arith.constant 0 : index
    %87 = vector.load %arg20[%c288, %c0_53] : memref<312x128xf32, #tpu.memory_space<vmem>>, vector<8x128xf32>
    tpu.vector_store %arg20[%c288, %c0_53], %86 {strides = array<i32>} : memref<312x128xf32, #tpu.memory_space<vmem>>, vector<8x128xf32>,
    %c110_i32 = arith.constant 110 : i32
    %88 = tpu.dynamic_rotate %13 by %c110_i32 dim 1 : vector<8x128xf32>, i32 -> vector<8x128xf32>
    %c296 = arith.constant 296 : index
    %c0_54 = arith.constant 0 : index
    %89 = vector.load %arg20[%c296, %c0_54] : memref<312x128xf32, #tpu.memory_space<vmem>>, vector<8x128xf32>
    tpu.vector_store %arg20[%c296, %c0_54], %88 {strides = array<i32>} : memref<312x128xf32, #tpu.memory_space<vmem>>, vector<8x128xf32>,
    %c109_i32 = arith.constant 109 : i32
    %90 = tpu.dynamic_rotate %13 by %c109_i32 dim 1 : vector<8x128xf32>, i32 -> vector<8x128xf32>
    %c304 = arith.constant 304 : index
    %c0_55 = arith.constant 0 : index
    %91 = vector.load %arg20[%c304, %c0_55] : memref<312x128xf32, #tpu.memory_space<vmem>>, vector<8x128xf32>
    tpu.vector_store %arg20[%c304, %c0_55], %90 {strides = array<i32>} : memref<312x128xf32, #tpu.memory_space<vmem>>, vector<8x128xf32>,
    %c0_56 = arith.constant 0 : index
    %c0_57 = arith.constant 0 : index
    %92 = vector.load %arg5[%c0_56, %c0_57] : memref<16x312xf32, #tpu.memory_space<vmem>>, vector<16x128xf32>
    %c0_58 = arith.constant 0 : index
    %c0_59 = arith.constant 0 : index
    %93 = vector.load %arg20[%c0_58, %c0_59] : memref<312x128xf32, #tpu.memory_space<vmem>>, vector<128x64xf32>
    %cst_60 = arith.constant dense<0.000000e+00> : vector<16x64xf32>
    %94 = tpu.matmul %92, %93, %cst_60 {dimension_numbers = #tpu.dot_dimension_numbers<[1], [0], [0], [1], [0, 0, 1, 1], [], []>} : vector<16x128xf32>, vector<128x64xf32>, vector<16x64xf32> -> vector<16x64xf32>
    %c0_61 = arith.constant 0 : index
    %c128_62 = arith.constant 128 : index
    %95 = vector.load %arg5[%c0_61, %c128_62] : memref<16x312xf32, #tpu.memory_space<vmem>>, vector<16x128xf32>
    %c128_63 = arith.constant 128 : index
    %c0_64 = arith.constant 0 : index
    %96 = vector.load %arg20[%c128_63, %c0_64] : memref<312x128xf32, #tpu.memory_space<vmem>>, vector<128x64xf32>
    %cst_65 = arith.constant dense<0.000000e+00> : vector<16x64xf32>
    %97 = tpu.matmul %95, %96, %cst_65 {dimension_numbers = #tpu.dot_dimension_numbers<[1], [0], [0], [1], [0, 0, 1, 1], [], []>} : vector<16x128xf32>, vector<128x64xf32>, vector<16x64xf32> -> vector<16x64xf32>
    %98 = arith.addf %94, %97 : vector<16x64xf32>
    %c0_66 = arith.constant 0 : index
    %c256_67 = arith.constant 256 : index
    %99 = vector.load %arg5[%c0_66, %c256_67] : memref<16x312xf32, #tpu.memory_space<vmem>>, vector<16x56xf32>
    %c256_68 = arith.constant 256 : index
    %c0_69 = arith.constant 0 : index
    %100 = vector.load %arg20[%c256_68, %c0_69] : memref<312x128xf32, #tpu.memory_space<vmem>>, vector<56x64xf32>
    %cst_70 = arith.constant dense<0.000000e+00> : vector<16x64xf32>
    %101 = tpu.matmul %99, %100, %cst_70 {dimension_numbers = #tpu.dot_dimension_numbers<[1], [0], [0], [1], [0, 0, 1, 1], [], []>} : vector<16x56xf32>, vector<56x64xf32>, vector<16x64xf32> -> vector<16x64xf32>
    %102 = arith.addf %98, %101 : vector<16x64xf32>
    %c0_71 = arith.constant 0 : index
    %c0_72 = arith.constant 0 : index
    %c0_73 = arith.constant 0 : index
    %103 = vector.load %arg21[%c0_71, %c0_72, %c0_73] : memref<2x64x64xf32, #tpu.memory_space<vmem>>, vector<1x16x64xf32>
    %104 = vector.shape_cast %103 : vector<1x16x64xf32> to vector<16x64xf32>
    %105 = vector.shape_cast %102 : vector<16x64xf32> to vector<1x16x64xf32>
    tpu.vector_store %arg21[%c0_71, %c0_72, %c0_73], %105 {strides = array<i32>} : memref<2x64x64xf32, #tpu.memory_space<vmem>>, vector<1x16x64xf32>,
    %c1_74 = arith.constant 1 : index
    %c0_75 = arith.constant 0 : index
    %c0_76 = arith.constant 0 : index
    %106 = vector.load %arg19[%c1_74, %c0_75, %c0_76] : memref<2x8x128xf32, #tpu.memory_space<vmem>>, vector<1x8x128xf32>
    %107 = vector.shape_cast %106 : vector<1x8x128xf32> to vector<8x128xf32>
    %c19_i32_77 = arith.constant 19 : i32
    %108 = tpu.dynamic_rotate %107 by %c19_i32_77 dim 1 : vector<8x128xf32>, i32 -> vector<8x128xf32>
    %c0_78 = arith.constant 0 : index
    %c0_79 = arith.constant 0 : index
    %109 = vector.load %arg20[%c0_78, %c0_79] : memref<312x128xf32, #tpu.memory_space<vmem>>, vector<8x128xf32>
    tpu.vector_store %arg20[%c0_78, %c0_79], %108 {strides = array<i32>} : memref<312x128xf32, #tpu.memory_space<vmem>>, vector<8x128xf32>,
    %c18_i32_80 = arith.constant 18 : i32
    %110 = tpu.dynamic_rotate %107 by %c18_i32_80 dim 1 : vector<8x128xf32>, i32 -> vector<8x128xf32>
    %c8_81 = arith.constant 8 : index
    %c0_82 = arith.constant 0 : index
    %111 = vector.load %arg20[%c8_81, %c0_82] : memref<312x128xf32, #tpu.memory_space<vmem>>, vector<8x128xf32>
    tpu.vector_store %arg20[%c8_81, %c0_82], %110 {strides = array<i32>} : memref<312x128xf32, #tpu.memory_space<vmem>>, vector<8x128xf32>,
    %c17_i32_83 = arith.constant 17 : i32
    %112 = tpu.dynamic_rotate %107 by %c17_i32_83 dim 1 : vector<8x128xf32>, i32 -> vector<8x128xf32>
    %c16_84 = arith.constant 16 : index
    %c0_85 = arith.constant 0 : index
    %113 = vector.load %arg20[%c16_84, %c0_85] : memref<312x128xf32, #tpu.memory_space<vmem>>, vector<8x128xf32>
    tpu.vector_store %arg20[%c16_84, %c0_85], %112 {strides = array<i32>} : memref<312x128xf32, #tpu.memory_space<vmem>>, vector<8x128xf32>,
    %c16_i32_86 = arith.constant 16 : i32
    %114 = tpu.dynamic_rotate %107 by %c16_i32_86 dim 1 : vector<8x128xf32>, i32 -> vector<8x128xf32>
    %c24_87 = arith.constant 24 : index
    %c0_88 = arith.constant 0 : index
    %115 = vector.load %arg20[%c24_87, %c0_88] : memref<312x128xf32, #tpu.memory_space<vmem>>, vector<8x128xf32>
    tpu.vector_store %arg20[%c24_87, %c0_88], %114 {strides = array<i32>} : memref<312x128xf32, #tpu.memory_space<vmem>>, vector<8x128xf32>,
    %c15_i32_89 = arith.constant 15 : i32
    %116 = tpu.dynamic_rotate %107 by %c15_i32_89 dim 1 : vector<8x128xf32>, i32 -> vector<8x128xf32>
    %c32_90 = arith.constant 32 : index
    %c0_91 = arith.constant 0 : index
    %117 = vector.load %arg20[%c32_90, %c0_91] : memref<312x128xf32, #tpu.memory_space<vmem>>, vector<8x128xf32>
    tpu.vector_store %arg20[%c32_90, %c0_91], %116 {strides = array<i32>} : memref<312x128xf32, #tpu.memory_space<vmem>>, vector<8x128xf32>,
    %c14_i32_92 = arith.constant 14 : i32
    %118 = tpu.dynamic_rotate %107 by %c14_i32_92 dim 1 : vector<8x128xf32>, i32 -> vector<8x128xf32>
    %c40_93 = arith.constant 40 : index
    %c0_94 = arith.constant 0 : index
    %119 = vector.load %arg20[%c40_93, %c0_94] : memref<312x128xf32, #tpu.memory_space<vmem>>, vector<8x128xf32>
    tpu.vector_store %arg20[%c40_93, %c0_94], %118 {strides = array<i32>} : memref<312x128xf32, #tpu.memory_space<vmem>>, vector<8x128xf32>,
    %c13_i32_95 = arith.constant 13 : i32
    %120 = tpu.dynamic_rotate %107 by %c13_i32_95 dim 1 : vector<8x128xf32>, i32 -> vector<8x128xf32>
    %c48_96 = arith.constant 48 : index
    %c0_97 = arith.constant 0 : index
    %121 = vector.load %arg20[%c48_96, %c0_97] : memref<312x128xf32, #tpu.memory_space<vmem>>, vector<8x128xf32>
    tpu.vector_store %arg20[%c48_96, %c0_97], %120 {strides = array<i32>} : memref<312x128xf32, #tpu.memory_space<vmem>>, vector<8x128xf32>,
    %c12_i32_98 = arith.constant 12 : i32
    %122 = tpu.dynamic_rotate %107 by %c12_i32_98 dim 1 : vector<8x128xf32>, i32 -> vector<8x128xf32>
    %c56_99 = arith.constant 56 : index
    %c0_100 = arith.constant 0 : index
    %123 = vector.load %arg20[%c56_99, %c0_100] : memref<312x128xf32, #tpu.memory_space<vmem>>, vector<8x128xf32>
    tpu.vector_store %arg20[%c56_99, %c0_100], %122 {strides = array<i32>} : memref<312x128xf32, #tpu.memory_space<vmem>>, vector<8x128xf32>,
    %c11_i32_101 = arith.constant 11 : i32
    %124 = tpu.dynamic_rotate %107 by %c11_i32_101 dim 1 : vector<8x128xf32>, i32 -> vector<8x128xf32>
    %c64_102 = arith.constant 64 : index
    %c0_103 = arith.constant 0 : index
    %125 = vector.load %arg20[%c64_102, %c0_103] : memref<312x128xf32, #tpu.memory_space<vmem>>, vector<8x128xf32>
    tpu.vector_store %arg20[%c64_102, %c0_103], %124 {strides = array<i32>} : memref<312x128xf32, #tpu.memory_space<vmem>>, vector<8x128xf32>,
    %c10_i32_104 = arith.constant 10 : i32
    %126 = tpu.dynamic_rotate %107 by %c10_i32_104 dim 1 : vector<8x128xf32>, i32 -> vector<8x128xf32>
    %c72_105 = arith.constant 72 : index
    %c0_106 = arith.constant 0 : index
    %127 = vector.load %arg20[%c72_105, %c0_106] : memref<312x128xf32, #tpu.memory_space<vmem>>, vector<8x128xf32>
    tpu.vector_store %arg20[%c72_105, %c0_106], %126 {strides = array<i32>} : memref<312x128xf32, #tpu.memory_space<vmem>>, vector<8x128xf32>,
    %c9_i32_107 = arith.constant 9 : i32
    %128 = tpu.dynamic_rotate %107 by %c9_i32_107 dim 1 : vector<8x128xf32>, i32 -> vector<8x128xf32>
    %c80_108 = arith.constant 80 : index
    %c0_109 = arith.constant 0 : index
    %129 = vector.load %arg20[%c80_108, %c0_109] : memref<312x128xf32, #tpu.memory_space<vmem>>, vector<8x128xf32>
    tpu.vector_store %arg20[%c80_108, %c0_109], %128 {strides = array<i32>} : memref<312x128xf32, #tpu.memory_space<vmem>>, vector<8x128xf32>,
    %c8_i32_110 = arith.constant 8 : i32
    %130 = tpu.dynamic_rotate %107 by %c8_i32_110 dim 1 : vector<8x128xf32>, i32 -> vector<8x128xf32>
    %c88_111 = arith.constant 88 : index
    %c0_112 = arith.constant 0 : index
    %131 = vector.load %arg20[%c88_111, %c0_112] : memref<312x128xf32, #tpu.memory_space<vmem>>, vector<8x128xf32>
    tpu.vector_store %arg20[%c88_111, %c0_112], %130 {strides = array<i32>} : memref<312x128xf32, #tpu.memory_space<vmem>>, vector<8x128xf32>,
    %c7_i32_113 = arith.constant 7 : i32
    %132 = tpu.dynamic_rotate %107 by %c7_i32_113 dim 1 : vector<8x128xf32>, i32 -> vector<8x128xf32>
    %c96_114 = arith.constant 96 : index
    %c0_115 = arith.constant 0 : index
    %133 = vector.load %arg20[%c96_114, %c0_115] : memref<312x128xf32, #tpu.memory_space<vmem>>, vector<8x128xf32>
    tpu.vector_store %arg20[%c96_114, %c0_115], %132 {strides = array<i32>} : memref<312x128xf32, #tpu.memory_space<vmem>>, vector<8x128xf32>,
    %c6_i32_116 = arith.constant 6 : i32
    %134 = tpu.dynamic_rotate %107 by %c6_i32_116 dim 1 : vector<8x128xf32>, i32 -> vector<8x128xf32>
    %c104_117 = arith.constant 104 : index
    %c0_118 = arith.constant 0 : index
    %135 = vector.load %arg20[%c104_117, %c0_118] : memref<312x128xf32, #tpu.memory_space<vmem>>, vector<8x128xf32>
    tpu.vector_store %arg20[%c104_117, %c0_118], %134 {strides = array<i32>} : memref<312x128xf32, #tpu.memory_space<vmem>>, vector<8x128xf32>,
    %c5_i32_119 = arith.constant 5 : i32
    %136 = tpu.dynamic_rotate %107 by %c5_i32_119 dim 1 : vector<8x128xf32>, i32 -> vector<8x128xf32>
    %c112_120 = arith.constant 112 : index
    %c0_121 = arith.constant 0 : index
    %137 = vector.load %arg20[%c112_120, %c0_121] : memref<312x128xf32, #tpu.memory_space<vmem>>, vector<8x128xf32>
    tpu.vector_store %arg20[%c112_120, %c0_121], %136 {strides = array<i32>} : memref<312x128xf32, #tpu.memory_space<vmem>>, vector<8x128xf32>,
    %c4_i32_122 = arith.constant 4 : i32
    %138 = tpu.dynamic_rotate %107 by %c4_i32_122 dim 1 : vector<8x128xf32>, i32 -> vector<8x128xf32>
    %c120_123 = arith.constant 120 : index
    %c0_124 = arith.constant 0 : index
    %139 = vector.load %arg20[%c120_123, %c0_124] : memref<312x128xf32, #tpu.memory_space<vmem>>, vector<8x128xf32>
    tpu.vector_store %arg20[%c120_123, %c0_124], %138 {strides = array<i32>} : memref<312x128xf32, #tpu.memory_space<vmem>>, vector<8x128xf32>,
    %c3_i32_125 = arith.constant 3 : i32
    %140 = tpu.dynamic_rotate %107 by %c3_i32_125 dim 1 : vector<8x128xf32>, i32 -> vector<8x128xf32>
    %c128_126 = arith.constant 128 : index
    %c0_127 = arith.constant 0 : index
    %141 = vector.load %arg20[%c128_126, %c0_127] : memref<312x128xf32, #tpu.memory_space<vmem>>, vector<8x128xf32>
    tpu.vector_store %arg20[%c128_126, %c0_127], %140 {strides = array<i32>} : memref<312x128xf32, #tpu.memory_space<vmem>>, vector<8x128xf32>,
    %c2_i32_128 = arith.constant 2 : i32
    %142 = tpu.dynamic_rotate %107 by %c2_i32_128 dim 1 : vector<8x128xf32>, i32 -> vector<8x128xf32>
    %c136_129 = arith.constant 136 : index
    %c0_130 = arith.constant 0 : index
    %143 = vector.load %arg20[%c136_129, %c0_130] : memref<312x128xf32, #tpu.memory_space<vmem>>, vector<8x128xf32>
    tpu.vector_store %arg20[%c136_129, %c0_130], %142 {strides = array<i32>} : memref<312x128xf32, #tpu.memory_space<vmem>>, vector<8x128xf32>,
    %c1_i32_131 = arith.constant 1 : i32
    %144 = tpu.dynamic_rotate %107 by %c1_i32_131 dim 1 : vector<8x128xf32>, i32 -> vector<8x128xf32>
    %c144_132 = arith.constant 144 : index
    %c0_133 = arith.constant 0 : index
    %145 = vector.load %arg20[%c144_132, %c0_133] : memref<312x128xf32, #tpu.memory_space<vmem>>, vector<8x128xf32>
    tpu.vector_store %arg20[%c144_132, %c0_133], %144 {strides = array<i32>} : memref<312x128xf32, #tpu.memory_space<vmem>>, vector<8x128xf32>,
    %c0_i32_134 = arith.constant 0 : i32
    %146 = tpu.dynamic_rotate %107 by %c0_i32_134 dim 1 : vector<8x128xf32>, i32 -> vector<8x128xf32>
    %c152_135 = arith.constant 152 : index
    %c0_136 = arith.constant 0 : index
    %147 = vector.load %arg20[%c152_135, %c0_136] : memref<312x128xf32, #tpu.memory_space<vmem>>, vector<8x128xf32>
    tpu.vector_store %arg20[%c152_135, %c0_136], %146 {strides = array<i32>} : memref<312x128xf32, #tpu.memory_space<vmem>>, vector<8x128xf32>,
    %c127_i32_137 = arith.constant 127 : i32
    %148 = tpu.dynamic_rotate %107 by %c127_i32_137 dim 1 : vector<8x128xf32>, i32 -> vector<8x128xf32>
    %c160_138 = arith.constant 160 : index
    %c0_139 = arith.constant 0 : index
    %149 = vector.load %arg20[%c160_138, %c0_139] : memref<312x128xf32, #tpu.memory_space<vmem>>, vector<8x128xf32>
    tpu.vector_store %arg20[%c160_138, %c0_139], %148 {strides = array<i32>} : memref<312x128xf32, #tpu.memory_space<vmem>>, vector<8x128xf32>,
    %c126_i32_140 = arith.constant 126 : i32
    %150 = tpu.dynamic_rotate %107 by %c126_i32_140 dim 1 : vector<8x128xf32>, i32 -> vector<8x128xf32>
    %c168_141 = arith.constant 168 : index
    %c0_142 = arith.constant 0 : index
    %151 = vector.load %arg20[%c168_141, %c0_142] : memref<312x128xf32, #tpu.memory_space<vmem>>, vector<8x128xf32>
    tpu.vector_store %arg20[%c168_141, %c0_142], %150 {strides = array<i32>} : memref<312x128xf32, #tpu.memory_space<vmem>>, vector<8x128xf32>,
    %c125_i32_143 = arith.constant 125 : i32
    %152 = tpu.dynamic_rotate %107 by %c125_i32_143 dim 1 : vector<8x128xf32>, i32 -> vector<8x128xf32>
    %c176_144 = arith.constant 176 : index
    %c0_145 = arith.constant 0 : index
    %153 = vector.load %arg20[%c176_144, %c0_145] : memref<312x128xf32, #tpu.memory_space<vmem>>, vector<8x128xf32>
    tpu.vector_store %arg20[%c176_144, %c0_145], %152 {strides = array<i32>} : memref<312x128xf32, #tpu.memory_space<vmem>>, vector<8x128xf32>,
    %c124_i32_146 = arith.constant 124 : i32
    %154 = tpu.dynamic_rotate %107 by %c124_i32_146 dim 1 : vector<8x128xf32>, i32 -> vector<8x128xf32>
    %c184_147 = arith.constant 184 : index
    %c0_148 = arith.constant 0 : index
    %155 = vector.load %arg20[%c184_147, %c0_148] : memref<312x128xf32, #tpu.memory_space<vmem>>, vector<8x128xf32>
    tpu.vector_store %arg20[%c184_147, %c0_148], %154 {strides = array<i32>} : memref<312x128xf32, #tpu.memory_space<vmem>>, vector<8x128xf32>,
    %c123_i32_149 = arith.constant 123 : i32
    %156 = tpu.dynamic_rotate %107 by %c123_i32_149 dim 1 : vector<8x128xf32>, i32 -> vector<8x128xf32>
    %c192_150 = arith.constant 192 : index
    %c0_151 = arith.constant 0 : index
    %157 = vector.load %arg20[%c192_150, %c0_151] : memref<312x128xf32, #tpu.memory_space<vmem>>, vector<8x128xf32>
    tpu.vector_store %arg20[%c192_150, %c0_151], %156 {strides = array<i32>} : memref<312x128xf32, #tpu.memory_space<vmem>>, vector<8x128xf32>,
    %c122_i32_152 = arith.constant 122 : i32
    %158 = tpu.dynamic_rotate %107 by %c122_i32_152 dim 1 : vector<8x128xf32>, i32 -> vector<8x128xf32>
    %c200_153 = arith.constant 200 : index
    %c0_154 = arith.constant 0 : index
    %159 = vector.load %arg20[%c200_153, %c0_154] : memref<312x128xf32, #tpu.memory_space<vmem>>, vector<8x128xf32>
    tpu.vector_store %arg20[%c200_153, %c0_154], %158 {strides = array<i32>} : memref<312x128xf32, #tpu.memory_space<vmem>>, vector<8x128xf32>,
    %c121_i32_155 = arith.constant 121 : i32
    %160 = tpu.dynamic_rotate %107 by %c121_i32_155 dim 1 : vector<8x128xf32>, i32 -> vector<8x128xf32>
    %c208_156 = arith.constant 208 : index
    %c0_157 = arith.constant 0 : index
    %161 = vector.load %arg20[%c208_156, %c0_157] : memref<312x128xf32, #tpu.memory_space<vmem>>, vector<8x128xf32>
    tpu.vector_store %arg20[%c208_156, %c0_157], %160 {strides = array<i32>} : memref<312x128xf32, #tpu.memory_space<vmem>>, vector<8x128xf32>,
    %c120_i32_158 = arith.constant 120 : i32
    %162 = tpu.dynamic_rotate %107 by %c120_i32_158 dim 1 : vector<8x128xf32>, i32 -> vector<8x128xf32>
    %c216_159 = arith.constant 216 : index
    %c0_160 = arith.constant 0 : index
    %163 = vector.load %arg20[%c216_159, %c0_160] : memref<312x128xf32, #tpu.memory_space<vmem>>, vector<8x128xf32>
    tpu.vector_store %arg20[%c216_159, %c0_160], %162 {strides = array<i32>} : memref<312x128xf32, #tpu.memory_space<vmem>>, vector<8x128xf32>,
    %c119_i32_161 = arith.constant 119 : i32
    %164 = tpu.dynamic_rotate %107 by %c119_i32_161 dim 1 : vector<8x128xf32>, i32 -> vector<8x128xf32>
    %c224_162 = arith.constant 224 : index
    %c0_163 = arith.constant 0 : index
    %165 = vector.load %arg20[%c224_162, %c0_163] : memref<312x128xf32, #tpu.memory_space<vmem>>, vector<8x128xf32>
    tpu.vector_store %arg20[%c224_162, %c0_163], %164 {strides = array<i32>} : memref<312x128xf32, #tpu.memory_space<vmem>>, vector<8x128xf32>,
    %c118_i32_164 = arith.constant 118 : i32
    %166 = tpu.dynamic_rotate %107 by %c118_i32_164 dim 1 : vector<8x128xf32>, i32 -> vector<8x128xf32>
    %c232_165 = arith.constant 232 : index
    %c0_166 = arith.constant 0 : index
    %167 = vector.load %arg20[%c232_165, %c0_166] : memref<312x128xf32, #tpu.memory_space<vmem>>, vector<8x128xf32>
    tpu.vector_store %arg20[%c232_165, %c0_166], %166 {strides = array<i32>} : memref<312x128xf32, #tpu.memory_space<vmem>>, vector<8x128xf32>,
    %c117_i32_167 = arith.constant 117 : i32
    %168 = tpu.dynamic_rotate %107 by %c117_i32_167 dim 1 : vector<8x128xf32>, i32 -> vector<8x128xf32>
    %c240_168 = arith.constant 240 : index
    %c0_169 = arith.constant 0 : index
    %169 = vector.load %arg20[%c240_168, %c0_169] : memref<312x128xf32, #tpu.memory_space<vmem>>, vector<8x128xf32>
    tpu.vector_store %arg20[%c240_168, %c0_169], %168 {strides = array<i32>} : memref<312x128xf32, #tpu.memory_space<vmem>>, vector<8x128xf32>,
    %c116_i32_170 = arith.constant 116 : i32
    %170 = tpu.dynamic_rotate %107 by %c116_i32_170 dim 1 : vector<8x128xf32>, i32 -> vector<8x128xf32>
    %c248_171 = arith.constant 248 : index
    %c0_172 = arith.constant 0 : index
    %171 = vector.load %arg20[%c248_171, %c0_172] : memref<312x128xf32, #tpu.memory_space<vmem>>, vector<8x128xf32>
    tpu.vector_store %arg20[%c248_171, %c0_172], %170 {strides = array<i32>} : memref<312x128xf32, #tpu.memory_space<vmem>>, vector<8x128xf32>,
    %c115_i32_173 = arith.constant 115 : i32
    %172 = tpu.dynamic_rotate %107 by %c115_i32_173 dim 1 : vector<8x128xf32>, i32 -> vector<8x128xf32>
    %c256_174 = arith.constant 256 : index
    %c0_175 = arith.constant 0 : index
    %173 = vector.load %arg20[%c256_174, %c0_175] : memref<312x128xf32, #tpu.memory_space<vmem>>, vector<8x128xf32>
    tpu.vector_store %arg20[%c256_174, %c0_175], %172 {strides = array<i32>} : memref<312x128xf32, #tpu.memory_space<vmem>>, vector<8x128xf32>,
    %c114_i32_176 = arith.constant 114 : i32
    %174 = tpu.dynamic_rotate %107 by %c114_i32_176 dim 1 : vector<8x128xf32>, i32 -> vector<8x128xf32>
    %c264_177 = arith.constant 264 : index
    %c0_178 = arith.constant 0 : index
    %175 = vector.load %arg20[%c264_177, %c0_178] : memref<312x128xf32, #tpu.memory_space<vmem>>, vector<8x128xf32>
    tpu.vector_store %arg20[%c264_177, %c0_178], %174 {strides = array<i32>} : memref<312x128xf32, #tpu.memory_space<vmem>>, vector<8x128xf32>,
    %c113_i32_179 = arith.constant 113 : i32
    %176 = tpu.dynamic_rotate %107 by %c113_i32_179 dim 1 : vector<8x128xf32>, i32 -> vector<8x128xf32>
    %c272_180 = arith.constant 272 : index
    %c0_181 = arith.constant 0 : index
    %177 = vector.load %arg20[%c272_180, %c0_181] : memref<312x128xf32, #tpu.memory_space<vmem>>, vector<8x128xf32>
    tpu.vector_store %arg20[%c272_180, %c0_181], %176 {strides = array<i32>} : memref<312x128xf32, #tpu.memory_space<vmem>>, vector<8x128xf32>,
    %c112_i32_182 = arith.constant 112 : i32
    %178 = tpu.dynamic_rotate %107 by %c112_i32_182 dim 1 : vector<8x128xf32>, i32 -> vector<8x128xf32>
    %c280_183 = arith.constant 280 : index
    %c0_184 = arith.constant 0 : index
    %179 = vector.load %arg20[%c280_183, %c0_184] : memref<312x128xf32, #tpu.memory_space<vmem>>, vector<8x128xf32>
    tpu.vector_store %arg20[%c280_183, %c0_184], %178 {strides = array<i32>} : memref<312x128xf32, #tpu.memory_space<vmem>>, vector<8x128xf32>,
    %c111_i32_185 = arith.constant 111 : i32
    %180 = tpu.dynamic_rotate %107 by %c111_i32_185 dim 1 : vector<8x128xf32>, i32 -> vector<8x128xf32>
    %c288_186 = arith.constant 288 : index
    %c0_187 = arith.constant 0 : index
    %181 = vector.load %arg20[%c288_186, %c0_187] : memref<312x128xf32, #tpu.memory_space<vmem>>, vector<8x128xf32>
    tpu.vector_store %arg20[%c288_186, %c0_187], %180 {strides = array<i32>} : memref<312x128xf32, #tpu.memory_space<vmem>>, vector<8x128xf32>,
    %c110_i32_188 = arith.constant 110 : i32
    %182 = tpu.dynamic_rotate %107 by %c110_i32_188 dim 1 : vector<8x128xf32>, i32 -> vector<8x128xf32>
    %c296_189 = arith.constant 296 : index
    %c0_190 = arith.constant 0 : index
    %183 = vector.load %arg20[%c296_189, %c0_190] : memref<312x128xf32, #tpu.memory_space<vmem>>, vector<8x128xf32>
    tpu.vector_store %arg20[%c296_189, %c0_190], %182 {strides = array<i32>} : memref<312x128xf32, #tpu.memory_space<vmem>>, vector<8x128xf32>,
    %c109_i32_191 = arith.constant 109 : i32
    %184 = tpu.dynamic_rotate %107 by %c109_i32_191 dim 1 : vector<8x128xf32>, i32 -> vector<8x128xf32>
    %c304_192 = arith.constant 304 : index
    %c0_193 = arith.constant 0 : index
    %185 = vector.load %arg20[%c304_192, %c0_193] : memref<312x128xf32, #tpu.memory_space<vmem>>, vector<8x128xf32>
    tpu.vector_store %arg20[%c304_192, %c0_193], %184 {strides = array<i32>} : memref<312x128xf32, #tpu.memory_space<vmem>>, vector<8x128xf32>,
    %c0_194 = arith.constant 0 : index
    %c0_195 = arith.constant 0 : index
    %186 = vector.load %arg5[%c0_194, %c0_195] : memref<16x312xf32, #tpu.memory_space<vmem>>, vector<16x128xf32>
    %c0_196 = arith.constant 0 : index
    %c0_197 = arith.constant 0 : index
    %187 = vector.load %arg20[%c0_196, %c0_197] : memref<312x128xf32, #tpu.memory_space<vmem>>, vector<128x64xf32>
    %cst_198 = arith.constant dense<0.000000e+00> : vector<16x64xf32>
    %188 = tpu.matmul %186, %187, %cst_198 {dimension_numbers = #tpu.dot_dimension_numbers<[1], [0], [0], [1], [0, 0, 1, 1], [], []>} : vector<16x128xf32>, vector<128x64xf32>, vector<16x64xf32> -> vector<16x64xf32>
    %c0_199 = arith.constant 0 : index
    %c128_200 = arith.constant 128 : index
    %189 = vector.load %arg5[%c0_199, %c128_200] : memref<16x312xf32, #tpu.memory_space<vmem>>, vector<16x128xf32>
    %c128_201 = arith.constant 128 : index
    %c0_202 = arith.constant 0 : index
    %190 = vector.load %arg20[%c128_201, %c0_202] : memref<312x128xf32, #tpu.memory_space<vmem>>, vector<128x64xf32>
    %cst_203 = arith.constant dense<0.000000e+00> : vector<16x64xf32>
    %191 = tpu.matmul %189, %190, %cst_203 {dimension_numbers = #tpu.dot_dimension_numbers<[1], [0], [0], [1], [0, 0, 1, 1], [], []>} : vector<16x128xf32>, vector<128x64xf32>, vector<16x64xf32> -> vector<16x64xf32>
    %192 = arith.addf %188, %191 : vector<16x64xf32>
    %c0_204 = arith.constant 0 : index
    %c256_205 = arith.constant 256 : index
    %193 = vector.load %arg5[%c0_204, %c256_205] : memref<16x312xf32, #tpu.memory_space<vmem>>, vector<16x56xf32>
    %c256_206 = arith.constant 256 : index
    %c0_207 = arith.constant 0 : index
    %194 = vector.load %arg20[%c256_206, %c0_207] : memref<312x128xf32, #tpu.memory_space<vmem>>, vector<56x64xf32>
    %cst_208 = arith.constant dense<0.000000e+00> : vector<16x64xf32>
    %195 = tpu.matmul %193, %194, %cst_208 {dimension_numbers = #tpu.dot_dimension_numbers<[1], [0], [0], [1], [0, 0, 1, 1], [], []>} : vector<16x56xf32>, vector<56x64xf32>, vector<16x64xf32> -> vector<16x64xf32>
    %196 = arith.addf %192, %195 : vector<16x64xf32>
    %c1_209 = arith.constant 1 : index
    %c0_210 = arith.constant 0 : index
    %c0_211 = arith.constant 0 : index
    %197 = vector.load %arg21[%c1_209, %c0_210, %c0_211] : memref<2x64x64xf32, #tpu.memory_space<vmem>>, vector<1x16x64xf32>
    %198 = vector.shape_cast %197 : vector<1x16x64xf32> to vector<16x64xf32>
    %199 = vector.shape_cast %196 : vector<16x64xf32> to vector<1x16x64xf32>
    tpu.vector_store %arg21[%c1_209, %c0_210, %c0_211], %199 {strides = array<i32>} : memref<2x64x64xf32, #tpu.memory_space<vmem>>, vector<1x16x64xf32>,
    %c0_212 = arith.constant 0 : index
    %c0_213 = arith.constant 0 : index
    %c0_214 = arith.constant 0 : index
    %200 = vector.load %arg21[%c0_212, %c0_213, %c0_214] : memref<2x64x64xf32, #tpu.memory_space<vmem>>, vector<2x8x64xf32>
    %c0_215 = arith.constant 0 : index
    %c8_216 = arith.constant 8 : index
    %c0_217 = arith.constant 0 : index
    %201 = vector.load %arg21[%c0_215, %c8_216, %c0_217] : memref<2x64x64xf32, #tpu.memory_space<vmem>>, vector<2x8x64xf32>
    %c0_218 = arith.constant 0 : index
    %c0_219 = arith.constant 0 : index
    %c0_220 = arith.constant 0 : index
    %202 = vector.load %arg2[%c0_218, %c0_219, %c0_220] : memref<2x8x64xi32, #tpu.memory_space<vmem>>, vector<2x8x64xi32>
    %203 = tpu.iota {dimensions = array<i32: 2>} : vector<2x8x64xi32>
    %c63_i32 = arith.constant 63 : i32
    %204 = tpu.dynamic_rotate %202 by %c63_i32 dim 2 : vector<2x8x64xi32>, i32 -> vector<2x8x64xi32>
    %c63_i32_221 = arith.constant 63 : i32
    %205 = tpu.dynamic_rotate %201 by %c63_i32_221 dim 2 : vector<2x8x64xf32>, i32 -> vector<2x8x64xf32>
    %c1_i32_222 = arith.constant 1 : i32
    %206 = tpu.dynamic_rotate %202 by %c1_i32_222 dim 2 : vector<2x8x64xi32>, i32 -> vector<2x8x64xi32>
    %c1_i32_223 = arith.constant 1 : i32
    %207 = tpu.dynamic_rotate %201 by %c1_i32_223 dim 2 : vector<2x8x64xf32>, i32 -> vector<2x8x64xf32>
    %208 = arith.cmpi eq, %204, %203 : vector<2x8x64xi32>
    %c63_i32_224 = arith.constant 63 : i32
    %209 = vector.broadcast %c63_i32_224 : i32 to vector<2x8x64xi32>
    %210 = arith.cmpi slt, %203, %209 : vector<2x8x64xi32>
    %211 = arith.andi %208, %210 : vector<2x8x64xi1>
    %212 = arith.cmpi eq, %202, %203 : vector<2x8x64xi32>
    %213 = arith.cmpi eq, %206, %203 : vector<2x8x64xi32>
    %c0_i32_225 = arith.constant 0 : i32
    %214 = vector.broadcast %c0_i32_225 : i32 to vector<2x8x64xi32>
    %215 = arith.cmpi sgt, %203, %214 : vector<2x8x64xi32>
    %216 = arith.andi %213, %215 : vector<2x8x64xi1>
    %cst_226 = arith.constant 0.000000e+00 : f32
    %217 = vector.broadcast %cst_226 : f32 to vector<2x8x64xf32>
    %218 = arith.select %216, %207, %217 : vector<2x8x64xi1>, vector<2x8x64xf32>
    %219 = arith.select %212, %201, %218 : vector<2x8x64xi1>, vector<2x8x64xf32>
    %220 = arith.select %211, %205, %219 : vector<2x8x64xi1>, vector<2x8x64xf32>
    %221 = arith.addf %200, %220 : vector<2x8x64xf32>
    %cst_227 = arith.constant dense<0.000000e+00> : vector<8xf32>
    %222 = vector.multi_reduction <add>, %221, %cst_227 [0, 2] : vector<2x8x64xf32> to vector<8xf32>
    %223 = vector.shape_cast %222 : vector<8xf32> to vector<1x8x1xf32>
    %cst_228 = arith.constant 1.280000e+02 : f32
    %224 = vector.broadcast %cst_228 : f32 to vector<1x8x1xf32>
    %225 = arith.divf %223, %224 : vector<1x8x1xf32>
    %226 = vector.broadcast %225 : vector<1x8x1xf32> to vector<2x8x64xf32>
    %227 = arith.subf %221, %226 : vector<2x8x64xf32>
    %228 = arith.mulf %227, %227 : vector<2x8x64xf32>
    %cst_229 = arith.constant dense<0.000000e+00> : vector<8xf32>
    %229 = vector.multi_reduction <add>, %228, %cst_229 [0, 2] : vector<2x8x64xf32> to vector<8xf32>
    %230 = vector.shape_cast %229 : vector<8xf32> to vector<1x8x1xf32>
    %cst_230 = arith.constant 1.280000e+02 : f32
    %231 = vector.broadcast %cst_230 : f32 to vector<1x8x1xf32>
    %232 = arith.divf %230, %231 : vector<1x8x1xf32>
    %233 = vector.broadcast %225 : vector<1x8x1xf32> to vector<2x8x64xf32>
    %234 = arith.subf %221, %233 : vector<2x8x64xf32>
    %cst_231 = arith.constant 9.99999974E-6 : f32
    %235 = vector.broadcast %cst_231 : f32 to vector<1x8x1xf32>
    %236 = arith.addf %232, %235 : vector<1x8x1xf32>
    %237 = math.rsqrt %236 : vector<1x8x1xf32>
    %238 = vector.broadcast %237 : vector<1x8x1xf32> to vector<2x8x64xf32>
    %239 = arith.mulf %234, %238 : vector<2x8x64xf32>
    %c0_232 = arith.constant 0 : index
    %c0_233 = arith.constant 0 : index
    %240 = vector.load %arg6[%c0_232, %c0_233] : memref<8x1xf32, #tpu.memory_space<vmem>>, vector<8x1xf32>
    %241 = vector.shape_cast %240 : vector<8x1xf32> to vector<1x8x1xf32>
    %242 = vector.broadcast %241 : vector<1x8x1xf32> to vector<2x8x64xf32>
    %243 = arith.mulf %239, %242 : vector<2x8x64xf32>
    %c0_234 = arith.constant 0 : index
    %c0_235 = arith.constant 0 : index
    %244 = vector.load %arg7[%c0_234, %c0_235] : memref<8x1xf32, #tpu.memory_space<vmem>>, vector<8x1xf32>
    %245 = vector.shape_cast %244 : vector<8x1xf32> to vector<1x8x1xf32>
    %246 = vector.broadcast %245 : vector<1x8x1xf32> to vector<2x8x64xf32>
    %247 = arith.addf %243, %246 : vector<2x8x64xf32>
    %cst_236 = arith.constant 0.000000e+00 : f32
    %248 = vector.broadcast %cst_236 : f32 to vector<2x8x64xf32>
    %249 = arith.maximumf %247, %248 : vector<2x8x64xf32>
    %c0_237 = arith.constant 0 : index
    %c0_238 = arith.constant 0 : index
    %c0_239 = arith.constant 0 : index
    %250 = vector.load %arg22[%c0_237, %c0_238, %c0_239] : memref<2x8x64xf32, #tpu.memory_space<vmem>>, vector<2x8x64xf32>
    tpu.vector_store %arg22[%c0_237, %c0_238, %c0_239], %249 {strides = array<i32>} : memref<2x8x64xf32, #tpu.memory_space<vmem>>, vector<2x8x64xf32>,
    %c0_240 = arith.constant 0 : index
    %c0_241 = arith.constant 0 : index
    %c0_242 = arith.constant 0 : index
    %251 = vector.load %arg22[%c0_240, %c0_241, %c0_242] : memref<2x8x64xf32, #tpu.memory_space<vmem>>, vector<1x8x64xf32>
    %252 = vector.shape_cast %251 : vector<1x8x64xf32> to vector<8x64xf32>
    %c0_243 = arith.constant 0 : index
    %c0_244 = arith.constant 0 : index
    %c0_245 = arith.constant 0 : index
    %253 = vector.load %arg19[%c0_243, %c0_244, %c0_245] : memref<2x8x128xf32, #tpu.memory_space<vmem>>, vector<1x8x64xf32>
    %254 = vector.shape_cast %253 : vector<1x8x64xf32> to vector<8x64xf32>
    %255 = vector.shape_cast %252 : vector<8x64xf32> to vector<1x8x64xf32>
    tpu.vector_store %arg19[%c0_243, %c0_244, %c0_245], %255 {strides = array<i32>} : memref<2x8x128xf32, #tpu.memory_space<vmem>>, vector<1x8x64xf32>,
    %c1_246 = arith.constant 1 : index
    %c0_247 = arith.constant 0 : index
    %c0_248 = arith.constant 0 : index
    %256 = vector.load %arg22[%c1_246, %c0_247, %c0_248] : memref<2x8x64xf32, #tpu.memory_space<vmem>>, vector<1x8x64xf32>
    %257 = vector.shape_cast %256 : vector<1x8x64xf32> to vector<8x64xf32>
    %c1_249 = arith.constant 1 : index
    %c0_250 = arith.constant 0 : index
    %c0_251 = arith.constant 0 : index
    %258 = vector.load %arg19[%c1_249, %c0_250, %c0_251] : memref<2x8x128xf32, #tpu.memory_space<vmem>>, vector<1x8x64xf32>
    %259 = vector.shape_cast %258 : vector<1x8x64xf32> to vector<8x64xf32>
    %260 = vector.shape_cast %257 : vector<8x64xf32> to vector<1x8x64xf32>
    tpu.vector_store %arg19[%c1_249, %c0_250, %c0_251], %260 {strides = array<i32>} : memref<2x8x128xf32, #tpu.memory_space<vmem>>, vector<1x8x64xf32>,
    %c0_252 = arith.constant 0 : index
    %c0_253 = arith.constant 0 : index
    %c0_254 = arith.constant 0 : index
    %261 = vector.load %arg19[%c0_252, %c0_253, %c0_254] : memref<2x8x128xf32, #tpu.memory_space<vmem>>, vector<1x8x128xf32>
    %262 = vector.shape_cast %261 : vector<1x8x128xf32> to vector<8x128xf32>
    %c19_i32_255 = arith.constant 19 : i32
    %263 = tpu.dynamic_rotate %262 by %c19_i32_255 dim 1 : vector<8x128xf32>, i32 -> vector<8x128xf32>
    %c0_256 = arith.constant 0 : index
    %c0_257 = arith.constant 0 : index
    %264 = vector.load %arg20[%c0_256, %c0_257] : memref<312x128xf32, #tpu.memory_space<vmem>>, vector<8x128xf32>
    tpu.vector_store %arg20[%c0_256, %c0_257], %263 {strides = array<i32>} : memref<312x128xf32, #tpu.memory_space<vmem>>, vector<8x128xf32>,
    %c18_i32_258 = arith.constant 18 : i32
    %265 = tpu.dynamic_rotate %262 by %c18_i32_258 dim 1 : vector<8x128xf32>, i32 -> vector<8x128xf32>
    %c8_259 = arith.constant 8 : index
    %c0_260 = arith.constant 0 : index
    %266 = vector.load %arg20[%c8_259, %c0_260] : memref<312x128xf32, #tpu.memory_space<vmem>>, vector<8x128xf32>
    tpu.vector_store %arg20[%c8_259, %c0_260], %265 {strides = array<i32>} : memref<312x128xf32, #tpu.memory_space<vmem>>, vector<8x128xf32>,
    %c17_i32_261 = arith.constant 17 : i32
    %267 = tpu.dynamic_rotate %262 by %c17_i32_261 dim 1 : vector<8x128xf32>, i32 -> vector<8x128xf32>
    %c16_262 = arith.constant 16 : index
    %c0_263 = arith.constant 0 : index
    %268 = vector.load %arg20[%c16_262, %c0_263] : memref<312x128xf32, #tpu.memory_space<vmem>>, vector<8x128xf32>
    tpu.vector_store %arg20[%c16_262, %c0_263], %267 {strides = array<i32>} : memref<312x128xf32, #tpu.memory_space<vmem>>, vector<8x128xf32>,
    %c16_i32_264 = arith.constant 16 : i32
    %269 = tpu.dynamic_rotate %262 by %c16_i32_264 dim 1 : vector<8x128xf32>, i32 -> vector<8x128xf32>
    %c24_265 = arith.constant 24 : index
    %c0_266 = arith.constant 0 : index
    %270 = vector.load %arg20[%c24_265, %c0_266] : memref<312x128xf32, #tpu.memory_space<vmem>>, vector<8x128xf32>
    tpu.vector_store %arg20[%c24_265, %c0_266], %269 {strides = array<i32>} : memref<312x128xf32, #tpu.memory_space<vmem>>, vector<8x128xf32>,
    %c15_i32_267 = arith.constant 15 : i32
    %271 = tpu.dynamic_rotate %262 by %c15_i32_267 dim 1 : vector<8x128xf32>, i32 -> vector<8x128xf32>
    %c32_268 = arith.constant 32 : index
    %c0_269 = arith.constant 0 : index
    %272 = vector.load %arg20[%c32_268, %c0_269] : memref<312x128xf32, #tpu.memory_space<vmem>>, vector<8x128xf32>
    tpu.vector_store %arg20[%c32_268, %c0_269], %271 {strides = array<i32>} : memref<312x128xf32, #tpu.memory_space<vmem>>, vector<8x128xf32>,
    %c14_i32_270 = arith.constant 14 : i32
    %273 = tpu.dynamic_rotate %262 by %c14_i32_270 dim 1 : vector<8x128xf32>, i32 -> vector<8x128xf32>
    %c40_271 = arith.constant 40 : index
    %c0_272 = arith.constant 0 : index
    %274 = vector.load %arg20[%c40_271, %c0_272] : memref<312x128xf32, #tpu.memory_space<vmem>>, vector<8x128xf32>
    tpu.vector_store %arg20[%c40_271, %c0_272], %273 {strides = array<i32>} : memref<312x128xf32, #tpu.memory_space<vmem>>, vector<8x128xf32>,
    %c13_i32_273 = arith.constant 13 : i32
    %275 = tpu.dynamic_rotate %262 by %c13_i32_273 dim 1 : vector<8x128xf32>, i32 -> vector<8x128xf32>
    %c48_274 = arith.constant 48 : index
    %c0_275 = arith.constant 0 : index
    %276 = vector.load %arg20[%c48_274, %c0_275] : memref<312x128xf32, #tpu.memory_space<vmem>>, vector<8x128xf32>
    tpu.vector_store %arg20[%c48_274, %c0_275], %275 {strides = array<i32>} : memref<312x128xf32, #tpu.memory_space<vmem>>, vector<8x128xf32>,
    %c12_i32_276 = arith.constant 12 : i32
    %277 = tpu.dynamic_rotate %262 by %c12_i32_276 dim 1 : vector<8x128xf32>, i32 -> vector<8x128xf32>
    %c56_277 = arith.constant 56 : index
    %c0_278 = arith.constant 0 : index
    %278 = vector.load %arg20[%c56_277, %c0_278] : memref<312x128xf32, #tpu.memory_space<vmem>>, vector<8x128xf32>
    tpu.vector_store %arg20[%c56_277, %c0_278], %277 {strides = array<i32>} : memref<312x128xf32, #tpu.memory_space<vmem>>, vector<8x128xf32>,
    %c11_i32_279 = arith.constant 11 : i32
    %279 = tpu.dynamic_rotate %262 by %c11_i32_279 dim 1 : vector<8x128xf32>, i32 -> vector<8x128xf32>
    %c64_280 = arith.constant 64 : index
    %c0_281 = arith.constant 0 : index
    %280 = vector.load %arg20[%c64_280, %c0_281] : memref<312x128xf32, #tpu.memory_space<vmem>>, vector<8x128xf32>
    tpu.vector_store %arg20[%c64_280, %c0_281], %279 {strides = array<i32>} : memref<312x128xf32, #tpu.memory_space<vmem>>, vector<8x128xf32>,
    %c10_i32_282 = arith.constant 10 : i32
    %281 = tpu.dynamic_rotate %262 by %c10_i32_282 dim 1 : vector<8x128xf32>, i32 -> vector<8x128xf32>
    %c72_283 = arith.constant 72 : index
    %c0_284 = arith.constant 0 : index
    %282 = vector.load %arg20[%c72_283, %c0_284] : memref<312x128xf32, #tpu.memory_space<vmem>>, vector<8x128xf32>
    tpu.vector_store %arg20[%c72_283, %c0_284], %281 {strides = array<i32>} : memref<312x128xf32, #tpu.memory_space<vmem>>, vector<8x128xf32>,
    %c9_i32_285 = arith.constant 9 : i32
    %283 = tpu.dynamic_rotate %262 by %c9_i32_285 dim 1 : vector<8x128xf32>, i32 -> vector<8x128xf32>
    %c80_286 = arith.constant 80 : index
    %c0_287 = arith.constant 0 : index
    %284 = vector.load %arg20[%c80_286, %c0_287] : memref<312x128xf32, #tpu.memory_space<vmem>>, vector<8x128xf32>
    tpu.vector_store %arg20[%c80_286, %c0_287], %283 {strides = array<i32>} : memref<312x128xf32, #tpu.memory_space<vmem>>, vector<8x128xf32>,
    %c8_i32_288 = arith.constant 8 : i32
    %285 = tpu.dynamic_rotate %262 by %c8_i32_288 dim 1 : vector<8x128xf32>, i32 -> vector<8x128xf32>
    %c88_289 = arith.constant 88 : index
    %c0_290 = arith.constant 0 : index
    %286 = vector.load %arg20[%c88_289, %c0_290] : memref<312x128xf32, #tpu.memory_space<vmem>>, vector<8x128xf32>
    tpu.vector_store %arg20[%c88_289, %c0_290], %285 {strides = array<i32>} : memref<312x128xf32, #tpu.memory_space<vmem>>, vector<8x128xf32>,
    %c7_i32_291 = arith.constant 7 : i32
    %287 = tpu.dynamic_rotate %262 by %c7_i32_291 dim 1 : vector<8x128xf32>, i32 -> vector<8x128xf32>
    %c96_292 = arith.constant 96 : index
    %c0_293 = arith.constant 0 : index
    %288 = vector.load %arg20[%c96_292, %c0_293] : memref<312x128xf32, #tpu.memory_space<vmem>>, vector<8x128xf32>
    tpu.vector_store %arg20[%c96_292, %c0_293], %287 {strides = array<i32>} : memref<312x128xf32, #tpu.memory_space<vmem>>, vector<8x128xf32>,
    %c6_i32_294 = arith.constant 6 : i32
    %289 = tpu.dynamic_rotate %262 by %c6_i32_294 dim 1 : vector<8x128xf32>, i32 -> vector<8x128xf32>
    %c104_295 = arith.constant 104 : index
    %c0_296 = arith.constant 0 : index
    %290 = vector.load %arg20[%c104_295, %c0_296] : memref<312x128xf32, #tpu.memory_space<vmem>>, vector<8x128xf32>
    tpu.vector_store %arg20[%c104_295, %c0_296], %289 {strides = array<i32>} : memref<312x128xf32, #tpu.memory_space<vmem>>, vector<8x128xf32>,
    %c5_i32_297 = arith.constant 5 : i32
    %291 = tpu.dynamic_rotate %262 by %c5_i32_297 dim 1 : vector<8x128xf32>, i32 -> vector<8x128xf32>
    %c112_298 = arith.constant 112 : index
    %c0_299 = arith.constant 0 : index
    %292 = vector.load %arg20[%c112_298, %c0_299] : memref<312x128xf32, #tpu.memory_space<vmem>>, vector<8x128xf32>
    tpu.vector_store %arg20[%c112_298, %c0_299], %291 {strides = array<i32>} : memref<312x128xf32, #tpu.memory_space<vmem>>, vector<8x128xf32>,
    %c4_i32_300 = arith.constant 4 : i32
    %293 = tpu.dynamic_rotate %262 by %c4_i32_300 dim 1 : vector<8x128xf32>, i32 -> vector<8x128xf32>
    %c120_301 = arith.constant 120 : index
    %c0_302 = arith.constant 0 : index
    %294 = vector.load %arg20[%c120_301, %c0_302] : memref<312x128xf32, #tpu.memory_space<vmem>>, vector<8x128xf32>
    tpu.vector_store %arg20[%c120_301, %c0_302], %293 {strides = array<i32>} : memref<312x128xf32, #tpu.memory_space<vmem>>, vector<8x128xf32>,
    %c3_i32_303 = arith.constant 3 : i32
    %295 = tpu.dynamic_rotate %262 by %c3_i32_303 dim 1 : vector<8x128xf32>, i32 -> vector<8x128xf32>
    %c128_304 = arith.constant 128 : index
    %c0_305 = arith.constant 0 : index
    %296 = vector.load %arg20[%c128_304, %c0_305] : memref<312x128xf32, #tpu.memory_space<vmem>>, vector<8x128xf32>
    tpu.vector_store %arg20[%c128_304, %c0_305], %295 {strides = array<i32>} : memref<312x128xf32, #tpu.memory_space<vmem>>, vector<8x128xf32>,
    %c2_i32_306 = arith.constant 2 : i32
    %297 = tpu.dynamic_rotate %262 by %c2_i32_306 dim 1 : vector<8x128xf32>, i32 -> vector<8x128xf32>
    %c136_307 = arith.constant 136 : index
    %c0_308 = arith.constant 0 : index
    %298 = vector.load %arg20[%c136_307, %c0_308] : memref<312x128xf32, #tpu.memory_space<vmem>>, vector<8x128xf32>
    tpu.vector_store %arg20[%c136_307, %c0_308], %297 {strides = array<i32>} : memref<312x128xf32, #tpu.memory_space<vmem>>, vector<8x128xf32>,
    %c1_i32_309 = arith.constant 1 : i32
    %299 = tpu.dynamic_rotate %262 by %c1_i32_309 dim 1 : vector<8x128xf32>, i32 -> vector<8x128xf32>
    %c144_310 = arith.constant 144 : index
    %c0_311 = arith.constant 0 : index
    %300 = vector.load %arg20[%c144_310, %c0_311] : memref<312x128xf32, #tpu.memory_space<vmem>>, vector<8x128xf32>
    tpu.vector_store %arg20[%c144_310, %c0_311], %299 {strides = array<i32>} : memref<312x128xf32, #tpu.memory_space<vmem>>, vector<8x128xf32>,
    %c0_i32_312 = arith.constant 0 : i32
    %301 = tpu.dynamic_rotate %262 by %c0_i32_312 dim 1 : vector<8x128xf32>, i32 -> vector<8x128xf32>
    %c152_313 = arith.constant 152 : index
    %c0_314 = arith.constant 0 : index
    %302 = vector.load %arg20[%c152_313, %c0_314] : memref<312x128xf32, #tpu.memory_space<vmem>>, vector<8x128xf32>
    tpu.vector_store %arg20[%c152_313, %c0_314], %301 {strides = array<i32>} : memref<312x128xf32, #tpu.memory_space<vmem>>, vector<8x128xf32>,
    %c127_i32_315 = arith.constant 127 : i32
    %303 = tpu.dynamic_rotate %262 by %c127_i32_315 dim 1 : vector<8x128xf32>, i32 -> vector<8x128xf32>
    %c160_316 = arith.constant 160 : index
    %c0_317 = arith.constant 0 : index
    %304 = vector.load %arg20[%c160_316, %c0_317] : memref<312x128xf32, #tpu.memory_space<vmem>>, vector<8x128xf32>
    tpu.vector_store %arg20[%c160_316, %c0_317], %303 {strides = array<i32>} : memref<312x128xf32, #tpu.memory_space<vmem>>, vector<8x128xf32>,
    %c126_i32_318 = arith.constant 126 : i32
    %305 = tpu.dynamic_rotate %262 by %c126_i32_318 dim 1 : vector<8x128xf32>, i32 -> vector<8x128xf32>
    %c168_319 = arith.constant 168 : index
    %c0_320 = arith.constant 0 : index
    %306 = vector.load %arg20[%c168_319, %c0_320] : memref<312x128xf32, #tpu.memory_space<vmem>>, vector<8x128xf32>
    tpu.vector_store %arg20[%c168_319, %c0_320], %305 {strides = array<i32>} : memref<312x128xf32, #tpu.memory_space<vmem>>, vector<8x128xf32>,
    %c125_i32_321 = arith.constant 125 : i32
    %307 = tpu.dynamic_rotate %262 by %c125_i32_321 dim 1 : vector<8x128xf32>, i32 -> vector<8x128xf32>
    %c176_322 = arith.constant 176 : index
    %c0_323 = arith.constant 0 : index
    %308 = vector.load %arg20[%c176_322, %c0_323] : memref<312x128xf32, #tpu.memory_space<vmem>>, vector<8x128xf32>
    tpu.vector_store %arg20[%c176_322, %c0_323], %307 {strides = array<i32>} : memref<312x128xf32, #tpu.memory_space<vmem>>, vector<8x128xf32>,
    %c124_i32_324 = arith.constant 124 : i32
    %309 = tpu.dynamic_rotate %262 by %c124_i32_324 dim 1 : vector<8x128xf32>, i32 -> vector<8x128xf32>
    %c184_325 = arith.constant 184 : index
    %c0_326 = arith.constant 0 : index
    %310 = vector.load %arg20[%c184_325, %c0_326] : memref<312x128xf32, #tpu.memory_space<vmem>>, vector<8x128xf32>
    tpu.vector_store %arg20[%c184_325, %c0_326], %309 {strides = array<i32>} : memref<312x128xf32, #tpu.memory_space<vmem>>, vector<8x128xf32>,
    %c123_i32_327 = arith.constant 123 : i32
    %311 = tpu.dynamic_rotate %262 by %c123_i32_327 dim 1 : vector<8x128xf32>, i32 -> vector<8x128xf32>
    %c192_328 = arith.constant 192 : index
    %c0_329 = arith.constant 0 : index
    %312 = vector.load %arg20[%c192_328, %c0_329] : memref<312x128xf32, #tpu.memory_space<vmem>>, vector<8x128xf32>
    tpu.vector_store %arg20[%c192_328, %c0_329], %311 {strides = array<i32>} : memref<312x128xf32, #tpu.memory_space<vmem>>, vector<8x128xf32>,
    %c122_i32_330 = arith.constant 122 : i32
    %313 = tpu.dynamic_rotate %262 by %c122_i32_330 dim 1 : vector<8x128xf32>, i32 -> vector<8x128xf32>
    %c200_331 = arith.constant 200 : index
    %c0_332 = arith.constant 0 : index
    %314 = vector.load %arg20[%c200_331, %c0_332] : memref<312x128xf32, #tpu.memory_space<vmem>>, vector<8x128xf32>
    tpu.vector_store %arg20[%c200_331, %c0_332], %313 {strides = array<i32>} : memref<312x128xf32, #tpu.memory_space<vmem>>, vector<8x128xf32>,
    %c121_i32_333 = arith.constant 121 : i32
    %315 = tpu.dynamic_rotate %262 by %c121_i32_333 dim 1 : vector<8x128xf32>, i32 -> vector<8x128xf32>
    %c208_334 = arith.constant 208 : index
    %c0_335 = arith.constant 0 : index
    %316 = vector.load %arg20[%c208_334, %c0_335] : memref<312x128xf32, #tpu.memory_space<vmem>>, vector<8x128xf32>
    tpu.vector_store %arg20[%c208_334, %c0_335], %315 {strides = array<i32>} : memref<312x128xf32, #tpu.memory_space<vmem>>, vector<8x128xf32>,
    %c120_i32_336 = arith.constant 120 : i32
    %317 = tpu.dynamic_rotate %262 by %c120_i32_336 dim 1 : vector<8x128xf32>, i32 -> vector<8x128xf32>
    %c216_337 = arith.constant 216 : index
    %c0_338 = arith.constant 0 : index
    %318 = vector.load %arg20[%c216_337, %c0_338] : memref<312x128xf32, #tpu.memory_space<vmem>>, vector<8x128xf32>
    tpu.vector_store %arg20[%c216_337, %c0_338], %317 {strides = array<i32>} : memref<312x128xf32, #tpu.memory_space<vmem>>, vector<8x128xf32>,
    %c119_i32_339 = arith.constant 119 : i32
    %319 = tpu.dynamic_rotate %262 by %c119_i32_339 dim 1 : vector<8x128xf32>, i32 -> vector<8x128xf32>
    %c224_340 = arith.constant 224 : index
    %c0_341 = arith.constant 0 : index
    %320 = vector.load %arg20[%c224_340, %c0_341] : memref<312x128xf32, #tpu.memory_space<vmem>>, vector<8x128xf32>
    tpu.vector_store %arg20[%c224_340, %c0_341], %319 {strides = array<i32>} : memref<312x128xf32, #tpu.memory_space<vmem>>, vector<8x128xf32>,
    %c118_i32_342 = arith.constant 118 : i32
    %321 = tpu.dynamic_rotate %262 by %c118_i32_342 dim 1 : vector<8x128xf32>, i32 -> vector<8x128xf32>
    %c232_343 = arith.constant 232 : index
    %c0_344 = arith.constant 0 : index
    %322 = vector.load %arg20[%c232_343, %c0_344] : memref<312x128xf32, #tpu.memory_space<vmem>>, vector<8x128xf32>
    tpu.vector_store %arg20[%c232_343, %c0_344], %321 {strides = array<i32>} : memref<312x128xf32, #tpu.memory_space<vmem>>, vector<8x128xf32>,
    %c117_i32_345 = arith.constant 117 : i32
    %323 = tpu.dynamic_rotate %262 by %c117_i32_345 dim 1 : vector<8x128xf32>, i32 -> vector<8x128xf32>
    %c240_346 = arith.constant 240 : index
    %c0_347 = arith.constant 0 : index
    %324 = vector.load %arg20[%c240_346, %c0_347] : memref<312x128xf32, #tpu.memory_space<vmem>>, vector<8x128xf32>
    tpu.vector_store %arg20[%c240_346, %c0_347], %323 {strides = array<i32>} : memref<312x128xf32, #tpu.memory_space<vmem>>, vector<8x128xf32>,
    %c116_i32_348 = arith.constant 116 : i32
    %325 = tpu.dynamic_rotate %262 by %c116_i32_348 dim 1 : vector<8x128xf32>, i32 -> vector<8x128xf32>
    %c248_349 = arith.constant 248 : index
    %c0_350 = arith.constant 0 : index
    %326 = vector.load %arg20[%c248_349, %c0_350] : memref<312x128xf32, #tpu.memory_space<vmem>>, vector<8x128xf32>
    tpu.vector_store %arg20[%c248_349, %c0_350], %325 {strides = array<i32>} : memref<312x128xf32, #tpu.memory_space<vmem>>, vector<8x128xf32>,
    %c115_i32_351 = arith.constant 115 : i32
    %327 = tpu.dynamic_rotate %262 by %c115_i32_351 dim 1 : vector<8x128xf32>, i32 -> vector<8x128xf32>
    %c256_352 = arith.constant 256 : index
    %c0_353 = arith.constant 0 : index
    %328 = vector.load %arg20[%c256_352, %c0_353] : memref<312x128xf32, #tpu.memory_space<vmem>>, vector<8x128xf32>
    tpu.vector_store %arg20[%c256_352, %c0_353], %327 {strides = array<i32>} : memref<312x128xf32, #tpu.memory_space<vmem>>, vector<8x128xf32>,
    %c114_i32_354 = arith.constant 114 : i32
    %329 = tpu.dynamic_rotate %262 by %c114_i32_354 dim 1 : vector<8x128xf32>, i32 -> vector<8x128xf32>
    %c264_355 = arith.constant 264 : index
    %c0_356 = arith.constant 0 : index
    %330 = vector.load %arg20[%c264_355, %c0_356] : memref<312x128xf32, #tpu.memory_space<vmem>>, vector<8x128xf32>
    tpu.vector_store %arg20[%c264_355, %c0_356], %329 {strides = array<i32>} : memref<312x128xf32, #tpu.memory_space<vmem>>, vector<8x128xf32>,
    %c113_i32_357 = arith.constant 113 : i32
    %331 = tpu.dynamic_rotate %262 by %c113_i32_357 dim 1 : vector<8x128xf32>, i32 -> vector<8x128xf32>
    %c272_358 = arith.constant 272 : index
    %c0_359 = arith.constant 0 : index
    %332 = vector.load %arg20[%c272_358, %c0_359] : memref<312x128xf32, #tpu.memory_space<vmem>>, vector<8x128xf32>
    tpu.vector_store %arg20[%c272_358, %c0_359], %331 {strides = array<i32>} : memref<312x128xf32, #tpu.memory_space<vmem>>, vector<8x128xf32>,
    %c112_i32_360 = arith.constant 112 : i32
    %333 = tpu.dynamic_rotate %262 by %c112_i32_360 dim 1 : vector<8x128xf32>, i32 -> vector<8x128xf32>
    %c280_361 = arith.constant 280 : index
    %c0_362 = arith.constant 0 : index
    %334 = vector.load %arg20[%c280_361, %c0_362] : memref<312x128xf32, #tpu.memory_space<vmem>>, vector<8x128xf32>
    tpu.vector_store %arg20[%c280_361, %c0_362], %333 {strides = array<i32>} : memref<312x128xf32, #tpu.memory_space<vmem>>, vector<8x128xf32>,
    %c111_i32_363 = arith.constant 111 : i32
    %335 = tpu.dynamic_rotate %262 by %c111_i32_363 dim 1 : vector<8x128xf32>, i32 -> vector<8x128xf32>
    %c288_364 = arith.constant 288 : index
    %c0_365 = arith.constant 0 : index
    %336 = vector.load %arg20[%c288_364, %c0_365] : memref<312x128xf32, #tpu.memory_space<vmem>>, vector<8x128xf32>
    tpu.vector_store %arg20[%c288_364, %c0_365], %335 {strides = array<i32>} : memref<312x128xf32, #tpu.memory_space<vmem>>, vector<8x128xf32>,
    %c110_i32_366 = arith.constant 110 : i32
    %337 = tpu.dynamic_rotate %262 by %c110_i32_366 dim 1 : vector<8x128xf32>, i32 -> vector<8x128xf32>
    %c296_367 = arith.constant 296 : index
    %c0_368 = arith.constant 0 : index
    %338 = vector.load %arg20[%c296_367, %c0_368] : memref<312x128xf32, #tpu.memory_space<vmem>>, vector<8x128xf32>
    tpu.vector_store %arg20[%c296_367, %c0_368], %337 {strides = array<i32>} : memref<312x128xf32, #tpu.memory_space<vmem>>, vector<8x128xf32>,
    %c109_i32_369 = arith.constant 109 : i32
    %339 = tpu.dynamic_rotate %262 by %c109_i32_369 dim 1 : vector<8x128xf32>, i32 -> vector<8x128xf32>
    %c304_370 = arith.constant 304 : index
    %c0_371 = arith.constant 0 : index
    %340 = vector.load %arg20[%c304_370, %c0_371] : memref<312x128xf32, #tpu.memory_space<vmem>>, vector<8x128xf32>
    tpu.vector_store %arg20[%c304_370, %c0_371], %339 {strides = array<i32>} : memref<312x128xf32, #tpu.memory_space<vmem>>, vector<8x128xf32>,
    %c0_372 = arith.constant 0 : index
    %c0_373 = arith.constant 0 : index
    %341 = vector.load %arg8[%c0_372, %c0_373] : memref<16x312xf32, #tpu.memory_space<vmem>>, vector<16x128xf32>
    %c0_374 = arith.constant 0 : index
    %c0_375 = arith.constant 0 : index
    %342 = vector.load %arg20[%c0_374, %c0_375] : memref<312x128xf32, #tpu.memory_space<vmem>>, vector<128x64xf32>
    %cst_376 = arith.constant dense<0.000000e+00> : vector<16x64xf32>
    %343 = tpu.matmul %341, %342, %cst_376 {dimension_numbers = #tpu.dot_dimension_numbers<[1], [0], [0], [1], [0, 0, 1, 1], [], []>} : vector<16x128xf32>, vector<128x64xf32>, vector<16x64xf32> -> vector<16x64xf32>
    %c0_377 = arith.constant 0 : index
    %c128_378 = arith.constant 128 : index
    %344 = vector.load %arg8[%c0_377, %c128_378] : memref<16x312xf32, #tpu.memory_space<vmem>>, vector<16x128xf32>
    %c128_379 = arith.constant 128 : index
    %c0_380 = arith.constant 0 : index
    %345 = vector.load %arg20[%c128_379, %c0_380] : memref<312x128xf32, #tpu.memory_space<vmem>>, vector<128x64xf32>
    %cst_381 = arith.constant dense<0.000000e+00> : vector<16x64xf32>
    %346 = tpu.matmul %344, %345, %cst_381 {dimension_numbers = #tpu.dot_dimension_numbers<[1], [0], [0], [1], [0, 0, 1, 1], [], []>} : vector<16x128xf32>, vector<128x64xf32>, vector<16x64xf32> -> vector<16x64xf32>
    %347 = arith.addf %343, %346 : vector<16x64xf32>
    %c0_382 = arith.constant 0 : index
    %c256_383 = arith.constant 256 : index
    %348 = vector.load %arg8[%c0_382, %c256_383] : memref<16x312xf32, #tpu.memory_space<vmem>>, vector<16x56xf32>
    %c256_384 = arith.constant 256 : index
    %c0_385 = arith.constant 0 : index
    %349 = vector.load %arg20[%c256_384, %c0_385] : memref<312x128xf32, #tpu.memory_space<vmem>>, vector<56x64xf32>
    %cst_386 = arith.constant dense<0.000000e+00> : vector<16x64xf32>
    %350 = tpu.matmul %348, %349, %cst_386 {dimension_numbers = #tpu.dot_dimension_numbers<[1], [0], [0], [1], [0, 0, 1, 1], [], []>} : vector<16x56xf32>, vector<56x64xf32>, vector<16x64xf32> -> vector<16x64xf32>
    %351 = arith.addf %347, %350 : vector<16x64xf32>
    %c0_387 = arith.constant 0 : index
    %c0_388 = arith.constant 0 : index
    %c0_389 = arith.constant 0 : index
    %352 = vector.load %arg21[%c0_387, %c0_388, %c0_389] : memref<2x64x64xf32, #tpu.memory_space<vmem>>, vector<1x16x64xf32>
    %353 = vector.shape_cast %352 : vector<1x16x64xf32> to vector<16x64xf32>
    %354 = vector.shape_cast %351 : vector<16x64xf32> to vector<1x16x64xf32>
    tpu.vector_store %arg21[%c0_387, %c0_388, %c0_389], %354 {strides = array<i32>} : memref<2x64x64xf32, #tpu.memory_space<vmem>>, vector<1x16x64xf32>,
    %c1_390 = arith.constant 1 : index
    %c0_391 = arith.constant 0 : index
    %c0_392 = arith.constant 0 : index
    %355 = vector.load %arg19[%c1_390, %c0_391, %c0_392] : memref<2x8x128xf32, #tpu.memory_space<vmem>>, vector<1x8x128xf32>
    %356 = vector.shape_cast %355 : vector<1x8x128xf32> to vector<8x128xf32>
    %c19_i32_393 = arith.constant 19 : i32
    %357 = tpu.dynamic_rotate %356 by %c19_i32_393 dim 1 : vector<8x128xf32>, i32 -> vector<8x128xf32>
    %c0_394 = arith.constant 0 : index
    %c0_395 = arith.constant 0 : index
    %358 = vector.load %arg20[%c0_394, %c0_395] : memref<312x128xf32, #tpu.memory_space<vmem>>, vector<8x128xf32>
    tpu.vector_store %arg20[%c0_394, %c0_395], %357 {strides = array<i32>} : memref<312x128xf32, #tpu.memory_space<vmem>>, vector<8x128xf32>,
    %c18_i32_396 = arith.constant 18 : i32
    %359 = tpu.dynamic_rotate %356 by %c18_i32_396 dim 1 : vector<8x128xf32>, i32 -> vector<8x128xf32>
    %c8_397 = arith.constant 8 : index
    %c0_398 = arith.constant 0 : index
    %360 = vector.load %arg20[%c8_397, %c0_398] : memref<312x128xf32, #tpu.memory_space<vmem>>, vector<8x128xf32>
    tpu.vector_store %arg20[%c8_397, %c0_398], %359 {strides = array<i32>} : memref<312x128xf32, #tpu.memory_space<vmem>>, vector<8x128xf32>,
    %c17_i32_399 = arith.constant 17 : i32
    %361 = tpu.dynamic_rotate %356 by %c17_i32_399 dim 1 : vector<8x128xf32>, i32 -> vector<8x128xf32>
    %c16_400 = arith.constant 16 : index
    %c0_401 = arith.constant 0 : index
    %362 = vector.load %arg20[%c16_400, %c0_401] : memref<312x128xf32, #tpu.memory_space<vmem>>, vector<8x128xf32>
    tpu.vector_store %arg20[%c16_400, %c0_401], %361 {strides = array<i32>} : memref<312x128xf32, #tpu.memory_space<vmem>>, vector<8x128xf32>,
    %c16_i32_402 = arith.constant 16 : i32
    %363 = tpu.dynamic_rotate %356 by %c16_i32_402 dim 1 : vector<8x128xf32>, i32 -> vector<8x128xf32>
    %c24_403 = arith.constant 24 : index
    %c0_404 = arith.constant 0 : index
    %364 = vector.load %arg20[%c24_403, %c0_404] : memref<312x128xf32, #tpu.memory_space<vmem>>, vector<8x128xf32>
    tpu.vector_store %arg20[%c24_403, %c0_404], %363 {strides = array<i32>} : memref<312x128xf32, #tpu.memory_space<vmem>>, vector<8x128xf32>,
    %c15_i32_405 = arith.constant 15 : i32
    %365 = tpu.dynamic_rotate %356 by %c15_i32_405 dim 1 : vector<8x128xf32>, i32 -> vector<8x128xf32>
    %c32_406 = arith.constant 32 : index
    %c0_407 = arith.constant 0 : index
    %366 = vector.load %arg20[%c32_406, %c0_407] : memref<312x128xf32, #tpu.memory_space<vmem>>, vector<8x128xf32>
    tpu.vector_store %arg20[%c32_406, %c0_407], %365 {strides = array<i32>} : memref<312x128xf32, #tpu.memory_space<vmem>>, vector<8x128xf32>,
    %c14_i32_408 = arith.constant 14 : i32
    %367 = tpu.dynamic_rotate %356 by %c14_i32_408 dim 1 : vector<8x128xf32>, i32 -> vector<8x128xf32>
    %c40_409 = arith.constant 40 : index
    %c0_410 = arith.constant 0 : index
    %368 = vector.load %arg20[%c40_409, %c0_410] : memref<312x128xf32, #tpu.memory_space<vmem>>, vector<8x128xf32>
    tpu.vector_store %arg20[%c40_409, %c0_410], %367 {strides = array<i32>} : memref<312x128xf32, #tpu.memory_space<vmem>>, vector<8x128xf32>,
    %c13_i32_411 = arith.constant 13 : i32
    %369 = tpu.dynamic_rotate %356 by %c13_i32_411 dim 1 : vector<8x128xf32>, i32 -> vector<8x128xf32>
    %c48_412 = arith.constant 48 : index
    %c0_413 = arith.constant 0 : index
    %370 = vector.load %arg20[%c48_412, %c0_413] : memref<312x128xf32, #tpu.memory_space<vmem>>, vector<8x128xf32>
    tpu.vector_store %arg20[%c48_412, %c0_413], %369 {strides = array<i32>} : memref<312x128xf32, #tpu.memory_space<vmem>>, vector<8x128xf32>,
    %c12_i32_414 = arith.constant 12 : i32
    %371 = tpu.dynamic_rotate %356 by %c12_i32_414 dim 1 : vector<8x128xf32>, i32 -> vector<8x128xf32>
    %c56_415 = arith.constant 56 : index
    %c0_416 = arith.constant 0 : index
    %372 = vector.load %arg20[%c56_415, %c0_416] : memref<312x128xf32, #tpu.memory_space<vmem>>, vector<8x128xf32>
    tpu.vector_store %arg20[%c56_415, %c0_416], %371 {strides = array<i32>} : memref<312x128xf32, #tpu.memory_space<vmem>>, vector<8x128xf32>,
    %c11_i32_417 = arith.constant 11 : i32
    %373 = tpu.dynamic_rotate %356 by %c11_i32_417 dim 1 : vector<8x128xf32>, i32 -> vector<8x128xf32>
    %c64_418 = arith.constant 64 : index
    %c0_419 = arith.constant 0 : index
    %374 = vector.load %arg20[%c64_418, %c0_419] : memref<312x128xf32, #tpu.memory_space<vmem>>, vector<8x128xf32>
    tpu.vector_store %arg20[%c64_418, %c0_419], %373 {strides = array<i32>} : memref<312x128xf32, #tpu.memory_space<vmem>>, vector<8x128xf32>,
    %c10_i32_420 = arith.constant 10 : i32
    %375 = tpu.dynamic_rotate %356 by %c10_i32_420 dim 1 : vector<8x128xf32>, i32 -> vector<8x128xf32>
    %c72_421 = arith.constant 72 : index
    %c0_422 = arith.constant 0 : index
    %376 = vector.load %arg20[%c72_421, %c0_422] : memref<312x128xf32, #tpu.memory_space<vmem>>, vector<8x128xf32>
    tpu.vector_store %arg20[%c72_421, %c0_422], %375 {strides = array<i32>} : memref<312x128xf32, #tpu.memory_space<vmem>>, vector<8x128xf32>,
    %c9_i32_423 = arith.constant 9 : i32
    %377 = tpu.dynamic_rotate %356 by %c9_i32_423 dim 1 : vector<8x128xf32>, i32 -> vector<8x128xf32>
    %c80_424 = arith.constant 80 : index
    %c0_425 = arith.constant 0 : index
    %378 = vector.load %arg20[%c80_424, %c0_425] : memref<312x128xf32, #tpu.memory_space<vmem>>, vector<8x128xf32>
    tpu.vector_store %arg20[%c80_424, %c0_425], %377 {strides = array<i32>} : memref<312x128xf32, #tpu.memory_space<vmem>>, vector<8x128xf32>,
    %c8_i32_426 = arith.constant 8 : i32
    %379 = tpu.dynamic_rotate %356 by %c8_i32_426 dim 1 : vector<8x128xf32>, i32 -> vector<8x128xf32>
    %c88_427 = arith.constant 88 : index
    %c0_428 = arith.constant 0 : index
    %380 = vector.load %arg20[%c88_427, %c0_428] : memref<312x128xf32, #tpu.memory_space<vmem>>, vector<8x128xf32>
    tpu.vector_store %arg20[%c88_427, %c0_428], %379 {strides = array<i32>} : memref<312x128xf32, #tpu.memory_space<vmem>>, vector<8x128xf32>,
    %c7_i32_429 = arith.constant 7 : i32
    %381 = tpu.dynamic_rotate %356 by %c7_i32_429 dim 1 : vector<8x128xf32>, i32 -> vector<8x128xf32>
    %c96_430 = arith.constant 96 : index
    %c0_431 = arith.constant 0 : index
    %382 = vector.load %arg20[%c96_430, %c0_431] : memref<312x128xf32, #tpu.memory_space<vmem>>, vector<8x128xf32>
    tpu.vector_store %arg20[%c96_430, %c0_431], %381 {strides = array<i32>} : memref<312x128xf32, #tpu.memory_space<vmem>>, vector<8x128xf32>,
    %c6_i32_432 = arith.constant 6 : i32
    %383 = tpu.dynamic_rotate %356 by %c6_i32_432 dim 1 : vector<8x128xf32>, i32 -> vector<8x128xf32>
    %c104_433 = arith.constant 104 : index
    %c0_434 = arith.constant 0 : index
    %384 = vector.load %arg20[%c104_433, %c0_434] : memref<312x128xf32, #tpu.memory_space<vmem>>, vector<8x128xf32>
    tpu.vector_store %arg20[%c104_433, %c0_434], %383 {strides = array<i32>} : memref<312x128xf32, #tpu.memory_space<vmem>>, vector<8x128xf32>,
    %c5_i32_435 = arith.constant 5 : i32
    %385 = tpu.dynamic_rotate %356 by %c5_i32_435 dim 1 : vector<8x128xf32>, i32 -> vector<8x128xf32>
    %c112_436 = arith.constant 112 : index
    %c0_437 = arith.constant 0 : index
    %386 = vector.load %arg20[%c112_436, %c0_437] : memref<312x128xf32, #tpu.memory_space<vmem>>, vector<8x128xf32>
    tpu.vector_store %arg20[%c112_436, %c0_437], %385 {strides = array<i32>} : memref<312x128xf32, #tpu.memory_space<vmem>>, vector<8x128xf32>,
    %c4_i32_438 = arith.constant 4 : i32
    %387 = tpu.dynamic_rotate %356 by %c4_i32_438 dim 1 : vector<8x128xf32>, i32 -> vector<8x128xf32>
    %c120_439 = arith.constant 120 : index
    %c0_440 = arith.constant 0 : index
    %388 = vector.load %arg20[%c120_439, %c0_440] : memref<312x128xf32, #tpu.memory_space<vmem>>, vector<8x128xf32>
    tpu.vector_store %arg20[%c120_439, %c0_440], %387 {strides = array<i32>} : memref<312x128xf32, #tpu.memory_space<vmem>>, vector<8x128xf32>,
    %c3_i32_441 = arith.constant 3 : i32
    %389 = tpu.dynamic_rotate %356 by %c3_i32_441 dim 1 : vector<8x128xf32>, i32 -> vector<8x128xf32>
    %c128_442 = arith.constant 128 : index
    %c0_443 = arith.constant 0 : index
    %390 = vector.load %arg20[%c128_442, %c0_443] : memref<312x128xf32, #tpu.memory_space<vmem>>, vector<8x128xf32>
    tpu.vector_store %arg20[%c128_442, %c0_443], %389 {strides = array<i32>} : memref<312x128xf32, #tpu.memory_space<vmem>>, vector<8x128xf32>,
    %c2_i32_444 = arith.constant 2 : i32
    %391 = tpu.dynamic_rotate %356 by %c2_i32_444 dim 1 : vector<8x128xf32>, i32 -> vector<8x128xf32>
    %c136_445 = arith.constant 136 : index
    %c0_446 = arith.constant 0 : index
    %392 = vector.load %arg20[%c136_445, %c0_446] : memref<312x128xf32, #tpu.memory_space<vmem>>, vector<8x128xf32>
    tpu.vector_store %arg20[%c136_445, %c0_446], %391 {strides = array<i32>} : memref<312x128xf32, #tpu.memory_space<vmem>>, vector<8x128xf32>,
    %c1_i32_447 = arith.constant 1 : i32
    %393 = tpu.dynamic_rotate %356 by %c1_i32_447 dim 1 : vector<8x128xf32>, i32 -> vector<8x128xf32>
    %c144_448 = arith.constant 144 : index
    %c0_449 = arith.constant 0 : index
    %394 = vector.load %arg20[%c144_448, %c0_449] : memref<312x128xf32, #tpu.memory_space<vmem>>, vector<8x128xf32>
    tpu.vector_store %arg20[%c144_448, %c0_449], %393 {strides = array<i32>} : memref<312x128xf32, #tpu.memory_space<vmem>>, vector<8x128xf32>,
    %c0_i32_450 = arith.constant 0 : i32
    %395 = tpu.dynamic_rotate %356 by %c0_i32_450 dim 1 : vector<8x128xf32>, i32 -> vector<8x128xf32>
    %c152_451 = arith.constant 152 : index
    %c0_452 = arith.constant 0 : index
    %396 = vector.load %arg20[%c152_451, %c0_452] : memref<312x128xf32, #tpu.memory_space<vmem>>, vector<8x128xf32>
    tpu.vector_store %arg20[%c152_451, %c0_452], %395 {strides = array<i32>} : memref<312x128xf32, #tpu.memory_space<vmem>>, vector<8x128xf32>,
    %c127_i32_453 = arith.constant 127 : i32
    %397 = tpu.dynamic_rotate %356 by %c127_i32_453 dim 1 : vector<8x128xf32>, i32 -> vector<8x128xf32>
    %c160_454 = arith.constant 160 : index
    %c0_455 = arith.constant 0 : index
    %398 = vector.load %arg20[%c160_454, %c0_455] : memref<312x128xf32, #tpu.memory_space<vmem>>, vector<8x128xf32>
    tpu.vector_store %arg20[%c160_454, %c0_455], %397 {strides = array<i32>} : memref<312x128xf32, #tpu.memory_space<vmem>>, vector<8x128xf32>,
    %c126_i32_456 = arith.constant 126 : i32
    %399 = tpu.dynamic_rotate %356 by %c126_i32_456 dim 1 : vector<8x128xf32>, i32 -> vector<8x128xf32>
    %c168_457 = arith.constant 168 : index
    %c0_458 = arith.constant 0 : index
    %400 = vector.load %arg20[%c168_457, %c0_458] : memref<312x128xf32, #tpu.memory_space<vmem>>, vector<8x128xf32>
    tpu.vector_store %arg20[%c168_457, %c0_458], %399 {strides = array<i32>} : memref<312x128xf32, #tpu.memory_space<vmem>>, vector<8x128xf32>,
    %c125_i32_459 = arith.constant 125 : i32
    %401 = tpu.dynamic_rotate %356 by %c125_i32_459 dim 1 : vector<8x128xf32>, i32 -> vector<8x128xf32>
    %c176_460 = arith.constant 176 : index
    %c0_461 = arith.constant 0 : index
    %402 = vector.load %arg20[%c176_460, %c0_461] : memref<312x128xf32, #tpu.memory_space<vmem>>, vector<8x128xf32>
    tpu.vector_store %arg20[%c176_460, %c0_461], %401 {strides = array<i32>} : memref<312x128xf32, #tpu.memory_space<vmem>>, vector<8x128xf32>,
    %c124_i32_462 = arith.constant 124 : i32
    %403 = tpu.dynamic_rotate %356 by %c124_i32_462 dim 1 : vector<8x128xf32>, i32 -> vector<8x128xf32>
    %c184_463 = arith.constant 184 : index
    %c0_464 = arith.constant 0 : index
    %404 = vector.load %arg20[%c184_463, %c0_464] : memref<312x128xf32, #tpu.memory_space<vmem>>, vector<8x128xf32>
    tpu.vector_store %arg20[%c184_463, %c0_464], %403 {strides = array<i32>} : memref<312x128xf32, #tpu.memory_space<vmem>>, vector<8x128xf32>,
    %c123_i32_465 = arith.constant 123 : i32
    %405 = tpu.dynamic_rotate %356 by %c123_i32_465 dim 1 : vector<8x128xf32>, i32 -> vector<8x128xf32>
    %c192_466 = arith.constant 192 : index
    %c0_467 = arith.constant 0 : index
    %406 = vector.load %arg20[%c192_466, %c0_467] : memref<312x128xf32, #tpu.memory_space<vmem>>, vector<8x128xf32>
    tpu.vector_store %arg20[%c192_466, %c0_467], %405 {strides = array<i32>} : memref<312x128xf32, #tpu.memory_space<vmem>>, vector<8x128xf32>,
    %c122_i32_468 = arith.constant 122 : i32
    %407 = tpu.dynamic_rotate %356 by %c122_i32_468 dim 1 : vector<8x128xf32>, i32 -> vector<8x128xf32>
    %c200_469 = arith.constant 200 : index
    %c0_470 = arith.constant 0 : index
    %408 = vector.load %arg20[%c200_469, %c0_470] : memref<312x128xf32, #tpu.memory_space<vmem>>, vector<8x128xf32>
    tpu.vector_store %arg20[%c200_469, %c0_470], %407 {strides = array<i32>} : memref<312x128xf32, #tpu.memory_space<vmem>>, vector<8x128xf32>,
    %c121_i32_471 = arith.constant 121 : i32
    %409 = tpu.dynamic_rotate %356 by %c121_i32_471 dim 1 : vector<8x128xf32>, i32 -> vector<8x128xf32>
    %c208_472 = arith.constant 208 : index
    %c0_473 = arith.constant 0 : index
    %410 = vector.load %arg20[%c208_472, %c0_473] : memref<312x128xf32, #tpu.memory_space<vmem>>, vector<8x128xf32>
    tpu.vector_store %arg20[%c208_472, %c0_473], %409 {strides = array<i32>} : memref<312x128xf32, #tpu.memory_space<vmem>>, vector<8x128xf32>,
    %c120_i32_474 = arith.constant 120 : i32
    %411 = tpu.dynamic_rotate %356 by %c120_i32_474 dim 1 : vector<8x128xf32>, i32 -> vector<8x128xf32>
    %c216_475 = arith.constant 216 : index
    %c0_476 = arith.constant 0 : index
    %412 = vector.load %arg20[%c216_475, %c0_476] : memref<312x128xf32, #tpu.memory_space<vmem>>, vector<8x128xf32>
    tpu.vector_store %arg20[%c216_475, %c0_476], %411 {strides = array<i32>} : memref<312x128xf32, #tpu.memory_space<vmem>>, vector<8x128xf32>,
    %c119_i32_477 = arith.constant 119 : i32
    %413 = tpu.dynamic_rotate %356 by %c119_i32_477 dim 1 : vector<8x128xf32>, i32 -> vector<8x128xf32>
    %c224_478 = arith.constant 224 : index
    %c0_479 = arith.constant 0 : index
    %414 = vector.load %arg20[%c224_478, %c0_479] : memref<312x128xf32, #tpu.memory_space<vmem>>, vector<8x128xf32>
    tpu.vector_store %arg20[%c224_478, %c0_479], %413 {strides = array<i32>} : memref<312x128xf32, #tpu.memory_space<vmem>>, vector<8x128xf32>,
    %c118_i32_480 = arith.constant 118 : i32
    %415 = tpu.dynamic_rotate %356 by %c118_i32_480 dim 1 : vector<8x128xf32>, i32 -> vector<8x128xf32>
    %c232_481 = arith.constant 232 : index
    %c0_482 = arith.constant 0 : index
    %416 = vector.load %arg20[%c232_481, %c0_482] : memref<312x128xf32, #tpu.memory_space<vmem>>, vector<8x128xf32>
    tpu.vector_store %arg20[%c232_481, %c0_482], %415 {strides = array<i32>} : memref<312x128xf32, #tpu.memory_space<vmem>>, vector<8x128xf32>,
    %c117_i32_483 = arith.constant 117 : i32
    %417 = tpu.dynamic_rotate %356 by %c117_i32_483 dim 1 : vector<8x128xf32>, i32 -> vector<8x128xf32>
    %c240_484 = arith.constant 240 : index
    %c0_485 = arith.constant 0 : index
    %418 = vector.load %arg20[%c240_484, %c0_485] : memref<312x128xf32, #tpu.memory_space<vmem>>, vector<8x128xf32>
    tpu.vector_store %arg20[%c240_484, %c0_485], %417 {strides = array<i32>} : memref<312x128xf32, #tpu.memory_space<vmem>>, vector<8x128xf32>,
    %c116_i32_486 = arith.constant 116 : i32
    %419 = tpu.dynamic_rotate %356 by %c116_i32_486 dim 1 : vector<8x128xf32>, i32 -> vector<8x128xf32>
    %c248_487 = arith.constant 248 : index
    %c0_488 = arith.constant 0 : index
    %420 = vector.load %arg20[%c248_487, %c0_488] : memref<312x128xf32, #tpu.memory_space<vmem>>, vector<8x128xf32>
    tpu.vector_store %arg20[%c248_487, %c0_488], %419 {strides = array<i32>} : memref<312x128xf32, #tpu.memory_space<vmem>>, vector<8x128xf32>,
    %c115_i32_489 = arith.constant 115 : i32
    %421 = tpu.dynamic_rotate %356 by %c115_i32_489 dim 1 : vector<8x128xf32>, i32 -> vector<8x128xf32>
    %c256_490 = arith.constant 256 : index
    %c0_491 = arith.constant 0 : index
    %422 = vector.load %arg20[%c256_490, %c0_491] : memref<312x128xf32, #tpu.memory_space<vmem>>, vector<8x128xf32>
    tpu.vector_store %arg20[%c256_490, %c0_491], %421 {strides = array<i32>} : memref<312x128xf32, #tpu.memory_space<vmem>>, vector<8x128xf32>,
    %c114_i32_492 = arith.constant 114 : i32
    %423 = tpu.dynamic_rotate %356 by %c114_i32_492 dim 1 : vector<8x128xf32>, i32 -> vector<8x128xf32>
    %c264_493 = arith.constant 264 : index
    %c0_494 = arith.constant 0 : index
    %424 = vector.load %arg20[%c264_493, %c0_494] : memref<312x128xf32, #tpu.memory_space<vmem>>, vector<8x128xf32>
    tpu.vector_store %arg20[%c264_493, %c0_494], %423 {strides = array<i32>} : memref<312x128xf32, #tpu.memory_space<vmem>>, vector<8x128xf32>,
    %c113_i32_495 = arith.constant 113 : i32
    %425 = tpu.dynamic_rotate %356 by %c113_i32_495 dim 1 : vector<8x128xf32>, i32 -> vector<8x128xf32>
    %c272_496 = arith.constant 272 : index
    %c0_497 = arith.constant 0 : index
    %426 = vector.load %arg20[%c272_496, %c0_497] : memref<312x128xf32, #tpu.memory_space<vmem>>, vector<8x128xf32>
    tpu.vector_store %arg20[%c272_496, %c0_497], %425 {strides = array<i32>} : memref<312x128xf32, #tpu.memory_space<vmem>>, vector<8x128xf32>,
    %c112_i32_498 = arith.constant 112 : i32
    %427 = tpu.dynamic_rotate %356 by %c112_i32_498 dim 1 : vector<8x128xf32>, i32 -> vector<8x128xf32>
    %c280_499 = arith.constant 280 : index
    %c0_500 = arith.constant 0 : index
    %428 = vector.load %arg20[%c280_499, %c0_500] : memref<312x128xf32, #tpu.memory_space<vmem>>, vector<8x128xf32>
    tpu.vector_store %arg20[%c280_499, %c0_500], %427 {strides = array<i32>} : memref<312x128xf32, #tpu.memory_space<vmem>>, vector<8x128xf32>,
    %c111_i32_501 = arith.constant 111 : i32
    %429 = tpu.dynamic_rotate %356 by %c111_i32_501 dim 1 : vector<8x128xf32>, i32 -> vector<8x128xf32>
    %c288_502 = arith.constant 288 : index
    %c0_503 = arith.constant 0 : index
    %430 = vector.load %arg20[%c288_502, %c0_503] : memref<312x128xf32, #tpu.memory_space<vmem>>, vector<8x128xf32>
    tpu.vector_store %arg20[%c288_502, %c0_503], %429 {strides = array<i32>} : memref<312x128xf32, #tpu.memory_space<vmem>>, vector<8x128xf32>,
    %c110_i32_504 = arith.constant 110 : i32
    %431 = tpu.dynamic_rotate %356 by %c110_i32_504 dim 1 : vector<8x128xf32>, i32 -> vector<8x128xf32>
    %c296_505 = arith.constant 296 : index
    %c0_506 = arith.constant 0 : index
    %432 = vector.load %arg20[%c296_505, %c0_506] : memref<312x128xf32, #tpu.memory_space<vmem>>, vector<8x128xf32>
    tpu.vector_store %arg20[%c296_505, %c0_506], %431 {strides = array<i32>} : memref<312x128xf32, #tpu.memory_space<vmem>>, vector<8x128xf32>,
    %c109_i32_507 = arith.constant 109 : i32
    %433 = tpu.dynamic_rotate %356 by %c109_i32_507 dim 1 : vector<8x128xf32>, i32 -> vector<8x128xf32>
    %c304_508 = arith.constant 304 : index
    %c0_509 = arith.constant 0 : index
    %434 = vector.load %arg20[%c304_508, %c0_509] : memref<312x128xf32, #tpu.memory_space<vmem>>, vector<8x128xf32>
    tpu.vector_store %arg20[%c304_508, %c0_509], %433 {strides = array<i32>} : memref<312x128xf32, #tpu.memory_space<vmem>>, vector<8x128xf32>,
    %c0_510 = arith.constant 0 : index
    %c0_511 = arith.constant 0 : index
    %435 = vector.load %arg8[%c0_510, %c0_511] : memref<16x312xf32, #tpu.memory_space<vmem>>, vector<16x128xf32>
    %c0_512 = arith.constant 0 : index
    %c0_513 = arith.constant 0 : index
    %436 = vector.load %arg20[%c0_512, %c0_513] : memref<312x128xf32, #tpu.memory_space<vmem>>, vector<128x64xf32>
    %cst_514 = arith.constant dense<0.000000e+00> : vector<16x64xf32>
    %437 = tpu.matmul %435, %436, %cst_514 {dimension_numbers = #tpu.dot_dimension_numbers<[1], [0], [0], [1], [0, 0, 1, 1], [], []>} : vector<16x128xf32>, vector<128x64xf32>, vector<16x64xf32> -> vector<16x64xf32>
    %c0_515 = arith.constant 0 : index
    %c128_516 = arith.constant 128 : index
    %438 = vector.load %arg8[%c0_515, %c128_516] : memref<16x312xf32, #tpu.memory_space<vmem>>, vector<16x128xf32>
    %c128_517 = arith.constant 128 : index
    %c0_518 = arith.constant 0 : index
    %439 = vector.load %arg20[%c128_517, %c0_518] : memref<312x128xf32, #tpu.memory_space<vmem>>, vector<128x64xf32>
    %cst_519 = arith.constant dense<0.000000e+00> : vector<16x64xf32>
    %440 = tpu.matmul %438, %439, %cst_519 {dimension_numbers = #tpu.dot_dimension_numbers<[1], [0], [0], [1], [0, 0, 1, 1], [], []>} : vector<16x128xf32>, vector<128x64xf32>, vector<16x64xf32> -> vector<16x64xf32>
    %441 = arith.addf %437, %440 : vector<16x64xf32>
    %c0_520 = arith.constant 0 : index
    %c256_521 = arith.constant 256 : index
    %442 = vector.load %arg8[%c0_520, %c256_521] : memref<16x312xf32, #tpu.memory_space<vmem>>, vector<16x56xf32>
    %c256_522 = arith.constant 256 : index
    %c0_523 = arith.constant 0 : index
    %443 = vector.load %arg20[%c256_522, %c0_523] : memref<312x128xf32, #tpu.memory_space<vmem>>, vector<56x64xf32>
    %cst_524 = arith.constant dense<0.000000e+00> : vector<16x64xf32>
    %444 = tpu.matmul %442, %443, %cst_524 {dimension_numbers = #tpu.dot_dimension_numbers<[1], [0], [0], [1], [0, 0, 1, 1], [], []>} : vector<16x56xf32>, vector<56x64xf32>, vector<16x64xf32> -> vector<16x64xf32>
    %445 = arith.addf %441, %444 : vector<16x64xf32>
    %c1_525 = arith.constant 1 : index
    %c0_526 = arith.constant 0 : index
    %c0_527 = arith.constant 0 : index
    %446 = vector.load %arg21[%c1_525, %c0_526, %c0_527] : memref<2x64x64xf32, #tpu.memory_space<vmem>>, vector<1x16x64xf32>
    %447 = vector.shape_cast %446 : vector<1x16x64xf32> to vector<16x64xf32>
    %448 = vector.shape_cast %445 : vector<16x64xf32> to vector<1x16x64xf32>
    tpu.vector_store %arg21[%c1_525, %c0_526, %c0_527], %448 {strides = array<i32>} : memref<2x64x64xf32, #tpu.memory_space<vmem>>, vector<1x16x64xf32>,
    %c0_528 = arith.constant 0 : index
    %c0_529 = arith.constant 0 : index
    %c0_530 = arith.constant 0 : index
    %449 = vector.load %arg21[%c0_528, %c0_529, %c0_530] : memref<2x64x64xf32, #tpu.memory_space<vmem>>, vector<2x8x64xf32>
    %c0_531 = arith.constant 0 : index
    %c8_532 = arith.constant 8 : index
    %c0_533 = arith.constant 0 : index
    %450 = vector.load %arg21[%c0_531, %c8_532, %c0_533] : memref<2x64x64xf32, #tpu.memory_space<vmem>>, vector<2x8x64xf32>
    %c0_534 = arith.constant 0 : index
    %c0_535 = arith.constant 0 : index
    %c0_536 = arith.constant 0 : index
    %451 = vector.load %arg3[%c0_534, %c0_535, %c0_536] : memref<2x8x64xi32, #tpu.memory_space<vmem>>, vector<2x8x64xi32>
    %452 = tpu.iota {dimensions = array<i32: 2>} : vector<2x8x64xi32>
    %c63_i32_537 = arith.constant 63 : i32
    %453 = tpu.dynamic_rotate %451 by %c63_i32_537 dim 2 : vector<2x8x64xi32>, i32 -> vector<2x8x64xi32>
    %c63_i32_538 = arith.constant 63 : i32
    %454 = tpu.dynamic_rotate %450 by %c63_i32_538 dim 2 : vector<2x8x64xf32>, i32 -> vector<2x8x64xf32>
    %c1_i32_539 = arith.constant 1 : i32
    %455 = tpu.dynamic_rotate %451 by %c1_i32_539 dim 2 : vector<2x8x64xi32>, i32 -> vector<2x8x64xi32>
    %c1_i32_540 = arith.constant 1 : i32
    %456 = tpu.dynamic_rotate %450 by %c1_i32_540 dim 2 : vector<2x8x64xf32>, i32 -> vector<2x8x64xf32>
    %457 = arith.cmpi eq, %453, %452 : vector<2x8x64xi32>
    %c63_i32_541 = arith.constant 63 : i32
    %458 = vector.broadcast %c63_i32_541 : i32 to vector<2x8x64xi32>
    %459 = arith.cmpi slt, %452, %458 : vector<2x8x64xi32>
    %460 = arith.andi %457, %459 : vector<2x8x64xi1>
    %461 = arith.cmpi eq, %451, %452 : vector<2x8x64xi32>
    %462 = arith.cmpi eq, %455, %452 : vector<2x8x64xi32>
    %c0_i32_542 = arith.constant 0 : i32
    %463 = vector.broadcast %c0_i32_542 : i32 to vector<2x8x64xi32>
    %464 = arith.cmpi sgt, %452, %463 : vector<2x8x64xi32>
    %465 = arith.andi %462, %464 : vector<2x8x64xi1>
    %cst_543 = arith.constant 0.000000e+00 : f32
    %466 = vector.broadcast %cst_543 : f32 to vector<2x8x64xf32>
    %467 = arith.select %465, %456, %466 : vector<2x8x64xi1>, vector<2x8x64xf32>
    %468 = arith.select %461, %450, %467 : vector<2x8x64xi1>, vector<2x8x64xf32>
    %469 = arith.select %460, %454, %468 : vector<2x8x64xi1>, vector<2x8x64xf32>
    %470 = arith.addf %449, %469 : vector<2x8x64xf32>
    %cst_544 = arith.constant dense<0.000000e+00> : vector<8xf32>
    %471 = vector.multi_reduction <add>, %470, %cst_544 [0, 2] : vector<2x8x64xf32> to vector<8xf32>
    %472 = vector.shape_cast %471 : vector<8xf32> to vector<1x8x1xf32>
    %cst_545 = arith.constant 1.280000e+02 : f32
    %473 = vector.broadcast %cst_545 : f32 to vector<1x8x1xf32>
    %474 = arith.divf %472, %473 : vector<1x8x1xf32>
    %475 = vector.broadcast %474 : vector<1x8x1xf32> to vector<2x8x64xf32>
    %476 = arith.subf %470, %475 : vector<2x8x64xf32>
    %477 = arith.mulf %476, %476 : vector<2x8x64xf32>
    %cst_546 = arith.constant dense<0.000000e+00> : vector<8xf32>
    %478 = vector.multi_reduction <add>, %477, %cst_546 [0, 2] : vector<2x8x64xf32> to vector<8xf32>
    %479 = vector.shape_cast %478 : vector<8xf32> to vector<1x8x1xf32>
    %cst_547 = arith.constant 1.280000e+02 : f32
    %480 = vector.broadcast %cst_547 : f32 to vector<1x8x1xf32>
    %481 = arith.divf %479, %480 : vector<1x8x1xf32>
    %482 = vector.broadcast %474 : vector<1x8x1xf32> to vector<2x8x64xf32>
    %483 = arith.subf %470, %482 : vector<2x8x64xf32>
    %cst_548 = arith.constant 9.99999974E-6 : f32
    %484 = vector.broadcast %cst_548 : f32 to vector<1x8x1xf32>
    %485 = arith.addf %481, %484 : vector<1x8x1xf32>
    %486 = math.rsqrt %485 : vector<1x8x1xf32>
    %487 = vector.broadcast %486 : vector<1x8x1xf32> to vector<2x8x64xf32>
    %488 = arith.mulf %483, %487 : vector<2x8x64xf32>
    %c0_549 = arith.constant 0 : index
    %c0_550 = arith.constant 0 : index
    %489 = vector.load %arg9[%c0_549, %c0_550] : memref<8x1xf32, #tpu.memory_space<vmem>>, vector<8x1xf32>
    %490 = vector.shape_cast %489 : vector<8x1xf32> to vector<1x8x1xf32>
    %491 = vector.broadcast %490 : vector<1x8x1xf32> to vector<2x8x64xf32>
    %492 = arith.mulf %488, %491 : vector<2x8x64xf32>
    %c0_551 = arith.constant 0 : index
    %c0_552 = arith.constant 0 : index
    %493 = vector.load %arg10[%c0_551, %c0_552] : memref<8x1xf32, #tpu.memory_space<vmem>>, vector<8x1xf32>
    %494 = vector.shape_cast %493 : vector<8x1xf32> to vector<1x8x1xf32>
    %495 = vector.broadcast %494 : vector<1x8x1xf32> to vector<2x8x64xf32>
    %496 = arith.addf %492, %495 : vector<2x8x64xf32>
    %cst_553 = arith.constant 0.000000e+00 : f32
    %497 = vector.broadcast %cst_553 : f32 to vector<2x8x64xf32>
    %498 = arith.maximumf %496, %497 : vector<2x8x64xf32>
    %c0_554 = arith.constant 0 : index
    %c0_555 = arith.constant 0 : index
    %c0_556 = arith.constant 0 : index
    %499 = vector.load %arg22[%c0_554, %c0_555, %c0_556] : memref<2x8x64xf32, #tpu.memory_space<vmem>>, vector<2x8x64xf32>
    tpu.vector_store %arg22[%c0_554, %c0_555, %c0_556], %498 {strides = array<i32>} : memref<2x8x64xf32, #tpu.memory_space<vmem>>, vector<2x8x64xf32>,
    %c0_557 = arith.constant 0 : index
    %c0_558 = arith.constant 0 : index
    %c0_559 = arith.constant 0 : index
    %500 = vector.load %arg22[%c0_557, %c0_558, %c0_559] : memref<2x8x64xf32, #tpu.memory_space<vmem>>, vector<1x8x64xf32>
    %501 = vector.shape_cast %500 : vector<1x8x64xf32> to vector<8x64xf32>
    %c0_560 = arith.constant 0 : index
    %c0_561 = arith.constant 0 : index
    %c0_562 = arith.constant 0 : index
    %502 = vector.load %arg19[%c0_560, %c0_561, %c0_562] : memref<2x8x128xf32, #tpu.memory_space<vmem>>, vector<1x8x64xf32>
    %503 = vector.shape_cast %502 : vector<1x8x64xf32> to vector<8x64xf32>
    %504 = vector.shape_cast %501 : vector<8x64xf32> to vector<1x8x64xf32>
    tpu.vector_store %arg19[%c0_560, %c0_561, %c0_562], %504 {strides = array<i32>} : memref<2x8x128xf32, #tpu.memory_space<vmem>>, vector<1x8x64xf32>,
    %c1_563 = arith.constant 1 : index
    %c0_564 = arith.constant 0 : index
    %c0_565 = arith.constant 0 : index
    %505 = vector.load %arg22[%c1_563, %c0_564, %c0_565] : memref<2x8x64xf32, #tpu.memory_space<vmem>>, vector<1x8x64xf32>
    %506 = vector.shape_cast %505 : vector<1x8x64xf32> to vector<8x64xf32>
    %c1_566 = arith.constant 1 : index
    %c0_567 = arith.constant 0 : index
    %c0_568 = arith.constant 0 : index
    %507 = vector.load %arg19[%c1_566, %c0_567, %c0_568] : memref<2x8x128xf32, #tpu.memory_space<vmem>>, vector<1x8x64xf32>
    %508 = vector.shape_cast %507 : vector<1x8x64xf32> to vector<8x64xf32>
    %509 = vector.shape_cast %506 : vector<8x64xf32> to vector<1x8x64xf32>
    tpu.vector_store %arg19[%c1_566, %c0_567, %c0_568], %509 {strides = array<i32>} : memref<2x8x128xf32, #tpu.memory_space<vmem>>, vector<1x8x64xf32>,
    %c0_569 = arith.constant 0 : index
    %c0_570 = arith.constant 0 : index
    %c0_571 = arith.constant 0 : index
    %510 = vector.load %arg19[%c0_569, %c0_570, %c0_571] : memref<2x8x128xf32, #tpu.memory_space<vmem>>, vector<1x8x128xf32>
    %511 = vector.shape_cast %510 : vector<1x8x128xf32> to vector<8x128xf32>
    %c19_i32_572 = arith.constant 19 : i32
    %512 = tpu.dynamic_rotate %511 by %c19_i32_572 dim 1 : vector<8x128xf32>, i32 -> vector<8x128xf32>
    %c0_573 = arith.constant 0 : index
    %c0_574 = arith.constant 0 : index
    %513 = vector.load %arg20[%c0_573, %c0_574] : memref<312x128xf32, #tpu.memory_space<vmem>>, vector<8x128xf32>
    tpu.vector_store %arg20[%c0_573, %c0_574], %512 {strides = array<i32>} : memref<312x128xf32, #tpu.memory_space<vmem>>, vector<8x128xf32>,
    %c18_i32_575 = arith.constant 18 : i32
    %514 = tpu.dynamic_rotate %511 by %c18_i32_575 dim 1 : vector<8x128xf32>, i32 -> vector<8x128xf32>
    %c8_576 = arith.constant 8 : index
    %c0_577 = arith.constant 0 : index
    %515 = vector.load %arg20[%c8_576, %c0_577] : memref<312x128xf32, #tpu.memory_space<vmem>>, vector<8x128xf32>
    tpu.vector_store %arg20[%c8_576, %c0_577], %514 {strides = array<i32>} : memref<312x128xf32, #tpu.memory_space<vmem>>, vector<8x128xf32>,
    %c17_i32_578 = arith.constant 17 : i32
    %516 = tpu.dynamic_rotate %511 by %c17_i32_578 dim 1 : vector<8x128xf32>, i32 -> vector<8x128xf32>
    %c16_579 = arith.constant 16 : index
    %c0_580 = arith.constant 0 : index
    %517 = vector.load %arg20[%c16_579, %c0_580] : memref<312x128xf32, #tpu.memory_space<vmem>>, vector<8x128xf32>
    tpu.vector_store %arg20[%c16_579, %c0_580], %516 {strides = array<i32>} : memref<312x128xf32, #tpu.memory_space<vmem>>, vector<8x128xf32>,
    %c16_i32_581 = arith.constant 16 : i32
    %518 = tpu.dynamic_rotate %511 by %c16_i32_581 dim 1 : vector<8x128xf32>, i32 -> vector<8x128xf32>
    %c24_582 = arith.constant 24 : index
    %c0_583 = arith.constant 0 : index
    %519 = vector.load %arg20[%c24_582, %c0_583] : memref<312x128xf32, #tpu.memory_space<vmem>>, vector<8x128xf32>
    tpu.vector_store %arg20[%c24_582, %c0_583], %518 {strides = array<i32>} : memref<312x128xf32, #tpu.memory_space<vmem>>, vector<8x128xf32>,
    %c15_i32_584 = arith.constant 15 : i32
    %520 = tpu.dynamic_rotate %511 by %c15_i32_584 dim 1 : vector<8x128xf32>, i32 -> vector<8x128xf32>
    %c32_585 = arith.constant 32 : index
    %c0_586 = arith.constant 0 : index
    %521 = vector.load %arg20[%c32_585, %c0_586] : memref<312x128xf32, #tpu.memory_space<vmem>>, vector<8x128xf32>
    tpu.vector_store %arg20[%c32_585, %c0_586], %520 {strides = array<i32>} : memref<312x128xf32, #tpu.memory_space<vmem>>, vector<8x128xf32>,
    %c14_i32_587 = arith.constant 14 : i32
    %522 = tpu.dynamic_rotate %511 by %c14_i32_587 dim 1 : vector<8x128xf32>, i32 -> vector<8x128xf32>
    %c40_588 = arith.constant 40 : index
    %c0_589 = arith.constant 0 : index
    %523 = vector.load %arg20[%c40_588, %c0_589] : memref<312x128xf32, #tpu.memory_space<vmem>>, vector<8x128xf32>
    tpu.vector_store %arg20[%c40_588, %c0_589], %522 {strides = array<i32>} : memref<312x128xf32, #tpu.memory_space<vmem>>, vector<8x128xf32>,
    %c13_i32_590 = arith.constant 13 : i32
    %524 = tpu.dynamic_rotate %511 by %c13_i32_590 dim 1 : vector<8x128xf32>, i32 -> vector<8x128xf32>
    %c48_591 = arith.constant 48 : index
    %c0_592 = arith.constant 0 : index
    %525 = vector.load %arg20[%c48_591, %c0_592] : memref<312x128xf32, #tpu.memory_space<vmem>>, vector<8x128xf32>
    tpu.vector_store %arg20[%c48_591, %c0_592], %524 {strides = array<i32>} : memref<312x128xf32, #tpu.memory_space<vmem>>, vector<8x128xf32>,
    %c12_i32_593 = arith.constant 12 : i32
    %526 = tpu.dynamic_rotate %511 by %c12_i32_593 dim 1 : vector<8x128xf32>, i32 -> vector<8x128xf32>
    %c56_594 = arith.constant 56 : index
    %c0_595 = arith.constant 0 : index
    %527 = vector.load %arg20[%c56_594, %c0_595] : memref<312x128xf32, #tpu.memory_space<vmem>>, vector<8x128xf32>
    tpu.vector_store %arg20[%c56_594, %c0_595], %526 {strides = array<i32>} : memref<312x128xf32, #tpu.memory_space<vmem>>, vector<8x128xf32>,
    %c11_i32_596 = arith.constant 11 : i32
    %528 = tpu.dynamic_rotate %511 by %c11_i32_596 dim 1 : vector<8x128xf32>, i32 -> vector<8x128xf32>
    %c64_597 = arith.constant 64 : index
    %c0_598 = arith.constant 0 : index
    %529 = vector.load %arg20[%c64_597, %c0_598] : memref<312x128xf32, #tpu.memory_space<vmem>>, vector<8x128xf32>
    tpu.vector_store %arg20[%c64_597, %c0_598], %528 {strides = array<i32>} : memref<312x128xf32, #tpu.memory_space<vmem>>, vector<8x128xf32>,
    %c10_i32_599 = arith.constant 10 : i32
    %530 = tpu.dynamic_rotate %511 by %c10_i32_599 dim 1 : vector<8x128xf32>, i32 -> vector<8x128xf32>
    %c72_600 = arith.constant 72 : index
    %c0_601 = arith.constant 0 : index
    %531 = vector.load %arg20[%c72_600, %c0_601] : memref<312x128xf32, #tpu.memory_space<vmem>>, vector<8x128xf32>
    tpu.vector_store %arg20[%c72_600, %c0_601], %530 {strides = array<i32>} : memref<312x128xf32, #tpu.memory_space<vmem>>, vector<8x128xf32>,
    %c9_i32_602 = arith.constant 9 : i32
    %532 = tpu.dynamic_rotate %511 by %c9_i32_602 dim 1 : vector<8x128xf32>, i32 -> vector<8x128xf32>
    %c80_603 = arith.constant 80 : index
    %c0_604 = arith.constant 0 : index
    %533 = vector.load %arg20[%c80_603, %c0_604] : memref<312x128xf32, #tpu.memory_space<vmem>>, vector<8x128xf32>
    tpu.vector_store %arg20[%c80_603, %c0_604], %532 {strides = array<i32>} : memref<312x128xf32, #tpu.memory_space<vmem>>, vector<8x128xf32>,
    %c8_i32_605 = arith.constant 8 : i32
    %534 = tpu.dynamic_rotate %511 by %c8_i32_605 dim 1 : vector<8x128xf32>, i32 -> vector<8x128xf32>
    %c88_606 = arith.constant 88 : index
    %c0_607 = arith.constant 0 : index
    %535 = vector.load %arg20[%c88_606, %c0_607] : memref<312x128xf32, #tpu.memory_space<vmem>>, vector<8x128xf32>
    tpu.vector_store %arg20[%c88_606, %c0_607], %534 {strides = array<i32>} : memref<312x128xf32, #tpu.memory_space<vmem>>, vector<8x128xf32>,
    %c7_i32_608 = arith.constant 7 : i32
    %536 = tpu.dynamic_rotate %511 by %c7_i32_608 dim 1 : vector<8x128xf32>, i32 -> vector<8x128xf32>
    %c96_609 = arith.constant 96 : index
    %c0_610 = arith.constant 0 : index
    %537 = vector.load %arg20[%c96_609, %c0_610] : memref<312x128xf32, #tpu.memory_space<vmem>>, vector<8x128xf32>
    tpu.vector_store %arg20[%c96_609, %c0_610], %536 {strides = array<i32>} : memref<312x128xf32, #tpu.memory_space<vmem>>, vector<8x128xf32>,
    %c6_i32_611 = arith.constant 6 : i32
    %538 = tpu.dynamic_rotate %511 by %c6_i32_611 dim 1 : vector<8x128xf32>, i32 -> vector<8x128xf32>
    %c104_612 = arith.constant 104 : index
    %c0_613 = arith.constant 0 : index
    %539 = vector.load %arg20[%c104_612, %c0_613] : memref<312x128xf32, #tpu.memory_space<vmem>>, vector<8x128xf32>
    tpu.vector_store %arg20[%c104_612, %c0_613], %538 {strides = array<i32>} : memref<312x128xf32, #tpu.memory_space<vmem>>, vector<8x128xf32>,
    %c5_i32_614 = arith.constant 5 : i32
    %540 = tpu.dynamic_rotate %511 by %c5_i32_614 dim 1 : vector<8x128xf32>, i32 -> vector<8x128xf32>
    %c112_615 = arith.constant 112 : index
    %c0_616 = arith.constant 0 : index
    %541 = vector.load %arg20[%c112_615, %c0_616] : memref<312x128xf32, #tpu.memory_space<vmem>>, vector<8x128xf32>
    tpu.vector_store %arg20[%c112_615, %c0_616], %540 {strides = array<i32>} : memref<312x128xf32, #tpu.memory_space<vmem>>, vector<8x128xf32>,
    %c4_i32_617 = arith.constant 4 : i32
    %542 = tpu.dynamic_rotate %511 by %c4_i32_617 dim 1 : vector<8x128xf32>, i32 -> vector<8x128xf32>
    %c120_618 = arith.constant 120 : index
    %c0_619 = arith.constant 0 : index
    %543 = vector.load %arg20[%c120_618, %c0_619] : memref<312x128xf32, #tpu.memory_space<vmem>>, vector<8x128xf32>
    tpu.vector_store %arg20[%c120_618, %c0_619], %542 {strides = array<i32>} : memref<312x128xf32, #tpu.memory_space<vmem>>, vector<8x128xf32>,
    %c3_i32_620 = arith.constant 3 : i32
    %544 = tpu.dynamic_rotate %511 by %c3_i32_620 dim 1 : vector<8x128xf32>, i32 -> vector<8x128xf32>
    %c128_621 = arith.constant 128 : index
    %c0_622 = arith.constant 0 : index
    %545 = vector.load %arg20[%c128_621, %c0_622] : memref<312x128xf32, #tpu.memory_space<vmem>>, vector<8x128xf32>
    tpu.vector_store %arg20[%c128_621, %c0_622], %544 {strides = array<i32>} : memref<312x128xf32, #tpu.memory_space<vmem>>, vector<8x128xf32>,
    %c2_i32_623 = arith.constant 2 : i32
    %546 = tpu.dynamic_rotate %511 by %c2_i32_623 dim 1 : vector<8x128xf32>, i32 -> vector<8x128xf32>
    %c136_624 = arith.constant 136 : index
    %c0_625 = arith.constant 0 : index
    %547 = vector.load %arg20[%c136_624, %c0_625] : memref<312x128xf32, #tpu.memory_space<vmem>>, vector<8x128xf32>
    tpu.vector_store %arg20[%c136_624, %c0_625], %546 {strides = array<i32>} : memref<312x128xf32, #tpu.memory_space<vmem>>, vector<8x128xf32>,
    %c1_i32_626 = arith.constant 1 : i32
    %548 = tpu.dynamic_rotate %511 by %c1_i32_626 dim 1 : vector<8x128xf32>, i32 -> vector<8x128xf32>
    %c144_627 = arith.constant 144 : index
    %c0_628 = arith.constant 0 : index
    %549 = vector.load %arg20[%c144_627, %c0_628] : memref<312x128xf32, #tpu.memory_space<vmem>>, vector<8x128xf32>
    tpu.vector_store %arg20[%c144_627, %c0_628], %548 {strides = array<i32>} : memref<312x128xf32, #tpu.memory_space<vmem>>, vector<8x128xf32>,
    %c0_i32_629 = arith.constant 0 : i32
    %550 = tpu.dynamic_rotate %511 by %c0_i32_629 dim 1 : vector<8x128xf32>, i32 -> vector<8x128xf32>
    %c152_630 = arith.constant 152 : index
    %c0_631 = arith.constant 0 : index
    %551 = vector.load %arg20[%c152_630, %c0_631] : memref<312x128xf32, #tpu.memory_space<vmem>>, vector<8x128xf32>
    tpu.vector_store %arg20[%c152_630, %c0_631], %550 {strides = array<i32>} : memref<312x128xf32, #tpu.memory_space<vmem>>, vector<8x128xf32>,
    %c127_i32_632 = arith.constant 127 : i32
    %552 = tpu.dynamic_rotate %511 by %c127_i32_632 dim 1 : vector<8x128xf32>, i32 -> vector<8x128xf32>
    %c160_633 = arith.constant 160 : index
    %c0_634 = arith.constant 0 : index
    %553 = vector.load %arg20[%c160_633, %c0_634] : memref<312x128xf32, #tpu.memory_space<vmem>>, vector<8x128xf32>
    tpu.vector_store %arg20[%c160_633, %c0_634], %552 {strides = array<i32>} : memref<312x128xf32, #tpu.memory_space<vmem>>, vector<8x128xf32>,
    %c126_i32_635 = arith.constant 126 : i32
    %554 = tpu.dynamic_rotate %511 by %c126_i32_635 dim 1 : vector<8x128xf32>, i32 -> vector<8x128xf32>
    %c168_636 = arith.constant 168 : index
    %c0_637 = arith.constant 0 : index
    %555 = vector.load %arg20[%c168_636, %c0_637] : memref<312x128xf32, #tpu.memory_space<vmem>>, vector<8x128xf32>
    tpu.vector_store %arg20[%c168_636, %c0_637], %554 {strides = array<i32>} : memref<312x128xf32, #tpu.memory_space<vmem>>, vector<8x128xf32>,
    %c125_i32_638 = arith.constant 125 : i32
    %556 = tpu.dynamic_rotate %511 by %c125_i32_638 dim 1 : vector<8x128xf32>, i32 -> vector<8x128xf32>
    %c176_639 = arith.constant 176 : index
    %c0_640 = arith.constant 0 : index
    %557 = vector.load %arg20[%c176_639, %c0_640] : memref<312x128xf32, #tpu.memory_space<vmem>>, vector<8x128xf32>
    tpu.vector_store %arg20[%c176_639, %c0_640], %556 {strides = array<i32>} : memref<312x128xf32, #tpu.memory_space<vmem>>, vector<8x128xf32>,
    %c124_i32_641 = arith.constant 124 : i32
    %558 = tpu.dynamic_rotate %511 by %c124_i32_641 dim 1 : vector<8x128xf32>, i32 -> vector<8x128xf32>
    %c184_642 = arith.constant 184 : index
    %c0_643 = arith.constant 0 : index
    %559 = vector.load %arg20[%c184_642, %c0_643] : memref<312x128xf32, #tpu.memory_space<vmem>>, vector<8x128xf32>
    tpu.vector_store %arg20[%c184_642, %c0_643], %558 {strides = array<i32>} : memref<312x128xf32, #tpu.memory_space<vmem>>, vector<8x128xf32>,
    %c123_i32_644 = arith.constant 123 : i32
    %560 = tpu.dynamic_rotate %511 by %c123_i32_644 dim 1 : vector<8x128xf32>, i32 -> vector<8x128xf32>
    %c192_645 = arith.constant 192 : index
    %c0_646 = arith.constant 0 : index
    %561 = vector.load %arg20[%c192_645, %c0_646] : memref<312x128xf32, #tpu.memory_space<vmem>>, vector<8x128xf32>
    tpu.vector_store %arg20[%c192_645, %c0_646], %560 {strides = array<i32>} : memref<312x128xf32, #tpu.memory_space<vmem>>, vector<8x128xf32>,
    %c122_i32_647 = arith.constant 122 : i32
    %562 = tpu.dynamic_rotate %511 by %c122_i32_647 dim 1 : vector<8x128xf32>, i32 -> vector<8x128xf32>
    %c200_648 = arith.constant 200 : index
    %c0_649 = arith.constant 0 : index
    %563 = vector.load %arg20[%c200_648, %c0_649] : memref<312x128xf32, #tpu.memory_space<vmem>>, vector<8x128xf32>
    tpu.vector_store %arg20[%c200_648, %c0_649], %562 {strides = array<i32>} : memref<312x128xf32, #tpu.memory_space<vmem>>, vector<8x128xf32>,
    %c121_i32_650 = arith.constant 121 : i32
    %564 = tpu.dynamic_rotate %511 by %c121_i32_650 dim 1 : vector<8x128xf32>, i32 -> vector<8x128xf32>
    %c208_651 = arith.constant 208 : index
    %c0_652 = arith.constant 0 : index
    %565 = vector.load %arg20[%c208_651, %c0_652] : memref<312x128xf32, #tpu.memory_space<vmem>>, vector<8x128xf32>
    tpu.vector_store %arg20[%c208_651, %c0_652], %564 {strides = array<i32>} : memref<312x128xf32, #tpu.memory_space<vmem>>, vector<8x128xf32>,
    %c120_i32_653 = arith.constant 120 : i32
    %566 = tpu.dynamic_rotate %511 by %c120_i32_653 dim 1 : vector<8x128xf32>, i32 -> vector<8x128xf32>
    %c216_654 = arith.constant 216 : index
    %c0_655 = arith.constant 0 : index
    %567 = vector.load %arg20[%c216_654, %c0_655] : memref<312x128xf32, #tpu.memory_space<vmem>>, vector<8x128xf32>
    tpu.vector_store %arg20[%c216_654, %c0_655], %566 {strides = array<i32>} : memref<312x128xf32, #tpu.memory_space<vmem>>, vector<8x128xf32>,
    %c119_i32_656 = arith.constant 119 : i32
    %568 = tpu.dynamic_rotate %511 by %c119_i32_656 dim 1 : vector<8x128xf32>, i32 -> vector<8x128xf32>
    %c224_657 = arith.constant 224 : index
    %c0_658 = arith.constant 0 : index
    %569 = vector.load %arg20[%c224_657, %c0_658] : memref<312x128xf32, #tpu.memory_space<vmem>>, vector<8x128xf32>
    tpu.vector_store %arg20[%c224_657, %c0_658], %568 {strides = array<i32>} : memref<312x128xf32, #tpu.memory_space<vmem>>, vector<8x128xf32>,
    %c118_i32_659 = arith.constant 118 : i32
    %570 = tpu.dynamic_rotate %511 by %c118_i32_659 dim 1 : vector<8x128xf32>, i32 -> vector<8x128xf32>
    %c232_660 = arith.constant 232 : index
    %c0_661 = arith.constant 0 : index
    %571 = vector.load %arg20[%c232_660, %c0_661] : memref<312x128xf32, #tpu.memory_space<vmem>>, vector<8x128xf32>
    tpu.vector_store %arg20[%c232_660, %c0_661], %570 {strides = array<i32>} : memref<312x128xf32, #tpu.memory_space<vmem>>, vector<8x128xf32>,
    %c117_i32_662 = arith.constant 117 : i32
    %572 = tpu.dynamic_rotate %511 by %c117_i32_662 dim 1 : vector<8x128xf32>, i32 -> vector<8x128xf32>
    %c240_663 = arith.constant 240 : index
    %c0_664 = arith.constant 0 : index
    %573 = vector.load %arg20[%c240_663, %c0_664] : memref<312x128xf32, #tpu.memory_space<vmem>>, vector<8x128xf32>
    tpu.vector_store %arg20[%c240_663, %c0_664], %572 {strides = array<i32>} : memref<312x128xf32, #tpu.memory_space<vmem>>, vector<8x128xf32>,
    %c116_i32_665 = arith.constant 116 : i32
    %574 = tpu.dynamic_rotate %511 by %c116_i32_665 dim 1 : vector<8x128xf32>, i32 -> vector<8x128xf32>
    %c248_666 = arith.constant 248 : index
    %c0_667 = arith.constant 0 : index
    %575 = vector.load %arg20[%c248_666, %c0_667] : memref<312x128xf32, #tpu.memory_space<vmem>>, vector<8x128xf32>
    tpu.vector_store %arg20[%c248_666, %c0_667], %574 {strides = array<i32>} : memref<312x128xf32, #tpu.memory_space<vmem>>, vector<8x128xf32>,
    %c115_i32_668 = arith.constant 115 : i32
    %576 = tpu.dynamic_rotate %511 by %c115_i32_668 dim 1 : vector<8x128xf32>, i32 -> vector<8x128xf32>
    %c256_669 = arith.constant 256 : index
    %c0_670 = arith.constant 0 : index
    %577 = vector.load %arg20[%c256_669, %c0_670] : memref<312x128xf32, #tpu.memory_space<vmem>>, vector<8x128xf32>
    tpu.vector_store %arg20[%c256_669, %c0_670], %576 {strides = array<i32>} : memref<312x128xf32, #tpu.memory_space<vmem>>, vector<8x128xf32>,
    %c114_i32_671 = arith.constant 114 : i32
    %578 = tpu.dynamic_rotate %511 by %c114_i32_671 dim 1 : vector<8x128xf32>, i32 -> vector<8x128xf32>
    %c264_672 = arith.constant 264 : index
    %c0_673 = arith.constant 0 : index
    %579 = vector.load %arg20[%c264_672, %c0_673] : memref<312x128xf32, #tpu.memory_space<vmem>>, vector<8x128xf32>
    tpu.vector_store %arg20[%c264_672, %c0_673], %578 {strides = array<i32>} : memref<312x128xf32, #tpu.memory_space<vmem>>, vector<8x128xf32>,
    %c113_i32_674 = arith.constant 113 : i32
    %580 = tpu.dynamic_rotate %511 by %c113_i32_674 dim 1 : vector<8x128xf32>, i32 -> vector<8x128xf32>
    %c272_675 = arith.constant 272 : index
    %c0_676 = arith.constant 0 : index
    %581 = vector.load %arg20[%c272_675, %c0_676] : memref<312x128xf32, #tpu.memory_space<vmem>>, vector<8x128xf32>
    tpu.vector_store %arg20[%c272_675, %c0_676], %580 {strides = array<i32>} : memref<312x128xf32, #tpu.memory_space<vmem>>, vector<8x128xf32>,
    %c112_i32_677 = arith.constant 112 : i32
    %582 = tpu.dynamic_rotate %511 by %c112_i32_677 dim 1 : vector<8x128xf32>, i32 -> vector<8x128xf32>
    %c280_678 = arith.constant 280 : index
    %c0_679 = arith.constant 0 : index
    %583 = vector.load %arg20[%c280_678, %c0_679] : memref<312x128xf32, #tpu.memory_space<vmem>>, vector<8x128xf32>
    tpu.vector_store %arg20[%c280_678, %c0_679], %582 {strides = array<i32>} : memref<312x128xf32, #tpu.memory_space<vmem>>, vector<8x128xf32>,
    %c111_i32_680 = arith.constant 111 : i32
    %584 = tpu.dynamic_rotate %511 by %c111_i32_680 dim 1 : vector<8x128xf32>, i32 -> vector<8x128xf32>
    %c288_681 = arith.constant 288 : index
    %c0_682 = arith.constant 0 : index
    %585 = vector.load %arg20[%c288_681, %c0_682] : memref<312x128xf32, #tpu.memory_space<vmem>>, vector<8x128xf32>
    tpu.vector_store %arg20[%c288_681, %c0_682], %584 {strides = array<i32>} : memref<312x128xf32, #tpu.memory_space<vmem>>, vector<8x128xf32>,
    %c110_i32_683 = arith.constant 110 : i32
    %586 = tpu.dynamic_rotate %511 by %c110_i32_683 dim 1 : vector<8x128xf32>, i32 -> vector<8x128xf32>
    %c296_684 = arith.constant 296 : index
    %c0_685 = arith.constant 0 : index
    %587 = vector.load %arg20[%c296_684, %c0_685] : memref<312x128xf32, #tpu.memory_space<vmem>>, vector<8x128xf32>
    tpu.vector_store %arg20[%c296_684, %c0_685], %586 {strides = array<i32>} : memref<312x128xf32, #tpu.memory_space<vmem>>, vector<8x128xf32>,
    %c109_i32_686 = arith.constant 109 : i32
    %588 = tpu.dynamic_rotate %511 by %c109_i32_686 dim 1 : vector<8x128xf32>, i32 -> vector<8x128xf32>
    %c304_687 = arith.constant 304 : index
    %c0_688 = arith.constant 0 : index
    %589 = vector.load %arg20[%c304_687, %c0_688] : memref<312x128xf32, #tpu.memory_space<vmem>>, vector<8x128xf32>
    tpu.vector_store %arg20[%c304_687, %c0_688], %588 {strides = array<i32>} : memref<312x128xf32, #tpu.memory_space<vmem>>, vector<8x128xf32>,
    %c0_689 = arith.constant 0 : index
    %c0_690 = arith.constant 0 : index
    %590 = vector.load %arg11[%c0_689, %c0_690] : memref<64x312xf32, #tpu.memory_space<vmem>>, vector<64x128xf32>
    %c0_691 = arith.constant 0 : index
    %c0_692 = arith.constant 0 : index
    %591 = vector.load %arg20[%c0_691, %c0_692] : memref<312x128xf32, #tpu.memory_space<vmem>>, vector<128x64xf32>
    %cst_693 = arith.constant dense<0.000000e+00> : vector<64x64xf32>
    %592 = tpu.matmul %590, %591, %cst_693 {dimension_numbers = #tpu.dot_dimension_numbers<[1], [0], [0], [1], [0, 0, 1, 1], [], []>} : vector<64x128xf32>, vector<128x64xf32>, vector<64x64xf32> -> vector<64x64xf32>
    %c0_694 = arith.constant 0 : index
    %c128_695 = arith.constant 128 : index
    %593 = vector.load %arg11[%c0_694, %c128_695] : memref<64x312xf32, #tpu.memory_space<vmem>>, vector<64x128xf32>
    %c128_696 = arith.constant 128 : index
    %c0_697 = arith.constant 0 : index
    %594 = vector.load %arg20[%c128_696, %c0_697] : memref<312x128xf32, #tpu.memory_space<vmem>>, vector<128x64xf32>
    %cst_698 = arith.constant dense<0.000000e+00> : vector<64x64xf32>
    %595 = tpu.matmul %593, %594, %cst_698 {dimension_numbers = #tpu.dot_dimension_numbers<[1], [0], [0], [1], [0, 0, 1, 1], [], []>} : vector<64x128xf32>, vector<128x64xf32>, vector<64x64xf32> -> vector<64x64xf32>
    %596 = arith.addf %592, %595 : vector<64x64xf32>
    %c0_699 = arith.constant 0 : index
    %c256_700 = arith.constant 256 : index
    %597 = vector.load %arg11[%c0_699, %c256_700] : memref<64x312xf32, #tpu.memory_space<vmem>>, vector<64x56xf32>
    %c256_701 = arith.constant 256 : index
    %c0_702 = arith.constant 0 : index
    %598 = vector.load %arg20[%c256_701, %c0_702] : memref<312x128xf32, #tpu.memory_space<vmem>>, vector<56x64xf32>
    %cst_703 = arith.constant dense<0.000000e+00> : vector<64x64xf32>
    %599 = tpu.matmul %597, %598, %cst_703 {dimension_numbers = #tpu.dot_dimension_numbers<[1], [0], [0], [1], [0, 0, 1, 1], [], []>} : vector<64x56xf32>, vector<56x64xf32>, vector<64x64xf32> -> vector<64x64xf32>
    %600 = arith.addf %596, %599 : vector<64x64xf32>
    %c0_704 = arith.constant 0 : index
    %c0_705 = arith.constant 0 : index
    %c0_706 = arith.constant 0 : index
    %601 = vector.load %arg21[%c0_704, %c0_705, %c0_706] : memref<2x64x64xf32, #tpu.memory_space<vmem>>, vector<1x64x64xf32>
    %602 = vector.shape_cast %601 : vector<1x64x64xf32> to vector<64x64xf32>
    %603 = vector.shape_cast %600 : vector<64x64xf32> to vector<1x64x64xf32>
    tpu.vector_store %arg21[%c0_704, %c0_705, %c0_706], %603 {strides = array<i32>} : memref<2x64x64xf32, #tpu.memory_space<vmem>>, vector<1x64x64xf32>,
    %c1_707 = arith.constant 1 : index
    %c0_708 = arith.constant 0 : index
    %c0_709 = arith.constant 0 : index
    %604 = vector.load %arg19[%c1_707, %c0_708, %c0_709] : memref<2x8x128xf32, #tpu.memory_space<vmem>>, vector<1x8x128xf32>
    %605 = vector.shape_cast %604 : vector<1x8x128xf32> to vector<8x128xf32>
    %c19_i32_710 = arith.constant 19 : i32
    %606 = tpu.dynamic_rotate %605 by %c19_i32_710 dim 1 : vector<8x128xf32>, i32 -> vector<8x128xf32>
    %c0_711 = arith.constant 0 : index
    %c0_712 = arith.constant 0 : index
    %607 = vector.load %arg20[%c0_711, %c0_712] : memref<312x128xf32, #tpu.memory_space<vmem>>, vector<8x128xf32>
    tpu.vector_store %arg20[%c0_711, %c0_712], %606 {strides = array<i32>} : memref<312x128xf32, #tpu.memory_space<vmem>>, vector<8x128xf32>,
    %c18_i32_713 = arith.constant 18 : i32
    %608 = tpu.dynamic_rotate %605 by %c18_i32_713 dim 1 : vector<8x128xf32>, i32 -> vector<8x128xf32>
    %c8_714 = arith.constant 8 : index
    %c0_715 = arith.constant 0 : index
    %609 = vector.load %arg20[%c8_714, %c0_715] : memref<312x128xf32, #tpu.memory_space<vmem>>, vector<8x128xf32>
    tpu.vector_store %arg20[%c8_714, %c0_715], %608 {strides = array<i32>} : memref<312x128xf32, #tpu.memory_space<vmem>>, vector<8x128xf32>,
    %c17_i32_716 = arith.constant 17 : i32
    %610 = tpu.dynamic_rotate %605 by %c17_i32_716 dim 1 : vector<8x128xf32>, i32 -> vector<8x128xf32>
    %c16_717 = arith.constant 16 : index
    %c0_718 = arith.constant 0 : index
    %611 = vector.load %arg20[%c16_717, %c0_718] : memref<312x128xf32, #tpu.memory_space<vmem>>, vector<8x128xf32>
    tpu.vector_store %arg20[%c16_717, %c0_718], %610 {strides = array<i32>} : memref<312x128xf32, #tpu.memory_space<vmem>>, vector<8x128xf32>,
    %c16_i32_719 = arith.constant 16 : i32
    %612 = tpu.dynamic_rotate %605 by %c16_i32_719 dim 1 : vector<8x128xf32>, i32 -> vector<8x128xf32>
    %c24_720 = arith.constant 24 : index
    %c0_721 = arith.constant 0 : index
    %613 = vector.load %arg20[%c24_720, %c0_721] : memref<312x128xf32, #tpu.memory_space<vmem>>, vector<8x128xf32>
    tpu.vector_store %arg20[%c24_720, %c0_721], %612 {strides = array<i32>} : memref<312x128xf32, #tpu.memory_space<vmem>>, vector<8x128xf32>,
    %c15_i32_722 = arith.constant 15 : i32
    %614 = tpu.dynamic_rotate %605 by %c15_i32_722 dim 1 : vector<8x128xf32>, i32 -> vector<8x128xf32>
    %c32_723 = arith.constant 32 : index
    %c0_724 = arith.constant 0 : index
    %615 = vector.load %arg20[%c32_723, %c0_724] : memref<312x128xf32, #tpu.memory_space<vmem>>, vector<8x128xf32>
    tpu.vector_store %arg20[%c32_723, %c0_724], %614 {strides = array<i32>} : memref<312x128xf32, #tpu.memory_space<vmem>>, vector<8x128xf32>,
    %c14_i32_725 = arith.constant 14 : i32
    %616 = tpu.dynamic_rotate %605 by %c14_i32_725 dim 1 : vector<8x128xf32>, i32 -> vector<8x128xf32>
    %c40_726 = arith.constant 40 : index
    %c0_727 = arith.constant 0 : index
    %617 = vector.load %arg20[%c40_726, %c0_727] : memref<312x128xf32, #tpu.memory_space<vmem>>, vector<8x128xf32>
    tpu.vector_store %arg20[%c40_726, %c0_727], %616 {strides = array<i32>} : memref<312x128xf32, #tpu.memory_space<vmem>>, vector<8x128xf32>,
    %c13_i32_728 = arith.constant 13 : i32
    %618 = tpu.dynamic_rotate %605 by %c13_i32_728 dim 1 : vector<8x128xf32>, i32 -> vector<8x128xf32>
    %c48_729 = arith.constant 48 : index
    %c0_730 = arith.constant 0 : index
    %619 = vector.load %arg20[%c48_729, %c0_730] : memref<312x128xf32, #tpu.memory_space<vmem>>, vector<8x128xf32>
    tpu.vector_store %arg20[%c48_729, %c0_730], %618 {strides = array<i32>} : memref<312x128xf32, #tpu.memory_space<vmem>>, vector<8x128xf32>,
    %c12_i32_731 = arith.constant 12 : i32
    %620 = tpu.dynamic_rotate %605 by %c12_i32_731 dim 1 : vector<8x128xf32>, i32 -> vector<8x128xf32>
    %c56_732 = arith.constant 56 : index
    %c0_733 = arith.constant 0 : index
    %621 = vector.load %arg20[%c56_732, %c0_733] : memref<312x128xf32, #tpu.memory_space<vmem>>, vector<8x128xf32>
    tpu.vector_store %arg20[%c56_732, %c0_733], %620 {strides = array<i32>} : memref<312x128xf32, #tpu.memory_space<vmem>>, vector<8x128xf32>,
    %c11_i32_734 = arith.constant 11 : i32
    %622 = tpu.dynamic_rotate %605 by %c11_i32_734 dim 1 : vector<8x128xf32>, i32 -> vector<8x128xf32>
    %c64_735 = arith.constant 64 : index
    %c0_736 = arith.constant 0 : index
    %623 = vector.load %arg20[%c64_735, %c0_736] : memref<312x128xf32, #tpu.memory_space<vmem>>, vector<8x128xf32>
    tpu.vector_store %arg20[%c64_735, %c0_736], %622 {strides = array<i32>} : memref<312x128xf32, #tpu.memory_space<vmem>>, vector<8x128xf32>,
    %c10_i32_737 = arith.constant 10 : i32
    %624 = tpu.dynamic_rotate %605 by %c10_i32_737 dim 1 : vector<8x128xf32>, i32 -> vector<8x128xf32>
    %c72_738 = arith.constant 72 : index
    %c0_739 = arith.constant 0 : index
    %625 = vector.load %arg20[%c72_738, %c0_739] : memref<312x128xf32, #tpu.memory_space<vmem>>, vector<8x128xf32>
    tpu.vector_store %arg20[%c72_738, %c0_739], %624 {strides = array<i32>} : memref<312x128xf32, #tpu.memory_space<vmem>>, vector<8x128xf32>,
    %c9_i32_740 = arith.constant 9 : i32
    %626 = tpu.dynamic_rotate %605 by %c9_i32_740 dim 1 : vector<8x128xf32>, i32 -> vector<8x128xf32>
    %c80_741 = arith.constant 80 : index
    %c0_742 = arith.constant 0 : index
    %627 = vector.load %arg20[%c80_741, %c0_742] : memref<312x128xf32, #tpu.memory_space<vmem>>, vector<8x128xf32>
    tpu.vector_store %arg20[%c80_741, %c0_742], %626 {strides = array<i32>} : memref<312x128xf32, #tpu.memory_space<vmem>>, vector<8x128xf32>,
    %c8_i32_743 = arith.constant 8 : i32
    %628 = tpu.dynamic_rotate %605 by %c8_i32_743 dim 1 : vector<8x128xf32>, i32 -> vector<8x128xf32>
    %c88_744 = arith.constant 88 : index
    %c0_745 = arith.constant 0 : index
    %629 = vector.load %arg20[%c88_744, %c0_745] : memref<312x128xf32, #tpu.memory_space<vmem>>, vector<8x128xf32>
    tpu.vector_store %arg20[%c88_744, %c0_745], %628 {strides = array<i32>} : memref<312x128xf32, #tpu.memory_space<vmem>>, vector<8x128xf32>,
    %c7_i32_746 = arith.constant 7 : i32
    %630 = tpu.dynamic_rotate %605 by %c7_i32_746 dim 1 : vector<8x128xf32>, i32 -> vector<8x128xf32>
    %c96_747 = arith.constant 96 : index
    %c0_748 = arith.constant 0 : index
    %631 = vector.load %arg20[%c96_747, %c0_748] : memref<312x128xf32, #tpu.memory_space<vmem>>, vector<8x128xf32>
    tpu.vector_store %arg20[%c96_747, %c0_748], %630 {strides = array<i32>} : memref<312x128xf32, #tpu.memory_space<vmem>>, vector<8x128xf32>,
    %c6_i32_749 = arith.constant 6 : i32
    %632 = tpu.dynamic_rotate %605 by %c6_i32_749 dim 1 : vector<8x128xf32>, i32 -> vector<8x128xf32>
    %c104_750 = arith.constant 104 : index
    %c0_751 = arith.constant 0 : index
    %633 = vector.load %arg20[%c104_750, %c0_751] : memref<312x128xf32, #tpu.memory_space<vmem>>, vector<8x128xf32>
    tpu.vector_store %arg20[%c104_750, %c0_751], %632 {strides = array<i32>} : memref<312x128xf32, #tpu.memory_space<vmem>>, vector<8x128xf32>,
    %c5_i32_752 = arith.constant 5 : i32
    %634 = tpu.dynamic_rotate %605 by %c5_i32_752 dim 1 : vector<8x128xf32>, i32 -> vector<8x128xf32>
    %c112_753 = arith.constant 112 : index
    %c0_754 = arith.constant 0 : index
    %635 = vector.load %arg20[%c112_753, %c0_754] : memref<312x128xf32, #tpu.memory_space<vmem>>, vector<8x128xf32>
    tpu.vector_store %arg20[%c112_753, %c0_754], %634 {strides = array<i32>} : memref<312x128xf32, #tpu.memory_space<vmem>>, vector<8x128xf32>,
    %c4_i32_755 = arith.constant 4 : i32
    %636 = tpu.dynamic_rotate %605 by %c4_i32_755 dim 1 : vector<8x128xf32>, i32 -> vector<8x128xf32>
    %c120_756 = arith.constant 120 : index
    %c0_757 = arith.constant 0 : index
    %637 = vector.load %arg20[%c120_756, %c0_757] : memref<312x128xf32, #tpu.memory_space<vmem>>, vector<8x128xf32>
    tpu.vector_store %arg20[%c120_756, %c0_757], %636 {strides = array<i32>} : memref<312x128xf32, #tpu.memory_space<vmem>>, vector<8x128xf32>,
    %c3_i32_758 = arith.constant 3 : i32
    %638 = tpu.dynamic_rotate %605 by %c3_i32_758 dim 1 : vector<8x128xf32>, i32 -> vector<8x128xf32>
    %c128_759 = arith.constant 128 : index
    %c0_760 = arith.constant 0 : index
    %639 = vector.load %arg20[%c128_759, %c0_760] : memref<312x128xf32, #tpu.memory_space<vmem>>, vector<8x128xf32>
    tpu.vector_store %arg20[%c128_759, %c0_760], %638 {strides = array<i32>} : memref<312x128xf32, #tpu.memory_space<vmem>>, vector<8x128xf32>,
    %c2_i32_761 = arith.constant 2 : i32
    %640 = tpu.dynamic_rotate %605 by %c2_i32_761 dim 1 : vector<8x128xf32>, i32 -> vector<8x128xf32>
    %c136_762 = arith.constant 136 : index
    %c0_763 = arith.constant 0 : index
    %641 = vector.load %arg20[%c136_762, %c0_763] : memref<312x128xf32, #tpu.memory_space<vmem>>, vector<8x128xf32>
    tpu.vector_store %arg20[%c136_762, %c0_763], %640 {strides = array<i32>} : memref<312x128xf32, #tpu.memory_space<vmem>>, vector<8x128xf32>,
    %c1_i32_764 = arith.constant 1 : i32
    %642 = tpu.dynamic_rotate %605 by %c1_i32_764 dim 1 : vector<8x128xf32>, i32 -> vector<8x128xf32>
    %c144_765 = arith.constant 144 : index
    %c0_766 = arith.constant 0 : index
    %643 = vector.load %arg20[%c144_765, %c0_766] : memref<312x128xf32, #tpu.memory_space<vmem>>, vector<8x128xf32>
    tpu.vector_store %arg20[%c144_765, %c0_766], %642 {strides = array<i32>} : memref<312x128xf32, #tpu.memory_space<vmem>>, vector<8x128xf32>,
    %c0_i32_767 = arith.constant 0 : i32
    %644 = tpu.dynamic_rotate %605 by %c0_i32_767 dim 1 : vector<8x128xf32>, i32 -> vector<8x128xf32>
    %c152_768 = arith.constant 152 : index
    %c0_769 = arith.constant 0 : index
    %645 = vector.load %arg20[%c152_768, %c0_769] : memref<312x128xf32, #tpu.memory_space<vmem>>, vector<8x128xf32>
    tpu.vector_store %arg20[%c152_768, %c0_769], %644 {strides = array<i32>} : memref<312x128xf32, #tpu.memory_space<vmem>>, vector<8x128xf32>,
    %c127_i32_770 = arith.constant 127 : i32
    %646 = tpu.dynamic_rotate %605 by %c127_i32_770 dim 1 : vector<8x128xf32>, i32 -> vector<8x128xf32>
    %c160_771 = arith.constant 160 : index
    %c0_772 = arith.constant 0 : index
    %647 = vector.load %arg20[%c160_771, %c0_772] : memref<312x128xf32, #tpu.memory_space<vmem>>, vector<8x128xf32>
    tpu.vector_store %arg20[%c160_771, %c0_772], %646 {strides = array<i32>} : memref<312x128xf32, #tpu.memory_space<vmem>>, vector<8x128xf32>,
    %c126_i32_773 = arith.constant 126 : i32
    %648 = tpu.dynamic_rotate %605 by %c126_i32_773 dim 1 : vector<8x128xf32>, i32 -> vector<8x128xf32>
    %c168_774 = arith.constant 168 : index
    %c0_775 = arith.constant 0 : index
    %649 = vector.load %arg20[%c168_774, %c0_775] : memref<312x128xf32, #tpu.memory_space<vmem>>, vector<8x128xf32>
    tpu.vector_store %arg20[%c168_774, %c0_775], %648 {strides = array<i32>} : memref<312x128xf32, #tpu.memory_space<vmem>>, vector<8x128xf32>,
    %c125_i32_776 = arith.constant 125 : i32
    %650 = tpu.dynamic_rotate %605 by %c125_i32_776 dim 1 : vector<8x128xf32>, i32 -> vector<8x128xf32>
    %c176_777 = arith.constant 176 : index
    %c0_778 = arith.constant 0 : index
    %651 = vector.load %arg20[%c176_777, %c0_778] : memref<312x128xf32, #tpu.memory_space<vmem>>, vector<8x128xf32>
    tpu.vector_store %arg20[%c176_777, %c0_778], %650 {strides = array<i32>} : memref<312x128xf32, #tpu.memory_space<vmem>>, vector<8x128xf32>,
    %c124_i32_779 = arith.constant 124 : i32
    %652 = tpu.dynamic_rotate %605 by %c124_i32_779 dim 1 : vector<8x128xf32>, i32 -> vector<8x128xf32>
    %c184_780 = arith.constant 184 : index
    %c0_781 = arith.constant 0 : index
    %653 = vector.load %arg20[%c184_780, %c0_781] : memref<312x128xf32, #tpu.memory_space<vmem>>, vector<8x128xf32>
    tpu.vector_store %arg20[%c184_780, %c0_781], %652 {strides = array<i32>} : memref<312x128xf32, #tpu.memory_space<vmem>>, vector<8x128xf32>,
    %c123_i32_782 = arith.constant 123 : i32
    %654 = tpu.dynamic_rotate %605 by %c123_i32_782 dim 1 : vector<8x128xf32>, i32 -> vector<8x128xf32>
    %c192_783 = arith.constant 192 : index
    %c0_784 = arith.constant 0 : index
    %655 = vector.load %arg20[%c192_783, %c0_784] : memref<312x128xf32, #tpu.memory_space<vmem>>, vector<8x128xf32>
    tpu.vector_store %arg20[%c192_783, %c0_784], %654 {strides = array<i32>} : memref<312x128xf32, #tpu.memory_space<vmem>>, vector<8x128xf32>,
    %c122_i32_785 = arith.constant 122 : i32
    %656 = tpu.dynamic_rotate %605 by %c122_i32_785 dim 1 : vector<8x128xf32>, i32 -> vector<8x128xf32>
    %c200_786 = arith.constant 200 : index
    %c0_787 = arith.constant 0 : index
    %657 = vector.load %arg20[%c200_786, %c0_787] : memref<312x128xf32, #tpu.memory_space<vmem>>, vector<8x128xf32>
    tpu.vector_store %arg20[%c200_786, %c0_787], %656 {strides = array<i32>} : memref<312x128xf32, #tpu.memory_space<vmem>>, vector<8x128xf32>,
    %c121_i32_788 = arith.constant 121 : i32
    %658 = tpu.dynamic_rotate %605 by %c121_i32_788 dim 1 : vector<8x128xf32>, i32 -> vector<8x128xf32>
    %c208_789 = arith.constant 208 : index
    %c0_790 = arith.constant 0 : index
    %659 = vector.load %arg20[%c208_789, %c0_790] : memref<312x128xf32, #tpu.memory_space<vmem>>, vector<8x128xf32>
    tpu.vector_store %arg20[%c208_789, %c0_790], %658 {strides = array<i32>} : memref<312x128xf32, #tpu.memory_space<vmem>>, vector<8x128xf32>,
    %c120_i32_791 = arith.constant 120 : i32
    %660 = tpu.dynamic_rotate %605 by %c120_i32_791 dim 1 : vector<8x128xf32>, i32 -> vector<8x128xf32>
    %c216_792 = arith.constant 216 : index
    %c0_793 = arith.constant 0 : index
    %661 = vector.load %arg20[%c216_792, %c0_793] : memref<312x128xf32, #tpu.memory_space<vmem>>, vector<8x128xf32>
    tpu.vector_store %arg20[%c216_792, %c0_793], %660 {strides = array<i32>} : memref<312x128xf32, #tpu.memory_space<vmem>>, vector<8x128xf32>,
    %c119_i32_794 = arith.constant 119 : i32
    %662 = tpu.dynamic_rotate %605 by %c119_i32_794 dim 1 : vector<8x128xf32>, i32 -> vector<8x128xf32>
    %c224_795 = arith.constant 224 : index
    %c0_796 = arith.constant 0 : index
    %663 = vector.load %arg20[%c224_795, %c0_796] : memref<312x128xf32, #tpu.memory_space<vmem>>, vector<8x128xf32>
    tpu.vector_store %arg20[%c224_795, %c0_796], %662 {strides = array<i32>} : memref<312x128xf32, #tpu.memory_space<vmem>>, vector<8x128xf32>,
    %c118_i32_797 = arith.constant 118 : i32
    %664 = tpu.dynamic_rotate %605 by %c118_i32_797 dim 1 : vector<8x128xf32>, i32 -> vector<8x128xf32>
    %c232_798 = arith.constant 232 : index
    %c0_799 = arith.constant 0 : index
    %665 = vector.load %arg20[%c232_798, %c0_799] : memref<312x128xf32, #tpu.memory_space<vmem>>, vector<8x128xf32>
    tpu.vector_store %arg20[%c232_798, %c0_799], %664 {strides = array<i32>} : memref<312x128xf32, #tpu.memory_space<vmem>>, vector<8x128xf32>,
    %c117_i32_800 = arith.constant 117 : i32
    %666 = tpu.dynamic_rotate %605 by %c117_i32_800 dim 1 : vector<8x128xf32>, i32 -> vector<8x128xf32>
    %c240_801 = arith.constant 240 : index
    %c0_802 = arith.constant 0 : index
    %667 = vector.load %arg20[%c240_801, %c0_802] : memref<312x128xf32, #tpu.memory_space<vmem>>, vector<8x128xf32>
    tpu.vector_store %arg20[%c240_801, %c0_802], %666 {strides = array<i32>} : memref<312x128xf32, #tpu.memory_space<vmem>>, vector<8x128xf32>,
    %c116_i32_803 = arith.constant 116 : i32
    %668 = tpu.dynamic_rotate %605 by %c116_i32_803 dim 1 : vector<8x128xf32>, i32 -> vector<8x128xf32>
    %c248_804 = arith.constant 248 : index
    %c0_805 = arith.constant 0 : index
    %669 = vector.load %arg20[%c248_804, %c0_805] : memref<312x128xf32, #tpu.memory_space<vmem>>, vector<8x128xf32>
    tpu.vector_store %arg20[%c248_804, %c0_805], %668 {strides = array<i32>} : memref<312x128xf32, #tpu.memory_space<vmem>>, vector<8x128xf32>,
    %c115_i32_806 = arith.constant 115 : i32
    %670 = tpu.dynamic_rotate %605 by %c115_i32_806 dim 1 : vector<8x128xf32>, i32 -> vector<8x128xf32>
    %c256_807 = arith.constant 256 : index
    %c0_808 = arith.constant 0 : index
    %671 = vector.load %arg20[%c256_807, %c0_808] : memref<312x128xf32, #tpu.memory_space<vmem>>, vector<8x128xf32>
    tpu.vector_store %arg20[%c256_807, %c0_808], %670 {strides = array<i32>} : memref<312x128xf32, #tpu.memory_space<vmem>>, vector<8x128xf32>,
    %c114_i32_809 = arith.constant 114 : i32
    %672 = tpu.dynamic_rotate %605 by %c114_i32_809 dim 1 : vector<8x128xf32>, i32 -> vector<8x128xf32>
    %c264_810 = arith.constant 264 : index
    %c0_811 = arith.constant 0 : index
    %673 = vector.load %arg20[%c264_810, %c0_811] : memref<312x128xf32, #tpu.memory_space<vmem>>, vector<8x128xf32>
    tpu.vector_store %arg20[%c264_810, %c0_811], %672 {strides = array<i32>} : memref<312x128xf32, #tpu.memory_space<vmem>>, vector<8x128xf32>,
    %c113_i32_812 = arith.constant 113 : i32
    %674 = tpu.dynamic_rotate %605 by %c113_i32_812 dim 1 : vector<8x128xf32>, i32 -> vector<8x128xf32>
    %c272_813 = arith.constant 272 : index
    %c0_814 = arith.constant 0 : index
    %675 = vector.load %arg20[%c272_813, %c0_814] : memref<312x128xf32, #tpu.memory_space<vmem>>, vector<8x128xf32>
    tpu.vector_store %arg20[%c272_813, %c0_814], %674 {strides = array<i32>} : memref<312x128xf32, #tpu.memory_space<vmem>>, vector<8x128xf32>,
    %c112_i32_815 = arith.constant 112 : i32
    %676 = tpu.dynamic_rotate %605 by %c112_i32_815 dim 1 : vector<8x128xf32>, i32 -> vector<8x128xf32>
    %c280_816 = arith.constant 280 : index
    %c0_817 = arith.constant 0 : index
    %677 = vector.load %arg20[%c280_816, %c0_817] : memref<312x128xf32, #tpu.memory_space<vmem>>, vector<8x128xf32>
    tpu.vector_store %arg20[%c280_816, %c0_817], %676 {strides = array<i32>} : memref<312x128xf32, #tpu.memory_space<vmem>>, vector<8x128xf32>,
    %c111_i32_818 = arith.constant 111 : i32
    %678 = tpu.dynamic_rotate %605 by %c111_i32_818 dim 1 : vector<8x128xf32>, i32 -> vector<8x128xf32>
    %c288_819 = arith.constant 288 : index
    %c0_820 = arith.constant 0 : index
    %679 = vector.load %arg20[%c288_819, %c0_820] : memref<312x128xf32, #tpu.memory_space<vmem>>, vector<8x128xf32>
    tpu.vector_store %arg20[%c288_819, %c0_820], %678 {strides = array<i32>} : memref<312x128xf32, #tpu.memory_space<vmem>>, vector<8x128xf32>,
    %c110_i32_821 = arith.constant 110 : i32
    %680 = tpu.dynamic_rotate %605 by %c110_i32_821 dim 1 : vector<8x128xf32>, i32 -> vector<8x128xf32>
    %c296_822 = arith.constant 296 : index
    %c0_823 = arith.constant 0 : index
    %681 = vector.load %arg20[%c296_822, %c0_823] : memref<312x128xf32, #tpu.memory_space<vmem>>, vector<8x128xf32>
    tpu.vector_store %arg20[%c296_822, %c0_823], %680 {strides = array<i32>} : memref<312x128xf32, #tpu.memory_space<vmem>>, vector<8x128xf32>,
    %c109_i32_824 = arith.constant 109 : i32
    %682 = tpu.dynamic_rotate %605 by %c109_i32_824 dim 1 : vector<8x128xf32>, i32 -> vector<8x128xf32>
    %c304_825 = arith.constant 304 : index
    %c0_826 = arith.constant 0 : index
    %683 = vector.load %arg20[%c304_825, %c0_826] : memref<312x128xf32, #tpu.memory_space<vmem>>, vector<8x128xf32>
    tpu.vector_store %arg20[%c304_825, %c0_826], %682 {strides = array<i32>} : memref<312x128xf32, #tpu.memory_space<vmem>>, vector<8x128xf32>,
    %c0_827 = arith.constant 0 : index
    %c0_828 = arith.constant 0 : index
    %684 = vector.load %arg11[%c0_827, %c0_828] : memref<64x312xf32, #tpu.memory_space<vmem>>, vector<64x128xf32>
    %c0_829 = arith.constant 0 : index
    %c0_830 = arith.constant 0 : index
    %685 = vector.load %arg20[%c0_829, %c0_830] : memref<312x128xf32, #tpu.memory_space<vmem>>, vector<128x64xf32>
    %cst_831 = arith.constant dense<0.000000e+00> : vector<64x64xf32>
    %686 = tpu.matmul %684, %685, %cst_831 {dimension_numbers = #tpu.dot_dimension_numbers<[1], [0], [0], [1], [0, 0, 1, 1], [], []>} : vector<64x128xf32>, vector<128x64xf32>, vector<64x64xf32> -> vector<64x64xf32>
    %c0_832 = arith.constant 0 : index
    %c128_833 = arith.constant 128 : index
    %687 = vector.load %arg11[%c0_832, %c128_833] : memref<64x312xf32, #tpu.memory_space<vmem>>, vector<64x128xf32>
    %c128_834 = arith.constant 128 : index
    %c0_835 = arith.constant 0 : index
    %688 = vector.load %arg20[%c128_834, %c0_835] : memref<312x128xf32, #tpu.memory_space<vmem>>, vector<128x64xf32>
    %cst_836 = arith.constant dense<0.000000e+00> : vector<64x64xf32>
    %689 = tpu.matmul %687, %688, %cst_836 {dimension_numbers = #tpu.dot_dimension_numbers<[1], [0], [0], [1], [0, 0, 1, 1], [], []>} : vector<64x128xf32>, vector<128x64xf32>, vector<64x64xf32> -> vector<64x64xf32>
    %690 = arith.addf %686, %689 : vector<64x64xf32>
    %c0_837 = arith.constant 0 : index
    %c256_838 = arith.constant 256 : index
    %691 = vector.load %arg11[%c0_837, %c256_838] : memref<64x312xf32, #tpu.memory_space<vmem>>, vector<64x56xf32>
    %c256_839 = arith.constant 256 : index
    %c0_840 = arith.constant 0 : index
    %692 = vector.load %arg20[%c256_839, %c0_840] : memref<312x128xf32, #tpu.memory_space<vmem>>, vector<56x64xf32>
    %cst_841 = arith.constant dense<0.000000e+00> : vector<64x64xf32>
    %693 = tpu.matmul %691, %692, %cst_841 {dimension_numbers = #tpu.dot_dimension_numbers<[1], [0], [0], [1], [0, 0, 1, 1], [], []>} : vector<64x56xf32>, vector<56x64xf32>, vector<64x64xf32> -> vector<64x64xf32>
    %694 = arith.addf %690, %693 : vector<64x64xf32>
    %c1_842 = arith.constant 1 : index
    %c0_843 = arith.constant 0 : index
    %c0_844 = arith.constant 0 : index
    %695 = vector.load %arg21[%c1_842, %c0_843, %c0_844] : memref<2x64x64xf32, #tpu.memory_space<vmem>>, vector<1x64x64xf32>
    %696 = vector.shape_cast %695 : vector<1x64x64xf32> to vector<64x64xf32>
    %697 = vector.shape_cast %694 : vector<64x64xf32> to vector<1x64x64xf32>
    tpu.vector_store %arg21[%c1_842, %c0_843, %c0_844], %697 {strides = array<i32>} : memref<2x64x64xf32, #tpu.memory_space<vmem>>, vector<1x64x64xf32>,
    %c0_845 = arith.constant 0 : index
    %c0_846 = arith.constant 0 : index
    %c0_847 = arith.constant 0 : index
    %698 = vector.load %arg21[%c0_845, %c0_846, %c0_847] : memref<2x64x64xf32, #tpu.memory_space<vmem>>, vector<2x32x64xf32>
    %c0_848 = arith.constant 0 : index
    %c32_849 = arith.constant 32 : index
    %c0_850 = arith.constant 0 : index
    %699 = vector.load %arg21[%c0_848, %c32_849, %c0_850] : memref<2x64x64xf32, #tpu.memory_space<vmem>>, vector<2x32x64xf32>
    %c0_851 = arith.constant 0 : index
    %c0_852 = arith.constant 0 : index
    %c0_853 = arith.constant 0 : index
    %700 = vector.load %arg4[%c0_851, %c0_852, %c0_853] : memref<2x32x64xi32, #tpu.memory_space<vmem>>, vector<2x32x64xi32>
    %701 = tpu.iota {dimensions = array<i32: 2>} : vector<2x32x64xi32>
    %c63_i32_854 = arith.constant 63 : i32
    %702 = tpu.dynamic_rotate %700 by %c63_i32_854 dim 2 : vector<2x32x64xi32>, i32 -> vector<2x32x64xi32>
    %c63_i32_855 = arith.constant 63 : i32
    %703 = tpu.dynamic_rotate %699 by %c63_i32_855 dim 2 : vector<2x32x64xf32>, i32 -> vector<2x32x64xf32>
    %c1_i32_856 = arith.constant 1 : i32
    %704 = tpu.dynamic_rotate %700 by %c1_i32_856 dim 2 : vector<2x32x64xi32>, i32 -> vector<2x32x64xi32>
    %c1_i32_857 = arith.constant 1 : i32
    %705 = tpu.dynamic_rotate %699 by %c1_i32_857 dim 2 : vector<2x32x64xf32>, i32 -> vector<2x32x64xf32>
    %706 = arith.cmpi eq, %702, %701 : vector<2x32x64xi32>
    %c63_i32_858 = arith.constant 63 : i32
    %707 = vector.broadcast %c63_i32_858 : i32 to vector<2x32x64xi32>
    %708 = arith.cmpi slt, %701, %707 : vector<2x32x64xi32>
    %709 = arith.andi %706, %708 : vector<2x32x64xi1>
    %710 = arith.cmpi eq, %700, %701 : vector<2x32x64xi32>
    %711 = arith.cmpi eq, %704, %701 : vector<2x32x64xi32>
    %c0_i32_859 = arith.constant 0 : i32
    %712 = vector.broadcast %c0_i32_859 : i32 to vector<2x32x64xi32>
    %713 = arith.cmpi sgt, %701, %712 : vector<2x32x64xi32>
    %714 = arith.andi %711, %713 : vector<2x32x64xi1>
    %cst_860 = arith.constant 0.000000e+00 : f32
    %715 = vector.broadcast %cst_860 : f32 to vector<2x32x64xf32>
    %716 = arith.select %714, %705, %715 : vector<2x32x64xi1>, vector<2x32x64xf32>
    %717 = arith.select %710, %699, %716 : vector<2x32x64xi1>, vector<2x32x64xf32>
    %718 = arith.select %709, %703, %717 : vector<2x32x64xi1>, vector<2x32x64xf32>
    %719 = arith.addf %698, %718 : vector<2x32x64xf32>
    %cst_861 = arith.constant dense<0.000000e+00> : vector<32xf32>
    %720 = vector.multi_reduction <add>, %719, %cst_861 [0, 2] : vector<2x32x64xf32> to vector<32xf32>
    %721 = vector.shape_cast %720 : vector<32xf32> to vector<1x32x1xf32>
    %cst_862 = arith.constant 1.280000e+02 : f32
    %722 = vector.broadcast %cst_862 : f32 to vector<1x32x1xf32>
    %723 = arith.divf %721, %722 : vector<1x32x1xf32>
    %724 = vector.broadcast %723 : vector<1x32x1xf32> to vector<2x32x64xf32>
    %725 = arith.subf %719, %724 : vector<2x32x64xf32>
    %726 = arith.mulf %725, %725 : vector<2x32x64xf32>
    %cst_863 = arith.constant dense<0.000000e+00> : vector<32xf32>
    %727 = vector.multi_reduction <add>, %726, %cst_863 [0, 2] : vector<2x32x64xf32> to vector<32xf32>
    %728 = vector.shape_cast %727 : vector<32xf32> to vector<1x32x1xf32>
    %cst_864 = arith.constant 1.280000e+02 : f32
    %729 = vector.broadcast %cst_864 : f32 to vector<1x32x1xf32>
    %730 = arith.divf %728, %729 : vector<1x32x1xf32>
    %731 = vector.broadcast %723 : vector<1x32x1xf32> to vector<2x32x64xf32>
    %732 = arith.subf %719, %731 : vector<2x32x64xf32>
    %cst_865 = arith.constant 9.99999974E-6 : f32
    %733 = vector.broadcast %cst_865 : f32 to vector<1x32x1xf32>
    %734 = arith.addf %730, %733 : vector<1x32x1xf32>
    %735 = math.rsqrt %734 : vector<1x32x1xf32>
    %736 = vector.broadcast %735 : vector<1x32x1xf32> to vector<2x32x64xf32>
    %737 = arith.mulf %732, %736 : vector<2x32x64xf32>
    %c0_866 = arith.constant 0 : index
    %c0_867 = arith.constant 0 : index
    %738 = vector.load %arg12[%c0_866, %c0_867] : memref<32x1xf32, #tpu.memory_space<vmem>>, vector<32x1xf32>
    %739 = vector.shape_cast %738 : vector<32x1xf32> to vector<1x32x1xf32>
    %740 = vector.broadcast %739 : vector<1x32x1xf32> to vector<2x32x64xf32>
    %741 = arith.mulf %737, %740 : vector<2x32x64xf32>
    %c0_868 = arith.constant 0 : index
    %c0_869 = arith.constant 0 : index
    %742 = vector.load %arg13[%c0_868, %c0_869] : memref<32x1xf32, #tpu.memory_space<vmem>>, vector<32x1xf32>
    %743 = vector.shape_cast %742 : vector<32x1xf32> to vector<1x32x1xf32>
    %744 = vector.broadcast %743 : vector<1x32x1xf32> to vector<2x32x64xf32>
    %745 = arith.addf %741, %744 : vector<2x32x64xf32>
    %cst_870 = arith.constant 0.000000e+00 : f32
    %746 = vector.broadcast %cst_870 : f32 to vector<2x32x64xf32>
    %747 = arith.maximumf %745, %746 : vector<2x32x64xf32>
    %c0_871 = arith.constant 0 : index
    %c0_872 = arith.constant 0 : index
    %c0_873 = arith.constant 0 : index
    %748 = vector.load %arg18[%c0_871, %c0_872, %c0_873] : memref<2x32x64xf32, #tpu.memory_space<vmem>>, vector<2x32x64xf32>
    tpu.vector_store %arg18[%c0_871, %c0_872, %c0_873], %747 {strides = array<i32>} : memref<2x32x64xf32, #tpu.memory_space<vmem>>, vector<2x32x64xf32>,
    %c0_874 = arith.constant 0 : index
    %c0_875 = arith.constant 0 : index
    %749 = vector.load %arg14[%c0_874, %c0_875] : memref<32x8xf32, #tpu.memory_space<vmem>>, vector<32x8xf32>
    %c0_876 = arith.constant 0 : index
    %c0_877 = arith.constant 0 : index
    %c0_878 = arith.constant 0 : index
    %750 = vector.load %arg1[%c0_876, %c0_877, %c0_878] : memref<2x8x64xf32, #tpu.memory_space<vmem>>, vector<1x8x64xf32>
    %751 = vector.shape_cast %750 : vector<1x8x64xf32> to vector<8x64xf32>
    %cst_879 = arith.constant dense<0.000000e+00> : vector<32x64xf32>
    %752 = tpu.matmul %749, %751, %cst_879 {dimension_numbers = #tpu.dot_dimension_numbers<[1], [0], [0], [1], [0, 0, 1, 1], [], []>} : vector<32x8xf32>, vector<8x64xf32>, vector<32x64xf32> -> vector<32x64xf32>
    %c0_880 = arith.constant 0 : index
    %c0_881 = arith.constant 0 : index
    %753 = vector.load %arg15[%c0_880, %c0_881] : memref<32x1xf32, #tpu.memory_space<vmem>>, vector<32x1xf32>
    %754 = vector.broadcast %753 : vector<32x1xf32> to vector<32x64xf32>
    %755 = arith.addf %752, %754 : vector<32x64xf32>
    %c0_882 = arith.constant 0 : index
    %c0_883 = arith.constant 0 : index
    %c0_884 = arith.constant 0 : index
    %756 = vector.load %arg21[%c0_882, %c0_883, %c0_884] : memref<2x64x64xf32, #tpu.memory_space<vmem>>, vector<1x32x64xf32>
    %757 = vector.shape_cast %756 : vector<1x32x64xf32> to vector<32x64xf32>
    %758 = vector.shape_cast %755 : vector<32x64xf32> to vector<1x32x64xf32>
    tpu.vector_store %arg21[%c0_882, %c0_883, %c0_884], %758 {strides = array<i32>} : memref<2x64x64xf32, #tpu.memory_space<vmem>>, vector<1x32x64xf32>,
    %c0_885 = arith.constant 0 : index
    %c0_886 = arith.constant 0 : index
    %759 = vector.load %arg14[%c0_885, %c0_886] : memref<32x8xf32, #tpu.memory_space<vmem>>, vector<32x8xf32>
    %c1_887 = arith.constant 1 : index
    %c0_888 = arith.constant 0 : index
    %c0_889 = arith.constant 0 : index
    %760 = vector.load %arg1[%c1_887, %c0_888, %c0_889] : memref<2x8x64xf32, #tpu.memory_space<vmem>>, vector<1x8x64xf32>
    %761 = vector.shape_cast %760 : vector<1x8x64xf32> to vector<8x64xf32>
    %cst_890 = arith.constant dense<0.000000e+00> : vector<32x64xf32>
    %762 = tpu.matmul %759, %761, %cst_890 {dimension_numbers = #tpu.dot_dimension_numbers<[1], [0], [0], [1], [0, 0, 1, 1], [], []>} : vector<32x8xf32>, vector<8x64xf32>, vector<32x64xf32> -> vector<32x64xf32>
    %c0_891 = arith.constant 0 : index
    %c0_892 = arith.constant 0 : index
    %763 = vector.load %arg15[%c0_891, %c0_892] : memref<32x1xf32, #tpu.memory_space<vmem>>, vector<32x1xf32>
    %764 = vector.broadcast %763 : vector<32x1xf32> to vector<32x64xf32>
    %765 = arith.addf %762, %764 : vector<32x64xf32>
    %c1_893 = arith.constant 1 : index
    %c0_894 = arith.constant 0 : index
    %c0_895 = arith.constant 0 : index
    %766 = vector.load %arg21[%c1_893, %c0_894, %c0_895] : memref<2x64x64xf32, #tpu.memory_space<vmem>>, vector<1x32x64xf32>
    %767 = vector.shape_cast %766 : vector<1x32x64xf32> to vector<32x64xf32>
    %768 = vector.shape_cast %765 : vector<32x64xf32> to vector<1x32x64xf32>
    tpu.vector_store %arg21[%c1_893, %c0_894, %c0_895], %768 {strides = array<i32>} : memref<2x64x64xf32, #tpu.memory_space<vmem>>, vector<1x32x64xf32>,
    %c0_896 = arith.constant 0 : index
    %c0_897 = arith.constant 0 : index
    %c0_898 = arith.constant 0 : index
    %769 = vector.load %arg21[%c0_896, %c0_897, %c0_898] : memref<2x64x64xf32, #tpu.memory_space<vmem>>, vector<2x32x64xf32>
    %cst_899 = arith.constant dense<0.000000e+00> : vector<32xf32>
    %770 = vector.multi_reduction <add>, %769, %cst_899 [0, 2] : vector<2x32x64xf32> to vector<32xf32>
    %771 = vector.shape_cast %770 : vector<32xf32> to vector<1x32x1xf32>
    %cst_900 = arith.constant 1.280000e+02 : f32
    %772 = vector.broadcast %cst_900 : f32 to vector<1x32x1xf32>
    %773 = arith.divf %771, %772 : vector<1x32x1xf32>
    %774 = vector.broadcast %773 : vector<1x32x1xf32> to vector<2x32x64xf32>
    %775 = arith.subf %769, %774 : vector<2x32x64xf32>
    %776 = arith.mulf %775, %775 : vector<2x32x64xf32>
    %cst_901 = arith.constant dense<0.000000e+00> : vector<32xf32>
    %777 = vector.multi_reduction <add>, %776, %cst_901 [0, 2] : vector<2x32x64xf32> to vector<32xf32>
    %778 = vector.shape_cast %777 : vector<32xf32> to vector<1x32x1xf32>
    %cst_902 = arith.constant 1.280000e+02 : f32
    %779 = vector.broadcast %cst_902 : f32 to vector<1x32x1xf32>
    %780 = arith.divf %778, %779 : vector<1x32x1xf32>
    %781 = vector.broadcast %773 : vector<1x32x1xf32> to vector<2x32x64xf32>
    %782 = arith.subf %769, %781 : vector<2x32x64xf32>
    %cst_903 = arith.constant 9.99999974E-6 : f32
    %783 = vector.broadcast %cst_903 : f32 to vector<1x32x1xf32>
    %784 = arith.addf %780, %783 : vector<1x32x1xf32>
    %785 = math.rsqrt %784 : vector<1x32x1xf32>
    %786 = vector.broadcast %785 : vector<1x32x1xf32> to vector<2x32x64xf32>
    %787 = arith.mulf %782, %786 : vector<2x32x64xf32>
    %c0_904 = arith.constant 0 : index
    %c0_905 = arith.constant 0 : index
    %788 = vector.load %arg16[%c0_904, %c0_905] : memref<32x1xf32, #tpu.memory_space<vmem>>, vector<32x1xf32>
    %789 = vector.shape_cast %788 : vector<32x1xf32> to vector<1x32x1xf32>
    %790 = vector.broadcast %789 : vector<1x32x1xf32> to vector<2x32x64xf32>
    %791 = arith.mulf %787, %790 : vector<2x32x64xf32>
    %c0_906 = arith.constant 0 : index
    %c0_907 = arith.constant 0 : index
    %792 = vector.load %arg17[%c0_906, %c0_907] : memref<32x1xf32, #tpu.memory_space<vmem>>, vector<32x1xf32>
    %793 = vector.shape_cast %792 : vector<32x1xf32> to vector<1x32x1xf32>
    %794 = vector.broadcast %793 : vector<1x32x1xf32> to vector<2x32x64xf32>
    %795 = arith.addf %791, %794 : vector<2x32x64xf32>
    %c0_908 = arith.constant 0 : index
    %c0_909 = arith.constant 0 : index
    %c0_910 = arith.constant 0 : index
    %796 = vector.load %arg18[%c0_908, %c0_909, %c0_910] : memref<2x32x64xf32, #tpu.memory_space<vmem>>, vector<2x32x64xf32>
    %797 = arith.addf %796, %795 : vector<2x32x64xf32>
    %cst_911 = arith.constant 0.000000e+00 : f32
    %798 = vector.broadcast %cst_911 : f32 to vector<2x32x64xf32>
    %799 = arith.maximumf %797, %798 : vector<2x32x64xf32>
    %c0_912 = arith.constant 0 : index
    %c0_913 = arith.constant 0 : index
    %c0_914 = arith.constant 0 : index
    %800 = vector.load %arg18[%c0_912, %c0_913, %c0_914] : memref<2x32x64xf32, #tpu.memory_space<vmem>>, vector<2x32x64xf32>
    tpu.vector_store %arg18[%c0_912, %c0_913, %c0_914], %799 {strides = array<i32>} : memref<2x32x64xf32, #tpu.memory_space<vmem>>, vector<2x32x64xf32>,
    return
  }
  func.func @transform_0(%arg0: i32) -> (i32, i32, i32) {
    %c0_i32 = arith.constant 0 : i32
    %c0_i32_0 = arith.constant 0 : i32
    %c0_i32_1 = arith.constant 0 : i32
    %c0_i32_2 = arith.constant 0 : i32
    return %c0_i32, %c0_i32_0, %c0_i32_1 : i32, i32, i32
  }
  func.func @transform_1(%arg0: i32) -> (i32, i32, i32) {
    %c0_i32 = arith.constant 0 : i32
    %c0_i32_0 = arith.constant 0 : i32
    %c0_i32_1 = arith.constant 0 : i32
    %c0_i32_2 = arith.constant 0 : i32
    return %c0_i32, %c0_i32_0, %c0_i32_1 : i32, i32, i32
  }
  func.func @transform_2(%arg0: i32) -> (i32, i32, i32) {
    %c0_i32 = arith.constant 0 : i32
    %c0_i32_0 = arith.constant 0 : i32
    %c0_i32_1 = arith.constant 0 : i32
    %c0_i32_2 = arith.constant 0 : i32
    return %c0_i32, %c0_i32_0, %c0_i32_1 : i32, i32, i32
  }
  func.func @transform_3(%arg0: i32) -> (i32, i32, i32) {
    %c0_i32 = arith.constant 0 : i32
    %c0_i32_0 = arith.constant 0 : i32
    %c0_i32_1 = arith.constant 0 : i32
    %c0_i32_2 = arith.constant 0 : i32
    return %c0_i32, %c0_i32_0, %c0_i32_1 : i32, i32, i32
  }
  func.func @transform_4(%arg0: i32) -> (i32, i32) {
    %c0_i32 = arith.constant 0 : i32
    %c0_i32_0 = arith.constant 0 : i32
    %c0_i32_1 = arith.constant 0 : i32
    return %c0_i32, %c0_i32_0 : i32, i32
  }
  func.func @transform_5(%arg0: i32) -> (i32, i32) {
    %c0_i32 = arith.constant 0 : i32
    %c0_i32_0 = arith.constant 0 : i32
    %c0_i32_1 = arith.constant 0 : i32
    return %c0_i32, %c0_i32_0 : i32, i32
  }
  func.func @transform_6(%arg0: i32) -> (i32, i32) {
    %c0_i32 = arith.constant 0 : i32
    %c0_i32_0 = arith.constant 0 : i32
    %c0_i32_1 = arith.constant 0 : i32
    return %c0_i32, %c0_i32_0 : i32, i32
  }
  func.func @transform_7(%arg0: i32) -> (i32, i32) {
    %c0_i32 = arith.constant 0 : i32
    %c0_i32_0 = arith.constant 0 : i32
    %c0_i32_1 = arith.constant 0 : i32
    return %c0_i32, %c0_i32_0 : i32, i32
  }
  func.func @transform_8(%arg0: i32) -> (i32, i32) {
    %c0_i32 = arith.constant 0 : i32
    %c0_i32_0 = arith.constant 0 : i32
    %c0_i32_1 = arith.constant 0 : i32
    return %c0_i32, %c0_i32_0 : i32, i32
  }
  func.func @transform_9(%arg0: i32) -> (i32, i32) {
    %c0_i32 = arith.constant 0 : i32
    %c0_i32_0 = arith.constant 0 : i32
    %c0_i32_1 = arith.constant 0 : i32
    return %c0_i32, %c0_i32_0 : i32, i32
  }
  func.func @transform_10(%arg0: i32) -> (i32, i32) {
    %c0_i32 = arith.constant 0 : i32
    %c0_i32_0 = arith.constant 0 : i32
    %c0_i32_1 = arith.constant 0 : i32
    return %c0_i32, %c0_i32_0 : i32, i32
  }
  func.func @transform_11(%arg0: i32) -> (i32, i32) {
    %c0_i32 = arith.constant 0 : i32
    %c0_i32_0 = arith.constant 0 : i32
    %c0_i32_1 = arith.constant 0 : i32
    return %c0_i32, %c0_i32_0 : i32, i32
  }
  func.func @transform_12(%arg0: i32) -> (i32, i32) {
    %c0_i32 = arith.constant 0 : i32
    %c0_i32_0 = arith.constant 0 : i32
    %c0_i32_1 = arith.constant 0 : i32
    return %c0_i32, %c0_i32_0 : i32, i32
  }
  func.func @transform_13(%arg0: i32) -> (i32, i32) {
    %c0_i32 = arith.constant 0 : i32
    %c0_i32_0 = arith.constant 0 : i32
    %c0_i32_1 = arith.constant 0 : i32
    return %c0_i32, %c0_i32_0 : i32, i32
  }
  func.func @transform_14(%arg0: i32) -> (i32, i32) {
    %c0_i32 = arith.constant 0 : i32
    %c0_i32_0 = arith.constant 0 : i32
    %c0_i32_1 = arith.constant 0 : i32
    return %c0_i32, %c0_i32_0 : i32, i32
  }
  func.func @transform_15(%arg0: i32) -> (i32, i32) {
    %c0_i32 = arith.constant 0 : i32
    %c0_i32_0 = arith.constant 0 : i32
    %c0_i32_1 = arith.constant 0 : i32
    return %c0_i32, %c0_i32_0 : i32, i32
  }
  func.func @transform_16(%arg0: i32) -> (i32, i32) {
    %c0_i32 = arith.constant 0 : i32
    %c0_i32_0 = arith.constant 0 : i32
    %c0_i32_1 = arith.constant 0 : i32
    return %c0_i32, %c0_i32_0 : i32, i32
  }
  func.func @transform_17(%arg0: i32) -> (i32, i32, i32) {
    %c0_i32 = arith.constant 0 : i32
    %c0_i32_0 = arith.constant 0 : i32
    %c0_i32_1 = arith.constant 0 : i32
    %c0_i32_2 = arith.constant 0 : i32
    return %c0_i32, %c0_i32_0, %c0_i32_1 : i32, i32, i32
  }
}

</mosaic_0001>

<bundles_post_ra>
// kernel: tpu_custom_call.1
= control target key start
LH: loop header
LB: loop body
LE: loop exit
PB: predicated region body
PF: predicated region fallthrough
CT: control target
= control target key end

     0   :  { %s6766_s0 = inlined_call_operand.hbm [shape: f32[2,8,64], index: 0, kind: input, shape index: {}]   ;;  %s6767_s1 = inlined_call_operand.hbm [shape: s32[2,8,64], index: 1, kind: input, shape index: {}]   ;;  %s6768_s2 = inlined_call_operand.hbm [shape: s32[2,8,64], index: 2, kind: input, shape index: {}]   ;;  %s6769_s3 = inlined_call_operand.vmem [shape: s32[2,32,64], index: 3, kind: input, shape index: {}]   ;;  %s6770_s4 = inlined_call_operand.hbm [shape: f32[16,312], index: 4, kind: input, shape index: {}]   ;;  %s6771_s5 = inlined_call_operand.vmem [shape: f32[8,1], index: 5, kind: input, shape index: {}]   ;;  %s6772_s6 = inlined_call_operand.vmem [shape: f32[8,1], index: 6, kind: input, shape index: {}]   ;;  %s6773_s7 = inlined_call_operand.hbm [shape: f32[16,312], index: 7, kind: input, shape index: {}]   ;;  %s6774_s8 = inlined_call_operand.vmem [shape: f32[8,1], index: 8, kind: input, shape index: {}]   ;;  %s6775_s9 = inlined_call_operand.vmem [shape: f32[8,1], index: 9, kind: input, shape index: {}]   ;;  %s6776_s10 = inlined_call_operand.vmem [shape: f32[64,312], index: 10, kind: input, shape index: {}]   ;;  %s6777_s11 = inlined_call_operand.vmem [shape: f32[32,1], index: 11, kind: input, shape index: {}]   ;;  %s6778_s12 = inlined_call_operand.vmem [shape: f32[32,1], index: 12, kind: input, shape index: {}]   ;;  %s6779_s13 = inlined_call_operand.vmem [shape: f32[32,8], index: 13, kind: input, shape index: {}]   ;;  %s6780_s14 = inlined_call_operand.vmem [shape: f32[32,1], index: 14, kind: input, shape index: {}]   ;;  %s6781_s15 = inlined_call_operand.vmem [shape: f32[32,1], index: 15, kind: input, shape index: {}]   ;;  %s6782_s16 = inlined_call_operand.vmem [shape: f32[32,1], index: 16, kind: input, shape index: {}]   ;;  %s6783_s17 = inlined_call_operand.hbm [shape: f32[2,32,64], index: 17, kind: output, shape index: {}]  }
   0x1   :  { %6894 = sst [smem:[#allocation20_spill]] %s6766_s0 }
   0x2   :  { %6895 = sst [smem:[#allocation21_spill]] %s6767_s1 }
   0x3   :  { %6896 = sst [smem:[#allocation22_spill]] %s6769_s3 }
   0x4   :  { %6897 = sst [smem:[#allocation23_spill]] %s6774_s8 }
   0x5   :  { %6898 = sst [smem:[#allocation24_spill]] %s6775_s9 }
   0x6   :  { %6899 = sst [smem:[#allocation25_spill]] %s6776_s10 }
   0x7   :  { %6900 = sst [smem:[#allocation26_spill]] %s6777_s11 }
   0x8   :  { %6901 = sst [smem:[#allocation27_spill]] %s6778_s12 }
   0x9   :  { %6902 = sst [smem:[#allocation28_spill]] %s6779_s13 }
   0xa   :  { %6903 = sst [smem:[#allocation29_spill]] %s6780_s14 }
   0xb   :  { %6904 = sst [smem:[#allocation30_spill]] %s6781_s15 }
   0xc   :  { %6905 = sst [smem:[#allocation31_spill]] %s6782_s16 }
   0xd   :  { %6906 = sst [smem:[#allocation32_spill]] %s6783_s17 }
   0xe   :  { %22 = vsyncpa [#allocation7], 0 }
   0xf   :  { %23 = vsyncpa [#allocation10], 0 }
  0x10   :  { %24 = vsyncpa [#allocation13], 0 }
  0x11   :  { %25 = vsyncpa [#allocation8], 0  ;;  %s5093_s24 = smov [#allocation9]   ;;  %s5094_s26 = smov [#allocation12]  }
  0x12   :  { %s43_s25 = sshll.u32 %s5093_s24, 4  ;;  %s69_s27 = sshll.u32 %s5094_s26, 4  ;;  %s44_s25 = int_to_ptr.vmem [resolvable:$true] %s43_s25  ;;  %s70_s27 = int_to_ptr.vmem [resolvable:$true] %s69_s27 }
  0x13   :  { %s4973_s28 = scalar_lea.vmem %s44_s25, 256  ;;  %p4978_p1 = scmp.lt.s32.totalorder %s44_s25, %s44_s25 }
  0x14   :  { %p4974_p0 = scmp.ne.s32.totalorder %s44_s25, %s4973_s28  ;;  %p4979_p2 = scmp.lt.s32.totalorder %s4973_s28, %s4973_s28 }
  0x16   :  { %p4980_p3 = por %p4979_p2, %p4978_p1 }
  0x18   :  { %p4981_p4 = pnand %p4980_p3, %p4974_p0 }
  0x1a   :  { %4984 = shalt.err (!%p4981_p4)
}
  0x1b   :  { %s6784_s29 = smov 128   ;;  %s6791_s0 = smov 8  }
  0x1c   :  { %s6907_s19 = sld [smem:[#allocation21_spill]]  ;;  %s4993_s1 = scalar_lea.vmem %s70_s27, 768 }
  0x1d   :  { %p4994_p5 = scmp.ne.s32.totalorder %s70_s27, %s4993_s1  ;;  %p4998_p6 = scmp.lt.s32.totalorder %s70_s27, %s70_s27 }
  0x1e   :  { %p4999_p7 = scmp.lt.s32.totalorder %s4993_s1, %s4993_s1 }
  0x20   :  { %p5000_p8 = por %p4999_p7, %p4998_p6 }
  0x22   :  { %49 = dma.hbm_to_vmem [thread:$0]  %s6907_s19, 256, %s44_s25, [#allocation10], %s6784_s29, %s6784_s29, %s6791_s0  }
  0x23   :  { %p5001_p9 = pnand %p5000_p8, %p4994_p5 }
  0x25   :  { %5004 = shalt.err (!%p5001_p9)
}
  0x26   :  { %s5097_s20 = smov 384   ;;  %s5098_s21 = smov 24  }
  0x27   :  { %75 = dma.hbm_to_vmem [thread:$0]  %s6770_s4, 768, %s70_s27, [#allocation13], %s5097_s20, %s5097_s20, %s5098_s21  }
  0x28   :  { %s5099_s24 = smov [#allocation6]   ;;  %s5100_s28 = smov [#allocation11]  }
  0x29   :  { %s31_s26 = sshll.u32 %s5099_s24, 4  ;;  %s55_s25 = sshll.u32 %s5100_s28, 4  ;;  %s32_s26 = int_to_ptr.vmem [resolvable:$true] %s31_s26  ;;  %s56_s25 = int_to_ptr.vmem [resolvable:$true] %s55_s25 }
  0x2a   :  { %s5013_s30 = scalar_lea.vmem %s32_s26, 256  ;;  %p5018_p11 = scmp.lt.s32.totalorder %s32_s26, %s32_s26 }
  0x2b   :  { %p5014_p10 = scmp.ne.s32.totalorder %s32_s26, %s5013_s30  ;;  %p5019_p12 = scmp.lt.s32.totalorder %s5013_s30, %s5013_s30 }
  0x2d   :  { %p5020_p13 = por %p5019_p12, %p5018_p11 }
  0x2f   :  { %p5021_p0 = pnand %p5020_p13, %p5014_p10 }
  0x31   :  { %5024 = shalt.err (!%p5021_p0)
}
  0x32   :  { %s6908_s1 = sld [smem:[#allocation20_spill]]  ;;  %s5033_s4 = scalar_lea.vmem %s56_s25, 256 }
  0x33   :  { %p5034_p1 = scmp.ne.s32.totalorder %s56_s25, %s5033_s4  ;;  %p5038_p2 = scmp.lt.s32.totalorder %s56_s25, %s56_s25 }
  0x34   :  { %p5039_p3 = scmp.lt.s32.totalorder %s5033_s4, %s5033_s4 }
  0x36   :  { %p5040_p4 = por %p5039_p3, %p5038_p2 }
  0x38   :  { %37 = dma.hbm_to_vmem [thread:$0]  %s6908_s1, 256, %s32_s26, [#allocation7], %s6784_s29, %s6784_s29, %s6791_s0  }
  0x39   :  { %p5041_p5 = pnand %p5040_p4, %p5034_p1 }
  0x3b   :  { %5044 = shalt.err (!%p5041_p5)
}
  0x3c   :  { %61 = dma.hbm_to_vmem [thread:$0]  %s6768_s2, 256, %s56_s25, [#allocation10], %s6784_s29, %s6784_s29, %s6791_s0  }
  0x3d   :  { %s5101_s23 = smov [#allocation14]  }
  0x3e   :  { %s85_s24 = sshll.u32 %s5101_s23, 4  ;;  %s86_s24 = int_to_ptr.vmem [resolvable:$true] %s85_s24 }
  0x3f   :  { %s5053_s28 = scalar_lea.vmem %s86_s24, 768  ;;  %p5058_p7 = scmp.lt.s32.totalorder %s86_s24, %s86_s24 }
  0x40   :  { %p5054_p6 = scmp.ne.s32.totalorder %s86_s24, %s5053_s28  ;;  %p5059_p8 = scmp.lt.s32.totalorder %s5053_s28, %s5053_s28 }
  0x42   :  { %p5060_p9 = por %p5059_p8, %p5058_p7 }
  0x44   :  { %p5061_p10 = pnand %p5060_p9, %p5054_p6 }
  0x46   :  { %5064 = shalt.err (!%p5061_p10)
}
  0x47   :  { %91 = dma.hbm_to_vmem [thread:$0]  %s6773_s7, 768, %s86_s24, [#allocation13], %s5097_s20, %s5097_s20, %s5098_s21  }
  0x48   :  { %5085 = dma.done.wait [#allocation7], 256  }
  0x49   :  { %5086 = vsyncadd [#allocation7], 4294967040 }
  0x4a   :  { %5087 = dma.done.wait [#allocation10], 512  }
  0x4b   :  { %5088 = vsyncadd [#allocation10], 4294966784 }
  0x4c   :  { %5089 = dma.done.wait [#allocation13], 1536  }
  0x4d   :  { %5090 = vsyncadd [#allocation13], 4294965760  ;;  %v5102_v0 = vmov 0.0   ;;  %vm128_vm0 = vcmask 523264   ;;  %v127_v1 = vld [vmem:[#allocation6] sm:$0xff]  ;;  %v131_v2 = vld [vmem:[#allocation6 + $0x8] sm:$0xff] }
  0x4e   :  { %125 = vst [vmem:[#allocation2] sm:$0xff] %v5102_v0  ;;  %126 = vst [vmem:[#allocation2 + $0x8] sm:$0xff] %v5102_v0  ;;  %s6821_s2 = smov 117   ;;  %s6819_s7 = smov 116   ;;  %v5317_v4 = vld [vmem:[#allocation12 + $0x8] sm:$0xff]  ;;  %v5324_v5 = vld [vmem:[#allocation12] sm:$0xff] }
  0x4f   :  { %129 = vst.msk [vmem:[#allocation2] sm:$0xff] %vm128_vm0, %v127_v1  ;;  %133 = vst.msk [vmem:[#allocation2 + $0x8] sm:$0xff] %vm128_vm0, %v131_v2  ;;  %s6835_s20 = smov 5   ;;  %s6831_s21 = smov 4   ;;  %4331 = vmatprep.mubr.f32.mxu0 %v5317_v4  ;;  %4366 = vmatprep.mubr.f32.mxu1 %v5324_v5  ;;  %v5431_v37 = vld [vmem:[#allocation12 + $0x20] sm:$0xff]  ;;  %v5433_v38 = vld [vmem:[#allocation12 + $0x10] sm:$0xff] }
  0x50   :  { %s6839_s25 = smov 6   ;;  %s6823_s18 = smov 118   ;;  %vm445_vm1 = vcmask 457728   ;;  %v5436_v41 = vld [vmem:[#allocation12 + $0x18] sm:$0xff]  ;;  %v5442_v54 = vld [vmem:[#allocation12 + $0x28] sm:$0xff]  ;;  %vm936_vm2 = vcmask 1048064  }
  0x51   :  { %s6795_s19 = smov 7   ;;  %s6841_s1 = smov 119  }
  0x52   :  { %s6827_s4 = smov 120   ;;  %s6787_s27 = smov 9  }
  0x53   :  { %s6825_s22 = smov 121   ;;  %s6785_s23 = smov 10  }
  0x54   :  { %s6829_s24 = smov 122   ;;  %s6789_s28 = smov 11  }
  0x55   :  { %s6833_s26 = smov 123   ;;  %s6793_s30 = smov 12  }
  0x56   :  { %v5267_v3 = vld [vmem:[#allocation2] sm:$0xff]  ;;  %s6837_s29 = smov 124   ;;  %v5339_v6 = vld [vmem:[#allocation2 + $0x8] sm:$0xff]  ;;  %s6926_s17 = smov 19  }
  0x57   :  { %223 = vrot.lane.b32.xlu1 %v5267_v3, %s6821_s2  ;;  %226 = vrot.lane.b32.xlu0 %v5267_v3, %s6819_s7  ;;  %s6928_s16 = smov 114   ;;  %s6929_s15 = smov 115  }
  0x58   :  { %s6867_s12 = smov 64   ;;  %s5142_s11 = smov 63  }
  0x59   :  { %s6933_s13 = smov 4   ;;  %s6934_s14 = smov 121  }
  0x5a   :  { %s6936_s3 = smov 122   ;;  %s6937_s10 = smov 5  }
  0x5b   :  { %177 = vrot.lane.b32.xlu1 %v5267_v3, %s6835_s20  ;;  %180 = vrot.lane.b32.xlu0 %v5267_v3, %s6831_s21  ;;  %s6938_s9 = smov 123   ;;  %s6939_s8 = smov 118  }
  0x5f   :  { %174 = vrot.lane.b32.xlu1 %v5267_v3, %s6839_s25  ;;  %220 = vrot.lane.b32.xlu0 %v5267_v3, %s6823_s18 }
  0x63   :  { %171 = vrot.lane.b32.xlu1 %v5267_v3, %s6795_s19  ;;  %217 = vrot.lane.b32.xlu0 %v5267_v3, %s6841_s1  ;;  %s6805_s19 = smov 127  }
  0x67   :  { %168 = vrot.lane.b32.xlu1 %v5267_v3, %s6791_s0  ;;  %214 = vrot.lane.b32.xlu0 %v5267_v3, %s6827_s4  ;;  %s6811_s0 = smov 126  }
  0x6b   :  { %165 = vrot.lane.b32.xlu1 %v5267_v3, %s6787_s27  ;;  %211 = vrot.lane.b32.xlu0 %v5267_v3, %s6825_s22  ;;  %s6799_s27 = smov 125  }
  0x6f   :  { %162 = vrot.lane.b32.xlu1 %v5267_v3, %s6785_s23  ;;  %208 = vrot.lane.b32.xlu0 %v5267_v3, %s6829_s24  ;;  %s6797_s23 = smov 13  }
  0x73   :  { %159 = vrot.lane.b32.xlu1 %v5267_v3, %s6789_s28  ;;  %205 = vrot.lane.b32.xlu0 %v5267_v3, %s6833_s26  ;;  %s6801_s28 = smov 14  }
  0x77   :  { %156 = vrot.lane.b32.xlu1 %v5267_v3, %s6793_s30  ;;  %202 = vrot.lane.b32.xlu0 %v5267_v3, %s6837_s29  ;;  %s6803_s30 = smov 15  }
  0x7b   :  { %153 = vrot.lane.b32.xlu1 %v5267_v3, %s6797_s23  ;;  %199 = vrot.lane.b32.xlu0 %v5267_v3, %s6799_s27  ;;  %s6807_s23 = smov 1   ;;  %s6809_s27 = smov 16  }
  0x7f   :  { %150 = vrot.lane.b32.xlu1 %v5267_v3, %s6801_s28  ;;  %196 = vrot.lane.b32.xlu0 %v5267_v3, %s6811_s0  ;;  %s6849_s28 = smov 2   ;;  %s6817_s0 = smov 19  }
  0x83   :  { %147 = vrot.lane.b32.xlu1 %v5267_v3, %s6803_s30  ;;  %193 = vrot.lane.b32.xlu0 %v5267_v3, %s6805_s19  ;;  %s6813_s30 = smov 17   ;;  %s6851_s19 = smov 3  }
  0x87   :  { %189 = vrot.lane.b32.xlu1 %v5267_v3, %s6807_s23  ;;  %144 = vrot.lane.b32.xlu0 %v5267_v3, %s6809_s27  ;;  %s6815_s23 = smov 18   ;;  %s6855_s27 = smov 109  }
  0x8b   :  { %186 = vrot.lane.b32.xlu1 %v5267_v3, %s6849_s28  ;;  %141 = vrot.lane.b32.xlu0 %v5267_v3, %s6813_s30  ;;  %s6857_s30 = smov 110  }
  0x8f   :  { %183 = vrot.lane.b32.xlu1 %v5267_v3, %s6851_s19  ;;  %138 = vrot.lane.b32.xlu0 %v5267_v3, %s6815_s23  ;;  %s6859_s23 = smov 111  }
  0x93   :  { %247 = vrot.lane.b32.xlu1 %v5267_v3, %s6855_s27  ;;  %135 = vrot.lane.b32.xlu0 %v5267_v3, %s6817_s0  ;;  %s6853_s0 = smov 112  }
  0x97   :  { %623 = vrot.lane.b32.xlu1 %v5339_v6, %s6819_s7  ;;  %244 = vrot.lane.b32.xlu0 %v5267_v3, %s6857_s30  ;;  %s6847_s7 = smov 113  }
  0x9b   :  { %620 = vrot.lane.b32.xlu1 %v5339_v6, %s6821_s2  ;;  %241 = vrot.lane.b32.xlu0 %v5267_v3, %s6859_s23  ;;  %s6845_s2 = smov 114  }
  0x9f   :  { %617 = vrot.lane.b32.xlu1 %v5339_v6, %s6823_s18  ;;  %238 = vrot.lane.b32.xlu0 %v5267_v3, %s6853_s0  ;;  %s6843_s18 = smov 115   ;;  %s6923_s0 = smov 17  }
  0xa3   :  { %614 = vrot.lane.b32.xlu1 %v5339_v6, %s6841_s1  ;;  %235 = vrot.lane.b32.xlu0 %v5267_v3, %s6847_s7  ;;  %s6917_s1 = smov 12   ;;  %s6920_s7 = smov 14  }
  0xa7   :  { %611 = vrot.lane.b32.xlu1 %v5339_v6, %s6827_s4  ;;  %232 = vrot.lane.b32.xlu0 %v5267_v3, %s6845_s2  ;;  %s6910_s4 = smov 7   ;;  %s6919_s2 = smov 13  }
  0xab   :  { %608 = vrot.lane.b32.xlu1 %v5339_v6, %s6825_s22  ;;  %229 = vrot.lane.b32.xlu0 %v5267_v3, %s6843_s18  ;;  %s6909_s22 = smov 125   ;;  %s6918_s18 = smov 1  }
  0xaf   :  { %605 = vrot.lane.b32.xlu1 %v5339_v6, %s6829_s24  ;;  %577 = vrot.lane.b32.xlu0 %v5339_v6, %s6831_s21  ;;  %s6911_s24 = smov 126   ;;  %s6912_s21 = smov 8  }
  0xb3   :  { %602 = vrot.lane.b32.xlu1 %v5339_v6, %s6833_s26  ;;  %574 = vrot.lane.b32.xlu0 %v5339_v6, %s6835_s20  ;;  %s6913_s26 = smov 127   ;;  %s6914_s20 = smov 9  }
  0xb7   :  { %599 = vrot.lane.b32.xlu1 %v5339_v6, %s6837_s29  ;;  %571 = vrot.lane.b32.xlu0 %v5339_v6, %s6839_s25  ;;  %s6915_s29 = smov 11   ;;  %s6916_s25 = smov 10  }
  0xbb   :  { %596 = vrot.lane.b32.xlu1 %v5339_v6, %s6909_s22  ;;  %568 = vrot.lane.b32.xlu0 %v5339_v6, %s6910_s4 }
  0xbf   :  { %593 = vrot.lane.b32.xlu1 %v5339_v6, %s6911_s24  ;;  %565 = vrot.lane.b32.xlu0 %v5339_v6, %s6912_s21 }
  0xc3   :  { %590 = vrot.lane.b32.xlu1 %v5339_v6, %s6913_s26  ;;  %562 = vrot.lane.b32.xlu0 %v5339_v6, %s6914_s20 }
  0xc7   :  { %556 = vrot.lane.b32.xlu1 %v5339_v6, %s6915_s29  ;;  %559 = vrot.lane.b32.xlu0 %v5339_v6, %s6916_s25 }
  0xc9   :  { %v224_v7 = vpop.permute.xlu1 %223  ;;  %v227_v8 = vpop.permute.xlu0 %226 }
  0xca   :  { %4299 = vmatprep.subr.mxu0 %v227_v8 }
  0xcb   :  { %553 = vrot.lane.b32.xlu1 %v5339_v6, %s6917_s1  ;;  %586 = vrot.lane.b32.xlu0 %v5339_v6, %s6918_s18 }
  0xcc   :  { %4300 = vmatpush3.msra.mxu0 %v227_v8 }
  0xcd   :  { %4301 = vmatprep.subr.mxu0 %v224_v7  ;;  %v178_v9 = vpop.permute.xlu1 %177  ;;  %v181_v10 = vpop.permute.xlu0 %180 }
  0xce   :  { %4302 = vmatpush3.msra.mxu0 %v224_v7  ;;  %4334 = vmatprep.subr.mxu1 %v181_v10 }
  0xcf   :  { %550 = vrot.lane.b32.xlu1 %v5339_v6, %s6919_s2  ;;  %583 = vrot.lane.b32.xlu0 %v5339_v6, %s6849_s28  ;;  %s6921_s28 = smov 15  }
  0xd0   :  { %4335 = vmatpush3.msra.mxu1 %v181_v10 }
  0xd1   :  { %4336 = vmatprep.subr.mxu1 %v178_v9  ;;  %v175_v11 = vpop.permute.xlu1 %174  ;;  %v221_v12 = vpop.permute.xlu0 %220 }
  0xd2   :  { %4337 = vmatpush3.msra.mxu1 %v178_v9  ;;  %4303 = vmatprep.subr.mxu0 %v221_v12 }
  0xd3   :  { %547 = vrot.lane.b32.xlu1 %v5339_v6, %s6920_s7  ;;  %580 = vrot.lane.b32.xlu0 %v5339_v6, %s6851_s19  ;;  %s6922_s19 = smov 16  }
  0xd4   :  { %4304 = vmatpush3.msra.mxu0 %v221_v12  ;;  %4338 = vmatprep.subr.mxu1 %v175_v11 }
  0xd5   :  { %4339 = vmatpush3.msra.mxu1 %v175_v11  ;;  %v172_v13 = vpop.permute.xlu1 %171  ;;  %v218_v14 = vpop.permute.xlu0 %217 }
  0xd6   :  { %4305 = vmatprep.subr.mxu0 %v218_v14  ;;  %4340 = vmatprep.subr.mxu1 %v172_v13 }
  0xd7   :  { %544 = vrot.lane.b32.xlu1 %v5339_v6, %s6921_s28  ;;  %644 = vrot.lane.b32.xlu0 %v5339_v6, %s6855_s27  ;;  %s6924_s27 = smov 18  }
  0xd8   :  { %4306 = vmatpush3.msra.mxu0 %v218_v14  ;;  %4341 = vmatpush3.msra.mxu1 %v172_v13 }
  0xd9   :  { %v169_v15 = vpop.permute.xlu1 %168  ;;  %v215_v16 = vpop.permute.xlu0 %214 }
  0xda   :  { %4307 = vmatprep.subr.mxu0 %v215_v16  ;;  %4342 = vmatprep.subr.mxu1 %v169_v15 }
  0xdb   :  { %541 = vrot.lane.b32.xlu1 %v5339_v6, %s6922_s19  ;;  %641 = vrot.lane.b32.xlu0 %v5339_v6, %s6857_s30  ;;  %s6925_s30 = smov 112  }
  0xdc   :  { %4308 = vmatpush3.msra.mxu0 %v215_v16  ;;  %4343 = vmatpush3.msra.mxu1 %v169_v15 }
  0xdd   :  { %v166_v17 = vpop.permute.xlu1 %165  ;;  %v212_v18 = vpop.permute.xlu0 %211 }
  0xde   :  { %4309 = vmatprep.subr.mxu0 %v212_v18  ;;  %4344 = vmatprep.subr.mxu1 %v166_v17 }
  0xdf   :  { %538 = vrot.lane.b32.xlu1 %v5339_v6, %s6923_s0  ;;  %638 = vrot.lane.b32.xlu0 %v5339_v6, %s6859_s23  ;;  %s6927_s23 = smov 113  }
  0xe0   :  { %4310 = vmatpush3.msra.mxu0 %v212_v18  ;;  %4345 = vmatpush3.msra.mxu1 %v166_v17 }
  0xe1   :  { %v163_v19 = vpop.permute.xlu1 %162  ;;  %v209_v20 = vpop.permute.xlu0 %208 }
  0xe2   :  { %4311 = vmatprep.subr.mxu0 %v209_v20  ;;  %4346 = vmatprep.subr.mxu1 %v163_v19 }
  0xe3   :  { %535 = vrot.lane.b32.xlu1 %v5339_v6, %s6924_s27  ;;  %635 = vrot.lane.b32.xlu0 %v5339_v6, %s6925_s30 }
  0xe4   :  { %4312 = vmatpush3.msra.mxu0 %v209_v20  ;;  %4347 = vmatpush3.msra.mxu1 %v163_v19 }
  0xe5   :  { %v160_v21 = vpop.permute.xlu1 %159  ;;  %v206_v22 = vpop.permute.xlu0 %205 }
  0xe6   :  { %4313 = vmatprep.subr.mxu0 %v206_v22  ;;  %4348 = vmatprep.subr.mxu1 %v160_v21 }
  0xe7   :  { %532 = vrot.lane.b32.xlu1 %v5339_v6, %s6926_s17  ;;  %632 = vrot.lane.b32.xlu0 %v5339_v6, %s6927_s23 }
  0xe8   :  { %4314 = vmatpush3.msra.mxu0 %v206_v22  ;;  %4349 = vmatpush3.msra.mxu1 %v160_v21 }
  0xe9   :  { %v157_v23 = vpop.permute.xlu1 %156  ;;  %v203_v24 = vpop.permute.xlu0 %202 }
  0xea   :  { %4315 = vmatprep.subr.mxu0 %v203_v24  ;;  %4350 = vmatprep.subr.mxu1 %v157_v23 }
  0xeb   :  { %629 = vrot.lane.b32.xlu0 %v5339_v6, %s6928_s16  ;;  %4316 = vmatpush3.msra.mxu0 %v203_v24  ;;  %v5457_v24 = vld [vmem:[#allocation9 + $0x8] sm:$0xff] }
  0xec   :  { %4351 = vmatpush3.msra.mxu1 %v157_v23  ;;  %626 = vrot.lane.b32.xlu1 %v5339_v6, %s6929_s15  ;;  %v5455_v23 = vld [vmem:[#allocation9] sm:$0xff] }
  0xed   :  { %v154_v25 = vpop.permute.xlu1 %153  ;;  %v200_v26 = vpop.permute.xlu0 %199 }
  0xee   :  { %4317 = vmatprep.subr.mxu0 %v200_v26  ;;  %4352 = vmatprep.subr.mxu1 %v154_v25 }
  0xef   :  { %4318 = vmatpush3.msra.mxu0 %v200_v26  ;;  %4353 = vmatpush3.msra.mxu1 %v154_v25 }
  0xf0   :  { %937 = vrot.lane.b32.xlu0 %v5455_v23, %s6867_s12  ;;  %940 = vrot.lane.b32.xlu1 %v5457_v24, %s6867_s12 }
  0xf1   :  { %v151_v27 = vpop.permute.xlu1 %150  ;;  %v197_v28 = vpop.permute.xlu0 %196 }
  0xf2   :  { %4319 = vmatprep.subr.mxu0 %v197_v28  ;;  %4354 = vmatprep.subr.mxu1 %v151_v27 }
  0xf3   :  { %4320 = vmatpush3.msra.mxu0 %v197_v28  ;;  %4355 = vmatpush3.msra.mxu1 %v151_v27 }
  0xf5   :  { %v148_v29 = vpop.permute.xlu1 %147  ;;  %v194_v30 = vpop.permute.xlu0 %193 }
  0xf6   :  { %4321 = vmatprep.subr.mxu0 %v194_v30  ;;  %4356 = vmatprep.subr.mxu1 %v148_v29 }
  0xf7   :  { %4322 = vmatpush3.msra.mxu0 %v194_v30  ;;  %4357 = vmatpush3.msra.mxu1 %v148_v29  ;;  %v5141_v30 = vmov 0  }
  0xf8   :  { %4323 = vmatprep.subr.mxu0 %v5267_v3  ;;  %4944 = vset.pattern.permute.xlu1 %v5141_v30 }
  0xf9   :  { %v190_v31 = vpop.permute.xlu1 %189  ;;  %v145_v32 = vpop.permute.xlu0 %144  ;;  %4324 = vmatpush3.msra.mxu0 %v5267_v3  ;;  %4943 = vset.pattern.permute.xlu0 %v5141_v30 }
  0xfa   :  { %4358 = vmatprep.subr.mxu1 %v145_v32  ;;  %4325 = vmatprep.subr.mxu0 %v190_v31 }
  0xfb   :  { %4359 = vmatpush3.msra.mxu1 %v145_v32  ;;  %4326 = vmatpush3.msra.mxu0 %v190_v31 }
  0xfd   :  { %v187_v33 = vpop.permute.xlu1 %186  ;;  %v142_v34 = vpop.permute.xlu0 %141 }
  0xfe   :  { %4360 = vmatprep.subr.mxu1 %v142_v34  ;;  %4327 = vmatprep.subr.mxu0 %v187_v33 }
  0xff   :  { %4361 = vmatpush3.msra.mxu1 %v142_v34  ;;  %4328 = vmatpush3.msra.mxu0 %v187_v33 }
 0x101   :  { %v184_v35 = vpop.permute.xlu1 %183  ;;  %v139_v36 = vpop.permute.xlu0 %138 }
 0x102   :  { %4362 = vmatprep.subr.mxu1 %v139_v36  ;;  %4329 = vmatprep.subr.mxu0 %v184_v35 }
 0x103   :  { %4363 = vmatpush3.msra.mxu1 %v139_v36  ;;  %4330 = vmatpush3.msra.mxu0 %v184_v35 }
 0x104   :  { %4332 = vmatmul.mubr.f32.vlgmr.msra.gmra.mxu0 %v5431_v37 }
 0x105   :  { %v248_v39 = vpop.permute.xlu1 %247  ;;  %v136_v40 = vpop.permute.xlu0 %135  ;;  %4383 = vmatprep.mubr.msk.f32.mxu0 %vm445_vm1, %v5433_v38 }
 0x106   :  { %4364 = vmatprep.subr.mxu1 %v136_v40  ;;  %4369 = vmatprep.subr.mxu0 %v248_v39 }
 0x107   :  { %4365 = vmatpush3.msra.mxu1 %v136_v40  ;;  %4370 = vmatpush3.msra.mxu0 %v248_v39 }
 0x108   :  { %4367 = vmatmul.mubr.f32.vlgmr.msra.gmra.mxu1 %v5436_v41 }
 0x109   :  { %v624_v42 = vpop.permute.xlu1 %623  ;;  %v245_v43 = vpop.permute.xlu0 %244  ;;  %4418 = vmatprep.mubr.f32.mxu1 %v5317_v4 }
 0x10a   :  { %4371 = vmatprep.subr.mxu0 %v245_v43  ;;  %4386 = vmatprep.subr.mxu1 %v624_v42 }
 0x10b   :  { %4372 = vmatpush3.msra.mxu0 %v245_v43  ;;  %4387 = vmatpush3.msra.mxu1 %v624_v42 }
 0x10d   :  { %v621_v44 = vpop.permute.xlu1 %620  ;;  %v242_v45 = vpop.permute.xlu0 %241 }
 0x10e   :  { %4373 = vmatprep.subr.mxu0 %v242_v45  ;;  %4388 = vmatprep.subr.mxu1 %v621_v44 }
 0x10f   :  { %4374 = vmatpush3.msra.mxu0 %v242_v45  ;;  %4389 = vmatpush3.msra.mxu1 %v621_v44 }
 0x111   :  { %v618_v46 = vpop.permute.xlu1 %617  ;;  %v239_v47 = vpop.permute.xlu0 %238 }
 0x112   :  { %4375 = vmatprep.subr.mxu0 %v239_v47  ;;  %4390 = vmatprep.subr.mxu1 %v618_v46 }
 0x113   :  { %4376 = vmatpush3.msra.mxu0 %v239_v47  ;;  %4391 = vmatpush3.msra.mxu1 %v618_v46 }
 0x115   :  { %v615_v48 = vpop.permute.xlu1 %614  ;;  %v236_v49 = vpop.permute.xlu0 %235 }
 0x116   :  { %4377 = vmatprep.subr.mxu0 %v236_v49  ;;  %4392 = vmatprep.subr.mxu1 %v615_v48 }
 0x117   :  { %4378 = vmatpush3.msra.mxu0 %v236_v49  ;;  %4393 = vmatpush3.msra.mxu1 %v615_v48 }
 0x119   :  { %v612_v50 = vpop.permute.xlu1 %611  ;;  %v233_v51 = vpop.permute.xlu0 %232 }
 0x11a   :  { %4379 = vmatprep.subr.mxu0 %v233_v51  ;;  %4394 = vmatprep.subr.mxu1 %v612_v50 }
 0x11b   :  { %4380 = vmatpush3.msra.mxu0 %v233_v51  ;;  %4395 = vmatpush3.msra.mxu1 %v612_v50 }
 0x11d   :  { %v609_v52 = vpop.permute.xlu1 %608  ;;  %v230_v53 = vpop.permute.xlu0 %229 }
 0x11e   :  { %4381 = vmatprep.subr.mxu0 %v230_v53  ;;  %4396 = vmatprep.subr.mxu1 %v609_v52 }
 0x11f   :  { %4382 = vmatpush3.msra.mxu0 %v230_v53  ;;  %4397 = vmatpush3.msra.mxu1 %v609_v52 }
 0x120   :  { %4384 = vmatmul.mubr.msk.f32.vlgmr.msra.gmra.mxu0 %vm445_vm1, %v5442_v54 }
 0x121   :  { %v606_v55 = vpop.permute.xlu1 %605  ;;  %v578_v56 = vpop.permute.xlu0 %577  ;;  %4453 = vmatprep.mubr.f32.mxu0 %v5324_v5 }
 0x122   :  { %4421 = vmatprep.subr.mxu0 %v578_v56  ;;  %4398 = vmatprep.subr.mxu1 %v606_v55 }
 0x123   :  { %4422 = vmatpush3.msra.mxu0 %v578_v56  ;;  %4399 = vmatpush3.msra.mxu1 %v606_v55 }
 0x125   :  { %v603_v57 = vpop.permute.xlu1 %602  ;;  %v575_v58 = vpop.permute.xlu0 %574 }
 0x126   :  { %4423 = vmatprep.subr.mxu0 %v575_v58  ;;  %4400 = vmatprep.subr.mxu1 %v603_v57 }
 0x127   :  { %4424 = vmatpush3.msra.mxu0 %v575_v58  ;;  %4401 = vmatpush3.msra.mxu1 %v603_v57 }
 0x129   :  { %v600_v59 = vpop.permute.xlu1 %599  ;;  %v572_v60 = vpop.permute.xlu0 %571 }
 0x12a   :  { %4425 = vmatprep.subr.mxu0 %v572_v60  ;;  %4402 = vmatprep.subr.mxu1 %v600_v59 }
 0x12b   :  { %4426 = vmatpush3.msra.mxu0 %v572_v60  ;;  %4403 = vmatpush3.msra.mxu1 %v600_v59 }
 0x12d   :  { %v597_v61 = vpop.permute.xlu1 %596  ;;  %v569_v62 = vpop.permute.xlu0 %568 }
 0x12e   :  { %4427 = vmatprep.subr.mxu0 %v569_v62  ;;  %4404 = vmatprep.subr.mxu1 %v597_v61 }
 0x12f   :  { %4428 = vmatpush3.msra.mxu0 %v569_v62  ;;  %4405 = vmatpush3.msra.mxu1 %v597_v61 }
 0x131   :  { %v594_v63 = vpop.permute.xlu1 %593  ;;  %v566_v0 = vpop.permute.xlu0 %565 }
 0x132   :  { %4429 = vmatprep.subr.mxu0 %v566_v0  ;;  %4406 = vmatprep.subr.mxu1 %v594_v63 }
 0x133   :  { %4430 = vmatpush3.msra.mxu0 %v566_v0  ;;  %4407 = vmatpush3.msra.mxu1 %v594_v63 }
 0x135   :  { %v591_v1 = vpop.permute.xlu1 %590  ;;  %v563_v2 = vpop.permute.xlu0 %562 }
 0x136   :  { %4431 = vmatprep.subr.mxu0 %v563_v2  ;;  %4408 = vmatprep.subr.mxu1 %v591_v1 }
 0x137   :  { %4432 = vmatpush3.msra.mxu0 %v563_v2  ;;  %4409 = vmatpush3.msra.mxu1 %v591_v1 }
 0x138   :  { %4410 = vmatprep.subr.mxu1 %v5339_v6 }
 0x139   :  { %v557_v3 = vpop.permute.xlu1 %556  ;;  %v560_v4 = vpop.permute.xlu0 %559  ;;  %4411 = vmatpush3.msra.mxu1 %v5339_v6 }
 0x13a   :  { %4433 = vmatprep.subr.mxu0 %v560_v4 }
 0x13b   :  { %4434 = vmatpush3.msra.mxu0 %v560_v4 }
 0x13c   :  { %4435 = vmatprep.subr.mxu0 %v557_v3 }
 0x13d   :  { %v554_v5 = vpop.permute.xlu1 %553  ;;  %4436 = vmatpush3.msra.mxu0 %v557_v3  ;;  %v587_v7 = vpop.permute.xlu0 %586 }
 0x13e   :  { %4412 = vmatprep.subr.mxu1 %v587_v7  ;;  %4437 = vmatprep.subr.mxu0 %v554_v5 }
 0x13f   :  { %4413 = vmatpush3.msra.mxu1 %v587_v7  ;;  %4438 = vmatpush3.msra.mxu0 %v554_v5 }
 0x141   :  { %v551_v8 = vpop.permute.xlu1 %550  ;;  %v584_v9 = vpop.permute.xlu0 %583 }
 0x142   :  { %4414 = vmatprep.subr.mxu1 %v584_v9  ;;  %4439 = vmatprep.subr.mxu0 %v551_v8 }
 0x143   :  { %4415 = vmatpush3.msra.mxu1 %v584_v9  ;;  %4440 = vmatpush3.msra.mxu0 %v551_v8 }
 0x145   :  { %v548_v10 = vpop.permute.xlu1 %547  ;;  %v581_v11 = vpop.permute.xlu0 %580 }
 0x146   :  { %4416 = vmatprep.subr.mxu1 %v581_v11  ;;  %4441 = vmatprep.subr.mxu0 %v548_v10 }
 0x147   :  { %4417 = vmatpush3.msra.mxu1 %v581_v11  ;;  %4442 = vmatpush3.msra.mxu0 %v548_v10 }
 0x148   :  { %4419 = vmatmul.mubr.f32.vlgmr.msra.gmra.mxu1 %v5431_v37 }
 0x149   :  { %v545_v6 = vpop.permute.xlu1 %544  ;;  %v645_v12 = vpop.permute.xlu0 %644  ;;  %4470 = vmatprep.mubr.msk.f32.mxu1 %vm445_vm1, %v5433_v38  ;;  %v934_v38 = vlaneseq }
 0x14a   :  { %4456 = vmatprep.subr.mxu1 %v645_v12  ;;  %4443 = vmatprep.subr.mxu0 %v545_v6 }
 0x14b   :  { %4457 = vmatpush3.msra.mxu1 %v645_v12  ;;  %4444 = vmatpush3.msra.mxu0 %v545_v6  ;;  %v5471_v40 = vand.u32 127, %v934_v38 }
 0x14d   :  { %v542_v13 = vpop.permute.xlu1 %541  ;;  %v642_v14 = vpop.permute.xlu0 %641  ;;  %vm978_vm3 = vcmp.gt.s32.totalorder %v5471_v40, 0  ;;  %vm965_vm9 = vcmp.lt.s32.totalorder %v5471_v40, 63  ;;  %vm972_vm10 = vcmp.eq.s32.totalorder %v5455_v23, %v5471_v40  ;;  %vm973_vm11 = vcmp.eq.s32.totalorder %v5457_v24, %v5471_v40 }
 0x14e   :  { %4458 = vmatprep.subr.mxu1 %v642_v14  ;;  %4445 = vmatprep.subr.mxu0 %v542_v13  ;;  %v966_v8 = vsel %vm965_vm9, 1, %v5141_v30 }
 0x14f   :  { %4459 = vmatpush3.msra.mxu1 %v642_v14  ;;  %4446 = vmatpush3.msra.mxu0 %v542_v13 }
 0x151   :  { %v539_v15 = vpop.permute.xlu1 %538  ;;  %v639_v16 = vpop.permute.xlu0 %638 }
 0x152   :  { %4460 = vmatprep.subr.mxu1 %v639_v16  ;;  %4447 = vmatprep.subr.mxu0 %v539_v15 }
 0x153   :  { %4461 = vmatpush3.msra.mxu1 %v639_v16  ;;  %4448 = vmatpush3.msra.mxu0 %v539_v15 }
 0x155   :  { %v536_v17 = vpop.permute.xlu1 %535  ;;  %v636_v18 = vpop.permute.xlu0 %635 }
 0x156   :  { %4462 = vmatprep.subr.mxu1 %v636_v18  ;;  %4449 = vmatprep.subr.mxu0 %v536_v17 }
 0x157   :  { %4463 = vmatpush3.msra.mxu1 %v636_v18  ;;  %4450 = vmatpush3.msra.mxu0 %v536_v17  ;;  %v1046_v18 = vld [vmem:[%s6772_s6] sm:$0xff]  ;;  %s6931_s6 = smov 116  }
 0x159   :  { %v533_v19 = vpop.permute.xlu1 %532  ;;  %v633_v20 = vpop.permute.xlu0 %632 }
 0x15a   :  { %4451 = vmatprep.subr.mxu0 %v533_v19  ;;  %4464 = vmatprep.subr.mxu1 %v633_v20 }
 0x15b   :  { %4452 = vmatpush3.msra.mxu0 %v533_v19  ;;  %4465 = vmatpush3.msra.mxu1 %v633_v20 }
 0x15c   :  { %4454 = vmatmul.mubr.f32.vlgmr.msra.gmra.mxu0 %v5436_v41 }
 0x15d   :  { %v630_v21 = vpop.permute.xlu0 %629 }
 0x15e   :  { %4466 = vmatprep.subr.mxu1 %v630_v21  ;;  %v627_v22 = vpop.permute.xlu1 %626 }
 0x15f   :  { %4467 = vmatpush3.msra.mxu1 %v630_v21 }
 0x160   :  { %4468 = vmatprep.subr.mxu1 %v627_v22 }
 0x161   :  { %4469 = vmatpush3.msra.mxu1 %v627_v22 }
 0x162   :  { %4471 = vmatmul.mubr.msk.f32.vlgmr.msra.gmra.mxu1 %vm445_vm1, %v5442_v54  ;;  %v938_v36 = vpop.permute.xlu0 %937  ;;  %v941_v51 = vpop.permute.xlu1 %940  ;;  %v979_v54 = vsel %vm978_vm3, 1, %v5141_v30 }
 0x163   :  { %v939_v39 = vsel %vm936_vm2, %v938_v36, %v5455_v23  ;;  %v942_v53 = vsel %vm936_vm2, %v941_v51, %v5457_v24 }
 0x1c4   :  { %v4333_v25 = vpop.f32.mrf.mxu0 }
 0x1c6   :  { %v352_v27 = vpop.f32.mrf.mxu0 }
 0x1c8   :  { %v4368_v26 = vpop.f32.mrf.mxu1 }
 0x1c9   :  { %v433_v29 = vadd.f32 %v4368_v26, %v4333_v25 }
 0x1ca   :  { %v427_v28 = vpop.f32.mrf.mxu1 }
 0x1cb   :  { %v428_v31 = vadd.f32 %v427_v28, %v352_v27  ;;  %v1038_v28 = vld [vmem:[%s6771_s5] sm:$0xff]  ;;  %s6930_s5 = smov 119  }
 0x1e0   :  { %v4385_v32 = vpop.f32.mrf.mxu0 }
 0x1e1   :  { %v528_v33 = vadd.f32 %v4385_v32, %v433_v29 }
 0x1e2   :  { %v518_v34 = vpop.f32.mrf.mxu0 }
 0x1e3   :  { %530 = vst.msk [vmem:[#allocation4 + $0x8] sm:$0xff] %vm128_vm0, %v528_v33  ;;  %v527_v35 = vadd.f32 %v518_v34, %v428_v31 }
 0x1e5   :  { %529 = vst.msk [vmem:[#allocation4] sm:$0xff] %vm128_vm0, %v527_v35 }
 0x1ea   :  { %v930_v37 = vld [vmem:[#allocation4 + $0x8] sm:$0xff] }
 0x1eb   :  { %949 = vrot.lane.b32.xlu0 %v930_v37, %s6867_s12 }
 0x1ec   :  { %v928_v20 = vld [vmem:[#allocation4] sm:$0xff] }
 0x1ef   :  { %943 = vrot.lane.b32.xlu0 %v939_v39, %s6867_s12 }
 0x1f3   :  { %974 = vrot.lane.b32.xlu0 %v5471_v40, %s5142_s11 }
 0x208   :  { %v4420_v41 = vpop.f32.mrf.mxu1 }
 0x20a   :  { %v749_v43 = vpop.f32.mrf.mxu1 }
 0x21c   :  { %v4455_v42 = vpop.f32.mrf.mxu0 }
 0x21d   :  { %v830_v45 = vadd.f32 %v4455_v42, %v4420_v41 }
 0x21e   :  { %v824_v44 = vpop.f32.mrf.mxu0 }
 0x21f   :  { %v825_v47 = vadd.f32 %v824_v44, %v749_v43 }
 0x222   :  { %v4472_v46 = vpop.f32.mrf.mxu1 }
 0x223   :  { %v924_v48 = vadd.f32 %v4472_v46, %v830_v45 }
 0x224   :  { %v914_v49 = vpop.f32.mrf.mxu1 }
 0x225   :  { %927 = vst.msk [vmem:[#allocation4 + $0x48] sm:$0xff] %vm128_vm0, %v924_v48  ;;  %v923_v50 = vadd.f32 %v914_v49, %v825_v47 }
 0x227   :  { %926 = vst.msk [vmem:[#allocation4 + $0x40] sm:$0xff] %vm128_vm0, %v923_v50 }
 0x22c   :  { %v931_v52 = vld [vmem:[#allocation4 + $0x48] sm:$0xff] }
 0x22d   :  { %952 = vrot.lane.b32.xlu1 %v931_v52, %s6867_s12 }
 0x22e   :  { %v929_v22 = vld [vmem:[#allocation4 + $0x40] sm:$0xff] }
 0x231   :  { %945 = vrot.lane.b32.xlu1 %v942_v53, %s6867_s12 }
 0x235   :  { %980 = vrot.lane.b32.xlu1 %v979_v54, %s5142_s11  ;;  %s6865_s11 = smov 65  }
 0x25d   :  { %v950_v55 = vpop.permute.xlu0 %949 }
 0x25e   :  { %v951_v56 = vsel %vm936_vm2, %v950_v55, %v930_v37 }
 0x25f   :  { %955 = vrot.lane.b32.xlu0 %v951_v56, %s6867_s12  ;;  %v5605_v56 = vld [vmem:[#allocation14 + $0x8] sm:$0xff] }
 0x260   :  { %4505 = vmatprep.mubr.f32.mxu0 %v5605_v56 }
 0x261   :  { %v944_v60 = vpop.permute.xlu0 %943 }
 0x262   :  { %v947_v61 = vsel %vm936_vm2, %v944_v60, %v5455_v23 }
 0x265   :  { %v5490_v63 = vpop.permute.xlu0 %974 }
 0x266   :  { %vm976_vm5 = vcmp.eq.s32.totalorder %v947_v61, %v5490_v63 }
 0x29f   :  { %v953_v57 = vpop.permute.xlu1 %952 }
 0x2a0   :  { %v954_v58 = vsel %vm936_vm2, %v953_v57, %v931_v52  ;;  %v5612_v57 = vld [vmem:[#allocation14] sm:$0xff] }
 0x2a1   :  { %957 = vrot.lane.b32.xlu1 %v954_v58, %s6867_s12  ;;  %s6932_s12 = smov 120   ;;  %4540 = vmatprep.mubr.f32.mxu1 %v5612_v57 }
 0x2a3   :  { %v946_v59 = vpop.permute.xlu1 %945 }
 0x2a4   :  { %v948_v3 = vsel %vm936_vm2, %v946_v59, %v5457_v24 }
 0x2a5   :  { %vm977_vm7 = vcmp.eq.s32.totalorder %v948_v3, %v5490_v63 }
 0x2a7   :  { %v5488_v62 = vpop.permute.xlu1 %980 }
 0x2a8   :  { %vm982_vm4 = vcmp.ne.s32.totalorder %v5488_v62, 0 }
 0x2a9   :  { %vm983_vm6 = vmand %vm976_vm5, %vm982_vm4 }
 0x2aa   :  { %vm984_vm8 = vmand %vm977_vm7, %vm982_vm4 }
 0x2d1   :  { %v956_v0 = vpop.permute.xlu0 %955 }
 0x2d2   :  { %v959_v1 = vsel %vm936_vm2, %v956_v0, %v930_v37 }
 0x2d3   :  { %v985_v2 = vsel %vm983_vm6, %v959_v1, 0.0 }
 0x2d4   :  { %989 = vrot.lane.b32.xlu0 %v985_v2, %s6865_s11 }
 0x2d8   :  { %961 = vrot.lane.b32.xlu0 %v5471_v40, %s6918_s18 }
 0x313   :  { %v958_v4 = vpop.permute.xlu1 %957 }
 0x314   :  { %v960_v5 = vsel %vm936_vm2, %v958_v4, %v931_v52 }
 0x315   :  { %v986_v7 = vsel %vm984_vm8, %v960_v5, 0.0 }
 0x316   :  { %991 = vrot.lane.b32.xlu1 %v986_v7, %s6865_s11  ;;  %s6935_s11 = smov 117  }
 0x31a   :  { %967 = vrot.lane.b32.xlu1 %v966_v8, %s6918_s18 }
 0x346   :  { %v990_v9 = vpop.permute.xlu0 %989 }
 0x347   :  { %v995_v10 = vsel %vm972_vm10, %v930_v37, %v990_v9 }
 0x348   :  { %999 = vrot.lane.b32.xlu0 %v995_v10, %s6918_s18 }
 0x34a   :  { %v5518_v13 = vpop.permute.xlu0 %961 }
 0x34b   :  { %vm963_vm13 = vcmp.eq.s32.totalorder %v947_v61, %v5518_v13  ;;  %vm964_vm15 = vcmp.eq.s32.totalorder %v948_v3, %v5518_v13 }
 0x388   :  { %v992_v11 = vpop.permute.xlu1 %991 }
 0x389   :  { %v996_v6 = vsel %vm973_vm11, %v931_v52, %v992_v11 }
 0x38a   :  { %1001 = vrot.lane.b32.xlu1 %v996_v6, %s6918_s18 }
 0x38c   :  { %v5516_v12 = vpop.permute.xlu1 %967 }
 0x38d   :  { %vm969_vm12 = vcmp.ne.s32.totalorder %v5516_v12, 0 }
 0x38e   :  { %vm970_vm14 = vmand %vm963_vm13, %vm969_vm12 }
 0x38f   :  { %vm971_vm3 = vmand %vm964_vm15, %vm969_vm12 }
 0x3ba   :  { %v1000_v14 = vpop.permute.xlu0 %999 }
 0x3bb   :  { %v1005_v15 = vsel %vm970_vm14, %v959_v1, %v1000_v14 }
 0x3bc   :  { %1009 = vrot.lane.b32.xlu0 %v1005_v15, %s6913_s26 }
 0x3fc   :  { %v1002_v16 = vpop.permute.xlu1 %1001 }
 0x3fd   :  { %v1006_v17 = vsel %vm971_vm3, %v960_v5, %v1002_v16 }
 0x3fe   :  { %1011 = vrot.lane.b32.xlu1 %v1006_v17, %s6913_s26 }
 0x402   :  { %1049 = vperm.xlu1 %4944, %v1046_v18  }
 0x42e   :  { %v1010_v19 = vpop.permute.xlu0 %1009 }
 0x42f   :  { %v1015_v21 = vadd.f32 %v1010_v19, %v928_v20  ;;  %v5699_v19 = vld [vmem:[#allocation11] sm:$0xff] }
 0x430   :  { %vm1889_vm9 = vcmp.eq.s32.totalorder %v5699_v19, %v5471_v40 }
 0x431   :  { %v1017_v25 = vsel %vm128_vm0, %v1015_v21, 0.0 }
 0x470   :  { %v1012_v23 = vpop.permute.xlu1 %1011 }
 0x471   :  { %v1016_v24 = vadd.f32 %v1012_v23, %v929_v22 }
 0x473   :  { %v1018_v26 = vsel %vm128_vm0, %v1016_v24, 0.0 }
 0x474   :  { %v1019_v27 = vadd.f32 %v1018_v26, %v1017_v25  ;;  %v5711_v26 = vld [vmem:[#allocation11 + $0x8] sm:$0xff] }
 0x475   :  { %vm1890_vm10 = vcmp.eq.s32.totalorder %v5711_v26, %v5471_v40 }
 0x476   :  { %1020 = vadd.xlane.f32.xlu0 %v1019_v27 }
 0x47d   :  { %v1050_v38 = vpop.permute.xlu1 %1049 }
 0x48c   :  { %1041 = vperm.xlu0 %4943, %v1038_v28  }
 0x4ff   :  { %v1021_v29 = vpop.xlane.xlu0 %1020 }
 0x500   :  { %v1023_v30 = vmul.f32 0.0078125, %v1021_v29 }
 0x502   :  { %v1024_v31 = vsub.f32 %v1015_v21, %v1023_v30  ;;  %v1025_v32 = vsub.f32 %v1016_v24, %v1023_v30 }
 0x504   :  { %v1026_v33 = vmul.f32 %v1024_v31, %v1024_v31  ;;  %v1027_v34 = vmul.f32 %v1025_v32, %v1025_v32 }
 0x506   :  { %v1028_v35 = vsel %vm128_vm0, %v1026_v33, 0.0  ;;  %v1029_v36 = vsel %vm128_vm0, %v1027_v34, 0.0 }
 0x507   :  { %v1030_v37 = vadd.f32 %v1029_v36, %v1028_v35  ;;  %v1042_v44 = vpop.permute.xlu0 %1041  ;;  %v5715_v35 = vld [vmem:[#allocation14 + $0x18] sm:$0xff] }
 0x509   :  { %1031 = vadd.xlane.f32.xlu1 %v1030_v37 }
 0x592   :  { %v1032_v39 = vpop.xlane.xlu1 %1031 }
 0x593   :  { %v1033_v41 = vmul.f32 0.0078125, %v1032_v39  ;;  %v5721_v39 = vld [vmem:[#allocation14 + $0x10] sm:$0xff] }
 0x595   :  { %v1034_v42 = vadd.f32 1e-05, %v1033_v41 }
 0x597   :  { %4945 = vrsqrt.f32 %v1034_v42 }
 0x5a4   :  { %v4946_v43 = vpop.eup %4945 }
 0x5a5   :  { %v1036_v45 = vmul.f32 %v4946_v43, %v1024_v31  ;;  %v1037_v46 = vmul.f32 %v4946_v43, %v1025_v32 }
 0x5a7   :  { %v1044_v47 = vmul.f32 %v1042_v44, %v1036_v45  ;;  %v1045_v48 = vmul.f32 %v1042_v44, %v1037_v46 }
 0x5a9   :  { %v1052_v49 = vadd.f32 %v1050_v38, %v1044_v47  ;;  %v1053_v50 = vadd.f32 %v1050_v38, %v1045_v48  ;;  %v5718_v38 = vld [vmem:[#allocation14 + $0x20] sm:$0xff] }
 0x5ab   :  { %v1054_v51 = vmax.f32 %v1052_v49, 0.0  ;;  %v1055_v52 = vmax.f32 %v1053_v50, 0.0  ;;  %v5726_v49 = vld [vmem:[#allocation14 + $0x28] sm:$0xff] }
 0x5ad   :  { %1056 = vst.msk [vmem:[#allocation5] sm:$0xff] %vm128_vm0, %v1054_v51  ;;  %1057 = vst.msk [vmem:[#allocation5 + $0x8] sm:$0xff] %vm128_vm0, %v1055_v52 }
 0x5b4   :  { %v1058_v53 = vld [vmem:[#allocation5] sm:$0xff]  ;;  %v1061_v54 = vld [vmem:[#allocation5 + $0x8] sm:$0xff] }
 0x5b5   :  { %1059 = vst.msk [vmem:[#allocation2] sm:$0xff] %vm128_vm0, %v1058_v53  ;;  %1062 = vst.msk [vmem:[#allocation2 + $0x8] sm:$0xff] %vm128_vm0, %v1061_v54 }
 0x5bc   :  { %v5543_v55 = vld [vmem:[#allocation2] sm:$0xff]  ;;  %v5627_v58 = vld [vmem:[#allocation2 + $0x8] sm:$0xff] }
 0x5bd   :  { %1146 = vrot.lane.b32.xlu0 %v5543_v55, %s6930_s5  ;;  %1155 = vrot.lane.b32.xlu1 %v5543_v55, %s6931_s6  ;;  %s6941_s5 = smov 6  }
 0x5c1   :  { %1143 = vrot.lane.b32.xlu0 %v5543_v55, %s6932_s12  ;;  %1109 = vrot.lane.b32.xlu1 %v5543_v55, %s6933_s13  ;;  %s6940_s12 = smov 124  }
 0x5c5   :  { %1140 = vrot.lane.b32.xlu0 %v5543_v55, %s6934_s14  ;;  %1152 = vrot.lane.b32.xlu1 %v5543_v55, %s6935_s11 }
 0x5c9   :  { %1137 = vrot.lane.b32.xlu0 %v5543_v55, %s6936_s3  ;;  %1106 = vrot.lane.b32.xlu1 %v5543_v55, %s6937_s10 }
 0x5cd   :  { %1134 = vrot.lane.b32.xlu0 %v5543_v55, %s6938_s9  ;;  %1149 = vrot.lane.b32.xlu1 %v5543_v55, %s6939_s8 }
 0x5d1   :  { %1131 = vrot.lane.b32.xlu0 %v5543_v55, %s6940_s12  ;;  %1103 = vrot.lane.b32.xlu1 %v5543_v55, %s6941_s5 }
 0x5d5   :  { %1128 = vrot.lane.b32.xlu0 %v5543_v55, %s6909_s22  ;;  %1100 = vrot.lane.b32.xlu1 %v5543_v55, %s6910_s4 }
 0x5d9   :  { %1125 = vrot.lane.b32.xlu0 %v5543_v55, %s6911_s24  ;;  %1097 = vrot.lane.b32.xlu1 %v5543_v55, %s6912_s21 }
 0x5dd   :  { %1122 = vrot.lane.b32.xlu0 %v5543_v55, %s6913_s26  ;;  %1094 = vrot.lane.b32.xlu1 %v5543_v55, %s6914_s20 }
 0x5e1   :  { %1073 = vrot.lane.b32.xlu0 %v5543_v55, %s6922_s19  ;;  %1091 = vrot.lane.b32.xlu1 %v5543_v55, %s6916_s25  ;;  %s6942_s19 = smov 110  }
 0x5e5   :  { %1070 = vrot.lane.b32.xlu0 %v5543_v55, %s6923_s0  ;;  %1088 = vrot.lane.b32.xlu1 %v5543_v55, %s6915_s29  ;;  %s6943_s0 = smov 111  }
 0x5e9   :  { %1067 = vrot.lane.b32.xlu0 %v5543_v55, %s6924_s27  ;;  %1085 = vrot.lane.b32.xlu1 %v5543_v55, %s6917_s1  ;;  %s6945_s27 = smov 3  }
 0x5ed   :  { %1064 = vrot.lane.b32.xlu0 %v5543_v55, %s6926_s17  ;;  %1082 = vrot.lane.b32.xlu1 %v5543_v55, %s6919_s2  ;;  %s6944_s17 = smov 2  }
 0x5f1   :  { %1173 = vrot.lane.b32.xlu0 %v5543_v55, %s6942_s19  ;;  %1079 = vrot.lane.b32.xlu1 %v5543_v55, %s6920_s7 }
 0x5f5   :  { %1170 = vrot.lane.b32.xlu0 %v5543_v55, %s6943_s0  ;;  %1076 = vrot.lane.b32.xlu1 %v5543_v55, %s6921_s28  ;;  %s6946_s28 = smov 109  }
 0x5f9   :  { %1167 = vrot.lane.b32.xlu0 %v5543_v55, %s6925_s30  ;;  %1118 = vrot.lane.b32.xlu1 %v5543_v55, %s6918_s18 }
 0x5fd   :  { %1164 = vrot.lane.b32.xlu0 %v5543_v55, %s6927_s23  ;;  %1115 = vrot.lane.b32.xlu1 %v5543_v55, %s6944_s17 }
 0x601   :  { %1161 = vrot.lane.b32.xlu0 %v5543_v55, %s6928_s16  ;;  %1112 = vrot.lane.b32.xlu1 %v5543_v55, %s6945_s27 }
 0x605   :  { %1158 = vrot.lane.b32.xlu0 %v5543_v55, %s6929_s15  ;;  %1176 = vrot.lane.b32.xlu1 %v5543_v55, %s6946_s28  ;;  %s6947_s15 = smov 119  }
 0x609   :  { %1505 = vrot.lane.b32.xlu0 %v5627_v58, %s6933_s13  ;;  %1551 = vrot.lane.b32.xlu1 %v5627_v58, %s6931_s6  ;;  %s6948_s6 = smov 120  }
 0x60d   :  { %1502 = vrot.lane.b32.xlu0 %v5627_v58, %s6937_s10  ;;  %1548 = vrot.lane.b32.xlu1 %v5627_v58, %s6935_s11 }
 0x611   :  { %1499 = vrot.lane.b32.xlu0 %v5627_v58, %s6941_s5  ;;  %1545 = vrot.lane.b32.xlu1 %v5627_v58, %s6939_s8 }
 0x615   :  { %1496 = vrot.lane.b32.xlu0 %v5627_v58, %s6910_s4  ;;  %1542 = vrot.lane.b32.xlu1 %v5627_v58, %s6947_s15 }
 0x619   :  { %1493 = vrot.lane.b32.xlu0 %v5627_v58, %s6912_s21  ;;  %1539 = vrot.lane.b32.xlu1 %v5627_v58, %s6948_s6 }
 0x61d   :  { %1490 = vrot.lane.b32.xlu0 %v5627_v58, %s6914_s20  ;;  %1536 = vrot.lane.b32.xlu1 %v5627_v58, %s6934_s14 }
 0x621   :  { %1487 = vrot.lane.b32.xlu0 %v5627_v58, %s6916_s25  ;;  %1533 = vrot.lane.b32.xlu1 %v5627_v58, %s6936_s3 }
 0x625   :  { %1514 = vrot.lane.b32.xlu0 %v5627_v58, %s6918_s18  ;;  %1530 = vrot.lane.b32.xlu1 %v5627_v58, %s6938_s9 }
 0x629   :  { %1511 = vrot.lane.b32.xlu0 %v5627_v58, %s6944_s17  ;;  %1527 = vrot.lane.b32.xlu1 %v5627_v58, %s6940_s12  ;;  %s6958_s17 = sld [smem:[#allocation24_spill]] }
 0x62d   :  { %1508 = vrot.lane.b32.xlu0 %v5627_v58, %s6945_s27  ;;  %1524 = vrot.lane.b32.xlu1 %v5627_v58, %s6909_s22  ;;  %s6955_s27 = smov 115  }
 0x62f   :  { %v1147_v59 = vpop.permute.xlu0 %1146  ;;  %v1156_v60 = vpop.permute.xlu1 %1155 }
 0x630   :  { %4473 = vmatprep.subr.mxu0 %v1156_v60 }
 0x631   :  { %1572 = vrot.lane.b32.xlu0 %v5627_v58, %s6946_s28  ;;  %1521 = vrot.lane.b32.xlu1 %v5627_v58, %s6911_s24  ;;  %s6954_s28 = smov 19  }
 0x632   :  { %4474 = vmatpush3.msra.mxu0 %v1156_v60 }
 0x633   :  { %v1144_v61 = vpop.permute.xlu0 %1143  ;;  %v1110_v0 = vpop.permute.xlu1 %1109 }
 0x634   :  { %4508 = vmatprep.subr.mxu1 %v1110_v0 }
 0x635   :  { %1569 = vrot.lane.b32.xlu0 %v5627_v58, %s6942_s19  ;;  %1518 = vrot.lane.b32.xlu1 %v5627_v58, %s6913_s26  ;;  %s6953_s19 = smov 64  }
 0x636   :  { %4509 = vmatpush3.msra.mxu1 %v1110_v0 }
 0x637   :  { %v1141_v1 = vpop.permute.xlu0 %1140  ;;  %v1153_v2 = vpop.permute.xlu1 %1152 }
 0x638   :  { %4475 = vmatprep.subr.mxu0 %v1153_v2 }
 0x639   :  { %1566 = vrot.lane.b32.xlu0 %v5627_v58, %s6943_s0  ;;  %1484 = vrot.lane.b32.xlu1 %v5627_v58, %s6915_s29  ;;  %s6952_s0 = smov 18  }
 0x63a   :  { %4476 = vmatpush3.msra.mxu0 %v1153_v2 }
 0x63b   :  { %v1138_v3 = vpop.permute.xlu0 %1137  ;;  %v1107_v4 = vpop.permute.xlu1 %1106 }
 0x63c   :  { %4510 = vmatprep.subr.mxu1 %v1107_v4 }
 0x63d   :  { %1563 = vrot.lane.b32.xlu0 %v5627_v58, %s6925_s30  ;;  %1481 = vrot.lane.b32.xlu1 %v5627_v58, %s6917_s1  ;;  %s6951_s30 = smov 17  }
 0x63e   :  { %4511 = vmatpush3.msra.mxu1 %v1107_v4 }
 0x63f   :  { %v1135_v5 = vpop.permute.xlu0 %1134  ;;  %v1150_v7 = vpop.permute.xlu1 %1149 }
 0x640   :  { %4477 = vmatprep.subr.mxu0 %v1150_v7 }
 0x641   :  { %1560 = vrot.lane.b32.xlu0 %v5627_v58, %s6927_s23  ;;  %1478 = vrot.lane.b32.xlu1 %v5627_v58, %s6919_s2  ;;  %s6949_s23 = smov 15  }
 0x642   :  { %4478 = vmatpush3.msra.mxu0 %v1150_v7 }
 0x643   :  { %4479 = vmatprep.subr.mxu0 %v1147_v59  ;;  %v1132_v8 = vpop.permute.xlu0 %1131  ;;  %v1104_v9 = vpop.permute.xlu1 %1103 }
 0x644   :  { %4480 = vmatpush3.msra.mxu0 %v1147_v59  ;;  %4512 = vmatprep.subr.mxu1 %v1104_v9 }
 0x645   :  { %4481 = vmatprep.subr.mxu0 %v1144_v61  ;;  %1557 = vrot.lane.b32.xlu0 %v5627_v58, %s6928_s16  ;;  %s6950_s16 = smov 16  }
 0x646   :  { %1475 = vrot.lane.b32.xlu1 %v5627_v58, %s6920_s7  ;;  %4482 = vmatpush3.msra.mxu0 %v1144_v61 }
 0x647   :  { %4513 = vmatpush3.msra.mxu1 %v1104_v9  ;;  %4483 = vmatprep.subr.mxu0 %v1141_v1  ;;  %v1129_v10 = vpop.permute.xlu0 %1128  ;;  %v1101_v11 = vpop.permute.xlu1 %1100 }
 0x648   :  { %4484 = vmatpush3.msra.mxu0 %v1141_v1  ;;  %4514 = vmatprep.subr.mxu1 %v1101_v11 }
 0x649   :  { %4485 = vmatprep.subr.mxu0 %v1138_v3  ;;  %4515 = vmatpush3.msra.mxu1 %v1101_v11 }
 0x64a   :  { %1472 = vrot.lane.b32.xlu1 %v5627_v58, %s6949_s23  ;;  %4486 = vmatpush3.msra.mxu0 %v1138_v3 }
 0x64b   :  { %4487 = vmatprep.subr.mxu0 %v1135_v5  ;;  %v1126_v6 = vpop.permute.xlu0 %1125  ;;  %v1098_v14 = vpop.permute.xlu1 %1097  ;;  %1861 = vrot.lane.b32.xlu0 %v5699_v19, %s6953_s19 }
 0x64c   :  { %4488 = vmatpush3.msra.mxu0 %v1135_v5  ;;  %4516 = vmatprep.subr.mxu1 %v1098_v14 }
 0x64d   :  { %4489 = vmatprep.subr.mxu0 %v1132_v8  ;;  %4517 = vmatpush3.msra.mxu1 %v1098_v14 }
 0x64e   :  { %1469 = vrot.lane.b32.xlu1 %v5627_v58, %s6950_s16  ;;  %4490 = vmatpush3.msra.mxu0 %v1132_v8 }
 0x64f   :  { %4491 = vmatprep.subr.mxu0 %v1129_v10  ;;  %v1123_v15 = vpop.permute.xlu0 %1122  ;;  %v1095_v16 = vpop.permute.xlu1 %1094 }
 0x650   :  { %4492 = vmatpush3.msra.mxu0 %v1129_v10  ;;  %4518 = vmatprep.subr.mxu1 %v1095_v16 }
 0x651   :  { %4493 = vmatprep.subr.mxu0 %v1126_v6  ;;  %4519 = vmatpush3.msra.mxu1 %v1095_v16 }
 0x652   :  { %1466 = vrot.lane.b32.xlu1 %v5627_v58, %s6951_s30  ;;  %4494 = vmatpush3.msra.mxu0 %v1126_v6  ;;  %s6967_s30 = smov 110  }
 0x653   :  { %4495 = vmatprep.subr.mxu0 %v1123_v15  ;;  %v1074_v17 = vpop.permute.xlu0 %1073  ;;  %v1092_v18 = vpop.permute.xlu1 %1091 }
 0x654   :  { %4496 = vmatpush3.msra.mxu0 %v1123_v15  ;;  %4520 = vmatprep.subr.mxu1 %v1092_v18 }
 0x655   :  { %4497 = vmatprep.subr.mxu0 %v5543_v55  ;;  %4521 = vmatpush3.msra.mxu1 %v1092_v18 }
 0x656   :  { %1463 = vrot.lane.b32.xlu1 %v5627_v58, %s6952_s0  ;;  %4498 = vmatpush3.msra.mxu0 %v5543_v55  ;;  %s6962_s0 = smov 17  }
 0x657   :  { %v1071_v20 = vpop.permute.xlu0 %1070  ;;  %v1089_v21 = vpop.permute.xlu1 %1088 }
 0x658   :  { %4522 = vmatprep.subr.mxu1 %v1089_v21 }
 0x659   :  { %4523 = vmatpush3.msra.mxu1 %v1089_v21 }
 0x65a   :  { %1460 = vrot.lane.b32.xlu1 %v5627_v58, %s6954_s28  ;;  %s6957_s28 = sld [smem:[#allocation23_spill]] }
 0x65b   :  { %v1068_v22 = vpop.permute.xlu0 %1067  ;;  %v1086_v23 = vpop.permute.xlu1 %1085 }
 0x65c   :  { %4524 = vmatprep.subr.mxu1 %v1086_v23 }
 0x65d   :  { %4525 = vmatpush3.msra.mxu1 %v1086_v23 }
 0x65e   :  { %1554 = vrot.lane.b32.xlu1 %v5627_v58, %s6955_s27  ;;  %s6956_s27 = smov 65  }
 0x65f   :  { %v1065_v24 = vpop.permute.xlu0 %1064  ;;  %v1083_v25 = vpop.permute.xlu1 %1082 }
 0x660   :  { %4526 = vmatprep.subr.mxu1 %v1083_v25 }
 0x661   :  { %4527 = vmatpush3.msra.mxu1 %v1083_v25 }
 0x662   :  { %1864 = vrot.lane.b32.xlu1 %v5711_v26, %s6953_s19 }
 0x663   :  { %v1174_v27 = vpop.permute.xlu0 %1173  ;;  %v1080_v28 = vpop.permute.xlu1 %1079 }
 0x664   :  { %4528 = vmatprep.subr.mxu1 %v1080_v28 }
 0x665   :  { %4529 = vmatpush3.msra.mxu1 %v1080_v28 }
 0x667   :  { %v1171_v29 = vpop.permute.xlu0 %1170  ;;  %v1077_v30 = vpop.permute.xlu1 %1076 }
 0x668   :  { %4530 = vmatprep.subr.mxu1 %v1077_v30 }
 0x669   :  { %4531 = vmatpush3.msra.mxu1 %v1077_v30 }
 0x66a   :  { %4532 = vmatprep.subr.mxu1 %v1074_v17 }
 0x66b   :  { %v1168_v31 = vpop.permute.xlu0 %1167  ;;  %4533 = vmatpush3.msra.mxu1 %v1074_v17  ;;  %v1119_v32 = vpop.permute.xlu1 %1118 }
 0x66c   :  { %4499 = vmatprep.subr.mxu0 %v1119_v32  ;;  %4534 = vmatprep.subr.mxu1 %v1071_v20 }
 0x66d   :  { %4500 = vmatpush3.msra.mxu0 %v1119_v32  ;;  %4535 = vmatpush3.msra.mxu1 %v1071_v20 }
 0x66e   :  { %4536 = vmatprep.subr.mxu1 %v1068_v22 }
 0x66f   :  { %v1165_v33 = vpop.permute.xlu0 %1164  ;;  %4537 = vmatpush3.msra.mxu1 %v1068_v22  ;;  %v1116_v34 = vpop.permute.xlu1 %1115 }
 0x670   :  { %4501 = vmatprep.subr.mxu0 %v1116_v34  ;;  %4538 = vmatprep.subr.mxu1 %v1065_v24 }
 0x671   :  { %4502 = vmatpush3.msra.mxu0 %v1116_v34  ;;  %4539 = vmatpush3.msra.mxu1 %v1065_v24 }
 0x672   :  { %4541 = vmatmul.mubr.f32.vlgmr.msra.gmra.mxu1 %v5715_v35 }
 0x673   :  { %v1162_v36 = vpop.permute.xlu0 %1161  ;;  %v1113_v37 = vpop.permute.xlu1 %1112  ;;  %4592 = vmatprep.mubr.f32.mxu1 %v5605_v56 }
 0x674   :  { %4503 = vmatprep.subr.mxu0 %v1113_v37 }
 0x675   :  { %4504 = vmatpush3.msra.mxu0 %v1113_v37 }
 0x676   :  { %4506 = vmatmul.mubr.f32.vlgmr.msra.gmra.mxu0 %v5718_v38 }
 0x677   :  { %v1159_v41 = vpop.permute.xlu0 %1158  ;;  %v1177_v42 = vpop.permute.xlu1 %1176  ;;  %4557 = vmatprep.mubr.msk.f32.mxu0 %vm445_vm1, %v5721_v39 }
 0x678   :  { %4543 = vmatprep.subr.mxu0 %v1177_v42 }
 0x679   :  { %4544 = vmatpush3.msra.mxu0 %v1177_v42 }
 0x67a   :  { %4545 = vmatprep.subr.mxu0 %v1174_v27 }
 0x67b   :  { %v1506_v43 = vpop.permute.xlu0 %1505  ;;  %4546 = vmatpush3.msra.mxu0 %v1174_v27  ;;  %v1552_v44 = vpop.permute.xlu1 %1551 }
 0x67c   :  { %4547 = vmatprep.subr.mxu0 %v1171_v29  ;;  %4560 = vmatprep.subr.mxu1 %v1552_v44 }
 0x67d   :  { %4548 = vmatpush3.msra.mxu0 %v1171_v29  ;;  %4561 = vmatpush3.msra.mxu1 %v1552_v44 }
 0x67e   :  { %4549 = vmatprep.subr.mxu0 %v1168_v31 }
 0x67f   :  { %v1503_v45 = vpop.permute.xlu0 %1502  ;;  %4550 = vmatpush3.msra.mxu0 %v1168_v31  ;;  %v1549_v46 = vpop.permute.xlu1 %1548 }
 0x680   :  { %4551 = vmatprep.subr.mxu0 %v1165_v33  ;;  %4562 = vmatprep.subr.mxu1 %v1549_v46 }
 0x681   :  { %4552 = vmatpush3.msra.mxu0 %v1165_v33  ;;  %4563 = vmatpush3.msra.mxu1 %v1549_v46 }
 0x682   :  { %4553 = vmatprep.subr.mxu0 %v1162_v36 }
 0x683   :  { %v1500_v47 = vpop.permute.xlu0 %1499  ;;  %4554 = vmatpush3.msra.mxu0 %v1162_v36  ;;  %v1546_v48 = vpop.permute.xlu1 %1545 }
 0x684   :  { %4555 = vmatprep.subr.mxu0 %v1159_v41  ;;  %4564 = vmatprep.subr.mxu1 %v1546_v48 }
 0x685   :  { %4556 = vmatpush3.msra.mxu0 %v1159_v41  ;;  %4565 = vmatpush3.msra.mxu1 %v1546_v48 }
 0x686   :  { %4558 = vmatmul.mubr.msk.f32.vlgmr.msra.gmra.mxu0 %vm445_vm1, %v5726_v49  ;;  %4595 = vmatprep.subr.mxu0 %v1506_v43 }
 0x687   :  { %v1497_v50 = vpop.permute.xlu0 %1496  ;;  %4596 = vmatpush3.msra.mxu0 %v1506_v43  ;;  %v1543_v51 = vpop.permute.xlu1 %1542  ;;  %4627 = vmatprep.mubr.f32.mxu0 %v5612_v57 }
 0x688   :  { %4566 = vmatprep.subr.mxu1 %v1543_v51  ;;  %4597 = vmatprep.subr.mxu0 %v1503_v45 }
 0x689   :  { %4567 = vmatpush3.msra.mxu1 %v1543_v51  ;;  %4598 = vmatpush3.msra.mxu0 %v1503_v45 }
 0x68a   :  { %4599 = vmatprep.subr.mxu0 %v1500_v47 }
 0x68b   :  { %v1494_v52 = vpop.permute.xlu0 %1493  ;;  %4600 = vmatpush3.msra.mxu0 %v1500_v47  ;;  %v1540_v53 = vpop.permute.xlu1 %1539 }
 0x68c   :  { %4568 = vmatprep.subr.mxu1 %v1540_v53  ;;  %4601 = vmatprep.subr.mxu0 %v1497_v50 }
 0x68d   :  { %4569 = vmatpush3.msra.mxu1 %v1540_v53  ;;  %4602 = vmatpush3.msra.mxu0 %v1497_v50 }
 0x68e   :  { %4603 = vmatprep.subr.mxu0 %v1494_v52 }
 0x68f   :  { %v1491_v54 = vpop.permute.xlu0 %1490  ;;  %4604 = vmatpush3.msra.mxu0 %v1494_v52  ;;  %v1537_v55 = vpop.permute.xlu1 %1536 }
 0x690   :  { %4570 = vmatprep.subr.mxu1 %v1537_v55  ;;  %4605 = vmatprep.subr.mxu0 %v1491_v54 }
 0x691   :  { %4571 = vmatpush3.msra.mxu1 %v1537_v55  ;;  %4606 = vmatpush3.msra.mxu0 %v1491_v54 }
 0x693   :  { %v1488_v56 = vpop.permute.xlu0 %1487  ;;  %v1534_v57 = vpop.permute.xlu1 %1533 }
 0x694   :  { %4572 = vmatprep.subr.mxu1 %v1534_v57  ;;  %4607 = vmatprep.subr.mxu0 %v1488_v56 }
 0x695   :  { %4573 = vmatpush3.msra.mxu1 %v1534_v57  ;;  %4608 = vmatpush3.msra.mxu0 %v1488_v56 }
 0x697   :  { %v1515_v59 = vpop.permute.xlu0 %1514  ;;  %v1531_v60 = vpop.permute.xlu1 %1530 }
 0x698   :  { %4574 = vmatprep.subr.mxu1 %v1531_v60 }
 0x699   :  { %4575 = vmatpush3.msra.mxu1 %v1531_v60 }
 0x69b   :  { %v1512_v61 = vpop.permute.xlu0 %1511  ;;  %v1528_v0 = vpop.permute.xlu1 %1527 }
 0x69c   :  { %4576 = vmatprep.subr.mxu1 %v1528_v0 }
 0x69d   :  { %4577 = vmatpush3.msra.mxu1 %v1528_v0 }
 0x69f   :  { %v1509_v1 = vpop.permute.xlu0 %1508  ;;  %v1525_v2 = vpop.permute.xlu1 %1524 }
 0x6a0   :  { %4578 = vmatprep.subr.mxu1 %v1525_v2 }
 0x6a1   :  { %4579 = vmatpush3.msra.mxu1 %v1525_v2 }
 0x6a3   :  { %v1573_v3 = vpop.permute.xlu0 %1572  ;;  %v1522_v4 = vpop.permute.xlu1 %1521 }
 0x6a4   :  { %4580 = vmatprep.subr.mxu1 %v1522_v4 }
 0x6a5   :  { %4581 = vmatpush3.msra.mxu1 %v1522_v4 }
 0x6a7   :  { %v1570_v5 = vpop.permute.xlu0 %1569  ;;  %v1519_v7 = vpop.permute.xlu1 %1518 }
 0x6a8   :  { %4582 = vmatprep.subr.mxu1 %v1519_v7 }
 0x6a9   :  { %4583 = vmatpush3.msra.mxu1 %v1519_v7 }
 0x6aa   :  { %4584 = vmatprep.subr.mxu1 %v5627_v58 }
 0x6ab   :  { %v1567_v8 = vpop.permute.xlu0 %1566  ;;  %4585 = vmatpush3.msra.mxu1 %v5627_v58  ;;  %v1485_v9 = vpop.permute.xlu1 %1484 }
 0x6ac   :  { %4586 = vmatprep.subr.mxu1 %v1515_v59  ;;  %4609 = vmatprep.subr.mxu0 %v1485_v9 }
 0x6ad   :  { %4587 = vmatpush3.msra.mxu1 %v1515_v59  ;;  %4610 = vmatpush3.msra.mxu0 %v1485_v9 }
 0x6ae   :  { %4588 = vmatprep.subr.mxu1 %v1512_v61 }
 0x6af   :  { %v1564_v10 = vpop.permute.xlu0 %1563  ;;  %4589 = vmatpush3.msra.mxu1 %v1512_v61  ;;  %v1482_v11 = vpop.permute.xlu1 %1481 }
 0x6b0   :  { %4590 = vmatprep.subr.mxu1 %v1509_v1  ;;  %4611 = vmatprep.subr.mxu0 %v1482_v11 }
 0x6b1   :  { %4591 = vmatpush3.msra.mxu1 %v1509_v1  ;;  %4612 = vmatpush3.msra.mxu0 %v1482_v11 }
 0x6b2   :  { %4630 = vmatprep.subr.mxu1 %v1573_v3  ;;  %4593 = vmatmul.mubr.f32.vlgmr.msra.gmra.mxu1 %v5718_v38 }
 0x6b3   :  { %4631 = vmatpush3.msra.mxu1 %v1573_v3  ;;  %v1479_v6 = vpop.permute.xlu1 %1478  ;;  %4644 = vmatprep.mubr.msk.f32.mxu1 %vm445_vm1, %v5721_v39  ;;  %v1561_v58 = vpop.permute.xlu0 %1560 }
 0x6b4   :  { %4613 = vmatprep.subr.mxu0 %v1479_v6  ;;  %4632 = vmatprep.subr.mxu1 %v1570_v5 }
 0x6b5   :  { %4614 = vmatpush3.msra.mxu0 %v1479_v6  ;;  %4633 = vmatpush3.msra.mxu1 %v1570_v5 }
 0x6b6   :  { %4634 = vmatprep.subr.mxu1 %v1567_v8 }
 0x6b7   :  { %4635 = vmatpush3.msra.mxu1 %v1567_v8  ;;  %v1558_v15 = vpop.permute.xlu0 %1557 }
 0x6b8   :  { %v1476_v14 = vpop.permute.xlu1 %1475  ;;  %4636 = vmatprep.subr.mxu1 %v1564_v10 }
 0x6b9   :  { %4615 = vmatprep.subr.mxu0 %v1476_v14  ;;  %4637 = vmatpush3.msra.mxu1 %v1564_v10 }
 0x6ba   :  { %4616 = vmatpush3.msra.mxu0 %v1476_v14  ;;  %4638 = vmatprep.subr.mxu1 %v1561_v58 }
 0x6bb   :  { %4639 = vmatpush3.msra.mxu1 %v1561_v58 }
 0x6bc   :  { %v1473_v16 = vpop.permute.xlu1 %1472  ;;  %4640 = vmatprep.subr.mxu1 %v1558_v15 }
 0x6bd   :  { %4617 = vmatprep.subr.mxu0 %v1473_v16  ;;  %4641 = vmatpush3.msra.mxu1 %v1558_v15  ;;  %v1862_v34 = vpop.permute.xlu0 %1861 }
 0x6be   :  { %4618 = vmatpush3.msra.mxu0 %v1473_v16  ;;  %v1863_v36 = vsel %vm936_vm2, %v1862_v34, %v5699_v19 }
 0x6c0   :  { %v1470_v17 = vpop.permute.xlu1 %1469 }
 0x6c1   :  { %4619 = vmatprep.subr.mxu0 %v1470_v17 }
 0x6c2   :  { %4620 = vmatpush3.msra.mxu0 %v1470_v17 }
 0x6c4   :  { %v1467_v18 = vpop.permute.xlu1 %1466 }
 0x6c5   :  { %4621 = vmatprep.subr.mxu0 %v1467_v18 }
 0x6c6   :  { %4622 = vmatpush3.msra.mxu0 %v1467_v18 }
 0x6c8   :  { %v1464_v20 = vpop.permute.xlu1 %1463 }
 0x6c9   :  { %4623 = vmatprep.subr.mxu0 %v1464_v20 }
 0x6ca   :  { %4624 = vmatpush3.msra.mxu0 %v1464_v20 }
 0x6cc   :  { %v1461_v21 = vpop.permute.xlu1 %1460 }
 0x6cd   :  { %4625 = vmatprep.subr.mxu0 %v1461_v21 }
 0x6ce   :  { %4626 = vmatpush3.msra.mxu0 %v1461_v21  ;;  %v1947_v21 = vld [vmem:[%s6957_s28] sm:$0xff]  ;;  %s6966_s28 = smov 19  }
 0x6cf   :  { %4628 = vmatmul.mubr.f32.vlgmr.msra.gmra.mxu0 %v5715_v35 }
 0x6d0   :  { %v1555_v22 = vpop.permute.xlu1 %1554 }
 0x6d1   :  { %4642 = vmatprep.subr.mxu1 %v1555_v22 }
 0x6d2   :  { %4643 = vmatpush3.msra.mxu1 %v1555_v22 }
 0x6d3   :  { %4645 = vmatmul.mubr.msk.f32.vlgmr.msra.gmra.mxu1 %vm445_vm1, %v5726_v49 }
 0x6d4   :  { %v1865_v48 = vpop.permute.xlu1 %1864 }
 0x6d5   :  { %v1866_v50 = vsel %vm936_vm2, %v1865_v48, %v5711_v26 }
 0x732   :  { %v4542_v24 = vpop.f32.mrf.mxu1 }
 0x734   :  { %v1356_v27 = vpop.f32.mrf.mxu1 }
 0x736   :  { %v4507_v23 = vpop.f32.mrf.mxu0 }
 0x737   :  { %v1362_v28 = vadd.f32 %v4542_v24, %v4507_v23 }
 0x738   :  { %v1281_v25 = vpop.f32.mrf.mxu0 }
 0x739   :  { %v1357_v29 = vadd.f32 %v1356_v27, %v1281_v25 }
 0x746   :  { %v4559_v30 = vpop.f32.mrf.mxu0 }
 0x747   :  { %v1456_v31 = vadd.f32 %v4559_v30, %v1362_v28 }
 0x748   :  { %v1446_v32 = vpop.f32.mrf.mxu0 }
 0x749   :  { %1458 = vst.msk [vmem:[#allocation4 + $0x8] sm:$0xff] %vm128_vm0, %v1456_v31  ;;  %v1455_v33 = vadd.f32 %v1446_v32, %v1357_v29  ;;  %v1955_v32 = vld [vmem:[%s6958_s17] sm:$0xff]  ;;  %s6959_s17 = smov 116  }
 0x74b   :  { %1457 = vst.msk [vmem:[#allocation4] sm:$0xff] %vm128_vm0, %v1455_v33 }
 0x750   :  { %v1857_v35 = vld [vmem:[#allocation4 + $0x8] sm:$0xff] }
 0x751   :  { %1873 = vrot.lane.b32.xlu0 %v1857_v35, %s6953_s19 }
 0x752   :  { %v1855_v6 = vld [vmem:[#allocation4] sm:$0xff] }
 0x755   :  { %1867 = vrot.lane.b32.xlu0 %v1863_v36, %s6953_s19 }
 0x772   :  { %v4594_v37 = vpop.f32.mrf.mxu1 }
 0x774   :  { %v1677_v39 = vpop.f32.mrf.mxu1 }
 0x78f   :  { %v4629_v38 = vpop.f32.mrf.mxu0 }
 0x790   :  { %v1758_v42 = vadd.f32 %v4629_v38, %v4594_v37 }
 0x791   :  { %v1752_v41 = vpop.f32.mrf.mxu0 }
 0x792   :  { %v1753_v44 = vadd.f32 %v1752_v41, %v1677_v39 }
 0x793   :  { %v4646_v43 = vpop.f32.mrf.mxu1 }
 0x794   :  { %v1852_v45 = vadd.f32 %v4646_v43, %v1758_v42 }
 0x795   :  { %v1842_v46 = vpop.f32.mrf.mxu1 }
 0x796   :  { %1854 = vst.msk [vmem:[#allocation4 + $0x48] sm:$0xff] %vm128_vm0, %v1852_v45  ;;  %v1851_v47 = vadd.f32 %v1842_v46, %v1753_v44 }
 0x798   :  { %1853 = vst.msk [vmem:[#allocation4 + $0x40] sm:$0xff] %vm128_vm0, %v1851_v47 }
 0x79d   :  { %v1858_v49 = vld [vmem:[#allocation4 + $0x48] sm:$0xff] }
 0x79e   :  { %1876 = vrot.lane.b32.xlu1 %v1858_v49, %s6953_s19 }
 0x79f   :  { %v1856_v14 = vld [vmem:[#allocation4 + $0x40] sm:$0xff] }
 0x7a2   :  { %1869 = vrot.lane.b32.xlu1 %v1866_v50, %s6953_s19 }
 0x7c3   :  { %v1874_v51 = vpop.permute.xlu0 %1873 }
 0x7c4   :  { %v1875_v52 = vsel %vm936_vm2, %v1874_v51, %v1857_v35 }
 0x7c5   :  { %1879 = vrot.lane.b32.xlu0 %v1875_v52, %s6953_s19 }
 0x7c7   :  { %v1868_v55 = vpop.permute.xlu0 %1867 }
 0x7c8   :  { %v1871_v56 = vsel %vm936_vm2, %v1868_v55, %v5699_v19 }
 0x7c9   :  { %vm1891_vm5 = vcmp.eq.s32.totalorder %v1871_v56, %v5490_v63  ;;  %vm1885_vm11 = vcmp.eq.s32.totalorder %v1871_v56, %v5518_v13 }
 0x7ca   :  { %vm1893_vm6 = vmand %vm1891_vm5, %vm982_vm4 }
 0x7cb   :  { %vm1887_vm13 = vmand %vm1885_vm11, %vm969_vm12 }
 0x810   :  { %v1877_v53 = vpop.permute.xlu1 %1876 }
 0x811   :  { %v1878_v54 = vsel %vm936_vm2, %v1877_v53, %v1858_v49 }
 0x812   :  { %1881 = vrot.lane.b32.xlu1 %v1878_v54, %s6953_s19  ;;  %s6963_s19 = smov 3  }
 0x814   :  { %v1870_v61 = vpop.permute.xlu1 %1869 }
 0x815   :  { %v1872_v0 = vsel %vm936_vm2, %v1870_v61, %v5711_v26 }
 0x816   :  { %vm1892_vm7 = vcmp.eq.s32.totalorder %v1872_v0, %v5490_v63  ;;  %vm1886_vm14 = vcmp.eq.s32.totalorder %v1872_v0, %v5518_v13 }
 0x817   :  { %vm1894_vm8 = vmand %vm1892_vm7, %vm982_vm4 }
 0x818   :  { %vm1888_vm15 = vmand %vm1886_vm14, %vm969_vm12 }
 0x837   :  { %v1880_v57 = vpop.permute.xlu0 %1879 }
 0x838   :  { %v1883_v59 = vsel %vm936_vm2, %v1880_v57, %v1857_v35 }
 0x839   :  { %v1895_v60 = vsel %vm1893_vm6, %v1883_v59, 0.0 }
 0x83a   :  { %1899 = vrot.lane.b32.xlu0 %v1895_v60, %s6956_s27 }
 0x884   :  { %v1882_v1 = vpop.permute.xlu1 %1881 }
 0x885   :  { %v1884_v2 = vsel %vm936_vm2, %v1882_v1, %v1858_v49 }
 0x886   :  { %v1896_v3 = vsel %vm1894_vm8, %v1884_v2, 0.0 }
 0x887   :  { %1901 = vrot.lane.b32.xlu1 %v1896_v3, %s6956_s27  ;;  %s6960_s27 = sld [smem:[#allocation25_spill]] }
 0x88d   :  { %v5850_v51 = vld [vmem:[%s6960_s27 + $0x8] sm:$0xff]  ;;  %v5860_v52 = vld [vmem:[%s6960_s27] sm:$0xff]  ;;  %s6968_s27 = smov 111  }
 0x88e   :  { %4679 = vmatprep.mubr.f32.mxu0 %v5850_v51  ;;  %4723 = vmatprep.mubr.f32.mxu1 %v5860_v52 }
 0x8ac   :  { %v1900_v4 = vpop.permute.xlu0 %1899 }
 0x8ad   :  { %v1905_v5 = vsel %vm1889_vm9, %v1857_v35, %v1900_v4 }
 0x8ae   :  { %1909 = vrot.lane.b32.xlu0 %v1905_v5, %s6918_s18 }
 0x8f9   :  { %v1902_v7 = vpop.permute.xlu1 %1901 }
 0x8fa   :  { %v1906_v8 = vsel %vm1890_vm10, %v1858_v49, %v1902_v7 }
 0x8fb   :  { %1911 = vrot.lane.b32.xlu1 %v1906_v8, %s6918_s18 }
 0x920   :  { %v1910_v9 = vpop.permute.xlu0 %1909 }
 0x921   :  { %v1915_v10 = vsel %vm1887_vm13, %v1883_v59, %v1910_v9 }
 0x922   :  { %1919 = vrot.lane.b32.xlu0 %v1915_v10, %s6913_s26 }
 0x96d   :  { %v1912_v19 = vpop.permute.xlu1 %1911 }
 0x96e   :  { %v1916_v26 = vsel %vm1888_vm15, %v1884_v2, %v1912_v19 }
 0x96f   :  { %1921 = vrot.lane.b32.xlu1 %v1916_v26, %s6913_s26 }
 0x994   :  { %v1920_v11 = vpop.permute.xlu0 %1919 }
 0x995   :  { %v1925_v58 = vadd.f32 %v1920_v11, %v1855_v6 }
 0x997   :  { %v1927_v17 = vsel %vm128_vm0, %v1925_v58, 0.0 }
 0x9e1   :  { %v1922_v15 = vpop.permute.xlu1 %1921 }
 0x9e2   :  { %v1926_v16 = vadd.f32 %v1922_v15, %v1856_v14 }
 0x9e4   :  { %v1928_v18 = vsel %vm128_vm0, %v1926_v16, 0.0 }
 0x9e5   :  { %v1929_v20 = vadd.f32 %v1928_v18, %v1927_v17 }
 0x9e7   :  { %1930 = vadd.xlane.f32.xlu0 %v1929_v20 }
 0x9fd   :  { %1950 = vperm.xlu0 %4943, %v1947_v21  }
 0xa70   :  { %v1931_v22 = vpop.xlane.xlu0 %1930 }
 0xa71   :  { %v1932_v23 = vmul.f32 0.0078125, %v1931_v22 }
 0xa73   :  { %v1933_v24 = vsub.f32 %v1925_v58, %v1932_v23  ;;  %v1934_v25 = vsub.f32 %v1926_v16, %v1932_v23 }
 0xa75   :  { %v1935_v27 = vmul.f32 %v1933_v24, %v1933_v24  ;;  %v1936_v28 = vmul.f32 %v1934_v25, %v1934_v25 }
 0xa77   :  { %v1937_v29 = vsel %vm128_vm0, %v1935_v27, 0.0  ;;  %v1938_v30 = vsel %vm128_vm0, %v1936_v28, 0.0 }
 0xa78   :  { %v1939_v31 = vadd.f32 %v1938_v30, %v1937_v29  ;;  %v1951_v39 = vpop.permute.xlu0 %1950 }
 0xa7a   :  { %1940 = vadd.xlane.f32.xlu1 %v1939_v31 }
 0xa8b   :  { %1958 = vperm.xlu1 %4944, %v1955_v32  }
 0xb03   :  { %v1941_v33 = vpop.xlane.xlu1 %1940 }
 0xb04   :  { %v1942_v34 = vmul.f32 0.0078125, %v1941_v33 }
 0xb06   :  { %v1943_v35 = vadd.f32 1e-05, %v1942_v34 }
 0xb07   :  { %v1959_v43 = vpop.permute.xlu1 %1958 }
 0xb08   :  { %4947 = vrsqrt.f32 %v1943_v35 }
 0xb15   :  { %v4948_v36 = vpop.eup %4947 }
 0xb16   :  { %v1945_v37 = vmul.f32 %v4948_v36, %v1933_v24  ;;  %v1946_v38 = vmul.f32 %v4948_v36, %v1934_v25 }
 0xb18   :  { %v1953_v41 = vmul.f32 %v1951_v39, %v1945_v37  ;;  %v1954_v42 = vmul.f32 %v1951_v39, %v1946_v38 }
 0xb1a   :  { %v1961_v44 = vadd.f32 %v1959_v43, %v1953_v41  ;;  %v1962_v45 = vadd.f32 %v1959_v43, %v1954_v42 }
 0xb1c   :  { %v1963_v46 = vmax.f32 %v1961_v44, 0.0  ;;  %v1964_v47 = vmax.f32 %v1962_v45, 0.0 }
 0xb1e   :  { %1965 = vst.msk [vmem:[#allocation5] sm:$0xff] %vm128_vm0, %v1963_v46  ;;  %1966 = vst.msk [vmem:[#allocation5 + $0x8] sm:$0xff] %vm128_vm0, %v1964_v47 }
 0xb25   :  { %v1967_v48 = vld [vmem:[#allocation5] sm:$0xff]  ;;  %v1969_v49 = vld [vmem:[#allocation5 + $0x8] sm:$0xff] }
 0xb26   :  { %1968 = vst.msk [vmem:[#allocation2] sm:$0xff] %vm128_vm0, %v1967_v48  ;;  %1970 = vst.msk [vmem:[#allocation2 + $0x8] sm:$0xff] %vm128_vm0, %v1969_v49 }
 0xb2d   :  { %v5797_v50 = vld [vmem:[#allocation2] sm:$0xff]  ;;  %v5875_v53 = vld [vmem:[#allocation2 + $0x8] sm:$0xff] }
 0xb2e   :  { %2017 = vrot.lane.b32.xlu1 %v5797_v50, %s6933_s13  ;;  %2063 = vrot.lane.b32.xlu0 %v5797_v50, %s6959_s17 }
 0xb32   :  { %2014 = vrot.lane.b32.xlu1 %v5797_v50, %s6937_s10  ;;  %2060 = vrot.lane.b32.xlu0 %v5797_v50, %s6935_s11 }
 0xb36   :  { %2011 = vrot.lane.b32.xlu1 %v5797_v50, %s6941_s5  ;;  %2057 = vrot.lane.b32.xlu0 %v5797_v50, %s6939_s8 }
 0xb3a   :  { %2008 = vrot.lane.b32.xlu1 %v5797_v50, %s6910_s4  ;;  %2054 = vrot.lane.b32.xlu0 %v5797_v50, %s6947_s15 }
 0xb3e   :  { %2005 = vrot.lane.b32.xlu1 %v5797_v50, %s6912_s21  ;;  %2051 = vrot.lane.b32.xlu0 %v5797_v50, %s6948_s6 }
 0xb42   :  { %2002 = vrot.lane.b32.xlu1 %v5797_v50, %s6914_s20  ;;  %2048 = vrot.lane.b32.xlu0 %v5797_v50, %s6934_s14 }
 0xb46   :  { %1999 = vrot.lane.b32.xlu1 %v5797_v50, %s6916_s25  ;;  %2045 = vrot.lane.b32.xlu0 %v5797_v50, %s6936_s3 }
 0xb4a   :  { %1996 = vrot.lane.b32.xlu1 %v5797_v50, %s6915_s29  ;;  %2042 = vrot.lane.b32.xlu0 %v5797_v50, %s6938_s9 }
 0xb4e   :  { %1993 = vrot.lane.b32.xlu1 %v5797_v50, %s6917_s1  ;;  %2039 = vrot.lane.b32.xlu0 %v5797_v50, %s6940_s12 }
 0xb52   :  { %1990 = vrot.lane.b32.xlu1 %v5797_v50, %s6919_s2  ;;  %2036 = vrot.lane.b32.xlu0 %v5797_v50, %s6909_s22  ;;  %s6964_s2 = smov 18  }
 0xb56   :  { %1987 = vrot.lane.b32.xlu1 %v5797_v50, %s6920_s7  ;;  %2033 = vrot.lane.b32.xlu0 %v5797_v50, %s6911_s24 }
 0xb5a   :  { %1984 = vrot.lane.b32.xlu1 %v5797_v50, %s6949_s23  ;;  %2030 = vrot.lane.b32.xlu0 %v5797_v50, %s6913_s26  ;;  %s6961_s23 = smov 2  }
 0xb5e   :  { %2026 = vrot.lane.b32.xlu1 %v5797_v50, %s6918_s18  ;;  %1981 = vrot.lane.b32.xlu0 %v5797_v50, %s6950_s16  ;;  %s6965_s16 = smov 109  }
 0xb62   :  { %2023 = vrot.lane.b32.xlu1 %v5797_v50, %s6961_s23  ;;  %1978 = vrot.lane.b32.xlu0 %v5797_v50, %s6962_s0  ;;  %s6971_s0 = smov 114  }
 0xb66   :  { %2020 = vrot.lane.b32.xlu1 %v5797_v50, %s6963_s19  ;;  %1975 = vrot.lane.b32.xlu0 %v5797_v50, %s6964_s2  ;;  %s6969_s2 = smov 112  }
 0xb6a   :  { %2084 = vrot.lane.b32.xlu1 %v5797_v50, %s6965_s16  ;;  %1972 = vrot.lane.b32.xlu0 %v5797_v50, %s6966_s28  ;;  %s6970_s28 = smov 113  }
 0xb6e   :  { %2081 = vrot.lane.b32.xlu1 %v5797_v50, %s6967_s30  ;;  %2597 = vrot.lane.b32.xlu0 %v5875_v53, %s6959_s17  ;;  %s6972_s17 = smov 115  }
 0xb72   :  { %2078 = vrot.lane.b32.xlu1 %v5797_v50, %s6968_s27  ;;  %2594 = vrot.lane.b32.xlu0 %v5875_v53, %s6935_s11 }
 0xb76   :  { %2075 = vrot.lane.b32.xlu1 %v5797_v50, %s6969_s2  ;;  %2591 = vrot.lane.b32.xlu0 %v5875_v53, %s6939_s8  ;;  %s6974_s8 = smov 15  }
 0xb7a   :  { %2072 = vrot.lane.b32.xlu1 %v5797_v50, %s6970_s28  ;;  %2588 = vrot.lane.b32.xlu0 %v5875_v53, %s6947_s15  ;;  %s6977_s15 = smov 18  }
 0xb7e   :  { %2069 = vrot.lane.b32.xlu1 %v5797_v50, %s6971_s0  ;;  %2585 = vrot.lane.b32.xlu0 %v5875_v53, %s6948_s6 }
 0xb82   :  { %2066 = vrot.lane.b32.xlu1 %v5797_v50, %s6972_s17  ;;  %2582 = vrot.lane.b32.xlu0 %v5875_v53, %s6934_s14 }
 0xb86   :  { %2551 = vrot.lane.b32.xlu1 %v5875_v53, %s6933_s13  ;;  %2579 = vrot.lane.b32.xlu0 %v5875_v53, %s6936_s3  ;;  %s6973_s3 = smov 13   ;;  %s6982_s13 = sld [smem:[#allocation28_spill]] }
 0xb8a   :  { %2548 = vrot.lane.b32.xlu1 %v5875_v53, %s6937_s10  ;;  %2576 = vrot.lane.b32.xlu0 %v5875_v53, %s6938_s9  ;;  %s6975_s9 = smov 16   ;;  %s6976_s10 = smov 17  }
 0xb8e   :  { %2545 = vrot.lane.b32.xlu1 %v5875_v53, %s6941_s5  ;;  %2573 = vrot.lane.b32.xlu0 %v5875_v53, %s6940_s12  ;;  %s6981_s12 = sld [smem:[#allocation25_spill]] }
 0xb92   :  { %2542 = vrot.lane.b32.xlu1 %v5875_v53, %s6910_s4  ;;  %2570 = vrot.lane.b32.xlu0 %v5875_v53, %s6909_s22  ;;  %s6986_s22 = sld [smem:[#allocation27_spill]]  ;;  %s5144_s4 = smov [#allocation15]  }
 0xb94   :  { %v5998_v28 = vld [vmem:[%s6981_s12 + $0x20] sm:$0xff]  ;;  %v6003_v29 = vld [vmem:[%s6981_s12 + $0x38] sm:$0xff]  ;;  %v6015_v33 = vld [vmem:[%s6981_s12 + $0x50] sm:$0xff] }
 0xb95   :  { %v6009_v32 = vld [vmem:[%s6981_s12 + $0x18] sm:$0xff]  ;;  %v6020_v34 = vld [vmem:[%s6981_s12 + $0x68] sm:$0xff]  ;;  %v6025_v35 = vld [vmem:[%s6981_s12 + $0x30] sm:$0xff] }
 0xb96   :  { %2539 = vrot.lane.b32.xlu1 %v5875_v53, %s6912_s21  ;;  %2567 = vrot.lane.b32.xlu0 %v5875_v53, %s6911_s24  ;;  %v6033_v38 = vld [vmem:[%s6981_s12 + $0x80] sm:$0xff]  ;;  %v6039_v39 = vld [vmem:[%s6981_s12 + $0x48] sm:$0xff] }
 0xb97   :  { %v6044_v41 = vld [vmem:[%s6981_s12 + $0x98] sm:$0xff]  ;;  %v6049_v42 = vld [vmem:[%s6981_s12 + $0x60] sm:$0xff]  ;;  %v6057_v45 = vld [vmem:[%s6981_s12 + $0xb0] sm:$0xff] }
 0xb98   :  { %v6063_v46 = vld [vmem:[%s6981_s12 + $0x78] sm:$0xff]  ;;  %v6068_v47 = vld [vmem:[%s6981_s12 + $0x10] sm:$0xff] }
 0xb99   :  { %v6073_v48 = vld [vmem:[%s6981_s12 + $0x90] sm:$0xff] }
 0xb9a   :  { %2536 = vrot.lane.b32.xlu1 %v5875_v53, %s6914_s20  ;;  %2564 = vrot.lane.b32.xlu0 %v5875_v53, %s6913_s26 }
 0xb9e   :  { %2560 = vrot.lane.b32.xlu1 %v5875_v53, %s6918_s18  ;;  %2533 = vrot.lane.b32.xlu0 %v5875_v53, %s6916_s25 }
 0xba0   :  { %v2018_v54 = vpop.permute.xlu1 %2017  ;;  %v2064_v55 = vpop.permute.xlu0 %2063 }
 0xba1   :  { %4647 = vmatprep.subr.mxu0 %v2064_v55  ;;  %4691 = vmatprep.subr.mxu1 %v2018_v54 }
 0xba2   :  { %2557 = vrot.lane.b32.xlu1 %v5875_v53, %s6961_s23  ;;  %4692 = vmatpush3.msra.mxu1 %v2018_v54  ;;  %v6083_v54 = vld [vmem:[%s6981_s12 + $0xa8] sm:$0xff] }
 0xba3   :  { %2530 = vrot.lane.b32.xlu0 %v5875_v53, %s6915_s29  ;;  %4648 = vmatpush3.msra.mxu0 %v2064_v55 }
 0xba4   :  { %v2015_v56 = vpop.permute.xlu1 %2014  ;;  %v2061_v57 = vpop.permute.xlu0 %2060 }
 0xba5   :  { %4649 = vmatprep.subr.mxu0 %v2061_v57  ;;  %4693 = vmatprep.subr.mxu1 %v2015_v56 }
 0xba6   :  { %2554 = vrot.lane.b32.xlu1 %v5875_v53, %s6963_s19  ;;  %4694 = vmatpush3.msra.mxu1 %v2015_v56 }
 0xba7   :  { %2527 = vrot.lane.b32.xlu0 %v5875_v53, %s6917_s1  ;;  %4650 = vmatpush3.msra.mxu0 %v2061_v57  ;;  %s6980_s1 = smov 64  }
 0xba8   :  { %v2012_v59 = vpop.permute.xlu1 %2011  ;;  %v2058_v60 = vpop.permute.xlu0 %2057 }
 0xba9   :  { %4651 = vmatprep.subr.mxu0 %v2058_v60  ;;  %4695 = vmatprep.subr.mxu1 %v2012_v59 }
 0xbaa   :  { %2521 = vrot.lane.b32.xlu1 %v5875_v53, %s6920_s7  ;;  %4696 = vmatpush3.msra.mxu1 %v2012_v59  ;;  %s6979_s7 = sld [smem:[#allocation22_spill]] }
 0xbab   :  { %2524 = vrot.lane.b32.xlu0 %v5875_v53, %s6973_s3  ;;  %4652 = vmatpush3.msra.mxu0 %v2058_v60  ;;  %s6984_s3 = sld [smem:[#allocation29_spill]] }
 0xbac   :  { %v2009_v61 = vpop.permute.xlu1 %2008  ;;  %v2055_v0 = vpop.permute.xlu0 %2054 }
 0xbad   :  { %4653 = vmatprep.subr.mxu0 %v2055_v0  ;;  %4697 = vmatprep.subr.mxu1 %v2009_v61 }
 0xbae   :  { %2518 = vrot.lane.b32.xlu1 %v5875_v53, %s6974_s8  ;;  %4698 = vmatpush3.msra.mxu1 %v2009_v61 }
 0xbaf   :  { %2618 = vrot.lane.b32.xlu0 %v5875_v53, %s6965_s16  ;;  %4654 = vmatpush3.msra.mxu0 %v2055_v0  ;;  %s6978_s16 = smov 19   ;;  %v6090_v0 = vld [vmem:[%s6981_s12 + $0x28] sm:$0xff] }
 0xbb0   :  { %v2006_v1 = vpop.permute.xlu1 %2005  ;;  %v2052_v2 = vpop.permute.xlu0 %2051  ;;  %v5968_v6 = vld [vmem:[%s6979_s7 + $0x8] sm:$0xff]  ;;  %v5973_v58 = vld [vmem:[%s6979_s7] sm:$0xff]  ;;  %v5982_v16 = vld [vmem:[%s6979_s7 + $0x18] sm:$0xff] }
 0xbb1   :  { %4655 = vmatprep.subr.mxu0 %v2052_v2  ;;  %4699 = vmatprep.subr.mxu1 %v2006_v1  ;;  %v5987_v17 = vld [vmem:[%s6979_s7 + $0x10] sm:$0xff] }
 0xbb2   :  { %2515 = vrot.lane.b32.xlu1 %v5875_v53, %s6975_s9  ;;  %4700 = vmatpush3.msra.mxu1 %v2006_v1 }
 0xbb3   :  { %2615 = vrot.lane.b32.xlu0 %v5875_v53, %s6967_s30  ;;  %4656 = vmatpush3.msra.mxu0 %v2052_v2 }
 0xbb4   :  { %v2003_v3 = vpop.permute.xlu1 %2002  ;;  %v2049_v4 = vpop.permute.xlu0 %2048 }
 0xbb5   :  { %4657 = vmatprep.subr.mxu0 %v2049_v4  ;;  %4701 = vmatprep.subr.mxu1 %v2003_v3 }
 0xbb6   :  { %2512 = vrot.lane.b32.xlu1 %v5875_v53, %s6976_s10  ;;  %4702 = vmatpush3.msra.mxu1 %v2003_v3  ;;  %v6104_v3 = vld [vmem:[%s6981_s12 + $0x58] sm:$0xff] }
 0xbb7   :  { %2612 = vrot.lane.b32.xlu0 %v5875_v53, %s6968_s27  ;;  %4658 = vmatpush3.msra.mxu0 %v2049_v4  ;;  %v6109_v4 = vld [vmem:[%s6981_s12 + $0x70] sm:$0xff] }
 0xbb8   :  { %v2000_v5 = vpop.permute.xlu1 %1999  ;;  %v2046_v7 = vpop.permute.xlu0 %2045 }
 0xbb9   :  { %4659 = vmatprep.subr.mxu0 %v2046_v7  ;;  %4703 = vmatprep.subr.mxu1 %v2000_v5 }
 0xbba   :  { %2509 = vrot.lane.b32.xlu1 %v5875_v53, %s6977_s15  ;;  %4704 = vmatpush3.msra.mxu1 %v2000_v5  ;;  %s6988_s15 = sld [smem:[#allocation31_spill]] }
 0xbbb   :  { %2609 = vrot.lane.b32.xlu0 %v5875_v53, %s6969_s2  ;;  %4660 = vmatpush3.msra.mxu0 %v2046_v7  ;;  %s6985_s2 = sld [smem:[#allocation26_spill]] }
 0xbbc   :  { %v1997_v8 = vpop.permute.xlu1 %1996  ;;  %v2043_v9 = vpop.permute.xlu0 %2042 }
 0xbbd   :  { %4661 = vmatprep.subr.mxu0 %v2043_v9  ;;  %4705 = vmatprep.subr.mxu1 %v1997_v8 }
 0xbbe   :  { %2506 = vrot.lane.b32.xlu1 %v5875_v53, %s6978_s16  ;;  %4706 = vmatpush3.msra.mxu1 %v1997_v8  ;;  %v6118_v8 = vld [vmem:[%s6981_s12 + $0x88] sm:$0xff] }
 0xbbf   :  { %2606 = vrot.lane.b32.xlu0 %v5875_v53, %s6970_s28  ;;  %4662 = vmatpush3.msra.mxu0 %v2043_v9  ;;  %v6123_v9 = vld [vmem:[%s6981_s12 + $0xa0] sm:$0xff]  ;;  %s6983_s28 = smov 65  }
 0xbc0   :  { %v1994_v10 = vpop.permute.xlu1 %1993  ;;  %v2040_v19 = vpop.permute.xlu0 %2039 }
 0xbc1   :  { %4663 = vmatprep.subr.mxu0 %v2040_v19  ;;  %4707 = vmatprep.subr.mxu1 %v1994_v10 }
 0xbc2   :  { %2600 = vrot.lane.b32.xlu1 %v5875_v53, %s6972_s17  ;;  %4708 = vmatpush3.msra.mxu1 %v1994_v10 }
 0xbc3   :  { %2603 = vrot.lane.b32.xlu0 %v5875_v53, %s6971_s0  ;;  %4664 = vmatpush3.msra.mxu0 %v2040_v19 }
 0xbc4   :  { %v1991_v26 = vpop.permute.xlu1 %1990  ;;  %v2037_v11 = vpop.permute.xlu0 %2036 }
 0xbc5   :  { %4665 = vmatprep.subr.mxu0 %v2037_v11  ;;  %4709 = vmatprep.subr.mxu1 %v1991_v26 }
 0xbc6   :  { %4666 = vmatpush3.msra.mxu0 %v2037_v11  ;;  %4710 = vmatpush3.msra.mxu1 %v1991_v26  ;;  %v6132_v26 = vld [vmem:[%s6981_s12 + $0xb8] sm:$0xff] }
 0xbc7   :  { %3066 = vrot.lane.b32.xlu1 %v5968_v6, %s6980_s1  ;;  %3063 = vrot.lane.b32.xlu0 %v5973_v58, %s6980_s1 }
 0xbc8   :  { %v1988_v14 = vpop.permute.xlu1 %1987  ;;  %v2034_v15 = vpop.permute.xlu0 %2033 }
 0xbc9   :  { %4667 = vmatprep.subr.mxu0 %v2034_v15  ;;  %4711 = vmatprep.subr.mxu1 %v1988_v14 }
 0xbca   :  { %4668 = vmatpush3.msra.mxu0 %v2034_v15  ;;  %4712 = vmatpush3.msra.mxu1 %v1988_v14 }
 0xbcb   :  { %3072 = vrot.lane.b32.xlu1 %v5982_v16, %s6980_s1  ;;  %3069 = vrot.lane.b32.xlu0 %v5987_v17, %s6980_s1 }
 0xbcc   :  { %v1985_v18 = vpop.permute.xlu1 %1984  ;;  %v2031_v20 = vpop.permute.xlu0 %2030 }
 0xbcd   :  { %4669 = vmatprep.subr.mxu0 %v2031_v20  ;;  %4713 = vmatprep.subr.mxu1 %v1985_v18 }
 0xbce   :  { %4670 = vmatpush3.msra.mxu0 %v2031_v20  ;;  %4714 = vmatpush3.msra.mxu1 %v1985_v18 }
 0xbcf   :  { %4671 = vmatprep.subr.mxu0 %v5797_v50 }
 0xbd0   :  { %v2027_v21 = vpop.permute.xlu1 %2026  ;;  %4672 = vmatpush3.msra.mxu0 %v5797_v50  ;;  %v1982_v22 = vpop.permute.xlu0 %1981 }
 0xbd1   :  { %4673 = vmatprep.subr.mxu0 %v2027_v21  ;;  %4715 = vmatprep.subr.mxu1 %v1982_v22 }
 0xbd2   :  { %4674 = vmatpush3.msra.mxu0 %v2027_v21  ;;  %4716 = vmatpush3.msra.mxu1 %v1982_v22 }
 0xbd4   :  { %v2024_v23 = vpop.permute.xlu1 %2023  ;;  %v1979_v24 = vpop.permute.xlu0 %1978 }
 0xbd5   :  { %4675 = vmatprep.subr.mxu0 %v2024_v23  ;;  %4717 = vmatprep.subr.mxu1 %v1979_v24 }
 0xbd6   :  { %4676 = vmatpush3.msra.mxu0 %v2024_v23  ;;  %4718 = vmatpush3.msra.mxu1 %v1979_v24 }
 0xbd8   :  { %v2021_v25 = vpop.permute.xlu1 %2020  ;;  %v1976_v27 = vpop.permute.xlu0 %1975 }
 0xbd9   :  { %4677 = vmatprep.subr.mxu0 %v2021_v25  ;;  %4719 = vmatprep.subr.mxu1 %v1976_v27 }
 0xbda   :  { %4678 = vmatpush3.msra.mxu0 %v2021_v25  ;;  %4720 = vmatpush3.msra.mxu1 %v1976_v27 }
 0xbdb   :  { %4680 = vmatmul.mubr.f32.vlgmr.msra.gmra.mxu0 %v5998_v28 }
 0xbdc   :  { %v2085_v30 = vpop.permute.xlu1 %2084  ;;  %v1973_v31 = vpop.permute.xlu0 %1972  ;;  %4682 = vmatprep.mubr.f32.mxu0 %v6003_v29 }
 0xbdd   :  { %4721 = vmatprep.subr.mxu1 %v1973_v31  ;;  %4735 = vmatprep.subr.mxu0 %v2085_v30 }
 0xbde   :  { %4722 = vmatpush3.msra.mxu1 %v1973_v31  ;;  %4736 = vmatpush3.msra.mxu0 %v2085_v30 }
 0xbdf   :  { %4724 = vmatmul.mubr.f32.vlgmr.msra.gmra.mxu1 %v6009_v32  ;;  %4683 = vmatmul.mubr.f32.gmra.mxu0 %v6015_v33 }
 0xbe0   :  { %v2082_v36 = vpop.permute.xlu1 %2081  ;;  %v2598_v37 = vpop.permute.xlu0 %2597  ;;  %4685 = vmatprep.mubr.f32.mxu0 %v6020_v34  ;;  %4726 = vmatprep.mubr.f32.mxu1 %v6025_v35 }
 0xbe1   :  { %4737 = vmatprep.subr.mxu0 %v2082_v36  ;;  %4761 = vmatprep.subr.mxu1 %v2598_v37 }
 0xbe2   :  { %4738 = vmatpush3.msra.mxu0 %v2082_v36  ;;  %4762 = vmatpush3.msra.mxu1 %v2598_v37  ;;  %v6151_v36 = vld [vmem:[%s6979_s7 + $0x20] sm:$0xff] }
 0xbe3   :  { %4686 = vmatmul.mubr.f32.gmra.mxu0 %v6033_v38  ;;  %4727 = vmatmul.mubr.f32.gmra.mxu1 %v6039_v39 }
 0xbe4   :  { %v2079_v43 = vpop.permute.xlu1 %2078  ;;  %v2595_v44 = vpop.permute.xlu0 %2594  ;;  %4688 = vmatprep.mubr.f32.mxu0 %v6044_v41  ;;  %4729 = vmatprep.mubr.f32.mxu1 %v6049_v42 }
 0xbe5   :  { %4739 = vmatprep.subr.mxu0 %v2079_v43  ;;  %4763 = vmatprep.subr.mxu1 %v2595_v44 }
 0xbe6   :  { %4740 = vmatpush3.msra.mxu0 %v2079_v43  ;;  %4764 = vmatpush3.msra.mxu1 %v2595_v44  ;;  %v6167_v43 = vld [vmem:[%s6979_s7 + $0x30] sm:$0xff] }
 0xbe7   :  { %4689 = vmatmul.mubr.f32.gmra.mxu0 %v6057_v45  ;;  %4730 = vmatmul.mubr.f32.gmra.mxu1 %v6063_v46 }
 0xbe8   :  { %v2076_v49 = vpop.permute.xlu1 %2075  ;;  %v2592_v50 = vpop.permute.xlu0 %2591  ;;  %4749 = vmatprep.mubr.msk.f32.mxu0 %vm445_vm1, %v6068_v47  ;;  %4732 = vmatprep.mubr.f32.mxu1 %v6073_v48 }
 0xbe9   :  { %4741 = vmatprep.subr.mxu0 %v2076_v49  ;;  %4765 = vmatprep.subr.mxu1 %v2592_v50 }
 0xbea   :  { %4742 = vmatpush3.msra.mxu0 %v2076_v49  ;;  %4766 = vmatpush3.msra.mxu1 %v2592_v50 }
 0xbeb   :  { %4733 = vmatmul.mubr.f32.gmra.mxu1 %v6083_v54  ;;  %3075 = vrot.lane.b32.xlu0 %v6151_v36, %s6980_s1 }
 0xbec   :  { %v2073_v55 = vpop.permute.xlu1 %2072  ;;  %v2589_v56 = vpop.permute.xlu0 %2588  ;;  %4793 = vmatprep.mubr.f32.mxu1 %v5850_v51  ;;  %v6095_v51 = vld [vmem:[%s6981_s12 + $0x40] sm:$0xff] }
 0xbed   :  { %4743 = vmatprep.subr.mxu0 %v2073_v55  ;;  %4767 = vmatprep.subr.mxu1 %v2589_v56 }
 0xbee   :  { %4744 = vmatpush3.msra.mxu0 %v2073_v55  ;;  %4768 = vmatpush3.msra.mxu1 %v2589_v56 }
 0xbef   :  { %3081 = vrot.lane.b32.xlu0 %v6167_v43, %s6980_s1 }
 0xbf0   :  { %v2070_v57 = vpop.permute.xlu1 %2069  ;;  %v2586_v59 = vpop.permute.xlu0 %2585 }
 0xbf1   :  { %4745 = vmatprep.subr.mxu0 %v2070_v57  ;;  %4769 = vmatprep.subr.mxu1 %v2586_v59 }
 0xbf2   :  { %4746 = vmatpush3.msra.mxu0 %v2070_v57  ;;  %4770 = vmatpush3.msra.mxu1 %v2586_v59 }
 0xbf4   :  { %v2067_v60 = vpop.permute.xlu1 %2066  ;;  %v2583_v61 = vpop.permute.xlu0 %2582 }
 0xbf5   :  { %4747 = vmatprep.subr.mxu0 %v2067_v60  ;;  %4771 = vmatprep.subr.mxu1 %v2583_v61 }
 0xbf6   :  { %4748 = vmatpush3.msra.mxu0 %v2067_v60  ;;  %4772 = vmatpush3.msra.mxu1 %v2583_v61 }
 0xbf7   :  { %4750 = vmatmul.mubr.msk.f32.vlgmr.msra.gmra.mxu0 %vm445_vm1, %v6090_v0 }
 0xbf8   :  { %v2552_v1 = vpop.permute.xlu1 %2551  ;;  %v2580_v2 = vpop.permute.xlu0 %2579  ;;  %4752 = vmatprep.mubr.msk.f32.mxu0 %vm445_vm1, %v6095_v51 }
 0xbf9   :  { %4773 = vmatprep.subr.mxu1 %v2580_v2  ;;  %4805 = vmatprep.subr.mxu0 %v2552_v1 }
 0xbfa   :  { %4774 = vmatpush3.msra.mxu1 %v2580_v2  ;;  %4806 = vmatpush3.msra.mxu0 %v2552_v1 }
 0xbfb   :  { %4753 = vmatmul.mubr.msk.f32.gmra.mxu0 %vm445_vm1, %v6104_v3 }
 0xbfc   :  { %v2549_v5 = vpop.permute.xlu1 %2548  ;;  %v2577_v7 = vpop.permute.xlu0 %2576  ;;  %4755 = vmatprep.mubr.msk.f32.mxu0 %vm445_vm1, %v6109_v4 }
 0xbfd   :  { %4775 = vmatprep.subr.mxu1 %v2577_v7  ;;  %4807 = vmatprep.subr.mxu0 %v2549_v5 }
 0xbfe   :  { %4776 = vmatpush3.msra.mxu1 %v2577_v7  ;;  %4808 = vmatpush3.msra.mxu0 %v2549_v5 }
 0xbff   :  { %4756 = vmatmul.mubr.msk.f32.gmra.mxu0 %vm445_vm1, %v6118_v8 }
 0xc00   :  { %v2546_v10 = vpop.permute.xlu1 %2545  ;;  %v2574_v19 = vpop.permute.xlu0 %2573  ;;  %4758 = vmatprep.mubr.msk.f32.mxu0 %vm445_vm1, %v6123_v9 }
 0xc01   :  { %4777 = vmatprep.subr.mxu1 %v2574_v19  ;;  %4809 = vmatprep.subr.mxu0 %v2546_v10 }
 0xc02   :  { %4778 = vmatpush3.msra.mxu1 %v2574_v19  ;;  %4810 = vmatpush3.msra.mxu0 %v2546_v10 }
 0xc03   :  { %4759 = vmatmul.mubr.msk.f32.gmra.mxu0 %vm445_vm1, %v6132_v26 }
 0xc04   :  { %v2543_v11 = vpop.permute.xlu1 %2542  ;;  %v2571_v14 = vpop.permute.xlu0 %2570  ;;  %4837 = vmatprep.mubr.f32.mxu0 %v5860_v52 }
 0xc05   :  { %4779 = vmatprep.subr.mxu1 %v2571_v14  ;;  %4811 = vmatprep.subr.mxu0 %v2543_v11 }
 0xc06   :  { %4780 = vmatpush3.msra.mxu1 %v2571_v14  ;;  %4812 = vmatpush3.msra.mxu0 %v2543_v11 }
 0xc08   :  { %v2540_v15 = vpop.permute.xlu1 %2539  ;;  %v2568_v18 = vpop.permute.xlu0 %2567 }
 0xc09   :  { %4781 = vmatprep.subr.mxu1 %v2568_v18  ;;  %4813 = vmatprep.subr.mxu0 %v2540_v15 }
 0xc0a   :  { %4782 = vmatpush3.msra.mxu1 %v2568_v18  ;;  %4814 = vmatpush3.msra.mxu0 %v2540_v15 }
 0xc0c   :  { %v2537_v20 = vpop.permute.xlu1 %2536  ;;  %v2565_v21 = vpop.permute.xlu0 %2564 }
 0xc0d   :  { %4783 = vmatprep.subr.mxu1 %v2565_v21  ;;  %4815 = vmatprep.subr.mxu0 %v2537_v20 }
 0xc0e   :  { %4784 = vmatpush3.msra.mxu1 %v2565_v21  ;;  %4816 = vmatpush3.msra.mxu0 %v2537_v20 }
 0xc0f   :  { %4785 = vmatprep.subr.mxu1 %v5875_v53 }
 0xc10   :  { %v2561_v22 = vpop.permute.xlu1 %2560  ;;  %4786 = vmatpush3.msra.mxu1 %v5875_v53  ;;  %v2534_v52 = vpop.permute.xlu0 %2533  ;;  %v6143_v53 = vld [vmem:[%s6979_s7 + $0x28] sm:$0xff] }
 0xc11   :  { %4787 = vmatprep.subr.mxu1 %v2561_v22  ;;  %4817 = vmatprep.subr.mxu0 %v2534_v52 }
 0xc12   :  { %4788 = vmatpush3.msra.mxu1 %v2561_v22  ;;  %4818 = vmatpush3.msra.mxu0 %v2534_v52 }
 0xc13   :  { %3078 = vrot.lane.b32.xlu1 %v6143_v53, %s6980_s1 }
 0xc14   :  { %v2558_v23 = vpop.permute.xlu1 %2557 }
 0xc15   :  { %v2531_v24 = vpop.permute.xlu0 %2530  ;;  %4789 = vmatprep.subr.mxu1 %v2558_v23 }
 0xc16   :  { %4819 = vmatprep.subr.mxu0 %v2531_v24  ;;  %4790 = vmatpush3.msra.mxu1 %v2558_v23 }
 0xc17   :  { %4820 = vmatpush3.msra.mxu0 %v2531_v24 }
 0xc18   :  { %v2555_v25 = vpop.permute.xlu1 %2554 }
 0xc19   :  { %v2528_v27 = vpop.permute.xlu0 %2527  ;;  %4791 = vmatprep.subr.mxu1 %v2555_v25 }
 0xc1a   :  { %4821 = vmatprep.subr.mxu0 %v2528_v27  ;;  %4792 = vmatpush3.msra.mxu1 %v2555_v25 }
 0xc1b   :  { %4822 = vmatpush3.msra.mxu0 %v2528_v27  ;;  %4794 = vmatmul.mubr.f32.vlgmr.msra.gmra.mxu1 %v5998_v28  ;;  %v6159_v28 = vld [vmem:[%s6979_s7 + $0x38] sm:$0xff] }
 0xc1c   :  { %v2522_v30 = vpop.permute.xlu1 %2521  ;;  %4796 = vmatprep.mubr.f32.mxu1 %v6003_v29  ;;  %3084 = vrot.lane.b32.xlu1 %v6159_v28, %s6980_s1 }
 0xc1d   :  { %v2525_v31 = vpop.permute.xlu0 %2524 }
 0xc1e   :  { %4823 = vmatprep.subr.mxu0 %v2525_v31 }
 0xc1f   :  { %4824 = vmatpush3.msra.mxu0 %v2525_v31  ;;  %4797 = vmatmul.mubr.f32.gmra.mxu1 %v6015_v33 }
 0xc20   :  { %4825 = vmatprep.subr.mxu0 %v2522_v30  ;;  %v2519_v29 = vpop.permute.xlu1 %2518  ;;  %4799 = vmatprep.mubr.f32.mxu1 %v6020_v34 }
 0xc21   :  { %4826 = vmatpush3.msra.mxu0 %v2522_v30  ;;  %v2619_v37 = vpop.permute.xlu0 %2618 }
 0xc22   :  { %4827 = vmatprep.subr.mxu0 %v2519_v29  ;;  %4849 = vmatprep.subr.mxu1 %v2619_v37 }
 0xc23   :  { %4828 = vmatpush3.msra.mxu0 %v2519_v29  ;;  %4850 = vmatpush3.msra.mxu1 %v2619_v37 }
 0xc24   :  { %v2516_v33 = vpop.permute.xlu1 %2515  ;;  %4800 = vmatmul.mubr.f32.gmra.mxu1 %v6033_v38 }
 0xc25   :  { %v2616_v34 = vpop.permute.xlu0 %2615  ;;  %4829 = vmatprep.subr.mxu0 %v2516_v33  ;;  %4802 = vmatprep.mubr.f32.mxu1 %v6044_v41 }
 0xc26   :  { %4851 = vmatprep.subr.mxu1 %v2616_v34  ;;  %4830 = vmatpush3.msra.mxu0 %v2516_v33 }
 0xc27   :  { %4852 = vmatpush3.msra.mxu1 %v2616_v34 }
 0xc28   :  { %v2513_v44 = vpop.permute.xlu1 %2512  ;;  %4803 = vmatmul.mubr.f32.gmra.mxu1 %v6057_v45 }
 0xc29   :  { %v2613_v49 = vpop.permute.xlu0 %2612  ;;  %4831 = vmatprep.subr.mxu0 %v2513_v44  ;;  %4863 = vmatprep.mubr.msk.f32.mxu1 %vm445_vm1, %v6068_v47 }
 0xc2a   :  { %4853 = vmatprep.subr.mxu1 %v2613_v49  ;;  %4832 = vmatpush3.msra.mxu0 %v2513_v44 }
 0xc2b   :  { %4854 = vmatpush3.msra.mxu1 %v2613_v49 }
 0xc2c   :  { %v2510_v38 = vpop.permute.xlu1 %2509 }
 0xc2d   :  { %v2610_v50 = vpop.permute.xlu0 %2609  ;;  %4833 = vmatprep.subr.mxu0 %v2510_v38 }
 0xc2e   :  { %4855 = vmatprep.subr.mxu1 %v2610_v50  ;;  %4834 = vmatpush3.msra.mxu0 %v2510_v38 }
 0xc2f   :  { %4856 = vmatpush3.msra.mxu1 %v2610_v50 }
 0xc30   :  { %v2507_v41 = vpop.permute.xlu1 %2506 }
 0xc31   :  { %v2607_v55 = vpop.permute.xlu0 %2606  ;;  %4835 = vmatprep.subr.mxu0 %v2507_v41 }
 0xc32   :  { %4857 = vmatprep.subr.mxu1 %v2607_v55  ;;  %4836 = vmatpush3.msra.mxu0 %v2507_v41 }
 0xc33   :  { %4858 = vmatpush3.msra.mxu1 %v2607_v55  ;;  %4838 = vmatmul.mubr.f32.vlgmr.msra.gmra.mxu0 %v6009_v32 }
 0xc34   :  { %4840 = vmatprep.mubr.f32.mxu0 %v6025_v35  ;;  %v2601_v47 = vpop.permute.xlu1 %2600 }
 0xc35   :  { %v2604_v45 = vpop.permute.xlu0 %2603 }
 0xc36   :  { %4859 = vmatprep.subr.mxu1 %v2604_v45 }
 0xc37   :  { %4860 = vmatpush3.msra.mxu1 %v2604_v45  ;;  %4841 = vmatmul.mubr.f32.gmra.mxu0 %v6039_v39 }
 0xc38   :  { %4861 = vmatprep.subr.mxu1 %v2601_v47  ;;  %4843 = vmatprep.mubr.f32.mxu0 %v6049_v42 }
 0xc39   :  { %4862 = vmatpush3.msra.mxu1 %v2601_v47 }
 0xc3a   :  { %4864 = vmatmul.mubr.msk.f32.vlgmr.msra.gmra.mxu1 %vm445_vm1, %v6090_v0 }
 0xc3b   :  { %4844 = vmatmul.mubr.f32.gmra.mxu0 %v6063_v46  ;;  %4866 = vmatprep.mubr.msk.f32.mxu1 %vm445_vm1, %v6095_v51 }
 0xc3c   :  { %4846 = vmatprep.mubr.f32.mxu0 %v6073_v48 }
 0xc3e   :  { %4867 = vmatmul.mubr.msk.f32.gmra.mxu1 %vm445_vm1, %v6104_v3 }
 0xc3f   :  { %4847 = vmatmul.mubr.f32.gmra.mxu0 %v6083_v54  ;;  %4869 = vmatprep.mubr.msk.f32.mxu1 %vm445_vm1, %v6109_v4 }
 0xc42   :  { %4870 = vmatmul.mubr.msk.f32.gmra.mxu1 %vm445_vm1, %v6118_v8 }
 0xc43   :  { %4872 = vmatprep.mubr.msk.f32.mxu1 %vm445_vm1, %v6123_v9 }
 0xc46   :  { %4873 = vmatmul.mubr.msk.f32.gmra.mxu1 %vm445_vm1, %v6132_v26  ;;  %vm3516_vm1 = vcmask 64512  }
 0xc9b   :  { %v4681_v32 = vpop.f32.mrf.mxu0 }
 0xc9d   :  { %v2201_v35 = vpop.f32.mrf.mxu0 }
 0xc9f   :  { %v4684_v39 = vpop.f32.mrf.mxu0  ;;  %v4725_v46 = vpop.f32.mrf.mxu1 }
 0xca0   :  { %v2312_v51 = vadd.f32 %v4725_v46, %v4681_v32 }
 0xca1   :  { %v2211_v42 = vpop.f32.mrf.mxu0  ;;  %v2306_v56 = vpop.f32.mrf.mxu1 }
 0xca2   :  { %v2307_v1 = vadd.f32 %v2306_v56, %v2201_v35 }
 0xca3   :  { %v4687_v48 = vpop.f32.mrf.mxu0  ;;  %v4728_v57 = vpop.f32.mrf.mxu1 }
 0xca4   :  { %v2322_v5 = vadd.f32 %v4728_v57, %v4684_v39 }
 0xca5   :  { %v2221_v54 = vpop.f32.mrf.mxu0  ;;  %v2316_v60 = vpop.f32.mrf.mxu1 }
 0xca6   :  { %v2317_v9 = vadd.f32 %v2316_v60, %v2211_v42 }
 0xca7   :  { %v4690_v59 = vpop.f32.mrf.mxu0  ;;  %v4731_v0 = vpop.f32.mrf.mxu1 }
 0xca8   :  { %v2332_v11 = vadd.f32 %v4731_v0, %v4687_v48 }
 0xca9   :  { %v2231_v61 = vpop.f32.mrf.mxu0  ;;  %v2326_v3 = vpop.f32.mrf.mxu1 }
 0xcaa   :  { %v2327_v18 = vadd.f32 %v2326_v3, %v2221_v54 }
 0xcab   :  { %v4734_v19 = vpop.f32.mrf.mxu1 }
 0xcac   :  { %v2342_v52 = vadd.f32 %v4734_v19, %v4690_v59 }
 0xcad   :  { %v2336_v21 = vpop.f32.mrf.mxu1 }
 0xcae   :  { %v2337_v25 = vadd.f32 %v2336_v21, %v2231_v61 }
 0xcb7   :  { %v4751_v2 = vpop.f32.mrf.mxu0 }
 0xcb8   :  { %v2490_v4 = vadd.f32 %v4751_v2, %v2312_v51 }
 0xcb9   :  { %v2450_v7 = vpop.f32.mrf.mxu0 }
 0xcba   :  { %2498 = vst.msk [vmem:[#allocation4 + $0x8] sm:$0xff] %vm128_vm0, %v2490_v4  ;;  %v2489_v8 = vadd.f32 %v2450_v7, %v2307_v1 }
 0xcbb   :  { %v4754_v10 = vpop.f32.mrf.mxu0 }
 0xcbc   :  { %2497 = vst.msk [vmem:[#allocation4] sm:$0xff] %vm128_vm0, %v2489_v8  ;;  %v2492_v26 = vadd.f32 %v4754_v10, %v2322_v5 }
 0xcbd   :  { %v2460_v14 = vpop.f32.mrf.mxu0 }
 0xcbe   :  { %2500 = vst.msk [vmem:[#allocation4 + $0x18] sm:$0xff] %vm128_vm0, %v2492_v26  ;;  %v2491_v15 = vadd.f32 %v2460_v14, %v2317_v9 }
 0xcbf   :  { %v4757_v20 = vpop.f32.mrf.mxu0 }
 0xcc0   :  { %2499 = vst.msk [vmem:[#allocation4 + $0x10] sm:$0xff] %vm128_vm0, %v2491_v15  ;;  %v2494_v22 = vadd.f32 %v4757_v20, %v2332_v11 }
 0xcc1   :  { %v2470_v23 = vpop.f32.mrf.mxu0 }
 0xcc2   :  { %2502 = vst.msk [vmem:[#allocation4 + $0x28] sm:$0xff] %vm128_vm0, %v2494_v22  ;;  %v2493_v24 = vadd.f32 %v2470_v23, %v2327_v18  ;;  %v3067_v23 = vpop.permute.xlu1 %3066 }
 0xcc3   :  { %v4760_v27 = vpop.f32.mrf.mxu0 }
 0xcc4   :  { %2501 = vst.msk [vmem:[#allocation4 + $0x20] sm:$0xff] %vm128_vm0, %v2493_v24  ;;  %v2496_v30 = vadd.f32 %v4760_v27, %v2342_v52  ;;  %v3064_v24 = vpop.permute.xlu0 %3063 }
 0xcc5   :  { %v2480_v31 = vpop.f32.mrf.mxu0 }
 0xcc6   :  { %2504 = vst.msk [vmem:[#allocation4 + $0x38] sm:$0xff] %vm128_vm0, %v2496_v30  ;;  %v2495_v29 = vadd.f32 %v2480_v31, %v2337_v25  ;;  %v3073_v30 = vpop.permute.xlu1 %3072 }
 0xcc8   :  { %2503 = vst.msk [vmem:[#allocation4 + $0x30] sm:$0xff] %vm128_vm0, %v2495_v29  ;;  %v3070_v29 = vpop.permute.xlu0 %3069 }
 0xcc9   :  { %v6205_v37 = vld [vmem:[#allocation4 + $0x28] sm:$0xff] }
 0xcca   :  { %3114 = vrot.lane.b32.xlu1 %v6205_v37, %s6980_s1 }
 0xccb   :  { %v6209_v33 = vld [vmem:[#allocation4 + $0x20] sm:$0xff] }
 0xccc   :  { %3111 = vrot.lane.b32.xlu0 %v6209_v33, %s6980_s1 }
 0xccd   :  { %v6213_v34 = vld [vmem:[#allocation4 + $0x38] sm:$0xff] }
 0xcce   :  { %3120 = vrot.lane.b32.xlu1 %v6213_v34, %s6980_s1 }
 0xccf   :  { %v6217_v44 = vld [vmem:[#allocation4 + $0x30] sm:$0xff] }
 0xcd0   :  { %3117 = vrot.lane.b32.xlu0 %v6217_v44, %s6980_s1 }
 0xcdb   :  { %v4795_v49 = vpop.f32.mrf.mxu1 }
 0xcdd   :  { %v2735_v38 = vpop.f32.mrf.mxu1 }
 0xcdf   :  { %v4798_v50 = vpop.f32.mrf.mxu1 }
 0xce1   :  { %v2745_v41 = vpop.f32.mrf.mxu1 }
 0xce4   :  { %v4801_v55 = vpop.f32.mrf.mxu1 }
 0xce6   :  { %v2755_v45 = vpop.f32.mrf.mxu1 }
 0xce8   :  { %v4804_v32 = vpop.f32.mrf.mxu1 }
 0xcea   :  { %v2765_v42 = vpop.f32.mrf.mxu1 }
 0xcf3   :  { %v4839_v47 = vpop.f32.mrf.mxu0 }
 0xcf4   :  { %v2846_v46 = vadd.f32 %v4839_v47, %v4795_v49  ;;  %v3068_v49 = vsel %vm936_vm2, %v3067_v23, %v5968_v6  ;;  %v3071_v47 = vsel %vm936_vm2, %v3070_v29, %v5987_v17 }
 0xcf5   :  { %v2840_v35 = vpop.f32.mrf.mxu0 }
 0xcf6   :  { %v2841_v54 = vadd.f32 %v2840_v35, %v2735_v38 }
 0xcf7   :  { %v4842_v39 = vpop.f32.mrf.mxu0 }
 0xcf8   :  { %v2856_v61 = vadd.f32 %v4842_v39, %v4798_v50  ;;  %v3065_v50 = vsel %vm936_vm2, %v3064_v24, %v5973_v58  ;;  %v3489_v24 = vld [vmem:[%s6982_s13 + $0x10] sm:$0xff] }
 0xcf9   :  { %v2850_v48 = vpop.f32.mrf.mxu0 }
 0xcfa   :  { %v4865_v56 = vpop.f32.mrf.mxu1  ;;  %v2851_v2 = vadd.f32 %v2850_v48, %v2745_v41  ;;  %v3079_v41 = vpop.permute.xlu1 %3078 }
 0xcfb   :  { %v3024_v57 = vadd.f32 %v4865_v56, %v2846_v46  ;;  %v4845_v59 = vpop.f32.mrf.mxu0 }
 0xcfc   :  { %v2984_v60 = vpop.f32.mrf.mxu1  ;;  %v2866_v7 = vadd.f32 %v4845_v59, %v4801_v55  ;;  %v3074_v55 = vsel %vm936_vm2, %v3073_v30, %v5982_v16  ;;  %v3622_v30 = vld [vmem:[#allocation6 + $0x8] sm:$0xff] }
 0xcfd   :  { %3032 = vst.msk [vmem:[#allocation4 + $0x48] sm:$0xff] %vm128_vm0, %v3024_v57  ;;  %v3023_v0 = vadd.f32 %v2984_v60, %v2841_v54  ;;  %v2860_v51 = vpop.f32.mrf.mxu0  ;;  %4883 = vmatprep.subr.mxu1 %v3622_v30 }
 0xcfe   :  { %v4868_v1 = vpop.f32.mrf.mxu1  ;;  %v2861_v10 = vadd.f32 %v2860_v51, %v2755_v45  ;;  %v3076_v45 = vpop.permute.xlu0 %3075  ;;  %4884 = vmatpush3.msra.mxu1 %v3622_v30 }
 0xcff   :  { %3031 = vst.msk [vmem:[#allocation4 + $0x40] sm:$0xff] %vm128_vm0, %v3023_v0  ;;  %v3026_v3 = vadd.f32 %v4868_v1, %v2856_v61  ;;  %v4848_v4 = vpop.f32.mrf.mxu0  ;;  %v3085_v35 = vpop.permute.xlu1 %3084  ;;  %v3077_v39 = vsel %vm936_vm2, %v3076_v45, %v6151_v36 }
 0xd00   :  { %v2994_v5 = vpop.f32.mrf.mxu1  ;;  %v2876_v14 = vadd.f32 %v4848_v4, %v4804_v32  ;;  %v3080_v32 = vsel %vm936_vm2, %v3079_v41, %v6143_v53  ;;  %v3086_v46 = vsel %vm936_vm2, %v3085_v35, %v6159_v28 }
 0xd01   :  { %3034 = vst.msk [vmem:[#allocation4 + $0x58] sm:$0xff] %vm128_vm0, %v3026_v3  ;;  %v3025_v8 = vadd.f32 %v2994_v5, %v2851_v2  ;;  %v2870_v26 = vpop.f32.mrf.mxu0 }
 0xd02   :  { %v4871_v9 = vpop.f32.mrf.mxu1  ;;  %v2871_v20 = vadd.f32 %v2870_v26, %v2765_v42  ;;  %v3082_v42 = vpop.permute.xlu0 %3081 }
 0xd03   :  { %3033 = vst.msk [vmem:[#allocation4 + $0x50] sm:$0xff] %vm128_vm0, %v3025_v8  ;;  %v3028_v19 = vadd.f32 %v4871_v9, %v2866_v7  ;;  %v3083_v48 = vsel %vm936_vm2, %v3082_v42, %v6167_v43 }
 0xd04   :  { %v3004_v11 = vpop.f32.mrf.mxu1 }
 0xd05   :  { %3036 = vst.msk [vmem:[#allocation4 + $0x68] sm:$0xff] %vm128_vm0, %v3028_v19  ;;  %v3027_v15 = vadd.f32 %v3004_v11, %v2861_v10 }
 0xd06   :  { %v4874_v18 = vpop.f32.mrf.mxu1 }
 0xd07   :  { %3035 = vst.msk [vmem:[#allocation4 + $0x60] sm:$0xff] %vm128_vm0, %v3027_v15  ;;  %v3030_v21 = vadd.f32 %v4874_v18, %v2876_v14  ;;  %v3491_v18 = vld [vmem:[#allocation6] sm:$0xff] }
 0xd08   :  { %v3014_v22 = vpop.f32.mrf.mxu1  ;;  %4875 = vmatprep.subr.mxu0 %v3491_v18 }
 0xd09   :  { %3038 = vst.msk [vmem:[#allocation4 + $0x78] sm:$0xff] %vm128_vm0, %v3030_v21  ;;  %v3029_v52 = vadd.f32 %v3014_v22, %v2871_v20  ;;  %v3487_v20 = vld [vmem:[%s6982_s13] sm:$0xff]  ;;  %4876 = vmatpush3.msra.mxu0 %v3491_v18  ;;  %v3493_v18 = vld [vmem:[%s6984_s3 + $0x8] sm:$0xff] }
 0xd0a   :  { %4877 = vmatprep.mubr.msk.f32.mxu0 %vm3516_vm1, %v3487_v20  ;;  %4885 = vmatprep.mubr.msk.f32.mxu1 %vm3516_vm1, %v3487_v20 }
 0xd0b   :  { %3037 = vst.msk [vmem:[#allocation4 + $0x70] sm:$0xff] %vm128_vm0, %v3029_v52  ;;  %v3488_v52 = vld [vmem:[%s6982_s13 + $0x8] sm:$0xff] }
 0xd0c   :  { %v6229_v25 = vld [vmem:[#allocation4 + $0x68] sm:$0xff]  ;;  %4878 = vmatmul.mubr.msk.f32.vlgmr.msra.gmra.mxu0 %vm3516_vm1, %v3488_v52  ;;  %4886 = vmatmul.mubr.msk.f32.vlgmr.msra.gmra.mxu1 %vm3516_vm1, %v3488_v52 }
 0xd0d   :  { %3126 = vrot.lane.b32.xlu1 %v6229_v25, %s6980_s1  ;;  %4880 = vmatprep.mubr.msk.f32.mxu0 %vm3516_vm1, %v3489_v24 }
 0xd0e   :  { %v6233_v27 = vld [vmem:[#allocation4 + $0x60] sm:$0xff]  ;;  %4888 = vmatprep.mubr.msk.f32.mxu1 %vm3516_vm1, %v3489_v24 }
 0xd0f   :  { %3123 = vrot.lane.b32.xlu0 %v6233_v27, %s6980_s1 }
 0xd10   :  { %v6237_v31 = vld [vmem:[#allocation4 + $0x78] sm:$0xff] }
 0xd11   :  { %3132 = vrot.lane.b32.xlu1 %v6237_v31, %s6980_s1 }
 0xd12   :  { %v6243_v38 = vld [vmem:[#allocation4 + $0x70] sm:$0xff] }
 0xd13   :  { %3129 = vrot.lane.b32.xlu0 %v6243_v38, %s6980_s1 }
 0xd15   :  { %3089 = vrot.lane.b32.xlu1 %v3068_v49, %s6980_s1  ;;  %v3490_v49 = vld [vmem:[%s6982_s13 + $0x18] sm:$0xff] }
 0xd16   :  { %4881 = vmatmul.mubr.msk.f32.gmra.mxu0 %vm3516_vm1, %v3490_v49  ;;  %4889 = vmatmul.mubr.msk.f32.gmra.mxu1 %vm3516_vm1, %v3490_v49 }
 0xd17   :  { %3087 = vrot.lane.b32.xlu0 %v3065_v50, %s6980_s1 }
 0xd19   :  { %3093 = vrot.lane.b32.xlu1 %v3074_v55, %s6980_s1 }
 0xd1b   :  { %3091 = vrot.lane.b32.xlu0 %v3071_v47, %s6980_s1 }
 0xd1d   :  { %3097 = vrot.lane.b32.xlu1 %v3080_v32, %s6980_s1 }
 0xd1f   :  { %3095 = vrot.lane.b32.xlu0 %v3077_v39, %s6980_s1 }
 0xd21   :  { %3101 = vrot.lane.b32.xlu1 %v3086_v46, %s6980_s1 }
 0xd23   :  { %3099 = vrot.lane.b32.xlu0 %v3083_v48, %s6980_s1 }
 0xd3c   :  { %v3115_v56 = vpop.permute.xlu1 %3114 }
 0xd3d   :  { %v3116_v54 = vsel %vm936_vm2, %v3115_v56, %v6205_v37 }
 0xd3e   :  { %3137 = vrot.lane.b32.xlu1 %v3116_v54, %s6980_s1  ;;  %v3112_v57 = vpop.permute.xlu0 %3111 }
 0xd3f   :  { %v3113_v59 = vsel %vm936_vm2, %v3112_v57, %v6209_v33 }
 0xd40   :  { %v3121_v60 = vpop.permute.xlu1 %3120  ;;  %3135 = vrot.lane.b32.xlu0 %v3113_v59, %s6980_s1 }
 0xd41   :  { %v3122_v61 = vsel %vm936_vm2, %v3121_v60, %v6213_v34 }
 0xd42   :  { %3141 = vrot.lane.b32.xlu1 %v3122_v61, %s6980_s1  ;;  %v3118_v0 = vpop.permute.xlu0 %3117 }
 0xd43   :  { %v3119_v51 = vsel %vm936_vm2, %v3118_v0, %v6217_v44 }
 0xd44   :  { %3139 = vrot.lane.b32.xlu0 %v3119_v51, %s6980_s1 }
 0xd7f   :  { %v3127_v1 = vpop.permute.xlu1 %3126 }
 0xd80   :  { %v3128_v2 = vsel %vm936_vm2, %v3127_v1, %v6229_v25 }
 0xd81   :  { %3145 = vrot.lane.b32.xlu1 %v3128_v2, %s6980_s1  ;;  %v3124_v3 = vpop.permute.xlu0 %3123 }
 0xd82   :  { %v3125_v4 = vsel %vm936_vm2, %v3124_v3, %v6233_v27 }
 0xd83   :  { %v3133_v5 = vpop.permute.xlu1 %3132  ;;  %3143 = vrot.lane.b32.xlu0 %v3125_v4, %s6980_s1 }
 0xd84   :  { %v3134_v7 = vsel %vm936_vm2, %v3133_v5, %v6237_v31 }
 0xd85   :  { %3149 = vrot.lane.b32.xlu1 %v3134_v7, %s6980_s1  ;;  %v3130_v8 = vpop.permute.xlu0 %3129 }
 0xd86   :  { %v3131_v9 = vsel %vm936_vm2, %v3130_v8, %v6243_v38 }
 0xd87   :  { %3147 = vrot.lane.b32.xlu0 %v3131_v9, %s6980_s1  ;;  %v3090_v10 = vpop.permute.xlu1 %3089  ;;  %s6987_s1 = sld [smem:[#allocation30_spill]] }
 0xd88   :  { %v6298_v21 = vsel %vm936_vm2, %v3090_v10, %v5968_v6 }
 0xd89   :  { %v3088_v19 = vpop.permute.xlu0 %3087  ;;  %vm3184_vm3 = vcmp.eq.s32.totalorder %v6298_v21, %v5490_v63 }
 0xd8a   :  { %v6307_v23 = vsel %vm936_vm2, %v3088_v19, %v5973_v58  ;;  %vm3192_vm6 = vmand %vm3184_vm3, %vm982_vm4 }
 0xd8b   :  { %v3094_v26 = vpop.permute.xlu1 %3093  ;;  %vm3183_vm5 = vcmp.eq.s32.totalorder %v6307_v23, %v5490_v63 }
 0xd8c   :  { %v6321_v50 = vsel %vm936_vm2, %v3094_v26, %v5982_v16  ;;  %vm3191_vm8 = vmand %vm3183_vm5, %vm982_vm4 }
 0xd8d   :  { %v3092_v11 = vpop.permute.xlu0 %3091  ;;  %vm3186_vm7 = vcmp.eq.s32.totalorder %v6321_v50, %v5490_v63 }
 0xd8e   :  { %v6328_v55 = vsel %vm936_vm2, %v3092_v11, %v5987_v17  ;;  %vm3194_vm10 = vmand %vm3186_vm7, %vm982_vm4 }
 0xd8f   :  { %v3098_v14 = vpop.permute.xlu1 %3097  ;;  %vm3185_vm9 = vcmp.eq.s32.totalorder %v6328_v55, %v5490_v63 }
 0xd90   :  { %vm3193_vm11 = vmand %vm3185_vm9, %vm982_vm4  ;;  %v6371_v59 = vsel %vm936_vm2, %v3098_v14, %v6143_v53  ;;  %vm3175_vm9 = vcmp.eq.s32.totalorder %v5973_v58, %v5471_v40 }
 0xd91   :  { %v3096_v15 = vpop.permute.xlu0 %3095  ;;  %vm3188_vm13 = vcmp.eq.s32.totalorder %v6371_v59, %v5490_v63 }
 0xd92   :  { %v6375_v60 = vsel %vm936_vm2, %v3096_v15, %v6151_v36  ;;  %vm3196_vm15 = vmand %vm3188_vm13, %vm982_vm4  ;;  %vm3182_vm13 = vcmp.eq.s32.totalorder %v6159_v28, %v5471_v40 }
 0xd93   :  { %v3102_v22 = vpop.permute.xlu1 %3101  ;;  %vm3187_vm14 = vcmp.eq.s32.totalorder %v6375_v60, %v5490_v63 }
 0xd94   :  { %v6381_v61 = vsel %vm936_vm2, %v3102_v22, %v6159_v28  ;;  %vm3195_vm3 = vmand %vm3187_vm14, %vm982_vm4  ;;  %vm3181_vm14 = vcmp.eq.s32.totalorder %v6167_v43, %v5471_v40  ;;  %v3492_v28 = vld [vmem:[%s6984_s3] sm:$0xff] }
 0xd95   :  { %v3100_v29 = vpop.permute.xlu0 %3099  ;;  %vm3190_vm1 = vcmp.eq.s32.totalorder %v6381_v61, %v5490_v63 }
 0xd96   :  { %v6387_v51 = vsel %vm936_vm2, %v3100_v29, %v6167_v43  ;;  %v3494_v43 = vld [vmem:[%s6984_s3 + $0x10] sm:$0xff] }
 0xd97   :  { %vm3189_vm5 = vcmp.eq.s32.totalorder %v6387_v51, %v5490_v63 }
 0xd98   :  { %vm3197_vm7 = vmand %vm3189_vm5, %vm982_vm4  ;;  %vm3162_vm5 = vcmp.eq.s32.totalorder %v6321_v50, %v5518_v13 }
 0xdb0   :  { %v3138_v41 = vpop.permute.xlu1 %3137 }
 0xdb1   :  { %v6334_v45 = vsel %vm936_vm2, %v3138_v41, %v6205_v37 }
 0xdb2   :  { %v3200_v47 = vsel %vm3192_vm6, %v6334_v45, 0.0  ;;  %v3136_v32 = vpop.permute.xlu0 %3135  ;;  %vm3198_vm6 = vmand %vm3190_vm1, %vm982_vm4  ;;  %vm3177_vm4 = vcmp.eq.s32.totalorder %v5987_v17, %v5471_v40  ;;  %vm3159_vm1 = vcmp.eq.s32.totalorder %v6307_v23, %v5518_v13 }
 0xdb3   :  { %v6345_v35 = vsel %vm936_vm2, %v3136_v32, %v6209_v33  ;;  %3217 = vrot.lane.b32.xlu1 %v3200_v47, %s6983_s28 }
 0xdb4   :  { %v3199_v39 = vsel %vm3191_vm8, %v6345_v35, 0.0  ;;  %v3142_v42 = vpop.permute.xlu1 %3141  ;;  %vm3176_vm8 = vcmp.eq.s32.totalorder %v5968_v6, %v5471_v40 }
 0xdb5   :  { %v6356_v46 = vsel %vm936_vm2, %v3142_v42, %v6213_v34  ;;  %3215 = vrot.lane.b32.xlu0 %v3199_v39, %s6983_s28 }
 0xdb6   :  { %v3202_v48 = vsel %vm3194_vm10, %v6356_v46, 0.0  ;;  %v3140_v56 = vpop.permute.xlu0 %3139  ;;  %vm3180_vm10 = vcmp.eq.s32.totalorder %v6143_v53, %v5471_v40 }
 0xdb7   :  { %v6364_v54 = vsel %vm936_vm2, %v3140_v56, %v6217_v44  ;;  %3221 = vrot.lane.b32.xlu1 %v3202_v48, %s6983_s28 }
 0xdb8   :  { %v3201_v57 = vsel %vm3193_vm11, %v6364_v54, 0.0  ;;  %vm3179_vm11 = vcmp.eq.s32.totalorder %v6151_v36, %v5471_v40 }
 0xdb9   :  { %3219 = vrot.lane.b32.xlu0 %v3201_v57, %s6983_s28 }
 0xdcc   :  { %v4887_v39 = vpop.f32.mrf.mxu1 }
 0xdf3   :  { %v3146_v0 = vpop.permute.xlu1 %3145 }
 0xdf4   :  { %v6393_v1 = vsel %vm936_vm2, %v3146_v0, %v6229_v25  ;;  %v3042_v0 = vld [vmem:[#allocation4 + $0x18] sm:$0xff] }
 0xdf5   :  { %v3204_v2 = vsel %vm3196_vm15, %v6393_v1, 0.0  ;;  %v3144_v3 = vpop.permute.xlu0 %3143  ;;  %vm3160_vm15 = vcmp.eq.s32.totalorder %v6298_v21, %v5518_v13 }
 0xdf6   :  { %v6402_v4 = vsel %vm936_vm2, %v3144_v3, %v6233_v27  ;;  %3225 = vrot.lane.b32.xlu1 %v3204_v2, %s6983_s28 }
 0xdf7   :  { %v3203_v5 = vsel %vm3195_vm3, %v6402_v4, 0.0  ;;  %v3150_v7 = vpop.permute.xlu1 %3149  ;;  %vm3168_vm3 = vmand %vm3160_vm15, %vm969_vm12 }
 0xdf8   :  { %v6412_v8 = vsel %vm936_vm2, %v3150_v7, %v6237_v31  ;;  %3223 = vrot.lane.b32.xlu0 %v3203_v5, %s6983_s28  ;;  %v3044_v5 = vld [vmem:[#allocation4 + $0x48] sm:$0xff] }
 0xdf9   :  { %v3206_v9 = vsel %vm3198_vm6, %v6412_v8, 0.0  ;;  %v3148_v10 = vpop.permute.xlu0 %3147  ;;  %vm3167_vm6 = vmand %vm3159_vm1, %vm969_vm12 }
 0xdfa   :  { %v6420_v63 = vsel %vm936_vm2, %v3148_v10, %v6243_v38  ;;  %3229 = vrot.lane.b32.xlu1 %v3206_v9, %s6983_s28  ;;  %vm3178_vm2 = vcmp.eq.s32.totalorder %v5982_v16, %v5471_v40  ;;  %v3495_v40 = vld [vmem:[%s6984_s3 + $0x18] sm:$0xff]  ;;  %v3043_v9 = vld [vmem:[#allocation4 + $0x40] sm:$0xff] }
 0xdfb   :  { %v3205_v19 = vsel %vm3197_vm7, %v6420_v63, 0.0  ;;  %vm3161_vm7 = vcmp.eq.s32.totalorder %v6328_v55, %v5518_v13 }
 0xdfc   :  { %3227 = vrot.lane.b32.xlu0 %v3205_v19, %s6983_s28 }
 0xe25   :  { %v3218_v26 = vpop.permute.xlu1 %3217 }
 0xe26   :  { %v3240_v62 = vsel %vm3176_vm8, %v6205_v37, %v3218_v26  ;;  %vm3170_vm8 = vmand %vm3162_vm5, %vm969_vm12 }
 0xe27   :  { %3257 = vrot.lane.b32.xlu1 %v3240_v62, %s6918_s18  ;;  %v3216_v11 = vpop.permute.xlu0 %3215  ;;  %v3046_v62 = vld [vmem:[#allocation4 + $0x58] sm:$0xff] }
 0xe28   :  { %v3239_v14 = vsel %vm3175_vm9, %v6209_v33, %v3216_v11  ;;  %vm3169_vm9 = vmand %vm3161_vm7, %vm969_vm12 }
 0xe29   :  { %v3222_v15 = vpop.permute.xlu1 %3221  ;;  %3255 = vrot.lane.b32.xlu0 %v3239_v14, %s6918_s18  ;;  %v3045_v14 = vld [vmem:[#allocation4 + $0x50] sm:$0xff] }
 0xe2a   :  { %v3242_v6 = vsel %vm3178_vm2, %v6213_v34, %v3222_v15  ;;  %vm3164_vm2 = vcmp.eq.s32.totalorder %v6371_v59, %v5518_v13  ;;  %v3725_v59 = vpop.f32.mrf.mxu1 }
 0xe2b   :  { %3261 = vrot.lane.b32.xlu1 %v3242_v6, %s6918_s18  ;;  %v3220_v58 = vpop.permute.xlu0 %3219 }
 0xe2c   :  { %v3241_v37 = vsel %vm3177_vm4, %v6217_v44, %v3220_v58  ;;  %vm3163_vm4 = vcmp.eq.s32.totalorder %v6375_v60, %v5518_v13  ;;  %v4890_v3 = vpop.f32.mrf.mxu1 }
 0xe2d   :  { %3259 = vrot.lane.b32.xlu0 %v3241_v37, %s6918_s18 }
 0xe68   :  { %v3226_v16 = vpop.permute.xlu1 %3225 }
 0xe69   :  { %v3244_v33 = vsel %vm3180_vm10, %v6229_v25, %v3226_v16  ;;  %vm3172_vm10 = vmand %vm3164_vm2, %vm969_vm12 }
 0xe6a   :  { %3265 = vrot.lane.b32.xlu1 %v3244_v33, %s6918_s18  ;;  %v3224_v17 = vpop.permute.xlu0 %3223 }
 0xe6b   :  { %v3243_v34 = vsel %vm3179_vm11, %v6233_v27, %v3224_v17  ;;  %vm3166_vm11 = vcmp.eq.s32.totalorder %v6381_v61, %v5518_v13 }
 0xe6c   :  { %v3230_v44 = vpop.permute.xlu1 %3229  ;;  %3263 = vrot.lane.b32.xlu0 %v3243_v34, %s6918_s18  ;;  %vm3174_vm15 = vmand %vm3166_vm11, %vm969_vm12 }
 0xe6d   :  { %v3246_v53 = vsel %vm3182_vm13, %v6237_v31, %v3230_v44  ;;  %vm3171_vm13 = vmand %vm3163_vm4, %vm969_vm12 }
 0xe6e   :  { %3269 = vrot.lane.b32.xlu1 %v3246_v53, %s6918_s18  ;;  %v3228_v36 = vpop.permute.xlu0 %3227 }
 0xe6f   :  { %v3245_v25 = vsel %vm3181_vm14, %v6243_v38, %v3228_v36  ;;  %vm3165_vm14 = vcmp.eq.s32.totalorder %v6387_v51, %v5518_v13  ;;  %v4879_v13 = vpop.f32.mrf.mxu0 }
 0xe70   :  { %3267 = vrot.lane.b32.xlu0 %v3245_v25, %s6918_s18  ;;  %vm3173_vm1 = vmand %vm3165_vm14, %vm969_vm12 }
 0xe71   :  { %v3595_v47 = vpop.f32.mrf.mxu0 }
 0xe72   :  { %3503 = vperm.xlu1 %4944, %v3493_v18  }
 0xe73   :  { %v4882_v32 = vpop.f32.mrf.mxu0 }
 0xe74   :  { %3498 = vperm.xlu0 %4943, %v3492_v28  }
 0xe75   :  { %v3605_v12 = vpop.f32.mrf.mxu0 }
 0xe76   :  { %3513 = vperm.xlu1 %4944, %v3495_v40  }
 0xe78   :  { %3508 = vperm.xlu0 %4943, %v3494_v43  }
 0xe7a   :  { %3634 = vperm.xlu1 %4944, %v3493_v18  }
 0xe7c   :  { %3629 = vperm.xlu0 %4943, %v3492_v28  }
 0xe7e   :  { %3644 = vperm.xlu1 %4944, %v3495_v40  }
 0xe80   :  { %3639 = vperm.xlu0 %4943, %v3494_v43  }
 0xe99   :  { %v3258_v27 = vpop.permute.xlu1 %3257 }
 0xe9a   :  { %v3280_v31 = vsel %vm3168_vm3, %v6334_v45, %v3258_v27 }
 0xe9b   :  { %3297 = vrot.lane.b32.xlu1 %v3280_v31, %s6913_s26  ;;  %v3256_v38 = vpop.permute.xlu0 %3255 }
 0xe9c   :  { %v3279_v20 = vsel %vm3167_vm6, %v6345_v35, %v3256_v38 }
 0xe9d   :  { %v3262_v21 = vpop.permute.xlu1 %3261  ;;  %3295 = vrot.lane.b32.xlu0 %v3279_v20, %s6913_s26 }
 0xe9e   :  { %v3282_v22 = vsel %vm3170_vm8, %v6356_v46, %v3262_v21  ;;  %v3040_v46 = vld [vmem:[#allocation4 + $0x8] sm:$0xff] }
 0xe9f   :  { %3301 = vrot.lane.b32.xlu1 %v3282_v22, %s6913_s26  ;;  %v3260_v52 = vpop.permute.xlu0 %3259 }
 0xea0   :  { %v3281_v23 = vsel %vm3169_vm9, %v6364_v54, %v3260_v52  ;;  %v3039_v54 = vld [vmem:[#allocation4] sm:$0xff] }
 0xea1   :  { %3299 = vrot.lane.b32.xlu0 %v3281_v23, %s6913_s26 }
 0xedc   :  { %v3266_v24 = vpop.permute.xlu1 %3265 }
 0xedd   :  { %v3284_v30 = vsel %vm3172_vm10, %v6393_v1, %v3266_v24  ;;  %v6520_v1 = vld [vmem:[#allocation4 + $0x10] sm:$0xff] }
 0xede   :  { %3305 = vrot.lane.b32.xlu1 %v3284_v30, %s6913_s26  ;;  %v3264_v29 = vpop.permute.xlu0 %3263 }
 0xedf   :  { %v3283_v49 = vsel %vm3171_vm13, %v6402_v4, %v3264_v29 }
 0xee0   :  { %v3270_v50 = vpop.permute.xlu1 %3269  ;;  %3303 = vrot.lane.b32.xlu0 %v3283_v49, %s6913_s26 }
 0xee1   :  { %v3286_v41 = vsel %vm3174_vm15, %v6412_v8, %v3270_v50 }
 0xee2   :  { %3309 = vrot.lane.b32.xlu1 %v3286_v41, %s6913_s26  ;;  %v3268_v55 = vpop.permute.xlu0 %3267 }
 0xee3   :  { %v3285_v45 = vsel %vm3173_vm1, %v6420_v63, %v3268_v55  ;;  %v3735_v63 = vpop.f32.mrf.mxu1 }
 0xee4   :  { %3307 = vrot.lane.b32.xlu0 %v3285_v45, %s6913_s26 }
 0xeed   :  { %v3504_v35 = vpop.permute.xlu1 %3503 }
 0xeee   :  { %v3601_v42 = vadd.f32 %v4879_v13, %v3504_v35 }
 0xeef   :  { %v3499_v48 = vpop.permute.xlu0 %3498 }
 0xef0   :  { %3615 = vst.msk [vmem:[#allocation4 + $0x8] sm:$0xff] %vm128_vm0, %v3601_v42  ;;  %v3596_v56 = vadd.f32 %v3595_v47, %v3499_v48 }
 0xef1   :  { %v3514_v57 = vpop.permute.xlu1 %3513 }
 0xef2   :  { %3614 = vst.msk [vmem:[#allocation4] sm:$0xff] %vm128_vm0, %v3596_v56  ;;  %v3611_v60 = vadd.f32 %v4882_v32, %v3514_v57 }
 0xef3   :  { %v3509_v61 = vpop.permute.xlu0 %3508 }
 0xef4   :  { %v3606_v51 = vadd.f32 %v3605_v12, %v3509_v61  ;;  %3617 = vst.msk [vmem:[#allocation4 + $0x18] sm:$0xff] %vm128_vm0, %v3611_v60 }
 0xef5   :  { %v3635_v2 = vpop.permute.xlu1 %3634 }
 0xef6   :  { %3616 = vst.msk [vmem:[#allocation4 + $0x10] sm:$0xff] %vm128_vm0, %v3606_v51  ;;  %v3731_v4 = vadd.f32 %v4887_v39, %v3635_v2 }
 0xef7   :  { %v3630_v7 = vpop.permute.xlu0 %3629  ;;  %v3749_v15 = vld [vmem:[#allocation4 + $0x8] sm:$0xff] }
 0xef8   :  { %3745 = vst.msk [vmem:[#allocation4 + $0x48] sm:$0xff] %vm128_vm0, %v3731_v4  ;;  %v3726_v8 = vadd.f32 %v3725_v59, %v3630_v7  ;;  %v3761_v37 = vsel %vm128_vm0, %v3749_v15, 0.0 }
 0xef9   :  { %v3645_v10 = vpop.permute.xlu1 %3644  ;;  %v3748_v58 = vld [vmem:[#allocation4] sm:$0xff] }
 0xefa   :  { %3744 = vst.msk [vmem:[#allocation4 + $0x40] sm:$0xff] %vm128_vm0, %v3726_v8  ;;  %v3741_v19 = vadd.f32 %v4890_v3, %v3645_v10  ;;  %v3756_v34 = vsel %vm128_vm0, %v3748_v58, 0.0 }
 0xefb   :  { %v3640_v26 = vpop.permute.xlu0 %3639  ;;  %v3751_v59 = vld [vmem:[#allocation4 + $0x18] sm:$0xff] }
 0xefc   :  { %v3736_v11 = vadd.f32 %v3735_v63, %v3640_v26  ;;  %3747 = vst.msk [vmem:[#allocation4 + $0x58] sm:$0xff] %vm128_vm0, %v3741_v19  ;;  %v3771_v61 = vsel %vm128_vm0, %v3751_v59, 0.0 }
 0xefd   :  { %v3750_v36 = vld [vmem:[#allocation4 + $0x10] sm:$0xff] }
 0xefe   :  { %3746 = vst.msk [vmem:[#allocation4 + $0x50] sm:$0xff] %vm128_vm0, %v3736_v11  ;;  %v3766_v18 = vsel %vm128_vm0, %v3750_v36, 0.0 }
 0xeff   :  { %v3753_v6 = vld [vmem:[#allocation4 + $0x48] sm:$0xff] }
 0xf00   :  { %v3762_v16 = vsel %vm128_vm0, %v3753_v6, 0.0 }
 0xf01   :  { %v3763_v33 = vadd.f32 %v3762_v16, %v3761_v37  ;;  %v3752_v17 = vld [vmem:[#allocation4 + $0x40] sm:$0xff] }
 0xf02   :  { %v3757_v44 = vsel %vm128_vm0, %v3752_v17, 0.0 }
 0xf03   :  { %3764 = vadd.xlane.f32.xlu0 %v3763_v33  ;;  %v3758_v53 = vadd.f32 %v3757_v44, %v3756_v34  ;;  %v6564_v12 = vld [vmem:[#allocation4 + $0x58] sm:$0xff] }
 0xf04   :  { %v3772_v60 = vsel %vm128_vm0, %v6564_v12, 0.0 }
 0xf05   :  { %v3754_v25 = vld [vmem:[#allocation4 + $0x50] sm:$0xff] }
 0xf06   :  { %3759 = vadd.xlane.f32.xlu1 %v3758_v53  ;;  %v3767_v28 = vsel %vm128_vm0, %v3754_v25, 0.0 }
 0xf07   :  { %v3768_v40 = vadd.f32 %v3767_v28, %v3766_v18  ;;  %v3409_v18 = vld [vmem:[%s6985_s2 + $0x10] sm:$0xff]  ;;  %v3439_v28 = vld [vmem:[%s6986_s22] sm:$0xff] }
 0xf0a   :  { %3769 = vadd.xlane.f32.xlu1 %v3768_v40  ;;  %v3440_v40 = vld [vmem:[%s6986_s22 + $0x8] sm:$0xff] }
 0xf0d   :  { %v3298_v43 = vpop.permute.xlu1 %3297 }
 0xf0e   :  { %v6533_v20 = vadd.f32 %v3298_v43, %v3040_v46  ;;  %v3442_v43 = vld [vmem:[%s6986_s22 + $0x18] sm:$0xff] }
 0xf0f   :  { %v3296_v27 = vpop.permute.xlu0 %3295 }
 0xf10   :  { %v6535_v22 = vadd.f32 %v3296_v27, %v3039_v54  ;;  %v3332_v24 = vsel %vm128_vm0, %v6533_v20, 0.0  ;;  %v3837_v27 = vld [vmem:[%s6987_s1 + $0x8] sm:$0xff] }
 0xf11   :  { %v3302_v31 = vpop.permute.xlu1 %3301 }
 0xf12   :  { %v3327_v41 = vsel %vm128_vm0, %v6535_v22, 0.0  ;;  %v6547_v55 = vadd.f32 %v3302_v31, %v3042_v0  ;;  %v3773_v0 = vadd.f32 %v3772_v60, %v3771_v61  ;;  %v3410_v60 = vld [vmem:[%s6985_s2 + $0x18] sm:$0xff] }
 0xf13   :  { %v3300_v38 = vpop.permute.xlu0 %3299 }
 0xf14   :  { %v3342_v42 = vsel %vm128_vm0, %v6547_v55, 0.0  ;;  %v6560_v46 = vadd.f32 %v3300_v38, %v6520_v1 }
 0xf16   :  { %v3337_v54 = vsel %vm128_vm0, %v6560_v46, 0.0 }
 0xf50   :  { %v3306_v21 = vpop.permute.xlu1 %3305 }
 0xf51   :  { %v6537_v52 = vadd.f32 %v3306_v21, %v3044_v5 }
 0xf52   :  { %v3304_v23 = vpop.permute.xlu0 %3303 }
 0xf53   :  { %v3333_v30 = vsel %vm128_vm0, %v6537_v52, 0.0  ;;  %v6543_v29 = vadd.f32 %v3304_v23, %v3043_v9 }
 0xf54   :  { %v3334_v49 = vadd.f32 %v3333_v30, %v3332_v24  ;;  %v3310_v50 = vpop.permute.xlu1 %3309 }
 0xf55   :  { %v3328_v45 = vsel %vm128_vm0, %v6543_v29, 0.0  ;;  %v6551_v13 = vadd.f32 %v3310_v50, %v3046_v62 }
 0xf56   :  { %v3329_v47 = vadd.f32 %v3328_v45, %v3327_v41  ;;  %3335 = vadd.xlane.f32.xlu1 %v3334_v49  ;;  %v3308_v32 = vpop.permute.xlu0 %3307 }
 0xf57   :  { %v3343_v35 = vsel %vm128_vm0, %v6551_v13, 0.0  ;;  %v6555_v39 = vadd.f32 %v3308_v32, %v3045_v14 }
 0xf58   :  { %3330 = vadd.xlane.f32.xlu0 %v3329_v47  ;;  %v3344_v48 = vadd.f32 %v3343_v35, %v3342_v42 }
 0xf59   :  { %v3338_v56 = vsel %vm128_vm0, %v6555_v39, 0.0 }
 0xf5a   :  { %v3339_v57 = vadd.f32 %v3338_v56, %v3337_v54 }
 0xf5c   :  { %3345 = vadd.xlane.f32.xlu0 %v3344_v48 }
 0xf60   :  { %3340 = vadd.xlane.f32.xlu0 %v3339_v57 }
 0xf64   :  { %3774 = vadd.xlane.f32.xlu0 %v3773_v0  ;;  %v3441_v0 = vld [vmem:[%s6986_s22 + $0x10] sm:$0xff]  ;;  %s3937_s22 = sshll.u32 %s5144_s4, 4  ;;  %s3938_s22 = int_to_ptr.vmem [resolvable:$true] %s3937_s22 }
 0xf65   :  { %s5065_s23 = scalar_lea.vmem %s3938_s22, 1024  ;;  %p5070_p12 = scmp.lt.s32.totalorder %s3938_s22, %s3938_s22 }
 0xf66   :  { %p5066_p11 = scmp.ne.s32.totalorder %s3938_s22, %s5065_s23  ;;  %p5071_p13 = scmp.lt.s32.totalorder %s5065_s23, %s5065_s23 }
 0xf68   :  { %p5072_p0 = por %p5071_p13, %p5070_p12 }
 0xf6a   :  { %p5073_p1 = pnand %p5072_p0, %p5066_p11 }
 0xf8c   :  { %v3765_v51 = vpop.xlane.xlu0 %3764 }
 0xf8d   :  { %v3777_v1 = vmul.f32 0.0078125, %v3765_v51 }
 0xf8f   :  { %v6571_v2 = vsub.f32 %v3749_v15, %v3777_v1  ;;  %v6573_v3 = vsub.f32 %v3753_v6, %v3777_v1  ;;  %v3760_v4 = vpop.xlane.xlu1 %3759 }
 0xf90   :  { %v3776_v5 = vmul.f32 0.0078125, %v3760_v4  ;;  %v3836_v4 = vld [vmem:[%s6987_s1] sm:$0xff] }
 0xf91   :  { %v3789_v7 = vmul.f32 %v6571_v2, %v6571_v2  ;;  %v3793_v8 = vmul.f32 %v6573_v3, %v6573_v3 }
 0xf92   :  { %v6579_v9 = vsub.f32 %v3748_v58, %v3776_v5  ;;  %v6581_v10 = vsub.f32 %v3752_v17, %v3776_v5 }
 0xf93   :  { %v3770_v63 = vpop.xlane.xlu1 %3769  ;;  %v3801_v19 = vsel %vm128_vm0, %v3789_v7, 0.0  ;;  %v3802_v26 = vsel %vm128_vm0, %v3793_v8, 0.0 }
 0xf94   :  { %v3788_v62 = vmul.f32 %v6579_v9, %v6579_v9  ;;  %v3792_v11 = vmul.f32 %v6581_v10, %v6581_v10  ;;  %v3778_v14 = vmul.f32 0.0078125, %v3770_v63  ;;  %v3803_v15 = vadd.f32 %v3802_v26, %v3801_v19 }
 0xf96   :  { %v6589_v6 = vsub.f32 %v3750_v36, %v3778_v14  ;;  %v6591_v37 = vsub.f32 %v3754_v25, %v3778_v14  ;;  %3804 = vadd.xlane.f32.xlu0 %v3803_v15  ;;  %v3796_v58 = vsel %vm128_vm0, %v3788_v62, 0.0  ;;  %v3797_v16 = vsel %vm128_vm0, %v3792_v11, 0.0  ;;  %v3407_v25 = vld [vmem:[%s6985_s2] sm:$0xff]  ;;  %v3869_v14 = vld [vmem:[%s6988_s15 + $0x8] sm:$0xff] }
 0xf97   :  { %v3798_v33 = vadd.f32 %v3797_v16, %v3796_v58 }
 0xf98   :  { %v3790_v17 = vmul.f32 %v6589_v6, %v6589_v6  ;;  %v3794_v34 = vmul.f32 %v6591_v37, %v6591_v37 }
 0xf99   :  { %3799 = vadd.xlane.f32.xlu1 %v3798_v33 }
 0xf9a   :  { %v3806_v44 = vsel %vm128_vm0, %v3790_v17, 0.0  ;;  %v3807_v53 = vsel %vm128_vm0, %v3794_v34, 0.0 }
 0xf9b   :  { %v3808_v36 = vadd.f32 %v3807_v53, %v3806_v44 }
 0xf9d   :  { %3809 = vadd.xlane.f32.xlu1 %v3808_v36 }
 0xfae   :  { %3413 = vperm.xlu1 %4944, %v3407_v25  }
 0xfb2   :  { %3423 = vperm.xlu1 %4944, %v3409_v18  }
 0xfb6   :  { %3445 = vperm.xlu1 %4944, %v3439_v28   ;;  %v3838_v28 = vld [vmem:[%s6987_s1 + $0x10] sm:$0xff] }
 0xfba   :  { %3450 = vperm.xlu1 %4944, %v3440_v40  }
 0xfbe   :  { %3460 = vperm.xlu1 %4944, %v3442_v43   ;;  %v3868_v43 = vld [vmem:[%s6988_s15] sm:$0xff] }
 0xfc2   :  { %3847 = vperm.xlu1 %4944, %v3837_v27   ;;  %v3870_v27 = vld [vmem:[%s6988_s15 + $0x10] sm:$0xff] }
 0xfe1   :  { %v3331_v31 = vpop.xlane.xlu0 %3330 }
 0xfe2   :  { %v3347_v38 = vmul.f32 0.0078125, %v3331_v31 }
 0xfe4   :  { %v6620_v21 = vsub.f32 %v6535_v22, %v3347_v38  ;;  %v6623_v23 = vsub.f32 %v6543_v29, %v3347_v38 }
 0xfe5   :  { %v3346_v24 = vpop.xlane.xlu0 %3345 }
 0xfe6   :  { %v3359_v30 = vmul.f32 %v6620_v21, %v6620_v21  ;;  %v3363_v49 = vmul.f32 %v6623_v23, %v6623_v23  ;;  %v3350_v11 = vmul.f32 0.0078125, %v3346_v24 }
 0xfe8   :  { %v3367_v50 = vsel %vm128_vm0, %v3359_v30, 0.0  ;;  %v3368_v41 = vsel %vm128_vm0, %v3363_v49, 0.0  ;;  %v6683_v16 = vsub.f32 %v6547_v55, %v3350_v11 }
 0xfe9   :  { %v3341_v45 = vpop.xlane.xlu0 %3340  ;;  %v3369_v47 = vadd.f32 %v3368_v41, %v3367_v50 }
 0xfea   :  { %v3349_v61 = vmul.f32 0.0078125, %v3341_v45  ;;  %v3362_v33 = vmul.f32 %v6683_v16, %v6683_v16 }
 0xfeb   :  { %3370 = vadd.xlane.f32.xlu1 %v3369_v47 }
 0xfec   :  { %v6655_v51 = vsub.f32 %v6560_v46, %v3349_v61  ;;  %v6658_v1 = vsub.f32 %v6555_v39, %v3349_v61  ;;  %v3336_v39 = vpop.xlane.xlu1 %3335 }
 0xfed   :  { %v3775_v32 = vpop.xlane.xlu0 %3774  ;;  %v3348_v19 = vmul.f32 0.0078125, %v3336_v39 }
 0xfee   :  { %v3779_v22 = vmul.f32 0.0078125, %v3775_v32  ;;  %v3361_v5 = vmul.f32 %v6655_v51, %v6655_v51  ;;  %v3365_v7 = vmul.f32 %v6658_v1, %v6658_v1 }
 0xfef   :  { %v6670_v26 = vsub.f32 %v6533_v20, %v3348_v19  ;;  %v6673_v62 = vsub.f32 %v6537_v52, %v3348_v19  ;;  %v6686_v20 = vsub.f32 %v6551_v13, %v3350_v11  ;;  %v3871_v52 = vld [vmem:[%s6988_s15 + $0x18] sm:$0xff]  ;;  %v3382_v13 = vsel %vm128_vm0, %v3362_v33, 0.0 }
 0xff0   :  { %v6631_v35 = vsub.f32 %v3751_v59, %v3779_v22  ;;  %v6634_v29 = vsub.f32 %v6564_v12, %v3779_v22  ;;  %v3839_v59 = vld [vmem:[%s6987_s1 + $0x18] sm:$0xff]  ;;  %v3408_v12 = vld [vmem:[%s6985_s2 + $0x8] sm:$0xff]  ;;  %v3377_v8 = vsel %vm128_vm0, %v3361_v5, 0.0  ;;  %v3378_v46 = vsel %vm128_vm0, %v3365_v7, 0.0 }
 0xff1   :  { %v3379_v63 = vadd.f32 %v3378_v46, %v3377_v8  ;;  %v3360_v15 = vmul.f32 %v6670_v26, %v6670_v26  ;;  %v3364_v58 = vmul.f32 %v6673_v62, %v6673_v62  ;;  %v3366_v17 = vmul.f32 %v6686_v20, %v6686_v20 }
 0xff2   :  { %v3791_v42 = vmul.f32 %v6631_v35, %v6631_v35  ;;  %v3795_v48 = vmul.f32 %v6634_v29, %v6634_v29 }
 0xff3   :  { %v3372_v34 = vsel %vm128_vm0, %v3360_v15, 0.0  ;;  %v3373_v44 = vsel %vm128_vm0, %v3364_v58, 0.0  ;;  %v3383_v53 = vsel %vm128_vm0, %v3366_v17, 0.0 }
 0xff4   :  { %v3811_v56 = vsel %vm128_vm0, %v3791_v42, 0.0  ;;  %v3812_v54 = vsel %vm128_vm0, %v3795_v48, 0.0  ;;  %v3374_v55 = vadd.f32 %v3373_v44, %v3372_v34  ;;  %v3384_v36 = vadd.f32 %v3383_v53, %v3382_v13 }
 0xff5   :  { %v3813_v57 = vadd.f32 %v3812_v54, %v3811_v56 }
 0xff7   :  { %3814 = vadd.xlane.f32.xlu0 %v3813_v57 }
 0xffc   :  { %3857 = vperm.xlu1 %4944, %v3839_v59  }
0x100d   :  { %3418 = vperm.xlu0 %4943, %v3408_v12  }
0x1011   :  { %3428 = vperm.xlu0 %4943, %v3410_v60  }
0x1015   :  { %3455 = vperm.xlu0 %4943, %v3441_v0  }
0x1019   :  { %3842 = vperm.xlu0 %4943, %v3836_v4  }
0x101f   :  { %v3805_v12 = vpop.xlane.xlu0 %3804 }
0x1020   :  { %3380 = vadd.xlane.f32.xlu1 %v3379_v63 }
0x1022   :  { %v3800_v25 = vpop.xlane.xlu1 %3799 }
0x1023   :  { %v3816_v7 = vmul.f32 0.0078125, %v3800_v25 }
0x1025   :  { %v3820_v46 = vadd.f32 1e-05, %v3816_v7 }
0x1026   :  { %v3810_v18 = vpop.xlane.xlu1 %3809 }
0x1027   :  { %v3818_v39 = vmul.f32 0.0078125, %v3810_v18 }
0x102a   :  { %v3414_v40 = vpop.permute.xlu1 %3413 }
0x102e   :  { %v3424_v31 = vpop.permute.xlu1 %3423 }
0x1031   :  { %3879 = vperm.xlu1 %4944, %v3869_v14  }
0x1032   :  { %v3446_v38 = vpop.permute.xlu1 %3445 }
0x1035   :  { %3889 = vperm.xlu1 %4944, %v3871_v52   ;;  %v3822_v52 = vadd.f32 1e-05, %v3818_v39 }
0x1036   :  { %v6708_v24 = vpop.permute.xlu1 %3450 }
0x1038   :  { %3375 = vadd.xlane.f32.xlu0 %v3374_v55 }
0x103a   :  { %v6710_v30 = vpop.permute.xlu1 %3460 }
0x103c   :  { %3385 = vadd.xlane.f32.xlu0 %v3384_v36  ;;  %v3817_v36 = vmul.f32 0.0078125, %v3805_v12 }
0x103e   :  { %v6712_v49 = vpop.permute.xlu1 %3847 }
0x1052   :  { %3852 = vperm.xlu0 %4943, %v3838_v28   ;;  %v3821_v28 = vadd.f32 1e-05, %v3817_v36 }
0x1056   :  { %3874 = vperm.xlu0 %4943, %v3868_v43  }
0x105a   :  { %3884 = vperm.xlu0 %4943, %v3870_v27  }
0x1074   :  { %v3371_v50 = vpop.xlane.xlu1 %3370 }
0x1075   :  { %v3387_v41 = vmul.f32 0.0078125, %v3371_v50 }
0x1077   :  { %v3391_v45 = vadd.f32 1e-05, %v3387_v41 }
0x1078   :  { %v6718_v60 = vpop.permute.xlu1 %3857 }
0x1079   :  { %4949 = vrsqrt.f32 %v3391_v45 }
0x1080   :  { %v3815_v61 = vpop.xlane.xlu0 %3814 }
0x1081   :  { %v3819_v25 = vmul.f32 0.0078125, %v3815_v61 }
0x1083   :  { %v3823_v43 = vadd.f32 1e-05, %v3819_v25 }
0x1086   :  { %v4950_v47 = vpop.eup %4949 }
0x1087   :  { %v3399_v32 = vmul.f32 %v4950_v47, %v6620_v21  ;;  %v3403_v22 = vmul.f32 %v4950_v47, %v6623_v23 }
0x1088   :  { %v3419_v5 = vpop.permute.xlu0 %3418 }
0x1089   :  { %v3431_v42 = vmul.f32 %v3414_v40, %v3399_v32  ;;  %v3435_v48 = vmul.f32 %v3414_v40, %v3403_v22 }
0x108b   :  { %v3463_v56 = vadd.f32 %v3446_v38, %v3431_v42  ;;  %v3467_v54 = vadd.f32 %v3446_v38, %v3435_v48 }
0x108c   :  { %v6720_v23 = vpop.permute.xlu0 %3428 }
0x108d   :  { %v3471_v57 = vmax.f32 %v3463_v56, 0.0  ;;  %v3475_v59 = vmax.f32 %v3467_v54, 0.0 }
0x108f   :  { %3479 = vst.msk [vmem:[#allocation15] sm:$0xff] %vm128_vm0, %v3471_v57  ;;  %3483 = vst.msk [vmem:[#allocation15 + $0x20] sm:$0xff] %vm128_vm0, %v3475_v59 }
0x1090   :  { %v3456_v8 = vpop.permute.xlu0 %3455 }
0x1094   :  { %v3843_v14 = vpop.permute.xlu0 %3842 }
0x1096   :  { %v3900_v54 = vld [vmem:[#allocation15] sm:$0xff] }
0x1097   :  { %v3904_v57 = vld [vmem:[#allocation15 + $0x20] sm:$0xff] }
0x10a9   :  { %v3381_v0 = vpop.xlane.xlu1 %3380 }
0x10aa   :  { %v3389_v4 = vmul.f32 0.0078125, %v3381_v0 }
0x10ac   :  { %v3393_v21 = vadd.f32 1e-05, %v3389_v4 }
0x10ae   :  { %4951 = vrsqrt.f32 %v3393_v21 }
0x10af   :  { %4953 = vrsqrt.f32 %v3820_v46 }
0x10b0   :  { %4955 = vrsqrt.f32 %v3822_v52 }
0x10bb   :  { %v4952_v63 = vpop.eup %4951 }
0x10bc   :  { %v3401_v19 = vmul.f32 %v4952_v63, %v6655_v51  ;;  %v3405_v11 = vmul.f32 %v4952_v63, %v6658_v1  ;;  %v4954_v40 = vpop.eup %4953 }
0x10bd   :  { %v3832_v38 = vmul.f32 %v4954_v40, %v6581_v10  ;;  %v4956_v50 = vpop.eup %4955 }
0x10be   :  { %v3433_v15 = vmul.f32 %v3424_v31, %v3401_v19  ;;  %v3437_v58 = vmul.f32 %v3424_v31, %v3405_v11  ;;  %v3828_v31 = vmul.f32 %v4954_v40, %v6579_v9  ;;  %v3830_v48 = vmul.f32 %v4956_v50, %v6589_v6 }
0x10bf   :  { %v3864_v45 = vmul.f32 %v3843_v14, %v3832_v38  ;;  %v3834_v56 = vmul.f32 %v4956_v50, %v6591_v37 }
0x10c0   :  { %v3465_v33 = vadd.f32 %v3456_v8, %v3433_v15  ;;  %v3469_v17 = vadd.f32 %v3456_v8, %v3437_v58  ;;  %v3860_v41 = vmul.f32 %v3843_v14, %v3828_v31 }
0x10c1   :  { %v3376_v34 = vpop.xlane.xlu0 %3375 }
0x10c2   :  { %v3473_v44 = vmax.f32 %v3465_v33, 0.0  ;;  %v3477_v55 = vmax.f32 %v3469_v17, 0.0  ;;  %v3388_v13 = vmul.f32 0.0078125, %v3376_v34 }
0x10c4   :  { %3481 = vst.msk [vmem:[#allocation15 + $0x10] sm:$0xff] %vm128_vm0, %v3473_v44  ;;  %3485 = vst.msk [vmem:[#allocation15 + $0x30] sm:$0xff] %vm128_vm0, %v3477_v55  ;;  %v3392_v53 = vadd.f32 1e-05, %v3388_v13  ;;  %v3880_v13 = vpop.permute.xlu1 %3879 }
0x10c5   :  { %v3386_v51 = vpop.xlane.xlu0 %3385 }
0x10c6   :  { %4957 = vrsqrt.f32 %v3392_v53  ;;  %v3390_v1 = vmul.f32 0.0078125, %v3386_v51 }
0x10c8   :  { %v3394_v18 = vadd.f32 1e-05, %v3390_v1 }
0x10ca   :  { %4959 = vrsqrt.f32 %v3394_v18 }
0x10cb   :  { %4961 = vrsqrt.f32 %v3821_v28  ;;  %v3902_v11 = vld [vmem:[#allocation15 + $0x10] sm:$0xff] }
0x10cc   :  { %4963 = vrsqrt.f32 %v3823_v43  ;;  %v3906_v14 = vld [vmem:[#allocation15 + $0x30] sm:$0xff]  ;;  %v3890_v43 = vpop.permute.xlu1 %3889 }
0x10cd   :  { %v3853_v27 = vpop.permute.xlu0 %3852 }
0x10ce   :  { %v3862_v61 = vmul.f32 %v3853_v27, %v3830_v48  ;;  %v3866_v0 = vmul.f32 %v3853_v27, %v3834_v56 }
0x10d1   :  { %v3875_v47 = vpop.permute.xlu0 %3874 }
0x10d2   :  { %v3892_v32 = vadd.f32 %v3875_v47, %v3860_v41  ;;  %v3896_v22 = vadd.f32 %v3875_v47, %v3864_v45 }
0x10d3   :  { %v4958_v42 = vpop.eup %4957 }
0x10d4   :  { %v3400_v59 = vmul.f32 %v4958_v42, %v6670_v26  ;;  %v3404_v9 = vmul.f32 %v4958_v42, %v6673_v62  ;;  %v3908_v12 = vadd.f32 %v3900_v54, %v3892_v32  ;;  %v3912_v10 = vadd.f32 %v3904_v57, %v3896_v22 }
0x10d5   :  { %v3885_v4 = vpop.permute.xlu0 %3884 }
0x10d6   :  { %v3432_v21 = vmul.f32 %v3419_v5, %v3400_v59  ;;  %v3436_v7 = vmul.f32 %v3419_v5, %v3404_v9  ;;  %v3916_v8 = vmax.f32 %v3908_v12, 0.0  ;;  %v3920_v46 = vmax.f32 %v3912_v10, 0.0 }
0x10d7   :  { %v4960_v63 = vpop.eup %4959  ;;  %v3894_v39 = vadd.f32 %v3885_v4, %v3862_v61  ;;  %v3898_v6 = vadd.f32 %v3885_v4, %v3866_v0 }
0x10d8   :  { %v3464_v37 = vadd.f32 %v6708_v24, %v3432_v21  ;;  %v3468_v19 = vadd.f32 %v6708_v24, %v3436_v7  ;;  %v3402_v26 = vmul.f32 %v4960_v63, %v6683_v16  ;;  %v3406_v62 = vmul.f32 %v4960_v63, %v6686_v20  ;;  %3924 = vst.msk [vmem:[#allocation15] sm:$0xff] %vm128_vm0, %v3916_v8  ;;  %v4962_v34 = vpop.eup %4961 }
0x10d9   :  { %3928 = vst.msk [vmem:[#allocation15 + $0x20] sm:$0xff] %vm128_vm0, %v3920_v46  ;;  %v3910_v5 = vadd.f32 %v3902_v11, %v3894_v39  ;;  %v3914_v15 = vadd.f32 %v3906_v14, %v3898_v6  ;;  %v4964_v55 = vpop.eup %4963  ;;  %v3829_v53 = vmul.f32 %v4962_v34, %v6571_v2 }
0x10da   :  { %v3472_v58 = vmax.f32 %v3464_v37, 0.0  ;;  %v3476_v52 = vmax.f32 %v3468_v19, 0.0  ;;  %v3434_v33 = vmul.f32 %v6720_v23, %v3402_v26  ;;  %v3438_v17 = vmul.f32 %v6720_v23, %v3406_v62 }
0x10db   :  { %v3918_v24 = vmax.f32 %v3910_v5, 0.0  ;;  %v3922_v44 = vmax.f32 %v3914_v15, 0.0  ;;  %v3833_v23 = vmul.f32 %v4962_v34, %v6573_v3  ;;  %v3861_v1 = vmul.f32 %v6712_v49, %v3829_v53 }
0x10dc   :  { %3480 = vst.msk [vmem:[#allocation15 + $0x8] sm:$0xff] %vm128_vm0, %v3472_v58  ;;  %3484 = vst.msk [vmem:[#allocation15 + $0x28] sm:$0xff] %vm128_vm0, %v3476_v52  ;;  %v3466_v16 = vadd.f32 %v6710_v30, %v3434_v33  ;;  %v3470_v20 = vadd.f32 %v6710_v30, %v3438_v17  ;;  %v3831_v18 = vmul.f32 %v4964_v55, %v6631_v35 }
0x10dd   :  { %3926 = vst.msk [vmem:[#allocation15 + $0x10] sm:$0xff] %vm128_vm0, %v3918_v24  ;;  %3930 = vst.msk [vmem:[#allocation15 + $0x30] sm:$0xff] %vm128_vm0, %v3922_v44  ;;  %v3865_v25 = vmul.f32 %v6712_v49, %v3833_v23  ;;  %v3835_v30 = vmul.f32 %v4964_v55, %v6634_v29  ;;  %v3893_v28 = vadd.f32 %v3880_v13, %v3861_v1 }
0x10de   :  { %v3474_v51 = vmax.f32 %v3466_v16, 0.0  ;;  %v3478_v36 = vmax.f32 %v3470_v20, 0.0  ;;  %v3863_v3 = vmul.f32 %v6718_v60, %v3831_v18 }
0x10df   :  { %v3897_v40 = vadd.f32 %v3880_v13, %v3865_v25  ;;  %v3867_v31 = vmul.f32 %v6718_v60, %v3835_v30 }
0x10e0   :  { %3482 = vst.msk [vmem:[#allocation15 + $0x18] sm:$0xff] %vm128_vm0, %v3474_v51  ;;  %3486 = vst.msk [vmem:[#allocation15 + $0x38] sm:$0xff] %vm128_vm0, %v3478_v36  ;;  %v3895_v49 = vadd.f32 %v3890_v43, %v3863_v3 }
0x10e1   :  { %v3899_v41 = vadd.f32 %v3890_v43, %v3867_v31 }
0x10e3   :  { %v3901_v2 = vld [vmem:[#allocation15 + $0x8] sm:$0xff] }
0x10e4   :  { %v3905_v27 = vld [vmem:[#allocation15 + $0x28] sm:$0xff]  ;;  %v3909_v38 = vadd.f32 %v3901_v2, %v3893_v28 }
0x10e5   :  { %v3913_v50 = vadd.f32 %v3905_v27, %v3897_v40 }
0x10e6   :  { %v3917_v35 = vmax.f32 %v3909_v38, 0.0 }
0x10e7   :  { %v3921_v45 = vmax.f32 %v3913_v50, 0.0  ;;  %v3903_v29 = vld [vmem:[#allocation15 + $0x18] sm:$0xff] }
0x10e8   :  { %v3907_v47 = vld [vmem:[#allocation15 + $0x38] sm:$0xff]  ;;  %v3911_v32 = vadd.f32 %v3903_v29, %v3895_v49  ;;  %3925 = vst.msk [vmem:[#allocation15 + $0x8] sm:$0xff] %vm128_vm0, %v3917_v35 }
0x10e9   :  { %v3915_v22 = vadd.f32 %v3907_v47, %v3899_v41  ;;  %3929 = vst.msk [vmem:[#allocation15 + $0x28] sm:$0xff] %vm128_vm0, %v3921_v45 }
0x10ea   :  { %v3919_v42 = vmax.f32 %v3911_v32, 0.0 }
0x10eb   :  { %v3923_v48 = vmax.f32 %v3915_v22, 0.0 }
0x10ec   :  { %3927 = vst.msk [vmem:[#allocation15 + $0x18] sm:$0xff] %vm128_vm0, %v3919_v42 }
0x10ed   :  { %3931 = vst.msk [vmem:[#allocation15 + $0x38] sm:$0xff] %vm128_vm0, %v3923_v48 }
0x10ee   :  { %5076 = shalt.err (!%p5073_p1)
}
0x10ef   :  { %s6989_s24 = smov 128   ;;  %s6990_s6 = sld [smem:[#allocation32_spill]] }
0x10f5   :  { %3943 = dma.vmem_to_hbm [thread:$0]  %s3938_s22, 1024, %s6990_s6, [#allocation8], %s6989_s24, %s6989_s24, %s6912_s21  }
0x10f6   :  { %5091 = dma.done.wait [#allocation8], 1024  }
0x10f7   :  { %5092 = vsyncadd [#allocation8], 4294966272 }
0x10f8   :  { %3947 = vsyncpa [#allocation7], 1 }
0x10f9   :  { %3948 = vsyncpa [#allocation10], 1 }
0x10fa   :  { %3949 = vsyncpa [#allocation13], 1 }
0x10fb   :  { %3950 = vsyncpa [#allocation8], 1 }

</bundles_post_ra>
